<compile_context>
chip_gen: v7x
topology: tpu7x:2x2x1
jax: 0.10.0
libtpu: 0.0.40
codegen_flags: <defaults>
</compile_context>

<pallas_src>
import numpy as np

import jax
import jax.numpy as jnp
from jax.experimental import pallas as pl
from jax.experimental.pallas import tpu as pltpu


# ------------------------------ fused kernel -------------------------------- #

def _net_kernel(x_ref, w1_ref, b1_ref, w2_ref, b2_ref, w3_ref, b3_ref,
                w4_ref, b4_ref, out_ref, z1_ref, z2_ref):
    f32 = jnp.float32
    bf16 = jnp.bfloat16
    B = x_ref.shape[0]

    w1 = w1_ref[...]                                   # (640, 256) bf16 (Toeplitz)
    w2 = w2_ref[...]                                   # (640, 256) bf16 (Toeplitz)
    # Hoisted bias broadcasts (reused by all unrolled iterations).
    b1b = jnp.broadcast_to(b1_ref[...], (B, 256))      # f32
    b2b = jnp.broadcast_to(b2_ref[...], (B, 256))      # f32

    # ---- conv1 (5x5, 1->10) + bias + ReLU + 2x2 max-pool --------------------
    # x lanes: image_row*128 + col (cols 28..127 are zero pad).
    # y cols : (oj%2)*128 + (oj//2)*10 + ch  (lanes 120..127 / 248..255 pad).
    for pi in range(12):                               # pooled output row
        halves = []
        for par in range(2):
            oi = 2 * pi + par                          # conv output row
            lhs = x_ref[:, 128 * oi: 128 * oi + 640]   # aligned (B, 640) window
            y = jnp.dot(lhs, w1, preferred_element_type=f32) + b1b
            y = jnp.maximum(y, 0.0)
            halves.append(jnp.maximum(y[:, 0:128], y[:, 128:256]))   # width pool
        z1_ref[:, 128 * pi: 128 * (pi + 1)] = (
            jnp.maximum(halves[0], halves[1]).astype(bf16))          # height pool

    # ---- conv2 (5x5, 10->20) + bias + ReLU + 2x2 max-pool (wide-K) ----------
    # z1 lanes per row: pj*10 + ci (lanes 120..127 pad = 0).
    # y cols : (qj%2)*128 + (qj//2)*20 + ch2 (lanes 80..127 / 208..255 pad).
    for ri in range(4):                                # pooled output row
        halves = []
        for par in range(2):
            qi = 2 * ri + par
            lhs = z1_ref[:, 128 * qi: 128 * qi + 640]  # aligned (B, 640) window
            y = jnp.dot(lhs, w2, preferred_element_type=f32) + b2b
            y = jnp.maximum(y, 0.0)
            halves.append(jnp.maximum(y[:, 0:128], y[:, 128:256]))
        z2_ref[:, 128 * ri: 128 * (ri + 1)] = (
            jnp.maximum(halves[0], halves[1]).astype(bf16))

    # ---- fc1 (K=512 aligned -> 50, padded to 128) + ReLU --------------------
    h1 = jnp.dot(z2_ref[...], w3_ref[...], preferred_element_type=f32) + b3_ref[...]
    h1 = jnp.maximum(h1, 0.0)                          # (B, 128); pad lanes stay 0

    # ---- fc2 (50 -> 10, padded to 128) + fused masked log_softmax -----------
    logits = jnp.dot(h1.astype(bf16), w4_ref[...],
                     preferred_element_type=f32) + b4_ref[...]       # (B, 128)
    lane = jax.lax.broadcasted_iota(jnp.int32, logits.shape, 1)
    logits = jnp.where(lane < 10, logits, -1e30)       # keep pads out of softmax
    m = jnp.max(logits, axis=-1, keepdims=True)
    z = logits - m
    lse = jnp.log(jnp.sum(jnp.exp(z), axis=-1, keepdims=True))
    out_ref[...] = (z - lse).astype(out_ref.dtype)


# --------------------------- host-side weight packing ----------------------- #

def pack_params(params):
    """Pack PyTorch-layout params once into lane-dense bf16 matmul weights."""
    conv1_w = np.asarray(params["conv1_w"], np.float32)   # (10, 1, 5, 5)
    conv1_b = np.asarray(params["conv1_b"], np.float32)
    conv2_w = np.asarray(params["conv2_w"], np.float32)   # (20, 10, 5, 5)
    conv2_b = np.asarray(params["conv2_b"], np.float32)
    fc1_w = np.asarray(params["fc1_w"], np.float32)       # (50, 320)  (out, in)
    fc1_b = np.asarray(params["fc1_b"], np.float32)
    fc2_w = np.asarray(params["fc2_w"], np.float32)       # (10, 50)
    fc2_b = np.asarray(params["fc2_b"], np.float32)

    # conv1: rows = di*128 + image_col (128-lane row pitch); shared by all rows.
    #        cols = (oj%2)*128 + (oj//2)*10 + channel  (240 valid of 256).
    w1 = np.zeros((640, 256), np.float32)
    b1 = np.zeros((1, 256), np.float32)
    for oj in range(24):
        col = (oj % 2) * 128 + (oj // 2) * 10
        b1[0, col:col + 10] = conv1_b
        for di in range(5):
            for dj in range(5):
                w1[di * 128 + oj + dj, col:col + 10] = conv1_w[:, 0, di, dj]

    # conv2: rows = d*128 + pj*10 + ci  (d = row offset into z1, pj pooled col,
    #        ci conv1 channel); cols = (qj%2)*128 + (qj//2)*20 + channel.
    w2 = np.zeros((640, 256), np.float32)
    b2 = np.zeros((1, 256), np.float32)
    for qj in range(8):
        col = (qj % 2) * 128 + (qj // 2) * 20
        b2[0, col:col + 20] = conv2_b
        for d in range(5):
            for dj in range(5):
                pj = qj + dj
                for ci in range(10):
                    w2[d * 128 + pj * 10 + ci, col:col + 20] = conv2_w[:, ci, d, dj]

    # fc1: kernel feature order (ri*128 + rj*20 + c2) vs torch NCHW flatten
    #      order (c2*16 + ri*4 + rj); pad 50 -> 128 output lanes, K = 512.
    w3 = np.zeros((512, 128), np.float32)
    b3 = np.zeros((1, 128), np.float32)
    for ri in range(4):
        for rj in range(4):
            for c2 in range(20):
                w3[ri * 128 + rj * 20 + c2, :50] = fc1_w[:, c2 * 16 + ri * 4 + rj]
    b3[0, :50] = fc1_b

    # fc2: (in, out) layout, padded to 128x128.
    w4 = np.zeros((128, 128), np.float32)
    b4 = np.zeros((1, 128), np.float32)
    w4[:50, :10] = fc2_w.T
    b4[0, :10] = fc2_b

    return {
        "w1": jnp.asarray(w1, jnp.bfloat16), "b1": jnp.asarray(b1),
        "w2": jnp.asarray(w2, jnp.bfloat16), "b2": jnp.asarray(b2),
        "w3": jnp.asarray(w3, jnp.bfloat16), "b3": jnp.asarray(b3),
        "w4": jnp.asarray(w4, jnp.bfloat16), "b4": jnp.asarray(b4),
    }


# ------------------------------- public wrapper ------------------------------ #

def _round_up(n, m):
    return ((n + m - 1) // m) * m


def _choose_tile_b(n):
    # Small batch: single grid step, tile rounded to bf16 sublane packing (16).
    if n <= 128:
        return min(128, _round_up(max(n, 16), 16))
    # Larger batch: biggest tile that still yields >=2 full grid steps
    # (keeps both v7x TensorCores busy and lets the pipeline overlap).
    for t in (512, 256, 128):
        if n >= 2 * t:
            return t
    return 128


@jax.jit
def net_forward(packed, x_nchw):
    n = x_nchw.shape[0]
    assert x_nchw.shape[1:] == (1, 28, 28), x_nchw.shape

    # Host pack: 128-lane row pitch so every conv1 window is lane-aligned.
    x = x_nchw.astype(jnp.bfloat16).reshape(n, 28, 28)
    x = jnp.pad(x, ((0, 0), (0, 0), (0, 100)))          # (n, 28, 128)
    x = x.reshape(n, 28 * 128)

    tile_b = _choose_tile_b(n)
    n_pad = _round_up(n, tile_b)
    if n_pad != n:
        x = jnp.pad(x, ((0, n_pad - n), (0, 0)))

    out = pl.pallas_call(
        _net_kernel,
        out_shape=jax.ShapeDtypeStruct((n_pad, 128), jnp.float32),
        grid=(n_pad // tile_b,),
        in_specs=[
            pl.BlockSpec((tile_b, 28 * 128), lambda i: (i, 0)),   # packed images
            pl.BlockSpec((640, 256), lambda i: (0, 0)),           # conv1 Toeplitz
            pl.BlockSpec((1, 256), lambda i: (0, 0)),
            pl.BlockSpec((640, 256), lambda i: (0, 0)),           # conv2 Toeplitz
            pl.BlockSpec((1, 256), lambda i: (0, 0)),
            pl.BlockSpec((512, 128), lambda i: (0, 0)),           # fc1
            pl.BlockSpec((1, 128), lambda i: (0, 0)),
            pl.BlockSpec((128, 128), lambda i: (0, 0)),           # fc2
            pl.BlockSpec((1, 128), lambda i: (0, 0)),
        ],
        out_specs=pl.BlockSpec((tile_b, 128), lambda i: (i, 0)),
        scratch_shapes=[
            pltpu.VMEM((tile_b, 12 * 128), jnp.bfloat16),   # pooled conv1 rows
            pltpu.VMEM((tile_b, 4 * 128), jnp.bfloat16),    # pooled conv2 rows
        ],
        compiler_params=pltpu.CompilerParams(
            dimension_semantics=("parallel",),
            vmem_limit_bytes=48 * 1024 * 1024,
        ),
    )(x, packed["w1"], packed["b1"], packed["w2"], packed["b2"],
      packed["w3"], packed["b3"], packed["w4"], packed["b4"])

    return out[:n, :10]


# --------------------------- pure-JAX reference ------------------------------ #

def _pool2_nchw(y):
    n, c, hh, ww = y.shape
    return jnp.max(y.reshape(n, c, hh // 2, 2, ww // 2, 2), axis=(3, 5))


@jax.jit
def _ref_forward(params, x_nchw):
    x = x_nchw.astype(jnp.float32)
    y = jax.lax.conv_general_dilated(
        x, params["conv1_w"], window_strides=(1, 1), padding="VALID",
        dimension_numbers=("NCHW", "OIHW", "NCHW"))
    y = y + params["conv1_b"][None, :, None, None]
    y = jnp.maximum(_pool2_nchw(y), 0.0)
    y = jax.lax.conv_general_dilated(
        y, params["conv2_w"], window_strides=(1, 1), padding="VALID",
        dimension_numbers=("NCHW", "OIHW", "NCHW"))
    y = y + params["conv2_b"][None, :, None, None]
    y = jnp.maximum(_pool2_nchw(y), 0.0)
    flat = y.reshape(y.shape[0], 320)
    h = jnp.maximum(flat @ params["fc1_w"].T + params["fc1_b"], 0.0)
    logits = h @ params["fc2_w"].T + params["fc2_b"]
    return jax.nn.log_softmax(logits, axis=-1)


# --------------------------- deterministic params ---------------------------- #

def init_params(key):
    def uniform(k, shape, fan_in):
        bound = 1.0 / (fan_in ** 0.5)
        return jax.random.uniform(k, shape, jnp.float32, -bound, bound)

    ks = jax.random.split(key, 8)
    return {
        "conv1_w": uniform(ks[0], (10, 1, 5, 5), 25),
        "conv1_b": uniform(ks[1], (10,), 25),
        "conv2_w": uniform(ks[2], (20, 10, 5, 5), 250),
        "conv2_b": uniform(ks[3], (20,), 250),
        "fc1_w": uniform(ks[4], (50, 320), 320),   # PyTorch Linear stores (out, in)
        "fc1_b": uniform(ks[5], (50,), 320),
        "fc2_w": uniform(ks[6], (10, 50), 50),
        "fc2_b": uniform(ks[7], (10,), 50),
    }


if __name__ == "__main__":
    root = jax.random.PRNGKey(0)
    k_params, k_x = jax.random.split(root)
    params = init_params(k_params)
    packed = pack_params(params)

    # Input must be 28x28 for `.view(-1, 320)` to be valid (MNIST-shaped).
    x = jax.random.normal(k_x, (2, 1, 28, 28), jnp.float32)

    out = jax.block_until_ready(net_forward(packed, x))
    ref = jax.block_until_ready(_ref_forward(params, x))

    assert out.shape == (2, 10) and out.dtype == jnp.float32
    # log_softmax rows should (numerically) sum to ~1 in prob space
    assert bool(jnp.all(jnp.abs(jnp.sum(jnp.exp(out), axis=1) - 1.0) < 1e-4))
    # match the pure-JAX f32 reference (bf16 MXU operands -> loose tolerance)
    assert bool(jnp.max(jnp.abs(out - ref)) < 0.1)
    print("KERNEL_OK")
</pallas_src>

<mosaic_0001>
module attributes {stable_mosaic.version = 11 : i64} {
  func.func @_net_kernel(%arg0: i32, %arg1: memref<16x3584xbf16, #tpu.memory_space<vmem>>, %arg2: memref<640x256xbf16, #tpu.memory_space<vmem>>, %arg3: memref<1x256xf32, #tpu.memory_space<vmem>>, %arg4: memref<640x256xbf16, #tpu.memory_space<vmem>>, %arg5: memref<1x256xf32, #tpu.memory_space<vmem>>, %arg6: memref<512x128xbf16, #tpu.memory_space<vmem>>, %arg7: memref<1x128xf32, #tpu.memory_space<vmem>>, %arg8: memref<128x128xbf16, #tpu.memory_space<vmem>>, %arg9: memref<1x128xf32, #tpu.memory_space<vmem>>, %arg10: memref<16x128xf32, #tpu.memory_space<vmem>>, %arg11: memref<16x1536xbf16, #tpu.memory_space<vmem>>, %arg12: memref<16x512xbf16, #tpu.memory_space<vmem>>) attributes {dimension_semantics = [#tpu.dimension_semantics<parallel>], iteration_bounds = array<i64: 1>, scalar_prefetch = 0 : i64, scratch_operands = 2 : i64, tpu.core_type = #tpu.core_type<tc>, window_params = [{transform_indices = @transform_0, window_bounds = array<i64: 16, 3584>}, {pipeline_mode = #tpu.pipeline_mode<synchronous>, transform_indices = @transform_1, window_bounds = array<i64: 640, 256>}, {pipeline_mode = #tpu.pipeline_mode<synchronous>, transform_indices = @transform_2, window_bounds = array<i64: 1, 256>}, {pipeline_mode = #tpu.pipeline_mode<synchronous>, transform_indices = @transform_3, window_bounds = array<i64: 640, 256>}, {pipeline_mode = #tpu.pipeline_mode<synchronous>, transform_indices = @transform_4, window_bounds = array<i64: 1, 256>}, {pipeline_mode = #tpu.pipeline_mode<synchronous>, transform_indices = @transform_5, window_bounds = array<i64: 512, 128>}, {pipeline_mode = #tpu.pipeline_mode<synchronous>, transform_indices = @transform_6, window_bounds = array<i64: 1, 128>}, {pipeline_mode = #tpu.pipeline_mode<synchronous>, transform_indices = @transform_7, window_bounds = array<i64: 128, 128>}, {pipeline_mode = #tpu.pipeline_mode<synchronous>, transform_indices = @transform_8, window_bounds = array<i64: 1, 128>}, {transform_indices = @transform_9, window_bounds = array<i64: 16, 128>}]} {
    %c0 = arith.constant 0 : index
    %c0_0 = arith.constant 0 : index
    %0 = vector.load %arg2[%c0, %c0_0] : memref<640x256xbf16, #tpu.memory_space<vmem>>, vector<640x256xbf16>
    %c0_1 = arith.constant 0 : index
    %c0_2 = arith.constant 0 : index
    %1 = vector.load %arg4[%c0_1, %c0_2] : memref<640x256xbf16, #tpu.memory_space<vmem>>, vector<640x256xbf16>
    %c0_3 = arith.constant 0 : index
    %c0_4 = arith.constant 0 : index
    %2 = vector.load %arg3[%c0_3, %c0_4] : memref<1x256xf32, #tpu.memory_space<vmem>>, vector<1x256xf32>
    %3 = vector.shape_cast %2 : vector<1x256xf32> to vector<1x256xf32>
    %4 = vector.broadcast %3 : vector<1x256xf32> to vector<16x256xf32>
    %c0_5 = arith.constant 0 : index
    %c0_6 = arith.constant 0 : index
    %5 = vector.load %arg5[%c0_5, %c0_6] : memref<1x256xf32, #tpu.memory_space<vmem>>, vector<1x256xf32>
    %6 = vector.shape_cast %5 : vector<1x256xf32> to vector<1x256xf32>
    %7 = vector.broadcast %6 : vector<1x256xf32> to vector<16x256xf32>
    %c0_7 = arith.constant 0 : index
    %c0_8 = arith.constant 0 : index
    %8 = vector.load %arg1[%c0_7, %c0_8] : memref<16x3584xbf16, #tpu.memory_space<vmem>>, vector<16x640xbf16>
    %cst = arith.constant dense<0.000000e+00> : vector<16x256xf32>
    %9 = tpu.matmul %8, %0, %cst {dimension_numbers = #tpu.dot_dimension_numbers<[1], [0], [0], [1], [0, 0, 1, 1], [], []>} : vector<16x640xbf16>, vector<640x256xbf16>, vector<16x256xf32> -> vector<16x256xf32>
    %10 = arith.addf %9, %4 : vector<16x256xf32>
    %cst_9 = arith.constant 0.000000e+00 : f32
    %11 = vector.broadcast %cst_9 : f32 to vector<16x256xf32>
    %12 = arith.maximumf %10, %11 : vector<16x256xf32>
    %13 = vector.extract_strided_slice %12 {offsets = [0, 0], sizes = [16, 128], strides = [1, 1]} : vector<16x256xf32> to vector<16x128xf32>
    %14 = vector.extract_strided_slice %12 {offsets = [0, 128], sizes = [16, 128], strides = [1, 1]} : vector<16x256xf32> to vector<16x128xf32>
    %15 = arith.maximumf %13, %14 : vector<16x128xf32>
    %c0_10 = arith.constant 0 : index
    %c128 = arith.constant 128 : index
    %16 = vector.load %arg1[%c0_10, %c128] : memref<16x3584xbf16, #tpu.memory_space<vmem>>, vector<16x640xbf16>
    %cst_11 = arith.constant dense<0.000000e+00> : vector<16x256xf32>
    %17 = tpu.matmul %16, %0, %cst_11 {dimension_numbers = #tpu.dot_dimension_numbers<[1], [0], [0], [1], [0, 0, 1, 1], [], []>} : vector<16x640xbf16>, vector<640x256xbf16>, vector<16x256xf32> -> vector<16x256xf32>
    %18 = arith.addf %17, %4 : vector<16x256xf32>
    %cst_12 = arith.constant 0.000000e+00 : f32
    %19 = vector.broadcast %cst_12 : f32 to vector<16x256xf32>
    %20 = arith.maximumf %18, %19 : vector<16x256xf32>
    %21 = vector.extract_strided_slice %20 {offsets = [0, 0], sizes = [16, 128], strides = [1, 1]} : vector<16x256xf32> to vector<16x128xf32>
    %22 = vector.extract_strided_slice %20 {offsets = [0, 128], sizes = [16, 128], strides = [1, 1]} : vector<16x256xf32> to vector<16x128xf32>
    %23 = arith.maximumf %21, %22 : vector<16x128xf32>
    %24 = arith.maximumf %15, %23 : vector<16x128xf32>
    %25 = arith.truncf %24 : vector<16x128xf32> to vector<16x128xbf16>
    %c0_13 = arith.constant 0 : index
    %c0_14 = arith.constant 0 : index
    %26 = vector.load %arg11[%c0_13, %c0_14] : memref<16x1536xbf16, #tpu.memory_space<vmem>>, vector<16x128xbf16>
    tpu.vector_store %arg11[%c0_13, %c0_14], %25 {strides = array<i32>} : memref<16x1536xbf16, #tpu.memory_space<vmem>>, vector<16x128xbf16>,
    %c0_15 = arith.constant 0 : index
    %c256 = arith.constant 256 : index
    %27 = vector.load %arg1[%c0_15, %c256] : memref<16x3584xbf16, #tpu.memory_space<vmem>>, vector<16x640xbf16>
    %cst_16 = arith.constant dense<0.000000e+00> : vector<16x256xf32>
    %28 = tpu.matmul %27, %0, %cst_16 {dimension_numbers = #tpu.dot_dimension_numbers<[1], [0], [0], [1], [0, 0, 1, 1], [], []>} : vector<16x640xbf16>, vector<640x256xbf16>, vector<16x256xf32> -> vector<16x256xf32>
    %29 = arith.addf %28, %4 : vector<16x256xf32>
    %cst_17 = arith.constant 0.000000e+00 : f32
    %30 = vector.broadcast %cst_17 : f32 to vector<16x256xf32>
    %31 = arith.maximumf %29, %30 : vector<16x256xf32>
    %32 = vector.extract_strided_slice %31 {offsets = [0, 0], sizes = [16, 128], strides = [1, 1]} : vector<16x256xf32> to vector<16x128xf32>
    %33 = vector.extract_strided_slice %31 {offsets = [0, 128], sizes = [16, 128], strides = [1, 1]} : vector<16x256xf32> to vector<16x128xf32>
    %34 = arith.maximumf %32, %33 : vector<16x128xf32>
    %c0_18 = arith.constant 0 : index
    %c384 = arith.constant 384 : index
    %35 = vector.load %arg1[%c0_18, %c384] : memref<16x3584xbf16, #tpu.memory_space<vmem>>, vector<16x640xbf16>
    %cst_19 = arith.constant dense<0.000000e+00> : vector<16x256xf32>
    %36 = tpu.matmul %35, %0, %cst_19 {dimension_numbers = #tpu.dot_dimension_numbers<[1], [0], [0], [1], [0, 0, 1, 1], [], []>} : vector<16x640xbf16>, vector<640x256xbf16>, vector<16x256xf32> -> vector<16x256xf32>
    %37 = arith.addf %36, %4 : vector<16x256xf32>
    %cst_20 = arith.constant 0.000000e+00 : f32
    %38 = vector.broadcast %cst_20 : f32 to vector<16x256xf32>
    %39 = arith.maximumf %37, %38 : vector<16x256xf32>
    %40 = vector.extract_strided_slice %39 {offsets = [0, 0], sizes = [16, 128], strides = [1, 1]} : vector<16x256xf32> to vector<16x128xf32>
    %41 = vector.extract_strided_slice %39 {offsets = [0, 128], sizes = [16, 128], strides = [1, 1]} : vector<16x256xf32> to vector<16x128xf32>
    %42 = arith.maximumf %40, %41 : vector<16x128xf32>
    %43 = arith.maximumf %34, %42 : vector<16x128xf32>
    %44 = arith.truncf %43 : vector<16x128xf32> to vector<16x128xbf16>
    %c0_21 = arith.constant 0 : index
    %c128_22 = arith.constant 128 : index
    %45 = vector.load %arg11[%c0_21, %c128_22] : memref<16x1536xbf16, #tpu.memory_space<vmem>>, vector<16x128xbf16>
    tpu.vector_store %arg11[%c0_21, %c128_22], %44 {strides = array<i32>} : memref<16x1536xbf16, #tpu.memory_space<vmem>>, vector<16x128xbf16>,
    %c0_23 = arith.constant 0 : index
    %c512 = arith.constant 512 : index
    %46 = vector.load %arg1[%c0_23, %c512] : memref<16x3584xbf16, #tpu.memory_space<vmem>>, vector<16x640xbf16>
    %cst_24 = arith.constant dense<0.000000e+00> : vector<16x256xf32>
    %47 = tpu.matmul %46, %0, %cst_24 {dimension_numbers = #tpu.dot_dimension_numbers<[1], [0], [0], [1], [0, 0, 1, 1], [], []>} : vector<16x640xbf16>, vector<640x256xbf16>, vector<16x256xf32> -> vector<16x256xf32>
    %48 = arith.addf %47, %4 : vector<16x256xf32>
    %cst_25 = arith.constant 0.000000e+00 : f32
    %49 = vector.broadcast %cst_25 : f32 to vector<16x256xf32>
    %50 = arith.maximumf %48, %49 : vector<16x256xf32>
    %51 = vector.extract_strided_slice %50 {offsets = [0, 0], sizes = [16, 128], strides = [1, 1]} : vector<16x256xf32> to vector<16x128xf32>
    %52 = vector.extract_strided_slice %50 {offsets = [0, 128], sizes = [16, 128], strides = [1, 1]} : vector<16x256xf32> to vector<16x128xf32>
    %53 = arith.maximumf %51, %52 : vector<16x128xf32>
    %c0_26 = arith.constant 0 : index
    %c640 = arith.constant 640 : index
    %54 = vector.load %arg1[%c0_26, %c640] : memref<16x3584xbf16, #tpu.memory_space<vmem>>, vector<16x640xbf16>
    %cst_27 = arith.constant dense<0.000000e+00> : vector<16x256xf32>
    %55 = tpu.matmul %54, %0, %cst_27 {dimension_numbers = #tpu.dot_dimension_numbers<[1], [0], [0], [1], [0, 0, 1, 1], [], []>} : vector<16x640xbf16>, vector<640x256xbf16>, vector<16x256xf32> -> vector<16x256xf32>
    %56 = arith.addf %55, %4 : vector<16x256xf32>
    %cst_28 = arith.constant 0.000000e+00 : f32
    %57 = vector.broadcast %cst_28 : f32 to vector<16x256xf32>
    %58 = arith.maximumf %56, %57 : vector<16x256xf32>
    %59 = vector.extract_strided_slice %58 {offsets = [0, 0], sizes = [16, 128], strides = [1, 1]} : vector<16x256xf32> to vector<16x128xf32>
    %60 = vector.extract_strided_slice %58 {offsets = [0, 128], sizes = [16, 128], strides = [1, 1]} : vector<16x256xf32> to vector<16x128xf32>
    %61 = arith.maximumf %59, %60 : vector<16x128xf32>
    %62 = arith.maximumf %53, %61 : vector<16x128xf32>
    %63 = arith.truncf %62 : vector<16x128xf32> to vector<16x128xbf16>
    %c0_29 = arith.constant 0 : index
    %c256_30 = arith.constant 256 : index
    %64 = vector.load %arg11[%c0_29, %c256_30] : memref<16x1536xbf16, #tpu.memory_space<vmem>>, vector<16x128xbf16>
    tpu.vector_store %arg11[%c0_29, %c256_30], %63 {strides = array<i32>} : memref<16x1536xbf16, #tpu.memory_space<vmem>>, vector<16x128xbf16>,
    %c0_31 = arith.constant 0 : index
    %c768 = arith.constant 768 : index
    %65 = vector.load %arg1[%c0_31, %c768] : memref<16x3584xbf16, #tpu.memory_space<vmem>>, vector<16x640xbf16>
    %cst_32 = arith.constant dense<0.000000e+00> : vector<16x256xf32>
    %66 = tpu.matmul %65, %0, %cst_32 {dimension_numbers = #tpu.dot_dimension_numbers<[1], [0], [0], [1], [0, 0, 1, 1], [], []>} : vector<16x640xbf16>, vector<640x256xbf16>, vector<16x256xf32> -> vector<16x256xf32>
    %67 = arith.addf %66, %4 : vector<16x256xf32>
    %cst_33 = arith.constant 0.000000e+00 : f32
    %68 = vector.broadcast %cst_33 : f32 to vector<16x256xf32>
    %69 = arith.maximumf %67, %68 : vector<16x256xf32>
    %70 = vector.extract_strided_slice %69 {offsets = [0, 0], sizes = [16, 128], strides = [1, 1]} : vector<16x256xf32> to vector<16x128xf32>
    %71 = vector.extract_strided_slice %69 {offsets = [0, 128], sizes = [16, 128], strides = [1, 1]} : vector<16x256xf32> to vector<16x128xf32>
    %72 = arith.maximumf %70, %71 : vector<16x128xf32>
    %c0_34 = arith.constant 0 : index
    %c896 = arith.constant 896 : index
    %73 = vector.load %arg1[%c0_34, %c896] : memref<16x3584xbf16, #tpu.memory_space<vmem>>, vector<16x640xbf16>
    %cst_35 = arith.constant dense<0.000000e+00> : vector<16x256xf32>
    %74 = tpu.matmul %73, %0, %cst_35 {dimension_numbers = #tpu.dot_dimension_numbers<[1], [0], [0], [1], [0, 0, 1, 1], [], []>} : vector<16x640xbf16>, vector<640x256xbf16>, vector<16x256xf32> -> vector<16x256xf32>
    %75 = arith.addf %74, %4 : vector<16x256xf32>
    %cst_36 = arith.constant 0.000000e+00 : f32
    %76 = vector.broadcast %cst_36 : f32 to vector<16x256xf32>
    %77 = arith.maximumf %75, %76 : vector<16x256xf32>
    %78 = vector.extract_strided_slice %77 {offsets = [0, 0], sizes = [16, 128], strides = [1, 1]} : vector<16x256xf32> to vector<16x128xf32>
    %79 = vector.extract_strided_slice %77 {offsets = [0, 128], sizes = [16, 128], strides = [1, 1]} : vector<16x256xf32> to vector<16x128xf32>
    %80 = arith.maximumf %78, %79 : vector<16x128xf32>
    %81 = arith.maximumf %72, %80 : vector<16x128xf32>
    %82 = arith.truncf %81 : vector<16x128xf32> to vector<16x128xbf16>
    %c0_37 = arith.constant 0 : index
    %c384_38 = arith.constant 384 : index
    %83 = vector.load %arg11[%c0_37, %c384_38] : memref<16x1536xbf16, #tpu.memory_space<vmem>>, vector<16x128xbf16>
    tpu.vector_store %arg11[%c0_37, %c384_38], %82 {strides = array<i32>} : memref<16x1536xbf16, #tpu.memory_space<vmem>>, vector<16x128xbf16>,
    %c0_39 = arith.constant 0 : index
    %c1024 = arith.constant 1024 : index
    %84 = vector.load %arg1[%c0_39, %c1024] : memref<16x3584xbf16, #tpu.memory_space<vmem>>, vector<16x640xbf16>
    %cst_40 = arith.constant dense<0.000000e+00> : vector<16x256xf32>
    %85 = tpu.matmul %84, %0, %cst_40 {dimension_numbers = #tpu.dot_dimension_numbers<[1], [0], [0], [1], [0, 0, 1, 1], [], []>} : vector<16x640xbf16>, vector<640x256xbf16>, vector<16x256xf32> -> vector<16x256xf32>
    %86 = arith.addf %85, %4 : vector<16x256xf32>
    %cst_41 = arith.constant 0.000000e+00 : f32
    %87 = vector.broadcast %cst_41 : f32 to vector<16x256xf32>
    %88 = arith.maximumf %86, %87 : vector<16x256xf32>
    %89 = vector.extract_strided_slice %88 {offsets = [0, 0], sizes = [16, 128], strides = [1, 1]} : vector<16x256xf32> to vector<16x128xf32>
    %90 = vector.extract_strided_slice %88 {offsets = [0, 128], sizes = [16, 128], strides = [1, 1]} : vector<16x256xf32> to vector<16x128xf32>
    %91 = arith.maximumf %89, %90 : vector<16x128xf32>
    %c0_42 = arith.constant 0 : index
    %c1152 = arith.constant 1152 : index
    %92 = vector.load %arg1[%c0_42, %c1152] : memref<16x3584xbf16, #tpu.memory_space<vmem>>, vector<16x640xbf16>
    %cst_43 = arith.constant dense<0.000000e+00> : vector<16x256xf32>
    %93 = tpu.matmul %92, %0, %cst_43 {dimension_numbers = #tpu.dot_dimension_numbers<[1], [0], [0], [1], [0, 0, 1, 1], [], []>} : vector<16x640xbf16>, vector<640x256xbf16>, vector<16x256xf32> -> vector<16x256xf32>
    %94 = arith.addf %93, %4 : vector<16x256xf32>
    %cst_44 = arith.constant 0.000000e+00 : f32
    %95 = vector.broadcast %cst_44 : f32 to vector<16x256xf32>
    %96 = arith.maximumf %94, %95 : vector<16x256xf32>
    %97 = vector.extract_strided_slice %96 {offsets = [0, 0], sizes = [16, 128], strides = [1, 1]} : vector<16x256xf32> to vector<16x128xf32>
    %98 = vector.extract_strided_slice %96 {offsets = [0, 128], sizes = [16, 128], strides = [1, 1]} : vector<16x256xf32> to vector<16x128xf32>
    %99 = arith.maximumf %97, %98 : vector<16x128xf32>
    %100 = arith.maximumf %91, %99 : vector<16x128xf32>
    %101 = arith.truncf %100 : vector<16x128xf32> to vector<16x128xbf16>
    %c0_45 = arith.constant 0 : index
    %c512_46 = arith.constant 512 : index
    %102 = vector.load %arg11[%c0_45, %c512_46] : memref<16x1536xbf16, #tpu.memory_space<vmem>>, vector<16x128xbf16>
    tpu.vector_store %arg11[%c0_45, %c512_46], %101 {strides = array<i32>} : memref<16x1536xbf16, #tpu.memory_space<vmem>>, vector<16x128xbf16>,
    %c0_47 = arith.constant 0 : index
    %c1280 = arith.constant 1280 : index
    %103 = vector.load %arg1[%c0_47, %c1280] : memref<16x3584xbf16, #tpu.memory_space<vmem>>, vector<16x640xbf16>
    %cst_48 = arith.constant dense<0.000000e+00> : vector<16x256xf32>
    %104 = tpu.matmul %103, %0, %cst_48 {dimension_numbers = #tpu.dot_dimension_numbers<[1], [0], [0], [1], [0, 0, 1, 1], [], []>} : vector<16x640xbf16>, vector<640x256xbf16>, vector<16x256xf32> -> vector<16x256xf32>
    %105 = arith.addf %104, %4 : vector<16x256xf32>
    %cst_49 = arith.constant 0.000000e+00 : f32
    %106 = vector.broadcast %cst_49 : f32 to vector<16x256xf32>
    %107 = arith.maximumf %105, %106 : vector<16x256xf32>
    %108 = vector.extract_strided_slice %107 {offsets = [0, 0], sizes = [16, 128], strides = [1, 1]} : vector<16x256xf32> to vector<16x128xf32>
    %109 = vector.extract_strided_slice %107 {offsets = [0, 128], sizes = [16, 128], strides = [1, 1]} : vector<16x256xf32> to vector<16x128xf32>
    %110 = arith.maximumf %108, %109 : vector<16x128xf32>
    %c0_50 = arith.constant 0 : index
    %c1408 = arith.constant 1408 : index
    %111 = vector.load %arg1[%c0_50, %c1408] : memref<16x3584xbf16, #tpu.memory_space<vmem>>, vector<16x640xbf16>
    %cst_51 = arith.constant dense<0.000000e+00> : vector<16x256xf32>
    %112 = tpu.matmul %111, %0, %cst_51 {dimension_numbers = #tpu.dot_dimension_numbers<[1], [0], [0], [1], [0, 0, 1, 1], [], []>} : vector<16x640xbf16>, vector<640x256xbf16>, vector<16x256xf32> -> vector<16x256xf32>
    %113 = arith.addf %112, %4 : vector<16x256xf32>
    %cst_52 = arith.constant 0.000000e+00 : f32
    %114 = vector.broadcast %cst_52 : f32 to vector<16x256xf32>
    %115 = arith.maximumf %113, %114 : vector<16x256xf32>
    %116 = vector.extract_strided_slice %115 {offsets = [0, 0], sizes = [16, 128], strides = [1, 1]} : vector<16x256xf32> to vector<16x128xf32>
    %117 = vector.extract_strided_slice %115 {offsets = [0, 128], sizes = [16, 128], strides = [1, 1]} : vector<16x256xf32> to vector<16x128xf32>
    %118 = arith.maximumf %116, %117 : vector<16x128xf32>
    %119 = arith.maximumf %110, %118 : vector<16x128xf32>
    %120 = arith.truncf %119 : vector<16x128xf32> to vector<16x128xbf16>
    %c0_53 = arith.constant 0 : index
    %c640_54 = arith.constant 640 : index
    %121 = vector.load %arg11[%c0_53, %c640_54] : memref<16x1536xbf16, #tpu.memory_space<vmem>>, vector<16x128xbf16>
    tpu.vector_store %arg11[%c0_53, %c640_54], %120 {strides = array<i32>} : memref<16x1536xbf16, #tpu.memory_space<vmem>>, vector<16x128xbf16>,
    %c0_55 = arith.constant 0 : index
    %c1536 = arith.constant 1536 : index
    %122 = vector.load %arg1[%c0_55, %c1536] : memref<16x3584xbf16, #tpu.memory_space<vmem>>, vector<16x640xbf16>
    %cst_56 = arith.constant dense<0.000000e+00> : vector<16x256xf32>
    %123 = tpu.matmul %122, %0, %cst_56 {dimension_numbers = #tpu.dot_dimension_numbers<[1], [0], [0], [1], [0, 0, 1, 1], [], []>} : vector<16x640xbf16>, vector<640x256xbf16>, vector<16x256xf32> -> vector<16x256xf32>
    %124 = arith.addf %123, %4 : vector<16x256xf32>
    %cst_57 = arith.constant 0.000000e+00 : f32
    %125 = vector.broadcast %cst_57 : f32 to vector<16x256xf32>
    %126 = arith.maximumf %124, %125 : vector<16x256xf32>
    %127 = vector.extract_strided_slice %126 {offsets = [0, 0], sizes = [16, 128], strides = [1, 1]} : vector<16x256xf32> to vector<16x128xf32>
    %128 = vector.extract_strided_slice %126 {offsets = [0, 128], sizes = [16, 128], strides = [1, 1]} : vector<16x256xf32> to vector<16x128xf32>
    %129 = arith.maximumf %127, %128 : vector<16x128xf32>
    %c0_58 = arith.constant 0 : index
    %c1664 = arith.constant 1664 : index
    %130 = vector.load %arg1[%c0_58, %c1664] : memref<16x3584xbf16, #tpu.memory_space<vmem>>, vector<16x640xbf16>
    %cst_59 = arith.constant dense<0.000000e+00> : vector<16x256xf32>
    %131 = tpu.matmul %130, %0, %cst_59 {dimension_numbers = #tpu.dot_dimension_numbers<[1], [0], [0], [1], [0, 0, 1, 1], [], []>} : vector<16x640xbf16>, vector<640x256xbf16>, vector<16x256xf32> -> vector<16x256xf32>
    %132 = arith.addf %131, %4 : vector<16x256xf32>
    %cst_60 = arith.constant 0.000000e+00 : f32
    %133 = vector.broadcast %cst_60 : f32 to vector<16x256xf32>
    %134 = arith.maximumf %132, %133 : vector<16x256xf32>
    %135 = vector.extract_strided_slice %134 {offsets = [0, 0], sizes = [16, 128], strides = [1, 1]} : vector<16x256xf32> to vector<16x128xf32>
    %136 = vector.extract_strided_slice %134 {offsets = [0, 128], sizes = [16, 128], strides = [1, 1]} : vector<16x256xf32> to vector<16x128xf32>
    %137 = arith.maximumf %135, %136 : vector<16x128xf32>
    %138 = arith.maximumf %129, %137 : vector<16x128xf32>
    %139 = arith.truncf %138 : vector<16x128xf32> to vector<16x128xbf16>
    %c0_61 = arith.constant 0 : index
    %c768_62 = arith.constant 768 : index
    %140 = vector.load %arg11[%c0_61, %c768_62] : memref<16x1536xbf16, #tpu.memory_space<vmem>>, vector<16x128xbf16>
    tpu.vector_store %arg11[%c0_61, %c768_62], %139 {strides = array<i32>} : memref<16x1536xbf16, #tpu.memory_space<vmem>>, vector<16x128xbf16>,
    %c0_63 = arith.constant 0 : index
    %c1792 = arith.constant 1792 : index
    %141 = vector.load %arg1[%c0_63, %c1792] : memref<16x3584xbf16, #tpu.memory_space<vmem>>, vector<16x640xbf16>
    %cst_64 = arith.constant dense<0.000000e+00> : vector<16x256xf32>
    %142 = tpu.matmul %141, %0, %cst_64 {dimension_numbers = #tpu.dot_dimension_numbers<[1], [0], [0], [1], [0, 0, 1, 1], [], []>} : vector<16x640xbf16>, vector<640x256xbf16>, vector<16x256xf32> -> vector<16x256xf32>
    %143 = arith.addf %142, %4 : vector<16x256xf32>
    %cst_65 = arith.constant 0.000000e+00 : f32
    %144 = vector.broadcast %cst_65 : f32 to vector<16x256xf32>
    %145 = arith.maximumf %143, %144 : vector<16x256xf32>
    %146 = vector.extract_strided_slice %145 {offsets = [0, 0], sizes = [16, 128], strides = [1, 1]} : vector<16x256xf32> to vector<16x128xf32>
    %147 = vector.extract_strided_slice %145 {offsets = [0, 128], sizes = [16, 128], strides = [1, 1]} : vector<16x256xf32> to vector<16x128xf32>
    %148 = arith.maximumf %146, %147 : vector<16x128xf32>
    %c0_66 = arith.constant 0 : index
    %c1920 = arith.constant 1920 : index
    %149 = vector.load %arg1[%c0_66, %c1920] : memref<16x3584xbf16, #tpu.memory_space<vmem>>, vector<16x640xbf16>
    %cst_67 = arith.constant dense<0.000000e+00> : vector<16x256xf32>
    %150 = tpu.matmul %149, %0, %cst_67 {dimension_numbers = #tpu.dot_dimension_numbers<[1], [0], [0], [1], [0, 0, 1, 1], [], []>} : vector<16x640xbf16>, vector<640x256xbf16>, vector<16x256xf32> -> vector<16x256xf32>
    %151 = arith.addf %150, %4 : vector<16x256xf32>
    %cst_68 = arith.constant 0.000000e+00 : f32
    %152 = vector.broadcast %cst_68 : f32 to vector<16x256xf32>
    %153 = arith.maximumf %151, %152 : vector<16x256xf32>
    %154 = vector.extract_strided_slice %153 {offsets = [0, 0], sizes = [16, 128], strides = [1, 1]} : vector<16x256xf32> to vector<16x128xf32>
    %155 = vector.extract_strided_slice %153 {offsets = [0, 128], sizes = [16, 128], strides = [1, 1]} : vector<16x256xf32> to vector<16x128xf32>
    %156 = arith.maximumf %154, %155 : vector<16x128xf32>
    %157 = arith.maximumf %148, %156 : vector<16x128xf32>
    %158 = arith.truncf %157 : vector<16x128xf32> to vector<16x128xbf16>
    %c0_69 = arith.constant 0 : index
    %c896_70 = arith.constant 896 : index
    %159 = vector.load %arg11[%c0_69, %c896_70] : memref<16x1536xbf16, #tpu.memory_space<vmem>>, vector<16x128xbf16>
    tpu.vector_store %arg11[%c0_69, %c896_70], %158 {strides = array<i32>} : memref<16x1536xbf16, #tpu.memory_space<vmem>>, vector<16x128xbf16>,
    %c0_71 = arith.constant 0 : index
    %c2048 = arith.constant 2048 : index
    %160 = vector.load %arg1[%c0_71, %c2048] : memref<16x3584xbf16, #tpu.memory_space<vmem>>, vector<16x640xbf16>
    %cst_72 = arith.constant dense<0.000000e+00> : vector<16x256xf32>
    %161 = tpu.matmul %160, %0, %cst_72 {dimension_numbers = #tpu.dot_dimension_numbers<[1], [0], [0], [1], [0, 0, 1, 1], [], []>} : vector<16x640xbf16>, vector<640x256xbf16>, vector<16x256xf32> -> vector<16x256xf32>
    %162 = arith.addf %161, %4 : vector<16x256xf32>
    %cst_73 = arith.constant 0.000000e+00 : f32
    %163 = vector.broadcast %cst_73 : f32 to vector<16x256xf32>
    %164 = arith.maximumf %162, %163 : vector<16x256xf32>
    %165 = vector.extract_strided_slice %164 {offsets = [0, 0], sizes = [16, 128], strides = [1, 1]} : vector<16x256xf32> to vector<16x128xf32>
    %166 = vector.extract_strided_slice %164 {offsets = [0, 128], sizes = [16, 128], strides = [1, 1]} : vector<16x256xf32> to vector<16x128xf32>
    %167 = arith.maximumf %165, %166 : vector<16x128xf32>
    %c0_74 = arith.constant 0 : index
    %c2176 = arith.constant 2176 : index
    %168 = vector.load %arg1[%c0_74, %c2176] : memref<16x3584xbf16, #tpu.memory_space<vmem>>, vector<16x640xbf16>
    %cst_75 = arith.constant dense<0.000000e+00> : vector<16x256xf32>
    %169 = tpu.matmul %168, %0, %cst_75 {dimension_numbers = #tpu.dot_dimension_numbers<[1], [0], [0], [1], [0, 0, 1, 1], [], []>} : vector<16x640xbf16>, vector<640x256xbf16>, vector<16x256xf32> -> vector<16x256xf32>
    %170 = arith.addf %169, %4 : vector<16x256xf32>
    %cst_76 = arith.constant 0.000000e+00 : f32
    %171 = vector.broadcast %cst_76 : f32 to vector<16x256xf32>
    %172 = arith.maximumf %170, %171 : vector<16x256xf32>
    %173 = vector.extract_strided_slice %172 {offsets = [0, 0], sizes = [16, 128], strides = [1, 1]} : vector<16x256xf32> to vector<16x128xf32>
    %174 = vector.extract_strided_slice %172 {offsets = [0, 128], sizes = [16, 128], strides = [1, 1]} : vector<16x256xf32> to vector<16x128xf32>
    %175 = arith.maximumf %173, %174 : vector<16x128xf32>
    %176 = arith.maximumf %167, %175 : vector<16x128xf32>
    %177 = arith.truncf %176 : vector<16x128xf32> to vector<16x128xbf16>
    %c0_77 = arith.constant 0 : index
    %c1024_78 = arith.constant 1024 : index
    %178 = vector.load %arg11[%c0_77, %c1024_78] : memref<16x1536xbf16, #tpu.memory_space<vmem>>, vector<16x128xbf16>
    tpu.vector_store %arg11[%c0_77, %c1024_78], %177 {strides = array<i32>} : memref<16x1536xbf16, #tpu.memory_space<vmem>>, vector<16x128xbf16>,
    %c0_79 = arith.constant 0 : index
    %c2304 = arith.constant 2304 : index
    %179 = vector.load %arg1[%c0_79, %c2304] : memref<16x3584xbf16, #tpu.memory_space<vmem>>, vector<16x640xbf16>
    %cst_80 = arith.constant dense<0.000000e+00> : vector<16x256xf32>
    %180 = tpu.matmul %179, %0, %cst_80 {dimension_numbers = #tpu.dot_dimension_numbers<[1], [0], [0], [1], [0, 0, 1, 1], [], []>} : vector<16x640xbf16>, vector<640x256xbf16>, vector<16x256xf32> -> vector<16x256xf32>
    %181 = arith.addf %180, %4 : vector<16x256xf32>
    %cst_81 = arith.constant 0.000000e+00 : f32
    %182 = vector.broadcast %cst_81 : f32 to vector<16x256xf32>
    %183 = arith.maximumf %181, %182 : vector<16x256xf32>
    %184 = vector.extract_strided_slice %183 {offsets = [0, 0], sizes = [16, 128], strides = [1, 1]} : vector<16x256xf32> to vector<16x128xf32>
    %185 = vector.extract_strided_slice %183 {offsets = [0, 128], sizes = [16, 128], strides = [1, 1]} : vector<16x256xf32> to vector<16x128xf32>
    %186 = arith.maximumf %184, %185 : vector<16x128xf32>
    %c0_82 = arith.constant 0 : index
    %c2432 = arith.constant 2432 : index
    %187 = vector.load %arg1[%c0_82, %c2432] : memref<16x3584xbf16, #tpu.memory_space<vmem>>, vector<16x640xbf16>
    %cst_83 = arith.constant dense<0.000000e+00> : vector<16x256xf32>
    %188 = tpu.matmul %187, %0, %cst_83 {dimension_numbers = #tpu.dot_dimension_numbers<[1], [0], [0], [1], [0, 0, 1, 1], [], []>} : vector<16x640xbf16>, vector<640x256xbf16>, vector<16x256xf32> -> vector<16x256xf32>
    %189 = arith.addf %188, %4 : vector<16x256xf32>
    %cst_84 = arith.constant 0.000000e+00 : f32
    %190 = vector.broadcast %cst_84 : f32 to vector<16x256xf32>
    %191 = arith.maximumf %189, %190 : vector<16x256xf32>
    %192 = vector.extract_strided_slice %191 {offsets = [0, 0], sizes = [16, 128], strides = [1, 1]} : vector<16x256xf32> to vector<16x128xf32>
    %193 = vector.extract_strided_slice %191 {offsets = [0, 128], sizes = [16, 128], strides = [1, 1]} : vector<16x256xf32> to vector<16x128xf32>
    %194 = arith.maximumf %192, %193 : vector<16x128xf32>
    %195 = arith.maximumf %186, %194 : vector<16x128xf32>
    %196 = arith.truncf %195 : vector<16x128xf32> to vector<16x128xbf16>
    %c0_85 = arith.constant 0 : index
    %c1152_86 = arith.constant 1152 : index
    %197 = vector.load %arg11[%c0_85, %c1152_86] : memref<16x1536xbf16, #tpu.memory_space<vmem>>, vector<16x128xbf16>
    tpu.vector_store %arg11[%c0_85, %c1152_86], %196 {strides = array<i32>} : memref<16x1536xbf16, #tpu.memory_space<vmem>>, vector<16x128xbf16>,
    %c0_87 = arith.constant 0 : index
    %c2560 = arith.constant 2560 : index
    %198 = vector.load %arg1[%c0_87, %c2560] : memref<16x3584xbf16, #tpu.memory_space<vmem>>, vector<16x640xbf16>
    %cst_88 = arith.constant dense<0.000000e+00> : vector<16x256xf32>
    %199 = tpu.matmul %198, %0, %cst_88 {dimension_numbers = #tpu.dot_dimension_numbers<[1], [0], [0], [1], [0, 0, 1, 1], [], []>} : vector<16x640xbf16>, vector<640x256xbf16>, vector<16x256xf32> -> vector<16x256xf32>
    %200 = arith.addf %199, %4 : vector<16x256xf32>
    %cst_89 = arith.constant 0.000000e+00 : f32
    %201 = vector.broadcast %cst_89 : f32 to vector<16x256xf32>
    %202 = arith.maximumf %200, %201 : vector<16x256xf32>
    %203 = vector.extract_strided_slice %202 {offsets = [0, 0], sizes = [16, 128], strides = [1, 1]} : vector<16x256xf32> to vector<16x128xf32>
    %204 = vector.extract_strided_slice %202 {offsets = [0, 128], sizes = [16, 128], strides = [1, 1]} : vector<16x256xf32> to vector<16x128xf32>
    %205 = arith.maximumf %203, %204 : vector<16x128xf32>
    %c0_90 = arith.constant 0 : index
    %c2688 = arith.constant 2688 : index
    %206 = vector.load %arg1[%c0_90, %c2688] : memref<16x3584xbf16, #tpu.memory_space<vmem>>, vector<16x640xbf16>
    %cst_91 = arith.constant dense<0.000000e+00> : vector<16x256xf32>
    %207 = tpu.matmul %206, %0, %cst_91 {dimension_numbers = #tpu.dot_dimension_numbers<[1], [0], [0], [1], [0, 0, 1, 1], [], []>} : vector<16x640xbf16>, vector<640x256xbf16>, vector<16x256xf32> -> vector<16x256xf32>
    %208 = arith.addf %207, %4 : vector<16x256xf32>
    %cst_92 = arith.constant 0.000000e+00 : f32
    %209 = vector.broadcast %cst_92 : f32 to vector<16x256xf32>
    %210 = arith.maximumf %208, %209 : vector<16x256xf32>
    %211 = vector.extract_strided_slice %210 {offsets = [0, 0], sizes = [16, 128], strides = [1, 1]} : vector<16x256xf32> to vector<16x128xf32>
    %212 = vector.extract_strided_slice %210 {offsets = [0, 128], sizes = [16, 128], strides = [1, 1]} : vector<16x256xf32> to vector<16x128xf32>
    %213 = arith.maximumf %211, %212 : vector<16x128xf32>
    %214 = arith.maximumf %205, %213 : vector<16x128xf32>
    %215 = arith.truncf %214 : vector<16x128xf32> to vector<16x128xbf16>
    %c0_93 = arith.constant 0 : index
    %c1280_94 = arith.constant 1280 : index
    %216 = vector.load %arg11[%c0_93, %c1280_94] : memref<16x1536xbf16, #tpu.memory_space<vmem>>, vector<16x128xbf16>
    tpu.vector_store %arg11[%c0_93, %c1280_94], %215 {strides = array<i32>} : memref<16x1536xbf16, #tpu.memory_space<vmem>>, vector<16x128xbf16>,
    %c0_95 = arith.constant 0 : index
    %c2816 = arith.constant 2816 : index
    %217 = vector.load %arg1[%c0_95, %c2816] : memref<16x3584xbf16, #tpu.memory_space<vmem>>, vector<16x640xbf16>
    %cst_96 = arith.constant dense<0.000000e+00> : vector<16x256xf32>
    %218 = tpu.matmul %217, %0, %cst_96 {dimension_numbers = #tpu.dot_dimension_numbers<[1], [0], [0], [1], [0, 0, 1, 1], [], []>} : vector<16x640xbf16>, vector<640x256xbf16>, vector<16x256xf32> -> vector<16x256xf32>
    %219 = arith.addf %218, %4 : vector<16x256xf32>
    %cst_97 = arith.constant 0.000000e+00 : f32
    %220 = vector.broadcast %cst_97 : f32 to vector<16x256xf32>
    %221 = arith.maximumf %219, %220 : vector<16x256xf32>
    %222 = vector.extract_strided_slice %221 {offsets = [0, 0], sizes = [16, 128], strides = [1, 1]} : vector<16x256xf32> to vector<16x128xf32>
    %223 = vector.extract_strided_slice %221 {offsets = [0, 128], sizes = [16, 128], strides = [1, 1]} : vector<16x256xf32> to vector<16x128xf32>
    %224 = arith.maximumf %222, %223 : vector<16x128xf32>
    %c0_98 = arith.constant 0 : index
    %c2944 = arith.constant 2944 : index
    %225 = vector.load %arg1[%c0_98, %c2944] : memref<16x3584xbf16, #tpu.memory_space<vmem>>, vector<16x640xbf16>
    %cst_99 = arith.constant dense<0.000000e+00> : vector<16x256xf32>
    %226 = tpu.matmul %225, %0, %cst_99 {dimension_numbers = #tpu.dot_dimension_numbers<[1], [0], [0], [1], [0, 0, 1, 1], [], []>} : vector<16x640xbf16>, vector<640x256xbf16>, vector<16x256xf32> -> vector<16x256xf32>
    %227 = arith.addf %226, %4 : vector<16x256xf32>
    %cst_100 = arith.constant 0.000000e+00 : f32
    %228 = vector.broadcast %cst_100 : f32 to vector<16x256xf32>
    %229 = arith.maximumf %227, %228 : vector<16x256xf32>
    %230 = vector.extract_strided_slice %229 {offsets = [0, 0], sizes = [16, 128], strides = [1, 1]} : vector<16x256xf32> to vector<16x128xf32>
    %231 = vector.extract_strided_slice %229 {offsets = [0, 128], sizes = [16, 128], strides = [1, 1]} : vector<16x256xf32> to vector<16x128xf32>
    %232 = arith.maximumf %230, %231 : vector<16x128xf32>
    %233 = arith.maximumf %224, %232 : vector<16x128xf32>
    %234 = arith.truncf %233 : vector<16x128xf32> to vector<16x128xbf16>
    %c0_101 = arith.constant 0 : index
    %c1408_102 = arith.constant 1408 : index
    %235 = vector.load %arg11[%c0_101, %c1408_102] : memref<16x1536xbf16, #tpu.memory_space<vmem>>, vector<16x128xbf16>
    tpu.vector_store %arg11[%c0_101, %c1408_102], %234 {strides = array<i32>} : memref<16x1536xbf16, #tpu.memory_space<vmem>>, vector<16x128xbf16>,
    %c0_103 = arith.constant 0 : index
    %c0_104 = arith.constant 0 : index
    %236 = vector.load %arg11[%c0_103, %c0_104] : memref<16x1536xbf16, #tpu.memory_space<vmem>>, vector<16x640xbf16>
    %cst_105 = arith.constant dense<0.000000e+00> : vector<16x256xf32>
    %237 = tpu.matmul %236, %1, %cst_105 {dimension_numbers = #tpu.dot_dimension_numbers<[1], [0], [0], [1], [0, 0, 1, 1], [], []>} : vector<16x640xbf16>, vector<640x256xbf16>, vector<16x256xf32> -> vector<16x256xf32>
    %238 = arith.addf %237, %7 : vector<16x256xf32>
    %cst_106 = arith.constant 0.000000e+00 : f32
    %239 = vector.broadcast %cst_106 : f32 to vector<16x256xf32>
    %240 = arith.maximumf %238, %239 : vector<16x256xf32>
    %241 = vector.extract_strided_slice %240 {offsets = [0, 0], sizes = [16, 128], strides = [1, 1]} : vector<16x256xf32> to vector<16x128xf32>
    %242 = vector.extract_strided_slice %240 {offsets = [0, 128], sizes = [16, 128], strides = [1, 1]} : vector<16x256xf32> to vector<16x128xf32>
    %243 = arith.maximumf %241, %242 : vector<16x128xf32>
    %c0_107 = arith.constant 0 : index
    %c128_108 = arith.constant 128 : index
    %244 = vector.load %arg11[%c0_107, %c128_108] : memref<16x1536xbf16, #tpu.memory_space<vmem>>, vector<16x640xbf16>
    %cst_109 = arith.constant dense<0.000000e+00> : vector<16x256xf32>
    %245 = tpu.matmul %244, %1, %cst_109 {dimension_numbers = #tpu.dot_dimension_numbers<[1], [0], [0], [1], [0, 0, 1, 1], [], []>} : vector<16x640xbf16>, vector<640x256xbf16>, vector<16x256xf32> -> vector<16x256xf32>
    %246 = arith.addf %245, %7 : vector<16x256xf32>
    %cst_110 = arith.constant 0.000000e+00 : f32
    %247 = vector.broadcast %cst_110 : f32 to vector<16x256xf32>
    %248 = arith.maximumf %246, %247 : vector<16x256xf32>
    %249 = vector.extract_strided_slice %248 {offsets = [0, 0], sizes = [16, 128], strides = [1, 1]} : vector<16x256xf32> to vector<16x128xf32>
    %250 = vector.extract_strided_slice %248 {offsets = [0, 128], sizes = [16, 128], strides = [1, 1]} : vector<16x256xf32> to vector<16x128xf32>
    %251 = arith.maximumf %249, %250 : vector<16x128xf32>
    %252 = arith.maximumf %243, %251 : vector<16x128xf32>
    %253 = arith.truncf %252 : vector<16x128xf32> to vector<16x128xbf16>
    %c0_111 = arith.constant 0 : index
    %c0_112 = arith.constant 0 : index
    %254 = vector.load %arg12[%c0_111, %c0_112] : memref<16x512xbf16, #tpu.memory_space<vmem>>, vector<16x128xbf16>
    tpu.vector_store %arg12[%c0_111, %c0_112], %253 {strides = array<i32>} : memref<16x512xbf16, #tpu.memory_space<vmem>>, vector<16x128xbf16>,
    %c0_113 = arith.constant 0 : index
    %c256_114 = arith.constant 256 : index
    %255 = vector.load %arg11[%c0_113, %c256_114] : memref<16x1536xbf16, #tpu.memory_space<vmem>>, vector<16x640xbf16>
    %cst_115 = arith.constant dense<0.000000e+00> : vector<16x256xf32>
    %256 = tpu.matmul %255, %1, %cst_115 {dimension_numbers = #tpu.dot_dimension_numbers<[1], [0], [0], [1], [0, 0, 1, 1], [], []>} : vector<16x640xbf16>, vector<640x256xbf16>, vector<16x256xf32> -> vector<16x256xf32>
    %257 = arith.addf %256, %7 : vector<16x256xf32>
    %cst_116 = arith.constant 0.000000e+00 : f32
    %258 = vector.broadcast %cst_116 : f32 to vector<16x256xf32>
    %259 = arith.maximumf %257, %258 : vector<16x256xf32>
    %260 = vector.extract_strided_slice %259 {offsets = [0, 0], sizes = [16, 128], strides = [1, 1]} : vector<16x256xf32> to vector<16x128xf32>
    %261 = vector.extract_strided_slice %259 {offsets = [0, 128], sizes = [16, 128], strides = [1, 1]} : vector<16x256xf32> to vector<16x128xf32>
    %262 = arith.maximumf %260, %261 : vector<16x128xf32>
    %c0_117 = arith.constant 0 : index
    %c384_118 = arith.constant 384 : index
    %263 = vector.load %arg11[%c0_117, %c384_118] : memref<16x1536xbf16, #tpu.memory_space<vmem>>, vector<16x640xbf16>
    %cst_119 = arith.constant dense<0.000000e+00> : vector<16x256xf32>
    %264 = tpu.matmul %263, %1, %cst_119 {dimension_numbers = #tpu.dot_dimension_numbers<[1], [0], [0], [1], [0, 0, 1, 1], [], []>} : vector<16x640xbf16>, vector<640x256xbf16>, vector<16x256xf32> -> vector<16x256xf32>
    %265 = arith.addf %264, %7 : vector<16x256xf32>
    %cst_120 = arith.constant 0.000000e+00 : f32
    %266 = vector.broadcast %cst_120 : f32 to vector<16x256xf32>
    %267 = arith.maximumf %265, %266 : vector<16x256xf32>
    %268 = vector.extract_strided_slice %267 {offsets = [0, 0], sizes = [16, 128], strides = [1, 1]} : vector<16x256xf32> to vector<16x128xf32>
    %269 = vector.extract_strided_slice %267 {offsets = [0, 128], sizes = [16, 128], strides = [1, 1]} : vector<16x256xf32> to vector<16x128xf32>
    %270 = arith.maximumf %268, %269 : vector<16x128xf32>
    %271 = arith.maximumf %262, %270 : vector<16x128xf32>
    %272 = arith.truncf %271 : vector<16x128xf32> to vector<16x128xbf16>
    %c0_121 = arith.constant 0 : index
    %c128_122 = arith.constant 128 : index
    %273 = vector.load %arg12[%c0_121, %c128_122] : memref<16x512xbf16, #tpu.memory_space<vmem>>, vector<16x128xbf16>
    tpu.vector_store %arg12[%c0_121, %c128_122], %272 {strides = array<i32>} : memref<16x512xbf16, #tpu.memory_space<vmem>>, vector<16x128xbf16>,
    %c0_123 = arith.constant 0 : index
    %c512_124 = arith.constant 512 : index
    %274 = vector.load %arg11[%c0_123, %c512_124] : memref<16x1536xbf16, #tpu.memory_space<vmem>>, vector<16x640xbf16>
    %cst_125 = arith.constant dense<0.000000e+00> : vector<16x256xf32>
    %275 = tpu.matmul %274, %1, %cst_125 {dimension_numbers = #tpu.dot_dimension_numbers<[1], [0], [0], [1], [0, 0, 1, 1], [], []>} : vector<16x640xbf16>, vector<640x256xbf16>, vector<16x256xf32> -> vector<16x256xf32>
    %276 = arith.addf %275, %7 : vector<16x256xf32>
    %cst_126 = arith.constant 0.000000e+00 : f32
    %277 = vector.broadcast %cst_126 : f32 to vector<16x256xf32>
    %278 = arith.maximumf %276, %277 : vector<16x256xf32>
    %279 = vector.extract_strided_slice %278 {offsets = [0, 0], sizes = [16, 128], strides = [1, 1]} : vector<16x256xf32> to vector<16x128xf32>
    %280 = vector.extract_strided_slice %278 {offsets = [0, 128], sizes = [16, 128], strides = [1, 1]} : vector<16x256xf32> to vector<16x128xf32>
    %281 = arith.maximumf %279, %280 : vector<16x128xf32>
    %c0_127 = arith.constant 0 : index
    %c640_128 = arith.constant 640 : index
    %282 = vector.load %arg11[%c0_127, %c640_128] : memref<16x1536xbf16, #tpu.memory_space<vmem>>, vector<16x640xbf16>
    %cst_129 = arith.constant dense<0.000000e+00> : vector<16x256xf32>
    %283 = tpu.matmul %282, %1, %cst_129 {dimension_numbers = #tpu.dot_dimension_numbers<[1], [0], [0], [1], [0, 0, 1, 1], [], []>} : vector<16x640xbf16>, vector<640x256xbf16>, vector<16x256xf32> -> vector<16x256xf32>
    %284 = arith.addf %283, %7 : vector<16x256xf32>
    %cst_130 = arith.constant 0.000000e+00 : f32
    %285 = vector.broadcast %cst_130 : f32 to vector<16x256xf32>
    %286 = arith.maximumf %284, %285 : vector<16x256xf32>
    %287 = vector.extract_strided_slice %286 {offsets = [0, 0], sizes = [16, 128], strides = [1, 1]} : vector<16x256xf32> to vector<16x128xf32>
    %288 = vector.extract_strided_slice %286 {offsets = [0, 128], sizes = [16, 128], strides = [1, 1]} : vector<16x256xf32> to vector<16x128xf32>
    %289 = arith.maximumf %287, %288 : vector<16x128xf32>
    %290 = arith.maximumf %281, %289 : vector<16x128xf32>
    %291 = arith.truncf %290 : vector<16x128xf32> to vector<16x128xbf16>
    %c0_131 = arith.constant 0 : index
    %c256_132 = arith.constant 256 : index
    %292 = vector.load %arg12[%c0_131, %c256_132] : memref<16x512xbf16, #tpu.memory_space<vmem>>, vector<16x128xbf16>
    tpu.vector_store %arg12[%c0_131, %c256_132], %291 {strides = array<i32>} : memref<16x512xbf16, #tpu.memory_space<vmem>>, vector<16x128xbf16>,
    %c0_133 = arith.constant 0 : index
    %c768_134 = arith.constant 768 : index
    %293 = vector.load %arg11[%c0_133, %c768_134] : memref<16x1536xbf16, #tpu.memory_space<vmem>>, vector<16x640xbf16>
    %cst_135 = arith.constant dense<0.000000e+00> : vector<16x256xf32>
    %294 = tpu.matmul %293, %1, %cst_135 {dimension_numbers = #tpu.dot_dimension_numbers<[1], [0], [0], [1], [0, 0, 1, 1], [], []>} : vector<16x640xbf16>, vector<640x256xbf16>, vector<16x256xf32> -> vector<16x256xf32>
    %295 = arith.addf %294, %7 : vector<16x256xf32>
    %cst_136 = arith.constant 0.000000e+00 : f32
    %296 = vector.broadcast %cst_136 : f32 to vector<16x256xf32>
    %297 = arith.maximumf %295, %296 : vector<16x256xf32>
    %298 = vector.extract_strided_slice %297 {offsets = [0, 0], sizes = [16, 128], strides = [1, 1]} : vector<16x256xf32> to vector<16x128xf32>
    %299 = vector.extract_strided_slice %297 {offsets = [0, 128], sizes = [16, 128], strides = [1, 1]} : vector<16x256xf32> to vector<16x128xf32>
    %300 = arith.maximumf %298, %299 : vector<16x128xf32>
    %c0_137 = arith.constant 0 : index
    %c896_138 = arith.constant 896 : index
    %301 = vector.load %arg11[%c0_137, %c896_138] : memref<16x1536xbf16, #tpu.memory_space<vmem>>, vector<16x640xbf16>
    %cst_139 = arith.constant dense<0.000000e+00> : vector<16x256xf32>
    %302 = tpu.matmul %301, %1, %cst_139 {dimension_numbers = #tpu.dot_dimension_numbers<[1], [0], [0], [1], [0, 0, 1, 1], [], []>} : vector<16x640xbf16>, vector<640x256xbf16>, vector<16x256xf32> -> vector<16x256xf32>
    %303 = arith.addf %302, %7 : vector<16x256xf32>
    %cst_140 = arith.constant 0.000000e+00 : f32
    %304 = vector.broadcast %cst_140 : f32 to vector<16x256xf32>
    %305 = arith.maximumf %303, %304 : vector<16x256xf32>
    %306 = vector.extract_strided_slice %305 {offsets = [0, 0], sizes = [16, 128], strides = [1, 1]} : vector<16x256xf32> to vector<16x128xf32>
    %307 = vector.extract_strided_slice %305 {offsets = [0, 128], sizes = [16, 128], strides = [1, 1]} : vector<16x256xf32> to vector<16x128xf32>
    %308 = arith.maximumf %306, %307 : vector<16x128xf32>
    %309 = arith.maximumf %300, %308 : vector<16x128xf32>
    %310 = arith.truncf %309 : vector<16x128xf32> to vector<16x128xbf16>
    %c0_141 = arith.constant 0 : index
    %c384_142 = arith.constant 384 : index
    %311 = vector.load %arg12[%c0_141, %c384_142] : memref<16x512xbf16, #tpu.memory_space<vmem>>, vector<16x128xbf16>
    tpu.vector_store %arg12[%c0_141, %c384_142], %310 {strides = array<i32>} : memref<16x512xbf16, #tpu.memory_space<vmem>>, vector<16x128xbf16>,
    %c0_143 = arith.constant 0 : index
    %c0_144 = arith.constant 0 : index
    %312 = vector.load %arg12[%c0_143, %c0_144] : memref<16x512xbf16, #tpu.memory_space<vmem>>, vector<16x512xbf16>
    %c0_145 = arith.constant 0 : index
    %c0_146 = arith.constant 0 : index
    %313 = vector.load %arg6[%c0_145, %c0_146] : memref<512x128xbf16, #tpu.memory_space<vmem>>, vector<512x128xbf16>
    %cst_147 = arith.constant dense<0.000000e+00> : vector<16x128xf32>
    %314 = tpu.matmul %312, %313, %cst_147 {dimension_numbers = #tpu.dot_dimension_numbers<[1], [0], [0], [1], [0, 0, 1, 1], [], []>} : vector<16x512xbf16>, vector<512x128xbf16>, vector<16x128xf32> -> vector<16x128xf32>
    %c0_148 = arith.constant 0 : index
    %c0_149 = arith.constant 0 : index
    %315 = vector.load %arg7[%c0_148, %c0_149] : memref<1x128xf32, #tpu.memory_space<vmem>>, vector<1x128xf32>
    %316 = vector.broadcast %315 : vector<1x128xf32> to vector<16x128xf32>
    %317 = arith.addf %314, %316 : vector<16x128xf32>
    %cst_150 = arith.constant 0.000000e+00 : f32
    %318 = vector.broadcast %cst_150 : f32 to vector<16x128xf32>
    %319 = arith.maximumf %317, %318 : vector<16x128xf32>
    %320 = arith.truncf %319 : vector<16x128xf32> to vector<16x128xbf16>
    %c0_151 = arith.constant 0 : index
    %c0_152 = arith.constant 0 : index
    %321 = vector.load %arg8[%c0_151, %c0_152] : memref<128x128xbf16, #tpu.memory_space<vmem>>, vector<128x128xbf16>
    %cst_153 = arith.constant dense<0.000000e+00> : vector<16x128xf32>
    %322 = tpu.matmul %320, %321, %cst_153 {dimension_numbers = #tpu.dot_dimension_numbers<[1], [0], [0], [1], [0, 0, 1, 1], [], []>} : vector<16x128xbf16>, vector<128x128xbf16>, vector<16x128xf32> -> vector<16x128xf32>
    %c0_154 = arith.constant 0 : index
    %c0_155 = arith.constant 0 : index
    %323 = vector.load %arg9[%c0_154, %c0_155] : memref<1x128xf32, #tpu.memory_space<vmem>>, vector<1x128xf32>
    %324 = vector.broadcast %323 : vector<1x128xf32> to vector<16x128xf32>
    %325 = arith.addf %322, %324 : vector<16x128xf32>
    %326 = tpu.iota {dimensions = array<i32: 1>} : vector<16x128xi32>
    %c10_i32 = arith.constant 10 : i32
    %327 = vector.broadcast %c10_i32 : i32 to vector<16x128xi32>
    %328 = arith.cmpi slt, %326, %327 : vector<16x128xi32>
    %cst_156 = arith.constant -1.000000e+30 : f32
    %329 = vector.broadcast %cst_156 : f32 to vector<16x128xf32>
    %330 = arith.select %328, %325, %329 : vector<16x128xi1>, vector<16x128xf32>
    %cst_157 = arith.constant dense<0xFF800000> : vector<16xf32>
    %331 = vector.multi_reduction <maximumf>, %330, %cst_157 [1] : vector<16x128xf32> to vector<16xf32>
    %332 = vector.shape_cast %331 : vector<16xf32> to vector<16x1xf32>
    %333 = vector.broadcast %332 : vector<16x1xf32> to vector<16x128xf32>
    %334 = arith.subf %330, %333 : vector<16x128xf32>
    %335 = math.exp %334 : vector<16x128xf32>
    %cst_158 = arith.constant dense<0.000000e+00> : vector<16xf32>
    %336 = vector.multi_reduction <add>, %335, %cst_158 [1] : vector<16x128xf32> to vector<16xf32>
    %337 = vector.shape_cast %336 : vector<16xf32> to vector<16x1xf32>
    %338 = math.log %337 : vector<16x1xf32>
    %339 = vector.broadcast %338 : vector<16x1xf32> to vector<16x128xf32>
    %340 = arith.subf %334, %339 : vector<16x128xf32>
    %c0_159 = arith.constant 0 : index
    %c0_160 = arith.constant 0 : index
    %341 = vector.load %arg10[%c0_159, %c0_160] : memref<16x128xf32, #tpu.memory_space<vmem>>, vector<16x128xf32>
    tpu.vector_store %arg10[%c0_159, %c0_160], %340 {strides = array<i32>} : memref<16x128xf32, #tpu.memory_space<vmem>>, vector<16x128xf32>,
    return
  }
  func.func @transform_0(%arg0: i32) -> (i32, i32) {
    %c0_i32 = arith.constant 0 : i32
    %c0_i32_0 = arith.constant 0 : i32
    return %arg0, %c0_i32 : i32, i32
  }
  func.func @transform_1(%arg0: i32) -> (i32, i32) {
    %c0_i32 = arith.constant 0 : i32
    %c0_i32_0 = arith.constant 0 : i32
    %c0_i32_1 = arith.constant 0 : i32
    return %c0_i32, %c0_i32_0 : i32, i32
  }
  func.func @transform_2(%arg0: i32) -> (i32, i32) {
    %c0_i32 = arith.constant 0 : i32
    %c0_i32_0 = arith.constant 0 : i32
    %c0_i32_1 = arith.constant 0 : i32
    return %c0_i32, %c0_i32_0 : i32, i32
  }
  func.func @transform_3(%arg0: i32) -> (i32, i32) {
    %c0_i32 = arith.constant 0 : i32
    %c0_i32_0 = arith.constant 0 : i32
    %c0_i32_1 = arith.constant 0 : i32
    return %c0_i32, %c0_i32_0 : i32, i32
  }
  func.func @transform_4(%arg0: i32) -> (i32, i32) {
    %c0_i32 = arith.constant 0 : i32
    %c0_i32_0 = arith.constant 0 : i32
    %c0_i32_1 = arith.constant 0 : i32
    return %c0_i32, %c0_i32_0 : i32, i32
  }
  func.func @transform_5(%arg0: i32) -> (i32, i32) {
    %c0_i32 = arith.constant 0 : i32
    %c0_i32_0 = arith.constant 0 : i32
    %c0_i32_1 = arith.constant 0 : i32
    return %c0_i32, %c0_i32_0 : i32, i32
  }
  func.func @transform_6(%arg0: i32) -> (i32, i32) {
    %c0_i32 = arith.constant 0 : i32
    %c0_i32_0 = arith.constant 0 : i32
    %c0_i32_1 = arith.constant 0 : i32
    return %c0_i32, %c0_i32_0 : i32, i32
  }
  func.func @transform_7(%arg0: i32) -> (i32, i32) {
    %c0_i32 = arith.constant 0 : i32
    %c0_i32_0 = arith.constant 0 : i32
    %c0_i32_1 = arith.constant 0 : i32
    return %c0_i32, %c0_i32_0 : i32, i32
  }
  func.func @transform_8(%arg0: i32) -> (i32, i32) {
    %c0_i32 = arith.constant 0 : i32
    %c0_i32_0 = arith.constant 0 : i32
    %c0_i32_1 = arith.constant 0 : i32
    return %c0_i32, %c0_i32_0 : i32, i32
  }
  func.func @transform_9(%arg0: i32) -> (i32, i32) {
    %c0_i32 = arith.constant 0 : i32
    %c0_i32_0 = arith.constant 0 : i32
    return %arg0, %c0_i32 : i32, i32
  }
}

</mosaic_0001>

<bundles_post_ra>
// kernel: net_forward.1
= control target key start
LH: loop header
LB: loop body
LE: loop exit
PB: predicated region body
PF: predicated region fallthrough
CT: control target
= control target key end

     0   :  { %14 = vsyncpa [#allocation5], 0  ;;  %s12305_s0 = inlined_call_operand.vmem [shape: bf16[16,3584], index: 0, kind: input, shape index: {}]   ;;  %s12306_s1 = inlined_call_operand.hbm [shape: bf16[640,256], index: 1, kind: input, shape index: {}]   ;;  %s12307_s2 = inlined_call_operand.vmem [shape: f32[1,256], index: 2, kind: input, shape index: {}]   ;;  %s12308_s3 = inlined_call_operand.hbm [shape: bf16[640,256], index: 3, kind: input, shape index: {}]   ;;  %s12309_s4 = inlined_call_operand.vmem [shape: f32[1,256], index: 4, kind: input, shape index: {}]   ;;  %s12310_s5 = inlined_call_operand.vmem [shape: bf16[512,128], index: 5, kind: input, shape index: {}]   ;;  %s12311_s6 = inlined_call_operand.vmem [shape: f32[1,128], index: 6, kind: input, shape index: {}]   ;;  %s12312_s7 = inlined_call_operand.vmem [shape: bf16[128,128], index: 7, kind: input, shape index: {}]   ;;  %s12313_s8 = inlined_call_operand.vmem [shape: f32[1,128], index: 8, kind: input, shape index: {}]   ;;  %s12314_s9 = inlined_call_operand.vmem [shape: f32[16,128], index: 9, kind: output, shape index: {}]  }
   0x1   :  { %15 = vsyncpa [#allocation7], 0  ;;  %s8338_s30 = smov [#allocation4]   ;;  %s8290_s13 = scalar_lea.hbm %s12306_s1, 10240 }
   0x2   :  { %s23_s10 = sshll.u32 %s8338_s30, 4  ;;  %p8291_p0 = scmp.ne.s32.totalorder %s12306_s1, %s8290_s13  ;;  %s24_s10 = int_to_ptr.vmem [resolvable:$true] %s23_s10 }
   0x3   :  { %p8294_p1 = scmp.lt.u32.totalorder %s8290_s13, %s12306_s1 }
   0x5   :  { %p8296_p2 = pnand %p8294_p1, %p8291_p0 }
   0x7   :  { %8299 = shalt.err (!%p8296_p2)
}
   0x8   :  { %s8300_s18 = scalar_lea.vmem %s24_s10, 10240  ;;  %p8305_p4 = scmp.lt.s32.totalorder %s24_s10, %s24_s10 }
   0x9   :  { %p8301_p3 = scmp.ne.s32.totalorder %s24_s10, %s8300_s18  ;;  %p8306_p5 = scmp.lt.s32.totalorder %s8300_s18, %s8300_s18 }
   0xb   :  { %p8307_p6 = por %p8306_p5, %p8305_p4 }
   0xd   :  { %p8308_p7 = pnand %p8307_p6, %p8301_p3 }
   0xf   :  { %8311 = shalt.err (!%p8308_p7)
}
  0x10   :  { %s8339_s19 = smov 128   ;;  %s8340_s20 = smov 8  }
  0x11   :  { %29 = dma.hbm_to_vmem [thread:$0]  %s12306_s1, 10240, %s24_s10, [#allocation5], %s8339_s19, %s8339_s19, %s8340_s20  }
  0x12   :  { %s8341_s23 = smov [#allocation6]   ;;  %s8312_s27 = scalar_lea.hbm %s12308_s3, 10240 }
  0x13   :  { %s37_s24 = sshll.u32 %s8341_s23, 4  ;;  %p8313_p8 = scmp.ne.s32.totalorder %s12308_s3, %s8312_s27  ;;  %s38_s24 = int_to_ptr.vmem [resolvable:$true] %s37_s24 }
  0x14   :  { %p8316_p9 = scmp.lt.u32.totalorder %s8312_s27, %s12308_s3 }
  0x16   :  { %p8318_p10 = pnand %p8316_p9, %p8313_p8 }
  0x18   :  { %8321 = shalt.err (!%p8318_p10)
}
  0x19   :  { %s8322_s12 = scalar_lea.vmem %s38_s24, 10240  ;;  %p8327_p12 = scmp.lt.s32.totalorder %s38_s24, %s38_s24 }
  0x1a   :  { %p8323_p11 = scmp.ne.s32.totalorder %s38_s24, %s8322_s12  ;;  %p8328_p13 = scmp.lt.s32.totalorder %s8322_s12, %s8322_s12 }
  0x1c   :  { %p8329_p0 = por %p8328_p13, %p8327_p12 }
  0x1e   :  { %p8330_p1 = pnand %p8329_p0, %p8323_p11 }
  0x20   :  { %8333 = shalt.err (!%p8330_p1)
}
  0x21   :  { %43 = dma.hbm_to_vmem [thread:$0]  %s12308_s3, 10240, %s38_s24, [#allocation7], %s8339_s19, %s8339_s19, %s8340_s20  }
  0x22   :  { %8334 = dma.done.wait [#allocation5], 10240  }
  0x23   :  { %8335 = vsyncadd [#allocation5], 4294957056 }
  0x24   :  { %8336 = dma.done.wait [#allocation7], 10240  }
  0x25   :  { %8337 = vsyncadd [#allocation7], 4294957056  ;;  %v7520_v0 = vld [vmem:[#allocation4 + $0x4] ss:$8 sps:$4 sm:$0xff]   ;;  %v7522_v1 = vld [vmem:[#allocation4] ss:$8 sps:$4 sm:$0xff]  }
  0x26   :  { %677 = vmatprep.subr.bf16.mxu0 %v7520_v0  ;;  %844 = vmatprep.subr.bf16.mxu1 %v7520_v0  ;;  %v7523_v2 = vld [vmem:[#allocation4 + $0x14] ss:$8 sps:$4 sm:$0xff]   ;;  %v7525_v3 = vld [vmem:[#allocation4 + $0x10] ss:$8 sps:$4 sm:$0xff]   ;;  %v7526_v4 = vld [vmem:[#allocation4 + $0x24] ss:$8 sps:$4 sm:$0xff]  }
  0x27   :  { %678 = vmatpush1.bf16.msra.mxu0 %v7522_v1  ;;  %845 = vmatpush1.bf16.msra.mxu1 %v7522_v1  ;;  %v7528_v5 = vld [vmem:[#allocation4 + $0x20] ss:$8 sps:$4 sm:$0xff]   ;;  %v7529_v6 = vld [vmem:[#allocation4 + $0x34] ss:$8 sps:$4 sm:$0xff]   ;;  %v7531_v7 = vld [vmem:[#allocation4 + $0x30] ss:$8 sps:$4 sm:$0xff]  }
  0x28   :  { %679 = vmatprep.subr.bf16.mxu0 %v7523_v2  ;;  %846 = vmatprep.subr.bf16.mxu1 %v7523_v2  ;;  %v7532_v8 = vld [vmem:[#allocation4 + $0x44] ss:$8 sps:$4 sm:$0xff]   ;;  %v7534_v9 = vld [vmem:[#allocation4 + $0x40] ss:$8 sps:$4 sm:$0xff]   ;;  %v7535_v10 = vld [vmem:[#allocation4 + $0x54] ss:$8 sps:$4 sm:$0xff]  }
  0x29   :  { %v7537_v11 = vld [vmem:[#allocation4 + $0x50] ss:$8 sps:$4 sm:$0xff]   ;;  %v7538_v12 = vld [vmem:[#allocation4 + $0x64] ss:$8 sps:$4 sm:$0xff]   ;;  %v7540_v14 = vld [vmem:[#allocation4 + $0x60] ss:$8 sps:$4 sm:$0xff]  }
  0x2a   :  { %v7570_v13 = vld [vmem:[%s12305_s0 + $0x4] ss:$112 sps:$4 sm:$0xff]   ;;  %v7575_v16 = vld [vmem:[%s12305_s0 + $0x8] ss:$112 sps:$4 sm:$0xff]   ;;  %v7568_v35 = vld [vmem:[%s12305_s0] ss:$112 sps:$4 sm:$0xff]  }
  0x2b   :  { %680 = vmatpush1.bf16.msra.mxu0 %v7525_v3  ;;  %847 = vmatpush1.bf16.msra.mxu1 %v7525_v3  ;;  %v7541_v15 = vld [vmem:[#allocation4 + $0x74] ss:$8 sps:$4 sm:$0xff]   ;;  %v7543_v17 = vld [vmem:[#allocation4 + $0x70] ss:$8 sps:$4 sm:$0xff]   ;;  %v7544_v18 = vld [vmem:[#allocation4 + $0x84] ss:$8 sps:$4 sm:$0xff]  }
  0x2c   :  { %681 = vmatprep.subr.bf16.mxu0 %v7526_v4  ;;  %848 = vmatprep.subr.bf16.mxu1 %v7526_v4  ;;  %v7546_v19 = vld [vmem:[#allocation4 + $0x80] ss:$8 sps:$4 sm:$0xff]   ;;  %v7547_v20 = vld [vmem:[#allocation4 + $0x94] ss:$8 sps:$4 sm:$0xff]   ;;  %v7549_v21 = vld [vmem:[#allocation4 + $0x90] ss:$8 sps:$4 sm:$0xff]  }
  0x2d   :  { %709 = vmatprep.mubr.bf16.mxu0 %v7570_v13  ;;  %876 = vmatprep.mubr.bf16.mxu1 %v7575_v16  ;;  %v7550_v22 = vld [vmem:[#allocation4 + $0xa4] ss:$8 sps:$4 sm:$0xff]   ;;  %v7552_v23 = vld [vmem:[#allocation4 + $0xa0] ss:$8 sps:$4 sm:$0xff]   ;;  %v7553_v24 = vld [vmem:[#allocation4 + $0xb4] ss:$8 sps:$4 sm:$0xff]  }
  0x2e   :  { %v7555_v25 = vld [vmem:[#allocation4 + $0xb0] ss:$8 sps:$4 sm:$0xff]   ;;  %v7556_v26 = vld [vmem:[#allocation4 + $0xc4] ss:$8 sps:$4 sm:$0xff]   ;;  %v8425_v27 = vld [vmem:[#allocation4 + $0xc0] ss:$8 sps:$4 sm:$0xff]  }
  0x2f   :  { %682 = vmatpush1.bf16.msra.mxu0 %v7528_v5  ;;  %849 = vmatpush1.bf16.msra.mxu1 %v7528_v5  ;;  %v8427_v28 = vld [vmem:[#allocation4 + $0xd4] ss:$8 sps:$4 sm:$0xff]   ;;  %v8431_v29 = vld [vmem:[#allocation4 + $0xd0] ss:$8 sps:$4 sm:$0xff]   ;;  %v8435_v30 = vld [vmem:[#allocation4 + $0xe4] ss:$8 sps:$4 sm:$0xff]  }
  0x30   :  { %683 = vmatprep.subr.bf16.mxu0 %v7529_v6  ;;  %850 = vmatprep.subr.bf16.mxu1 %v7529_v6  ;;  %v8439_v31 = vld [vmem:[#allocation4 + $0xe0] ss:$8 sps:$4 sm:$0xff]   ;;  %v8443_v32 = vld [vmem:[#allocation4 + $0xf4] ss:$8 sps:$4 sm:$0xff]   ;;  %v8445_v33 = vld [vmem:[#allocation4 + $0xf0] ss:$8 sps:$4 sm:$0xff]  }
  0x31   :  { %v8449_v34 = vld [vmem:[#allocation4 + $0x104] ss:$8 sps:$4 sm:$0xff]   ;;  %v8459_v37 = vld [vmem:[#allocation4 + $0x100] ss:$8 sps:$4 sm:$0xff]   ;;  %v8461_v38 = vld [vmem:[#allocation4 + $0x114] ss:$8 sps:$4 sm:$0xff]  }
  0x32   :  { %v7573_v36 = vld [vmem:[%s12305_s0 + $0x4] ss:$112 sps:$4 sm:$0xff]   ;;  %v8468_v39 = vld [vmem:[%s12305_s0 + $0xc] ss:$112 sps:$4 sm:$0xff]   ;;  %v8473_v40 = vld [vmem:[%s12305_s0 + $0x10] ss:$112 sps:$4 sm:$0xff]  }
  0x33   :  { %684 = vmatpush1.bf16.msra.mxu0 %v7531_v7  ;;  %851 = vmatpush1.bf16.msra.mxu1 %v7531_v7  ;;  %v8477_v41 = vld [vmem:[#allocation4 + $0x110] ss:$8 sps:$4 sm:$0xff]   ;;  %v8479_v42 = vld [vmem:[#allocation4 + $0x124] ss:$8 sps:$4 sm:$0xff]   ;;  %v8485_v43 = vld [vmem:[#allocation4 + $0x120] ss:$8 sps:$4 sm:$0xff]  }
  0x34   :  { %685 = vmatprep.subr.bf16.mxu0 %v7532_v8  ;;  %852 = vmatprep.subr.bf16.mxu1 %v7532_v8  ;;  %v8489_v44 = vld [vmem:[#allocation4 + $0x134] ss:$8 sps:$4 sm:$0xff]   ;;  %v8495_v45 = vld [vmem:[#allocation4 + $0x130] ss:$8 sps:$4 sm:$0xff]   ;;  %v8497_v46 = vld [vmem:[#allocation4 + $0x144] ss:$8 sps:$4 sm:$0xff]  }
  0x35   :  { %v8503_v47 = vld [vmem:[#allocation4 + $0x140] ss:$8 sps:$4 sm:$0xff]   ;;  %v8505_v48 = vld [vmem:[#allocation4 + $0x154] ss:$8 sps:$4 sm:$0xff]   ;;  %v8511_v49 = vld [vmem:[#allocation4 + $0x150] ss:$8 sps:$4 sm:$0xff]  }
  0x36   :  { %v8513_v50 = vld [vmem:[#allocation4 + $0x164] ss:$8 sps:$4 sm:$0xff]   ;;  %v8519_v51 = vld [vmem:[#allocation4 + $0x160] ss:$8 sps:$4 sm:$0xff]   ;;  %v8521_v52 = vld [vmem:[#allocation4 + $0x174] ss:$8 sps:$4 sm:$0xff]  }
  0x37   :  { %686 = vmatpush1.bf16.msra.mxu0 %v7534_v9  ;;  %853 = vmatpush1.bf16.msra.mxu1 %v7534_v9  ;;  %v8527_v53 = vld [vmem:[#allocation4 + $0x170] ss:$8 sps:$4 sm:$0xff]   ;;  %v8529_v54 = vld [vmem:[#allocation4 + $0x184] ss:$8 sps:$4 sm:$0xff]   ;;  %v8535_v55 = vld [vmem:[#allocation4 + $0x180] ss:$8 sps:$4 sm:$0xff]  }
  0x38   :  { %687 = vmatprep.subr.bf16.mxu0 %v7535_v10  ;;  %854 = vmatprep.subr.bf16.mxu1 %v7535_v10  ;;  %v8537_v56 = vld [vmem:[#allocation4 + $0x194] ss:$8 sps:$4 sm:$0xff]   ;;  %v8543_v57 = vld [vmem:[#allocation4 + $0x190] ss:$8 sps:$4 sm:$0xff]   ;;  %v8545_v58 = vld [vmem:[#allocation4 + $0x1a4] ss:$8 sps:$4 sm:$0xff]  }
  0x39   :  { %v8551_v59 = vld [vmem:[#allocation4 + $0x1a0] ss:$8 sps:$4 sm:$0xff]   ;;  %v8553_v60 = vld [vmem:[#allocation4 + $0x1b4] ss:$8 sps:$4 sm:$0xff]   ;;  %v8559_v61 = vld [vmem:[#allocation4 + $0x1b0] ss:$8 sps:$4 sm:$0xff]  }
  0x3a   :  { %v8561_v62 = vld [vmem:[#allocation4 + $0x1c4] ss:$8 sps:$4 sm:$0xff]   ;;  %v8567_v63 = vld [vmem:[#allocation4 + $0x1c0] ss:$8 sps:$4 sm:$0xff]   ;;  %v8569_v0 = vld [vmem:[#allocation4 + $0x1d4] ss:$8 sps:$4 sm:$0xff]  }
  0x3b   :  { %688 = vmatpush1.bf16.msra.mxu0 %v7537_v11  ;;  %855 = vmatpush1.bf16.msra.mxu1 %v7537_v11  ;;  %v8575_v1 = vld [vmem:[#allocation4 + $0x1d0] ss:$8 sps:$4 sm:$0xff]   ;;  %v8577_v2 = vld [vmem:[#allocation4 + $0x1e4] ss:$8 sps:$4 sm:$0xff]   ;;  %v8583_v3 = vld [vmem:[#allocation4 + $0x1e0] ss:$8 sps:$4 sm:$0xff]  }
  0x3c   :  { %689 = vmatprep.subr.bf16.mxu0 %v7538_v12  ;;  %856 = vmatprep.subr.bf16.mxu1 %v7538_v12  ;;  %v8585_v4 = vld [vmem:[#allocation4 + $0x1f4] ss:$8 sps:$4 sm:$0xff]   ;;  %v8591_v5 = vld [vmem:[#allocation4 + $0x1f0] ss:$8 sps:$4 sm:$0xff]   ;;  %v8593_v6 = vld [vmem:[#allocation4 + $0x204] ss:$8 sps:$4 sm:$0xff]  }
  0x3d   :  { %v8602_v7 = vld [vmem:[%s12305_s0 + $0x8] ss:$112 sps:$4 sm:$0xff]   ;;  %v8607_v8 = vld [vmem:[%s12305_s0 + $0xc] ss:$112 sps:$4 sm:$0xff]   ;;  %vm8344_vm0 = vmmov 0  }
  0x3e   :  { %v8609_v9 = vld [vmem:[#allocation4 + $0x200] ss:$8 sps:$4 sm:$0xff]   ;;  %v8611_v10 = vld [vmem:[#allocation4 + $0x214] ss:$8 sps:$4 sm:$0xff]   ;;  %v8617_v11 = vld [vmem:[#allocation4 + $0x210] ss:$8 sps:$4 sm:$0xff]  }
  0x3f   :  { %690 = vmatpush1.bf16.msra.mxu0 %v7540_v14  ;;  %857 = vmatpush1.bf16.msra.mxu1 %v7540_v14  ;;  %v8621_v12 = vld [vmem:[#allocation4 + $0x224] ss:$8 sps:$4 sm:$0xff]   ;;  %v8627_v13 = vld [vmem:[#allocation4 + $0x220] ss:$8 sps:$4 sm:$0xff]   ;;  %v12315_v14 = vmov 0  }
  0x40   :  { %691 = vmatprep.subr.bf16.mxu0 %v7541_v15  ;;  %858 = vmatprep.subr.bf16.mxu1 %v7541_v15  ;;  %v8631_v15 = vld [vmem:[#allocation4 + $0x234] ss:$8 sps:$4 sm:$0xff]   ;;  %v8637_v16 = vld [vmem:[#allocation4 + $0x230] ss:$8 sps:$4 sm:$0xff]  }
  0x43   :  { %692 = vmatpush1.bf16.msra.mxu0 %v7543_v17  ;;  %859 = vmatpush1.bf16.msra.mxu1 %v7543_v17  ;;  %v8639_v17 = vld [vmem:[#allocation4 + $0x244] ss:$8 sps:$4 sm:$0xff]  }
  0x44   :  { %693 = vmatprep.subr.bf16.mxu0 %v7544_v18  ;;  %860 = vmatprep.subr.bf16.mxu1 %v7544_v18  ;;  %v8647_v18 = vld [vmem:[#allocation4 + $0x240] ss:$8 sps:$4 sm:$0xff]  }
  0x47   :  { %694 = vmatpush1.bf16.msra.mxu0 %v7546_v19  ;;  %861 = vmatpush1.bf16.msra.mxu1 %v7546_v19  ;;  %v8651_v19 = vld [vmem:[#allocation4 + $0x254] ss:$8 sps:$4 sm:$0xff]  }
  0x48   :  { %695 = vmatprep.subr.bf16.mxu0 %v7547_v20  ;;  %862 = vmatprep.subr.bf16.mxu1 %v7547_v20  ;;  %v8655_v20 = vld [vmem:[#allocation4 + $0x250] ss:$8 sps:$4 sm:$0xff]  }
  0x4b   :  { %696 = vmatpush1.bf16.msra.mxu0 %v7549_v21  ;;  %863 = vmatpush1.bf16.msra.mxu1 %v7549_v21  ;;  %v8659_v21 = vld [vmem:[#allocation4 + $0x264] ss:$8 sps:$4 sm:$0xff]  }
  0x4c   :  { %697 = vmatprep.subr.bf16.mxu0 %v7550_v22  ;;  %864 = vmatprep.subr.bf16.mxu1 %v7550_v22  ;;  %v8663_v22 = vld [vmem:[#allocation4 + $0x260] ss:$8 sps:$4 sm:$0xff]  }
  0x4f   :  { %698 = vmatpush1.bf16.msra.mxu0 %v7552_v23  ;;  %865 = vmatpush1.bf16.msra.mxu1 %v7552_v23  ;;  %v8667_v23 = vld [vmem:[#allocation4 + $0x274] ss:$8 sps:$4 sm:$0xff]  }
  0x50   :  { %699 = vmatprep.subr.bf16.mxu0 %v7553_v24  ;;  %866 = vmatprep.subr.bf16.mxu1 %v7553_v24  ;;  %v8671_v24 = vld [vmem:[#allocation4 + $0x270] ss:$8 sps:$4 sm:$0xff]  }
  0x51   :  { %12814 = vst [vmem:[#allocation10_spill] sm:$0xff] %v8671_v24 }
  0x53   :  { %700 = vmatpush1.bf16.msra.mxu0 %v7555_v25  ;;  %867 = vmatpush1.bf16.msra.mxu1 %v7555_v25  ;;  %v7652_v25 = vld [vmem:[%s12305_s0 + $0x10] ss:$112 sps:$4 sm:$0xff]  }
  0x54   :  { %701 = vmatprep.subr.bf16.mxu0 %v7556_v26  ;;  %868 = vmatprep.subr.bf16.mxu1 %v7556_v26  ;;  %v7653_v26 = vld [vmem:[%s12305_s0 + $0x14] ss:$112 sps:$4 sm:$0xff]  }
  0x57   :  { %702 = vmatpush1.bf16.msra.mxu0 %v8425_v27  ;;  %869 = vmatpush1.bf16.msra.mxu1 %v8425_v27 }
  0x58   :  { %703 = vmatprep.subr.bf16.mxu0 %v8427_v28  ;;  %870 = vmatprep.subr.bf16.mxu1 %v8427_v28 }
  0x5b   :  { %704 = vmatpush1.bf16.msra.mxu0 %v8431_v29  ;;  %871 = vmatpush1.bf16.msra.mxu1 %v8431_v29 }
  0x5c   :  { %705 = vmatprep.subr.bf16.mxu0 %v8435_v30  ;;  %872 = vmatprep.subr.bf16.mxu1 %v8435_v30 }
  0x5f   :  { %706 = vmatpush1.bf16.msra.mxu0 %v8439_v31  ;;  %873 = vmatpush1.bf16.msra.mxu1 %v8439_v31 }
  0x60   :  { %707 = vmatprep.subr.bf16.mxu0 %v8443_v32  ;;  %874 = vmatprep.subr.bf16.mxu1 %v8443_v32 }
  0x63   :  { %708 = vmatpush1.bf16.msra.mxu0 %v8445_v33  ;;  %875 = vmatpush1.bf16.msra.mxu1 %v8445_v33 }
  0x64   :  { %720 = vmatprep.subr.bf16.mxu0 %v8449_v34  ;;  %887 = vmatprep.subr.bf16.mxu1 %v8449_v34 }
  0x66   :  { %710 = vmatmul.mubr.bf16.vlgmr.msra.gmra.mrb[0].mxu0 %v7568_v35  ;;  %877 = vmatmul.mubr.bf16.vlgmr.msra.gmra.mrb[0].mxu1 %v7573_v36  ;;  %v8683_v35 = vld [vmem:[#allocation4 + $0x4] ss:$8 sps:$4 sm:$0xff]   ;;  %v8687_v36 = vld [vmem:[#allocation4] ss:$8 sps:$4 sm:$0xff]  }
  0x67   :  { %721 = vmatpush1.bf16.msra.mxu0 %v8459_v37  ;;  %888 = vmatpush1.bf16.msra.mxu1 %v8459_v37 }
  0x68   :  { %722 = vmatprep.subr.bf16.mxu0 %v8461_v38  ;;  %889 = vmatprep.subr.bf16.mxu1 %v8461_v38 }
  0x69   :  { %752 = vmatprep.mubr.bf16.mxu0 %v8468_v39  ;;  %919 = vmatprep.mubr.bf16.mxu1 %v8473_v40 }
  0x6b   :  { %723 = vmatpush1.bf16.msra.mxu0 %v8477_v41  ;;  %890 = vmatpush1.bf16.msra.mxu1 %v8477_v41 }
  0x6c   :  { %724 = vmatprep.subr.bf16.mxu0 %v8479_v42  ;;  %891 = vmatprep.subr.bf16.mxu1 %v8479_v42 }
  0x6f   :  { %725 = vmatpush1.bf16.msra.mxu0 %v8485_v43  ;;  %892 = vmatpush1.bf16.msra.mxu1 %v8485_v43 }
  0x70   :  { %726 = vmatprep.subr.bf16.mxu0 %v8489_v44  ;;  %893 = vmatprep.subr.bf16.mxu1 %v8489_v44 }
  0x73   :  { %727 = vmatpush1.bf16.msra.mxu0 %v8495_v45  ;;  %894 = vmatpush1.bf16.msra.mxu1 %v8495_v45 }
  0x74   :  { %728 = vmatprep.subr.bf16.mxu0 %v8497_v46  ;;  %895 = vmatprep.subr.bf16.mxu1 %v8497_v46 }
  0x77   :  { %729 = vmatpush1.bf16.msra.mxu0 %v8503_v47  ;;  %896 = vmatpush1.bf16.msra.mxu1 %v8503_v47 }
  0x78   :  { %730 = vmatprep.subr.bf16.mxu0 %v8505_v48  ;;  %897 = vmatprep.subr.bf16.mxu1 %v8505_v48 }
  0x7b   :  { %731 = vmatpush1.bf16.msra.mxu0 %v8511_v49  ;;  %898 = vmatpush1.bf16.msra.mxu1 %v8511_v49 }
  0x7c   :  { %732 = vmatprep.subr.bf16.mxu0 %v8513_v50  ;;  %899 = vmatprep.subr.bf16.mxu1 %v8513_v50 }
  0x7f   :  { %733 = vmatpush1.bf16.msra.mxu0 %v8519_v51  ;;  %900 = vmatpush1.bf16.msra.mxu1 %v8519_v51 }
  0x80   :  { %734 = vmatprep.subr.bf16.mxu0 %v8521_v52  ;;  %901 = vmatprep.subr.bf16.mxu1 %v8521_v52 }
  0x83   :  { %735 = vmatpush1.bf16.msra.mxu0 %v8527_v53  ;;  %902 = vmatpush1.bf16.msra.mxu1 %v8527_v53 }
  0x84   :  { %736 = vmatprep.subr.bf16.mxu0 %v8529_v54  ;;  %903 = vmatprep.subr.bf16.mxu1 %v8529_v54 }
  0x87   :  { %737 = vmatpush1.bf16.msra.mxu0 %v8535_v55  ;;  %904 = vmatpush1.bf16.msra.mxu1 %v8535_v55 }
  0x88   :  { %738 = vmatprep.subr.bf16.mxu0 %v8537_v56  ;;  %905 = vmatprep.subr.bf16.mxu1 %v8537_v56 }
  0x8b   :  { %739 = vmatpush1.bf16.msra.mxu0 %v8543_v57  ;;  %906 = vmatpush1.bf16.msra.mxu1 %v8543_v57 }
  0x8c   :  { %740 = vmatprep.subr.bf16.mxu0 %v8545_v58  ;;  %907 = vmatprep.subr.bf16.mxu1 %v8545_v58 }
  0x8f   :  { %741 = vmatpush1.bf16.msra.mxu0 %v8551_v59  ;;  %908 = vmatpush1.bf16.msra.mxu1 %v8551_v59 }
  0x90   :  { %742 = vmatprep.subr.bf16.mxu0 %v8553_v60  ;;  %909 = vmatprep.subr.bf16.mxu1 %v8553_v60 }
  0x93   :  { %743 = vmatpush1.bf16.msra.mxu0 %v8559_v61  ;;  %910 = vmatpush1.bf16.msra.mxu1 %v8559_v61 }
  0x94   :  { %744 = vmatprep.subr.bf16.mxu0 %v8561_v62  ;;  %911 = vmatprep.subr.bf16.mxu1 %v8561_v62 }
  0x97   :  { %745 = vmatpush1.bf16.msra.mxu0 %v8567_v63  ;;  %912 = vmatpush1.bf16.msra.mxu1 %v8567_v63 }
  0x98   :  { %746 = vmatprep.subr.bf16.mxu0 %v8569_v0  ;;  %913 = vmatprep.subr.bf16.mxu1 %v8569_v0 }
  0x9b   :  { %747 = vmatpush1.bf16.msra.mxu0 %v8575_v1  ;;  %914 = vmatpush1.bf16.msra.mxu1 %v8575_v1 }
  0x9c   :  { %748 = vmatprep.subr.bf16.mxu0 %v8577_v2  ;;  %915 = vmatprep.subr.bf16.mxu1 %v8577_v2 }
  0x9f   :  { %749 = vmatpush1.bf16.msra.mxu0 %v8583_v3  ;;  %916 = vmatpush1.bf16.msra.mxu1 %v8583_v3 }
  0xa0   :  { %750 = vmatprep.subr.bf16.mxu0 %v8585_v4  ;;  %917 = vmatprep.subr.bf16.mxu1 %v8585_v4 }
  0xa3   :  { %751 = vmatpush1.bf16.msra.mxu0 %v8591_v5  ;;  %918 = vmatpush1.bf16.msra.mxu1 %v8591_v5 }
  0xa4   :  { %763 = vmatprep.subr.bf16.mxu0 %v8593_v6  ;;  %930 = vmatprep.subr.bf16.mxu1 %v8593_v6 }
  0xa6   :  { %753 = vmatmul.mubr.bf16.vlgmr.msra.gmra.mrb[0].mxu0 %v8602_v7  ;;  %920 = vmatmul.mubr.bf16.vlgmr.msra.gmra.mrb[0].mxu1 %v8607_v8 }
  0xa7   :  { %764 = vmatpush1.bf16.msra.mxu0 %v8609_v9  ;;  %931 = vmatpush1.bf16.msra.mxu1 %v8609_v9 }
  0xa8   :  { %765 = vmatprep.subr.bf16.mxu0 %v8611_v10  ;;  %932 = vmatprep.subr.bf16.mxu1 %v8611_v10 }
  0xa9   :  { %795 = vmatprep.mubr.bf16.mxu0 %v12315_v14  ;;  %962 = vmatprep.mubr.bf16.mxu1 %v12315_v14  ;;  %v8691_v14 = vld [vmem:[#allocation4 + $0x14] ss:$8 sps:$4 sm:$0xff]  }
  0xab   :  { %766 = vmatpush1.bf16.msra.mxu0 %v8617_v11  ;;  %933 = vmatpush1.bf16.msra.mxu1 %v8617_v11 }
  0xac   :  { %767 = vmatprep.subr.bf16.mxu0 %v8621_v12  ;;  %934 = vmatprep.subr.bf16.mxu1 %v8621_v12 }
  0xaf   :  { %768 = vmatpush1.bf16.msra.mxu0 %v8627_v13  ;;  %935 = vmatpush1.bf16.msra.mxu1 %v8627_v13 }
  0xb0   :  { %769 = vmatprep.subr.bf16.mxu0 %v8631_v15  ;;  %936 = vmatprep.subr.bf16.mxu1 %v8631_v15 }
  0xb3   :  { %770 = vmatpush1.bf16.msra.mxu0 %v8637_v16  ;;  %937 = vmatpush1.bf16.msra.mxu1 %v8637_v16 }
  0xb4   :  { %771 = vmatprep.subr.bf16.mxu0 %v8639_v17  ;;  %938 = vmatprep.subr.bf16.mxu1 %v8639_v17 }
  0xb7   :  { %772 = vmatpush1.bf16.msra.mxu0 %v8647_v18  ;;  %939 = vmatpush1.bf16.msra.mxu1 %v8647_v18 }
  0xb8   :  { %773 = vmatprep.subr.bf16.mxu0 %v8651_v19  ;;  %940 = vmatprep.subr.bf16.mxu1 %v8651_v19 }
  0xbb   :  { %774 = vmatpush1.bf16.msra.mxu0 %v8655_v20  ;;  %941 = vmatpush1.bf16.msra.mxu1 %v8655_v20 }
  0xbc   :  { %775 = vmatprep.subr.bf16.mxu0 %v8659_v21  ;;  %942 = vmatprep.subr.bf16.mxu1 %v8659_v21 }
  0xbf   :  { %776 = vmatpush1.bf16.msra.mxu0 %v8663_v22  ;;  %943 = vmatpush1.bf16.msra.mxu1 %v8663_v22 }
  0xc0   :  { %777 = vmatprep.subr.bf16.mxu0 %v8667_v23  ;;  %944 = vmatprep.subr.bf16.mxu1 %v8667_v23 }
  0xc3   :  { %778 = vmatpush1.bf16.msra.mxu0 %v8671_v24  ;;  %945 = vmatpush1.bf16.msra.mxu1 %v8671_v24  ;;  %v8697_v24 = vld [vmem:[#allocation4 + $0x10] ss:$8 sps:$4 sm:$0xff]  }
  0xc4   :  { %1015 = vmatprep.subr.bf16.mxu0 %v8683_v35  ;;  %1182 = vmatprep.subr.bf16.mxu1 %v8683_v35  ;;  %12815 = vst [vmem:[#allocation11_spill] sm:$0xff] %v8697_v24 }
  0xc6   :  { %796 = vmatmul.mubr.bf16.vlgmr.msra.gmra.mrb[0].mxu0 %v7652_v25  ;;  %963 = vmatmul.mubr.bf16.vlgmr.msra.gmra.mrb[0].mxu1 %v7653_v26  ;;  %v8701_v25 = vld [vmem:[#allocation4 + $0x24] ss:$8 sps:$4 sm:$0xff]   ;;  %v8705_v26 = vld [vmem:[#allocation4 + $0x20] ss:$8 sps:$4 sm:$0xff]  }
  0xc7   :  { %1016 = vmatpush1.bf16.msra.mxu0 %v8687_v36  ;;  %1183 = vmatpush1.bf16.msra.mxu1 %v8687_v36  ;;  %12816 = vst [vmem:[#allocation12_spill] sm:$0xff] %v8701_v25  ;;  %12817 = vst [vmem:[#allocation13_spill] sm:$0xff] %v8705_v26 }
  0xc8   :  { %1017 = vmatprep.subr.bf16.mxu0 %v8691_v14  ;;  %1184 = vmatprep.subr.bf16.mxu1 %v8691_v14 }
  0xc9   :  { %1047 = vmatprep.mubr.bf16.mxu0 %v8468_v39  ;;  %1214 = vmatprep.mubr.bf16.mxu1 %v8473_v40  ;;  %v8709_v39 = vld [vmem:[#allocation4 + $0x34] ss:$8 sps:$4 sm:$0xff]   ;;  %v8713_v40 = vld [vmem:[#allocation4 + $0x30] ss:$8 sps:$4 sm:$0xff]  }
  0xca   :  { %12818 = vst [vmem:[#allocation14_spill] sm:$0xff] %v8709_v39  ;;  %12819 = vst [vmem:[#allocation15_spill] sm:$0xff] %v8713_v40 }
  0xcb   :  { %1018 = vmatpush1.bf16.msra.mxu0 %v8697_v24  ;;  %1185 = vmatpush1.bf16.msra.mxu1 %v8697_v24  ;;  %v8717_v24 = vld [vmem:[#allocation4 + $0x44] ss:$8 sps:$4 sm:$0xff]  }
  0xcc   :  { %1019 = vmatprep.subr.bf16.mxu0 %v8701_v25  ;;  %1186 = vmatprep.subr.bf16.mxu1 %v8701_v25  ;;  %12820 = vst [vmem:[#allocation16_spill] sm:$0xff] %v8717_v24  ;;  %v8721_v25 = vld [vmem:[#allocation4 + $0x40] ss:$8 sps:$4 sm:$0xff]  }
  0xcd   :  { %12821 = vst [vmem:[#allocation17_spill] sm:$0xff] %v8721_v25 }
  0xcf   :  { %1020 = vmatpush1.bf16.msra.mxu0 %v8705_v26  ;;  %1187 = vmatpush1.bf16.msra.mxu1 %v8705_v26  ;;  %v8725_v26 = vld [vmem:[#allocation4 + $0x54] ss:$8 sps:$4 sm:$0xff]  }
  0xd0   :  { %1021 = vmatprep.subr.bf16.mxu0 %v8709_v39  ;;  %1188 = vmatprep.subr.bf16.mxu1 %v8709_v39  ;;  %12822 = vst [vmem:[#allocation18_spill] sm:$0xff] %v8725_v26  ;;  %v8729_v39 = vld [vmem:[#allocation4 + $0x50] ss:$8 sps:$4 sm:$0xff]  }
  0xd1   :  { %12823 = vst [vmem:[#allocation19_spill] sm:$0xff] %v8729_v39 }
  0xd3   :  { %1022 = vmatpush1.bf16.msra.mxu0 %v8713_v40  ;;  %1189 = vmatpush1.bf16.msra.mxu1 %v8713_v40  ;;  %v8733_v40 = vld [vmem:[#allocation4 + $0x64] ss:$8 sps:$4 sm:$0xff]  }
  0xd4   :  { %1023 = vmatprep.subr.bf16.mxu0 %v8717_v24  ;;  %1190 = vmatprep.subr.bf16.mxu1 %v8717_v24  ;;  %12824 = vst [vmem:[#allocation20_spill] sm:$0xff] %v8733_v40  ;;  %v8737_v24 = vld [vmem:[#allocation4 + $0x60] ss:$8 sps:$4 sm:$0xff]  }
  0xd5   :  { %12825 = vst [vmem:[#allocation21_spill] sm:$0xff] %v8737_v24 }
  0xd7   :  { %1024 = vmatpush1.bf16.msra.mxu0 %v8721_v25  ;;  %1191 = vmatpush1.bf16.msra.mxu1 %v8721_v25  ;;  %v8741_v25 = vld [vmem:[#allocation4 + $0x74] ss:$8 sps:$4 sm:$0xff]  }
  0xd8   :  { %1025 = vmatprep.subr.bf16.mxu0 %v8725_v26  ;;  %1192 = vmatprep.subr.bf16.mxu1 %v8725_v26  ;;  %12826 = vst [vmem:[#allocation22_spill] sm:$0xff] %v8741_v25  ;;  %v8745_v26 = vld [vmem:[#allocation4 + $0x70] ss:$8 sps:$4 sm:$0xff]  }
  0xd9   :  { %12827 = vst [vmem:[#allocation23_spill] sm:$0xff] %v8745_v26 }
  0xdb   :  { %1026 = vmatpush1.bf16.msra.mxu0 %v8729_v39  ;;  %1193 = vmatpush1.bf16.msra.mxu1 %v8729_v39  ;;  %v8749_v39 = vld [vmem:[#allocation4 + $0x84] ss:$8 sps:$4 sm:$0xff]  }
  0xdc   :  { %1027 = vmatprep.subr.bf16.mxu0 %v8733_v40  ;;  %1194 = vmatprep.subr.bf16.mxu1 %v8733_v40  ;;  %12828 = vst [vmem:[#allocation24_spill] sm:$0xff] %v8749_v39  ;;  %v8753_v40 = vld [vmem:[#allocation4 + $0x80] ss:$8 sps:$4 sm:$0xff]  }
  0xdd   :  { %12829 = vst [vmem:[#allocation25_spill] sm:$0xff] %v8753_v40 }
  0xdf   :  { %1028 = vmatpush1.bf16.msra.mxu0 %v8737_v24  ;;  %1195 = vmatpush1.bf16.msra.mxu1 %v8737_v24  ;;  %v8757_v24 = vld [vmem:[#allocation4 + $0x94] ss:$8 sps:$4 sm:$0xff]  }
  0xe0   :  { %1029 = vmatprep.subr.bf16.mxu0 %v8741_v25  ;;  %1196 = vmatprep.subr.bf16.mxu1 %v8741_v25  ;;  %12830 = vst [vmem:[#allocation26_spill] sm:$0xff] %v8757_v24  ;;  %v8761_v25 = vld [vmem:[#allocation4 + $0x90] ss:$8 sps:$4 sm:$0xff]  }
  0xe1   :  { %12831 = vst [vmem:[#allocation27_spill] sm:$0xff] %v8761_v25 }
  0xe3   :  { %1030 = vmatpush1.bf16.msra.mxu0 %v8745_v26  ;;  %1197 = vmatpush1.bf16.msra.mxu1 %v8745_v26  ;;  %v8765_v26 = vld [vmem:[#allocation4 + $0xa4] ss:$8 sps:$4 sm:$0xff]  }
  0xe4   :  { %1031 = vmatprep.subr.bf16.mxu0 %v8749_v39  ;;  %1198 = vmatprep.subr.bf16.mxu1 %v8749_v39  ;;  %12832 = vst [vmem:[#allocation28_spill] sm:$0xff] %v8765_v26  ;;  %v8769_v39 = vld [vmem:[#allocation4 + $0xa0] ss:$8 sps:$4 sm:$0xff]  }
  0xe5   :  { %12833 = vst [vmem:[#allocation29_spill] sm:$0xff] %v8769_v39 }
  0xe7   :  { %1032 = vmatpush1.bf16.msra.mxu0 %v8753_v40  ;;  %1199 = vmatpush1.bf16.msra.mxu1 %v8753_v40  ;;  %v8773_v40 = vld [vmem:[#allocation4 + $0xb4] ss:$8 sps:$4 sm:$0xff]  }
  0xe8   :  { %1033 = vmatprep.subr.bf16.mxu0 %v8757_v24  ;;  %1200 = vmatprep.subr.bf16.mxu1 %v8757_v24  ;;  %12834 = vst [vmem:[#allocation30_spill] sm:$0xff] %v8773_v40  ;;  %v8777_v24 = vld [vmem:[#allocation4 + $0xb0] ss:$8 sps:$4 sm:$0xff]  }
  0xe9   :  { %12835 = vst [vmem:[#allocation31_spill] sm:$0xff] %v8777_v24 }
  0xeb   :  { %1034 = vmatpush1.bf16.msra.mxu0 %v8761_v25  ;;  %1201 = vmatpush1.bf16.msra.mxu1 %v8761_v25  ;;  %v8781_v25 = vld [vmem:[#allocation4 + $0xc4] ss:$8 sps:$4 sm:$0xff]  }
  0xec   :  { %1035 = vmatprep.subr.bf16.mxu0 %v8765_v26  ;;  %1202 = vmatprep.subr.bf16.mxu1 %v8765_v26  ;;  %12836 = vst [vmem:[#allocation32_spill] sm:$0xff] %v8781_v25 }
  0xef   :  { %1036 = vmatpush1.bf16.msra.mxu0 %v8769_v39  ;;  %1203 = vmatpush1.bf16.msra.mxu1 %v8769_v39 }
  0xf0   :  { %1037 = vmatprep.subr.bf16.mxu0 %v8773_v40  ;;  %1204 = vmatprep.subr.bf16.mxu1 %v8773_v40 }
  0xf3   :  { %1038 = vmatpush1.bf16.msra.mxu0 %v8777_v24  ;;  %1205 = vmatpush1.bf16.msra.mxu1 %v8777_v24 }
  0xf4   :  { %1039 = vmatprep.subr.bf16.mxu0 %v8781_v25  ;;  %1206 = vmatprep.subr.bf16.mxu1 %v8781_v25 }
  0xf7   :  { %1040 = vmatpush1.bf16.msra.mxu0 %v8425_v27  ;;  %1207 = vmatpush1.bf16.msra.mxu1 %v8425_v27  ;;  %v8804_v27 = vld [vmem:[%s12305_s0 + $0x14] ss:$112 sps:$4 sm:$0xff]  }
  0xf8   :  { %1041 = vmatprep.subr.bf16.mxu0 %v8427_v28  ;;  %1208 = vmatprep.subr.bf16.mxu1 %v8427_v28  ;;  %v8809_v28 = vld [vmem:[%s12305_s0 + $0x18] ss:$112 sps:$4 sm:$0xff]  }
  0xfb   :  { %1042 = vmatpush1.bf16.msra.mxu0 %v8431_v29  ;;  %1209 = vmatpush1.bf16.msra.mxu1 %v8431_v29  ;;  %v8878_v29 = vld [vmem:[%s12305_s0 + $0x10] ss:$112 sps:$4 sm:$0xff]  }
  0xfc   :  { %1043 = vmatprep.subr.bf16.mxu0 %v8435_v30  ;;  %1210 = vmatprep.subr.bf16.mxu1 %v8435_v30  ;;  %v8883_v30 = vld [vmem:[%s12305_s0 + $0x14] ss:$112 sps:$4 sm:$0xff]  }
  0xff   :  { %1044 = vmatpush1.bf16.msra.mxu0 %v8439_v31  ;;  %1211 = vmatpush1.bf16.msra.mxu1 %v8439_v31  ;;  %v12837_v31 = vmov 0  }
 0x100   :  { %1045 = vmatprep.subr.bf16.mxu0 %v8443_v32  ;;  %1212 = vmatprep.subr.bf16.mxu1 %v8443_v32  ;;  %v7660_v32 = vld [vmem:[%s12305_s0 + $0x18] ss:$112 sps:$4 sm:$0xff]  }
 0x103   :  { %1046 = vmatpush1.bf16.msra.mxu0 %v8445_v33  ;;  %1213 = vmatpush1.bf16.msra.mxu1 %v8445_v33  ;;  %v7661_v33 = vld [vmem:[%s12305_s0 + $0x1c] ss:$112 sps:$4 sm:$0xff]  }
 0x104   :  { %1058 = vmatprep.subr.bf16.mxu0 %v8449_v34  ;;  %1225 = vmatprep.subr.bf16.mxu1 %v8449_v34  ;;  %v12838_v34 = vld [vmem:[#allocation10_spill] sm:$0xff] }
 0x106   :  { %1048 = vmatmul.mubr.bf16.vlgmr.msra.gmra.mrb[4].mxu0 %v8602_v7  ;;  %1215 = vmatmul.mubr.bf16.vlgmr.msra.gmra.mrb[4].mxu1 %v8607_v8 }
 0x107   :  { %1059 = vmatpush1.bf16.msra.mxu0 %v8459_v37  ;;  %1226 = vmatpush1.bf16.msra.mxu1 %v8459_v37  ;;  %v12839_v37 = vld [vmem:[#allocation11_spill] sm:$0xff] }
 0x108   :  { %1060 = vmatprep.subr.bf16.mxu0 %v8461_v38  ;;  %1227 = vmatprep.subr.bf16.mxu1 %v8461_v38  ;;  %v12840_v38 = vld [vmem:[#allocation12_spill] sm:$0xff] }
 0x109   :  { %1090 = vmatprep.mubr.bf16.mxu0 %v8804_v27  ;;  %1257 = vmatprep.mubr.bf16.mxu1 %v8809_v28 }
 0x10b   :  { %1061 = vmatpush1.bf16.msra.mxu0 %v8477_v41  ;;  %1228 = vmatpush1.bf16.msra.mxu1 %v8477_v41  ;;  %v12841_v41 = vld [vmem:[#allocation13_spill] sm:$0xff] }
 0x10c   :  { %1062 = vmatprep.subr.bf16.mxu0 %v8479_v42  ;;  %1229 = vmatprep.subr.bf16.mxu1 %v8479_v42  ;;  %v12842_v42 = vld [vmem:[#allocation14_spill] sm:$0xff] }
 0x10f   :  { %1063 = vmatpush1.bf16.msra.mxu0 %v8485_v43  ;;  %1230 = vmatpush1.bf16.msra.mxu1 %v8485_v43  ;;  %v12843_v43 = vld [vmem:[#allocation15_spill] sm:$0xff] }
 0x110   :  { %1064 = vmatprep.subr.bf16.mxu0 %v8489_v44  ;;  %1231 = vmatprep.subr.bf16.mxu1 %v8489_v44  ;;  %v12844_v44 = vld [vmem:[#allocation16_spill] sm:$0xff] }
 0x113   :  { %1065 = vmatpush1.bf16.msra.mxu0 %v8495_v45  ;;  %1232 = vmatpush1.bf16.msra.mxu1 %v8495_v45  ;;  %v12845_v45 = vld [vmem:[#allocation17_spill] sm:$0xff] }
 0x114   :  { %1066 = vmatprep.subr.bf16.mxu0 %v8497_v46  ;;  %1233 = vmatprep.subr.bf16.mxu1 %v8497_v46  ;;  %v12846_v46 = vld [vmem:[#allocation18_spill] sm:$0xff] }
 0x117   :  { %1067 = vmatpush1.bf16.msra.mxu0 %v8503_v47  ;;  %1234 = vmatpush1.bf16.msra.mxu1 %v8503_v47  ;;  %v12847_v47 = vld [vmem:[#allocation19_spill] sm:$0xff] }
 0x118   :  { %1068 = vmatprep.subr.bf16.mxu0 %v8505_v48  ;;  %1235 = vmatprep.subr.bf16.mxu1 %v8505_v48  ;;  %v12848_v48 = vld [vmem:[#allocation20_spill] sm:$0xff] }
 0x11b   :  { %1069 = vmatpush1.bf16.msra.mxu0 %v8511_v49  ;;  %1236 = vmatpush1.bf16.msra.mxu1 %v8511_v49  ;;  %v12849_v49 = vld [vmem:[#allocation21_spill] sm:$0xff] }
 0x11c   :  { %1070 = vmatprep.subr.bf16.mxu0 %v8513_v50  ;;  %1237 = vmatprep.subr.bf16.mxu1 %v8513_v50  ;;  %v12850_v50 = vld [vmem:[#allocation22_spill] sm:$0xff] }
 0x11f   :  { %1071 = vmatpush1.bf16.msra.mxu0 %v8519_v51  ;;  %1238 = vmatpush1.bf16.msra.mxu1 %v8519_v51  ;;  %v12851_v51 = vld [vmem:[#allocation23_spill] sm:$0xff] }
 0x120   :  { %1072 = vmatprep.subr.bf16.mxu0 %v8521_v52  ;;  %1239 = vmatprep.subr.bf16.mxu1 %v8521_v52  ;;  %v12852_v52 = vld [vmem:[#allocation24_spill] sm:$0xff] }
 0x123   :  { %1073 = vmatpush1.bf16.msra.mxu0 %v8527_v53  ;;  %1240 = vmatpush1.bf16.msra.mxu1 %v8527_v53  ;;  %v12853_v53 = vld [vmem:[#allocation25_spill] sm:$0xff] }
 0x124   :  { %1074 = vmatprep.subr.bf16.mxu0 %v8529_v54  ;;  %1241 = vmatprep.subr.bf16.mxu1 %v8529_v54  ;;  %v12854_v54 = vld [vmem:[#allocation26_spill] sm:$0xff] }
 0x127   :  { %1075 = vmatpush1.bf16.msra.mxu0 %v8535_v55  ;;  %1242 = vmatpush1.bf16.msra.mxu1 %v8535_v55  ;;  %v12353_v55 = vlaneseq }
 0x128   :  { %1076 = vmatprep.subr.bf16.mxu0 %v8537_v56  ;;  %1243 = vmatprep.subr.bf16.mxu1 %v8537_v56  ;;  %v12855_v56 = vld [vmem:[#allocation27_spill] sm:$0xff] }
 0x12b   :  { %1077 = vmatpush1.bf16.msra.mxu0 %v8543_v57  ;;  %1244 = vmatpush1.bf16.msra.mxu1 %v8543_v57  ;;  %v8974_v57 = vshrl.u32 %v12353_v55, 7 }
 0x12c   :  { %1078 = vmatprep.subr.bf16.mxu0 %v8545_v58  ;;  %1245 = vmatprep.subr.bf16.mxu1 %v8545_v58 }
 0x12d   :  { %12856 = vst [vmem:[#allocation10_spill] sm:$0xff] %v8974_v57  ;;  %v12354_v58 = vsub.s32 0, %v8974_v57 }
 0x12f   :  { %1079 = vmatpush1.bf16.msra.mxu0 %v8551_v59  ;;  %1246 = vmatpush1.bf16.msra.mxu1 %v8551_v59  ;;  %v221_v59 = vld [vmem:[%s12307_s2] sm:$0x3] }
 0x130   :  { %1080 = vmatprep.subr.bf16.mxu0 %v8553_v60  ;;  %1247 = vmatprep.subr.bf16.mxu1 %v8553_v60  ;;  %v12355_v60 = vsub.s32 1, %v8974_v57  ;;  %v9009_v57 = vld [vmem:[#allocation4 + $0xd0] ss:$8 sps:$4 sm:$0xff]  }
 0x131   :  { %12860 = vst [vmem:[#allocation14_spill] sm:$0xff] %v9009_v57 }
 0x133   :  { %1081 = vmatpush1.bf16.msra.mxu0 %v8559_v61  ;;  %1248 = vmatpush1.bf16.msra.mxu1 %v8559_v61  ;;  %v8991_v61 = vrot.slane %v221_v59, %v12354_v58 }
 0x134   :  { %1082 = vmatprep.subr.bf16.mxu0 %v8561_v62  ;;  %1249 = vmatprep.subr.bf16.mxu1 %v8561_v62  ;;  %v8993_v62 = vld [vmem:[#allocation4 + $0xc0] ss:$8 sps:$4 sm:$0xff]  }
 0x135   :  { %12857 = vst [vmem:[#allocation11_spill] sm:$0xff] %v8991_v61  ;;  %12858 = vst [vmem:[#allocation12_spill] sm:$0xff] %v8993_v62 }
 0x137   :  { %1083 = vmatpush1.bf16.msra.mxu0 %v8567_v63  ;;  %1250 = vmatpush1.bf16.msra.mxu1 %v8567_v63  ;;  %v8999_v63 = vrot.slane %v221_v59, %v12355_v60 }
 0x138   :  { %1084 = vmatprep.subr.bf16.mxu0 %v8569_v0  ;;  %1251 = vmatprep.subr.bf16.mxu1 %v8569_v0  ;;  %v9001_v0 = vld [vmem:[#allocation4 + $0xd4] ss:$8 sps:$4 sm:$0xff]  }
 0x139   :  { %12859 = vst [vmem:[#allocation13_spill] sm:$0xff] %v9001_v0 }
 0x13b   :  { %1085 = vmatpush1.bf16.msra.mxu0 %v8575_v1  ;;  %1252 = vmatpush1.bf16.msra.mxu1 %v8575_v1 }
 0x13c   :  { %1086 = vmatprep.subr.bf16.mxu0 %v8577_v2  ;;  %1253 = vmatprep.subr.bf16.mxu1 %v8577_v2 }
 0x13f   :  { %1087 = vmatpush1.bf16.msra.mxu0 %v8583_v3  ;;  %1254 = vmatpush1.bf16.msra.mxu1 %v8583_v3 }
 0x140   :  { %1088 = vmatprep.subr.bf16.mxu0 %v8585_v4  ;;  %1255 = vmatprep.subr.bf16.mxu1 %v8585_v4 }
 0x143   :  { %1089 = vmatpush1.bf16.msra.mxu0 %v8591_v5  ;;  %1256 = vmatpush1.bf16.msra.mxu1 %v8591_v5 }
 0x144   :  { %1101 = vmatprep.subr.bf16.mxu0 %v8593_v6  ;;  %1268 = vmatprep.subr.bf16.mxu1 %v8593_v6 }
 0x146   :  { %1091 = vmatmul.mubr.bf16.vlgmr.msra.gmra.mrb[4].mxu0 %v8878_v29  ;;  %1258 = vmatmul.mubr.bf16.vlgmr.msra.gmra.mrb[4].mxu1 %v8883_v30 }
 0x147   :  { %1102 = vmatpush1.bf16.msra.mxu0 %v8609_v9  ;;  %1269 = vmatpush1.bf16.msra.mxu1 %v8609_v9 }
 0x148   :  { %1103 = vmatprep.subr.bf16.mxu0 %v8611_v10  ;;  %1270 = vmatprep.subr.bf16.mxu1 %v8611_v10 }
 0x149   :  { %1133 = vmatprep.mubr.bf16.mxu0 %v12837_v31  ;;  %1300 = vmatprep.mubr.bf16.mxu1 %v12837_v31 }
 0x14b   :  { %1104 = vmatpush1.bf16.msra.mxu0 %v8617_v11  ;;  %1271 = vmatpush1.bf16.msra.mxu1 %v8617_v11 }
 0x14c   :  { %1105 = vmatprep.subr.bf16.mxu0 %v8621_v12  ;;  %1272 = vmatprep.subr.bf16.mxu1 %v8621_v12 }
 0x14f   :  { %1106 = vmatpush1.bf16.msra.mxu0 %v8627_v13  ;;  %1273 = vmatpush1.bf16.msra.mxu1 %v8627_v13 }
 0x150   :  { %1107 = vmatprep.subr.bf16.mxu0 %v8631_v15  ;;  %1274 = vmatprep.subr.bf16.mxu1 %v8631_v15 }
 0x153   :  { %1108 = vmatpush1.bf16.msra.mxu0 %v8637_v16  ;;  %1275 = vmatpush1.bf16.msra.mxu1 %v8637_v16 }
 0x154   :  { %1109 = vmatprep.subr.bf16.mxu0 %v8639_v17  ;;  %1276 = vmatprep.subr.bf16.mxu1 %v8639_v17 }
 0x157   :  { %1110 = vmatpush1.bf16.msra.mxu0 %v8647_v18  ;;  %1277 = vmatpush1.bf16.msra.mxu1 %v8647_v18 }
 0x158   :  { %1111 = vmatprep.subr.bf16.mxu0 %v8651_v19  ;;  %1278 = vmatprep.subr.bf16.mxu1 %v8651_v19 }
 0x15b   :  { %1112 = vmatpush1.bf16.msra.mxu0 %v8655_v20  ;;  %1279 = vmatpush1.bf16.msra.mxu1 %v8655_v20 }
 0x15c   :  { %1113 = vmatprep.subr.bf16.mxu0 %v8659_v21  ;;  %1280 = vmatprep.subr.bf16.mxu1 %v8659_v21 }
 0x15f   :  { %1114 = vmatpush1.bf16.msra.mxu0 %v8663_v22  ;;  %1281 = vmatpush1.bf16.msra.mxu1 %v8663_v22 }
 0x160   :  { %1115 = vmatprep.subr.bf16.mxu0 %v8667_v23  ;;  %1282 = vmatprep.subr.bf16.mxu1 %v8667_v23 }
 0x163   :  { %1116 = vmatpush1.bf16.msra.mxu0 %v12838_v34  ;;  %1283 = vmatpush1.bf16.msra.mxu1 %v12838_v34 }
 0x164   :  { %1353 = vmatprep.subr.bf16.mxu0 %v8683_v35  ;;  %1520 = vmatprep.subr.bf16.mxu1 %v8683_v35 }
 0x166   :  { %1134 = vmatmul.mubr.bf16.vlgmr.msra.gmra.mrb[4].mxu0 %v7660_v32  ;;  %1301 = vmatmul.mubr.bf16.vlgmr.msra.gmra.mrb[4].mxu1 %v7661_v33 }
 0x167   :  { %1354 = vmatpush1.bf16.msra.mxu0 %v8687_v36  ;;  %1521 = vmatpush1.bf16.msra.mxu1 %v8687_v36 }
 0x168   :  { %1355 = vmatprep.subr.bf16.mxu0 %v8691_v14  ;;  %1522 = vmatprep.subr.bf16.mxu1 %v8691_v14 }
 0x169   :  { %1385 = vmatprep.mubr.bf16.mxu0 %v8804_v27  ;;  %1552 = vmatprep.mubr.bf16.mxu1 %v8809_v28 }
 0x16b   :  { %1356 = vmatpush1.bf16.msra.mxu0 %v12839_v37  ;;  %1523 = vmatpush1.bf16.msra.mxu1 %v12839_v37 }
 0x16c   :  { %1357 = vmatprep.subr.bf16.mxu0 %v12840_v38  ;;  %1524 = vmatprep.subr.bf16.mxu1 %v12840_v38 }
 0x16f   :  { %1358 = vmatpush1.bf16.msra.mxu0 %v12841_v41  ;;  %1525 = vmatpush1.bf16.msra.mxu1 %v12841_v41 }
 0x170   :  { %1359 = vmatprep.subr.bf16.mxu0 %v12842_v42  ;;  %1526 = vmatprep.subr.bf16.mxu1 %v12842_v42 }
 0x173   :  { %1360 = vmatpush1.bf16.msra.mxu0 %v12843_v43  ;;  %1527 = vmatpush1.bf16.msra.mxu1 %v12843_v43 }
 0x174   :  { %1361 = vmatprep.subr.bf16.mxu0 %v12844_v44  ;;  %1528 = vmatprep.subr.bf16.mxu1 %v12844_v44 }
 0x177   :  { %1362 = vmatpush1.bf16.msra.mxu0 %v12845_v45  ;;  %1529 = vmatpush1.bf16.msra.mxu1 %v12845_v45 }
 0x178   :  { %1363 = vmatprep.subr.bf16.mxu0 %v12846_v46  ;;  %1530 = vmatprep.subr.bf16.mxu1 %v12846_v46 }
 0x17b   :  { %1364 = vmatpush1.bf16.msra.mxu0 %v12847_v47  ;;  %1531 = vmatpush1.bf16.msra.mxu1 %v12847_v47 }
 0x17c   :  { %1365 = vmatprep.subr.bf16.mxu0 %v12848_v48  ;;  %1532 = vmatprep.subr.bf16.mxu1 %v12848_v48 }
 0x17f   :  { %1366 = vmatpush1.bf16.msra.mxu0 %v12849_v49  ;;  %1533 = vmatpush1.bf16.msra.mxu1 %v12849_v49 }
 0x180   :  { %1367 = vmatprep.subr.bf16.mxu0 %v12850_v50  ;;  %1534 = vmatprep.subr.bf16.mxu1 %v12850_v50 }
 0x183   :  { %1368 = vmatpush1.bf16.msra.mxu0 %v12851_v51  ;;  %1535 = vmatpush1.bf16.msra.mxu1 %v12851_v51 }
 0x184   :  { %1369 = vmatprep.subr.bf16.mxu0 %v12852_v52  ;;  %1536 = vmatprep.subr.bf16.mxu1 %v12852_v52 }
 0x187   :  { %1370 = vmatpush1.bf16.msra.mxu0 %v12853_v53  ;;  %1537 = vmatpush1.bf16.msra.mxu1 %v12853_v53 }
 0x188   :  { %1371 = vmatprep.subr.bf16.mxu0 %v12854_v54  ;;  %1538 = vmatprep.subr.bf16.mxu1 %v12854_v54  ;;  %v9025_v54 = vld [vmem:[#allocation4 + $0xf4] ss:$8 sps:$4 sm:$0xff]  }
 0x18b   :  { %1372 = vmatpush1.bf16.msra.mxu0 %v12855_v56  ;;  %1539 = vmatpush1.bf16.msra.mxu1 %v12855_v56 }
 0x18c   :  { %1373 = vmatprep.subr.bf16.mxu0 %v8765_v26  ;;  %1540 = vmatprep.subr.bf16.mxu1 %v8765_v26 }
 0x18f   :  { %1374 = vmatpush1.bf16.msra.mxu0 %v8769_v39  ;;  %1541 = vmatpush1.bf16.msra.mxu1 %v8769_v39 }
 0x190   :  { %1375 = vmatprep.subr.bf16.mxu0 %v8773_v40  ;;  %1542 = vmatprep.subr.bf16.mxu1 %v8773_v40  ;;  %v9015_v40 = vld [vmem:[#allocation4 + $0xe4] ss:$8 sps:$4 sm:$0xff]  }
 0x193   :  { %1376 = vmatpush1.bf16.msra.mxu0 %v8777_v24  ;;  %1543 = vmatpush1.bf16.msra.mxu1 %v8777_v24 }
 0x194   :  { %1377 = vmatprep.subr.bf16.mxu0 %v8781_v25  ;;  %1544 = vmatprep.subr.bf16.mxu1 %v8781_v25 }
 0x197   :  { %1378 = vmatpush1.bf16.msra.mxu0 %v8993_v62  ;;  %1545 = vmatpush1.bf16.msra.mxu1 %v8993_v62 }
 0x198   :  { %1379 = vmatprep.subr.bf16.mxu0 %v9001_v0  ;;  %1546 = vmatprep.subr.bf16.mxu1 %v9001_v0 }
 0x199   :  { %v797_v7 = vpop.f32.mrb[0].mxu0  ;;  %v964_v8 = vpop.f32.mrb[0].mxu1 }
 0x19a   :  { %v7129_v27 = vadd.f32 %v797_v7, %v8991_v61  ;;  %v7133_v28 = vadd.f32 %v964_v8, %v8991_v61  ;;  %v799_v32 = vpop.f32.mrb[1].mxu0  ;;  %v966_v33 = vpop.f32.mrb[1].mxu1 }
 0x19b   :  { %v7130_v55 = vadd.f32 %v799_v32, %v8999_v63  ;;  %v7134_v58 = vadd.f32 %v966_v33, %v8999_v63  ;;  %v801_v59 = vpop.f32.mrb[2].mxu0  ;;  %v968_v60 = vpop.f32.mrb[2].mxu1  ;;  %1380 = vmatpush1.bf16.msra.mxu0 %v9009_v57  ;;  %1547 = vmatpush1.bf16.msra.mxu1 %v9009_v57 }
 0x19c   :  { %v806_v0 = vmax.f32 %v7129_v27, 0.0  ;;  %v973_v62 = vmax.f32 %v7133_v28, 0.0  ;;  %v7131_v7 = vadd.f32 %v801_v59, %v8991_v61  ;;  %v7135_v8 = vadd.f32 %v968_v60, %v8991_v61  ;;  %v803_v25 = vpop.f32.mrb[3].mxu0  ;;  %v970_v24 = vpop.f32.mrb[3].mxu1  ;;  %1381 = vmatprep.subr.bf16.mxu0 %v9015_v40  ;;  %1548 = vmatprep.subr.bf16.mxu1 %v9015_v40  ;;  %v9021_v61 = vld [vmem:[#allocation4 + $0xe0] ss:$8 sps:$4 sm:$0xff]  }
 0x19d   :  { %v807_v32 = vmax.f32 %v7130_v55, 0.0  ;;  %v974_v33 = vmax.f32 %v7134_v58, 0.0  ;;  %v7132_v39 = vadd.f32 %v803_v25, %v8999_v63  ;;  %v7136_v57 = vadd.f32 %v970_v24, %v8999_v63 }
 0x19e   :  { %v808_v27 = vmax.f32 %v7131_v7, 0.0  ;;  %v975_v28 = vmax.f32 %v7135_v8, 0.0  ;;  %v9055_v7 = vld [vmem:[#allocation4 + $0x114] ss:$8 sps:$4 sm:$0xff]   ;;  %v9061_v8 = vld [vmem:[#allocation4 + $0x110] ss:$8 sps:$4 sm:$0xff]  }
 0x19f   :  { %v810_v26 = vmax.f32 %v806_v0, %v807_v32  ;;  %v977_v59 = vmax.f32 %v973_v62, %v974_v33  ;;  %v809_v56 = vmax.f32 %v7132_v39, 0.0  ;;  %v976_v60 = vmax.f32 %v7136_v57, 0.0  ;;  %1382 = vmatpush1.bf16.msra.mxu0 %v9021_v61  ;;  %1549 = vmatpush1.bf16.msra.mxu1 %v9021_v61  ;;  %v9029_v0 = vld [vmem:[#allocation4 + $0xf0] ss:$8 sps:$4 sm:$0xff]   ;;  %v9033_v39 = vld [vmem:[#allocation4 + $0x104] ss:$8 sps:$4 sm:$0xff]  }
 0x1a0   :  { %1383 = vmatprep.subr.bf16.mxu0 %v9025_v54  ;;  %1550 = vmatprep.subr.bf16.mxu1 %v9025_v54  ;;  %v9051_v62 = vld [vmem:[#allocation4 + $0x100] ss:$8 sps:$4 sm:$0xff]   ;;  %v9073_v32 = vld [vmem:[#allocation4 + $0x134] ss:$8 sps:$4 sm:$0xff]   ;;  %v9077_v33 = vld [vmem:[#allocation4 + $0x130] ss:$8 sps:$4 sm:$0xff]  }
 0x1a1   :  { %v979_v25 = vmax.f32 %v810_v26, %v977_v59  ;;  %v811_v24 = vmax.f32 %v808_v27, %v809_v56  ;;  %v978_v55 = vmax.f32 %v975_v28, %v976_v60  ;;  %v9042_v26 = vld [vmem:[%s12305_s0 + $0x1c] ss:$112 sps:$4 sm:$0xff]   ;;  %v9047_v56 = vld [vmem:[%s12305_s0 + $0x20] ss:$112 sps:$4 sm:$0xff]  }
 0x1a2   :  { %v9081_v27 = vld [vmem:[#allocation4 + $0x144] ss:$8 sps:$4 sm:$0xff]   ;;  %v9085_v28 = vld [vmem:[#allocation4 + $0x140] ss:$8 sps:$4 sm:$0xff]   ;;  %v9089_v59 = vld [vmem:[#allocation4 + $0x154] ss:$8 sps:$4 sm:$0xff]  }
 0x1a3   :  { %v980_v58 = vmax.f32 %v811_v24, %v978_v55  ;;  %1384 = vmatpush1.bf16.msra.mxu0 %v9029_v0  ;;  %1551 = vmatpush1.bf16.msra.mxu1 %v9029_v0  ;;  %v9093_v60 = vld [vmem:[#allocation4 + $0x150] ss:$8 sps:$4 sm:$0xff]   ;;  %v9101_v24 = vld [vmem:[#allocation4 + $0x160] ss:$8 sps:$4 sm:$0xff]   ;;  %v9105_v55 = vld [vmem:[#allocation4 + $0x174] ss:$8 sps:$4 sm:$0xff]  }
 0x1a4   :  { %1396 = vmatprep.subr.bf16.mxu0 %v9033_v39  ;;  %1563 = vmatprep.subr.bf16.mxu1 %v9033_v39  ;;  %12863 = vst [vmem:[#allocation17_spill] sm:$0xff] %v9101_v24  ;;  %12864 = vst [vmem:[#allocation18_spill] sm:$0xff] %v9105_v55 }
 0x1a5   :  { %v9037_v57 = vpack.c.bf16 %v980_v58, %v979_v25  ;;  %v9097_v25 = vld [vmem:[#allocation4 + $0x164] ss:$8 sps:$4 sm:$0xff]   ;;  %v9109_v58 = vld [vmem:[#allocation4 + $0x170] ss:$8 sps:$4 sm:$0xff]  }
 0x1a6   :  { %1386 = vmatmul.mubr.bf16.vlgmr.msra.gmra.mrb[8].mxu0 %v8878_v29  ;;  %1553 = vmatmul.mubr.bf16.vlgmr.msra.gmra.mrb[8].mxu1 %v8883_v30  ;;  %v9065_v29 = vld [vmem:[#allocation4 + $0x124] ss:$8 sps:$4 sm:$0xff]   ;;  %v9069_v30 = vld [vmem:[#allocation4 + $0x120] ss:$8 sps:$4 sm:$0xff]   ;;  %12862 = vst [vmem:[#allocation16_spill] sm:$0xff] %v9097_v25  ;;  %12865 = vst [vmem:[#allocation19_spill] sm:$0xff] %v9109_v58 }
 0x1a7   :  { %12861 = vst [vmem:[#allocation15_spill] sm:$0xff] %v9037_v57  ;;  %1397 = vmatpush1.bf16.msra.mxu0 %v9051_v62  ;;  %1564 = vmatpush1.bf16.msra.mxu1 %v9051_v62  ;;  %v9113_v57 = vld [vmem:[#allocation4 + $0x184] ss:$8 sps:$4 sm:$0xff]  }
 0x1a8   :  { %1398 = vmatprep.subr.bf16.mxu0 %v9055_v7  ;;  %1565 = vmatprep.subr.bf16.mxu1 %v9055_v7  ;;  %12866 = vst [vmem:[#allocation20_spill] sm:$0xff] %v9113_v57 }
 0x1a9   :  { %1428 = vmatprep.mubr.bf16.mxu0 %v9042_v26  ;;  %1595 = vmatprep.mubr.bf16.mxu1 %v9047_v56 }
 0x1ab   :  { %1399 = vmatpush1.bf16.msra.mxu0 %v9061_v8  ;;  %1566 = vmatpush1.bf16.msra.mxu1 %v9061_v8 }
 0x1ac   :  { %1400 = vmatprep.subr.bf16.mxu0 %v9065_v29  ;;  %1567 = vmatprep.subr.bf16.mxu1 %v9065_v29 }
 0x1af   :  { %1401 = vmatpush1.bf16.msra.mxu0 %v9069_v30  ;;  %1568 = vmatpush1.bf16.msra.mxu1 %v9069_v30 }
 0x1b0   :  { %1402 = vmatprep.subr.bf16.mxu0 %v9073_v32  ;;  %1569 = vmatprep.subr.bf16.mxu1 %v9073_v32 }
 0x1b3   :  { %1403 = vmatpush1.bf16.msra.mxu0 %v9077_v33  ;;  %1570 = vmatpush1.bf16.msra.mxu1 %v9077_v33 }
 0x1b4   :  { %1404 = vmatprep.subr.bf16.mxu0 %v9081_v27  ;;  %1571 = vmatprep.subr.bf16.mxu1 %v9081_v27 }
 0x1b7   :  { %1405 = vmatpush1.bf16.msra.mxu0 %v9085_v28  ;;  %1572 = vmatpush1.bf16.msra.mxu1 %v9085_v28 }
 0x1b8   :  { %1406 = vmatprep.subr.bf16.mxu0 %v9089_v59  ;;  %1573 = vmatprep.subr.bf16.mxu1 %v9089_v59 }
 0x1bb   :  { %1407 = vmatpush1.bf16.msra.mxu0 %v9093_v60  ;;  %1574 = vmatpush1.bf16.msra.mxu1 %v9093_v60 }
 0x1bc   :  { %1408 = vmatprep.subr.bf16.mxu0 %v9097_v25  ;;  %1575 = vmatprep.subr.bf16.mxu1 %v9097_v25  ;;  %v9117_v25 = vld [vmem:[#allocation4 + $0x180] ss:$8 sps:$4 sm:$0xff]  }
 0x1bd   :  { %12867 = vst [vmem:[#allocation21_spill] sm:$0xff] %v9117_v25 }
 0x1bf   :  { %1409 = vmatpush1.bf16.msra.mxu0 %v9101_v24  ;;  %1576 = vmatpush1.bf16.msra.mxu1 %v9101_v24  ;;  %v9121_v24 = vld [vmem:[#allocation4 + $0x194] ss:$8 sps:$4 sm:$0xff]  }
 0x1c0   :  { %1410 = vmatprep.subr.bf16.mxu0 %v9105_v55  ;;  %1577 = vmatprep.subr.bf16.mxu1 %v9105_v55  ;;  %12868 = vst [vmem:[#allocation22_spill] sm:$0xff] %v9121_v24  ;;  %v9125_v55 = vld [vmem:[#allocation4 + $0x190] ss:$8 sps:$4 sm:$0xff]  }
 0x1c1   :  { %12869 = vst [vmem:[#allocation23_spill] sm:$0xff] %v9125_v55 }
 0x1c3   :  { %1411 = vmatpush1.bf16.msra.mxu0 %v9109_v58  ;;  %1578 = vmatpush1.bf16.msra.mxu1 %v9109_v58  ;;  %v9129_v58 = vld [vmem:[#allocation4 + $0x1a4] ss:$8 sps:$4 sm:$0xff]  }
 0x1c4   :  { %1412 = vmatprep.subr.bf16.mxu0 %v9113_v57  ;;  %1579 = vmatprep.subr.bf16.mxu1 %v9113_v57  ;;  %12870 = vst [vmem:[#allocation24_spill] sm:$0xff] %v9129_v58  ;;  %v9133_v57 = vld [vmem:[#allocation4 + $0x1a0] ss:$8 sps:$4 sm:$0xff]  }
 0x1c5   :  { %12871 = vst [vmem:[#allocation25_spill] sm:$0xff] %v9133_v57 }
 0x1c7   :  { %1413 = vmatpush1.bf16.msra.mxu0 %v9117_v25  ;;  %1580 = vmatpush1.bf16.msra.mxu1 %v9117_v25  ;;  %v9137_v25 = vld [vmem:[#allocation4 + $0x1b4] ss:$8 sps:$4 sm:$0xff]  }
 0x1c8   :  { %1414 = vmatprep.subr.bf16.mxu0 %v9121_v24  ;;  %1581 = vmatprep.subr.bf16.mxu1 %v9121_v24  ;;  %v9141_v24 = vld [vmem:[#allocation4 + $0x1b0] ss:$8 sps:$4 sm:$0xff]  }
 0x1c9   :  { %12872 = vst [vmem:[#allocation33_spill] sm:$0xff] %v9141_v24 }
 0x1cb   :  { %1415 = vmatpush1.bf16.msra.mxu0 %v9125_v55  ;;  %1582 = vmatpush1.bf16.msra.mxu1 %v9125_v55  ;;  %v9145_v55 = vld [vmem:[#allocation4 + $0x1c4] ss:$8 sps:$4 sm:$0xff]  }
 0x1cc   :  { %1416 = vmatprep.subr.bf16.mxu0 %v9129_v58  ;;  %1583 = vmatprep.subr.bf16.mxu1 %v9129_v58  ;;  %v9149_v58 = vld [vmem:[#allocation4 + $0x1c0] ss:$8 sps:$4 sm:$0xff]  }
 0x1cf   :  { %1417 = vmatpush1.bf16.msra.mxu0 %v9133_v57  ;;  %1584 = vmatpush1.bf16.msra.mxu1 %v9133_v57  ;;  %v9153_v57 = vld [vmem:[#allocation4 + $0x1d4] ss:$8 sps:$4 sm:$0xff]  }
 0x1d0   :  { %1418 = vmatprep.subr.bf16.mxu0 %v9137_v25  ;;  %1585 = vmatprep.subr.bf16.mxu1 %v9137_v25 }
 0x1d3   :  { %1419 = vmatpush1.bf16.msra.mxu0 %v9141_v24  ;;  %1586 = vmatpush1.bf16.msra.mxu1 %v9141_v24  ;;  %v9158_v24 = vld [vmem:[#allocation4 + $0x1d0] ss:$8 sps:$4 sm:$0xff]  }
 0x1d4   :  { %1420 = vmatprep.subr.bf16.mxu0 %v9145_v55  ;;  %1587 = vmatprep.subr.bf16.mxu1 %v9145_v55  ;;  %12873 = vst [vmem:[#allocation34_spill] sm:$0xff] %v9158_v24 }
 0x1d7   :  { %1421 = vmatpush1.bf16.msra.mxu0 %v9149_v58  ;;  %1588 = vmatpush1.bf16.msra.mxu1 %v9149_v58 }
 0x1d8   :  { %1422 = vmatprep.subr.bf16.mxu0 %v9153_v57  ;;  %1589 = vmatprep.subr.bf16.mxu1 %v9153_v57 }
 0x1db   :  { %1423 = vmatpush1.bf16.msra.mxu0 %v8575_v1  ;;  %1590 = vmatpush1.bf16.msra.mxu1 %v9158_v24  ;;  %v9170_v1 = vld [vmem:[%s12305_s0 + $0x18] ss:$112 sps:$4 sm:$0xff]   ;;  %v9175_v24 = vld [vmem:[%s12305_s0 + $0x1c] ss:$112 sps:$4 sm:$0xff]  }
 0x1dc   :  { %1424 = vmatprep.subr.bf16.mxu0 %v8577_v2  ;;  %1591 = vmatprep.subr.bf16.mxu1 %v8577_v2  ;;  %v7668_v2 = vld [vmem:[%s12305_s0 + $0x20] ss:$112 sps:$4 sm:$0xff]  }
 0x1df   :  { %1425 = vmatpush1.bf16.msra.mxu0 %v8583_v3  ;;  %1592 = vmatpush1.bf16.msra.mxu1 %v8583_v3  ;;  %v7669_v3 = vld [vmem:[%s12305_s0 + $0x24] ss:$112 sps:$4 sm:$0xff]  }
 0x1e0   :  { %1426 = vmatprep.subr.bf16.mxu0 %v8585_v4  ;;  %1593 = vmatprep.subr.bf16.mxu1 %v8585_v4  ;;  %v12874_v4 = vld [vmem:[#allocation26_spill] sm:$0xff] }
 0x1e3   :  { %1427 = vmatpush1.bf16.msra.mxu0 %v8591_v5  ;;  %1594 = vmatpush1.bf16.msra.mxu1 %v8591_v5  ;;  %v12875_v5 = vld [vmem:[#allocation27_spill] sm:$0xff] }
 0x1e4   :  { %1439 = vmatprep.subr.bf16.mxu0 %v8593_v6  ;;  %1606 = vmatprep.subr.bf16.mxu1 %v8593_v6  ;;  %v12876_v6 = vld [vmem:[#allocation28_spill] sm:$0xff] }
 0x1e6   :  { %1429 = vmatmul.mubr.bf16.vlgmr.msra.gmra.mrb[8].mxu0 %v9170_v1  ;;  %1596 = vmatmul.mubr.bf16.vlgmr.msra.gmra.mrb[8].mxu1 %v9175_v24 }
 0x1e7   :  { %1440 = vmatpush1.bf16.msra.mxu0 %v8609_v9  ;;  %1607 = vmatpush1.bf16.msra.mxu1 %v8609_v9  ;;  %v12877_v9 = vld [vmem:[#allocation29_spill] sm:$0xff] }
 0x1e8   :  { %1441 = vmatprep.subr.bf16.mxu0 %v8611_v10  ;;  %1608 = vmatprep.subr.bf16.mxu1 %v8611_v10  ;;  %v12878_v10 = vld [vmem:[#allocation30_spill] sm:$0xff] }
 0x1e9   :  { %1471 = vmatprep.mubr.bf16.mxu0 %v12837_v31  ;;  %1638 = vmatprep.mubr.bf16.mxu1 %v12837_v31 }
 0x1eb   :  { %1442 = vmatpush1.bf16.msra.mxu0 %v8617_v11  ;;  %1609 = vmatpush1.bf16.msra.mxu1 %v8617_v11  ;;  %v12879_v11 = vld [vmem:[#allocation31_spill] sm:$0xff] }
 0x1ec   :  { %1443 = vmatprep.subr.bf16.mxu0 %v8621_v12  ;;  %1610 = vmatprep.subr.bf16.mxu1 %v8621_v12  ;;  %v12880_v12 = vld [vmem:[#allocation32_spill] sm:$0xff] }
 0x1ef   :  { %1444 = vmatpush1.bf16.msra.mxu0 %v8627_v13  ;;  %1611 = vmatpush1.bf16.msra.mxu1 %v8627_v13  ;;  %v12881_v13 = vld [vmem:[#allocation12_spill] sm:$0xff] }
 0x1f0   :  { %1445 = vmatprep.subr.bf16.mxu0 %v8631_v15  ;;  %1612 = vmatprep.subr.bf16.mxu1 %v8631_v15 }
 0x1f3   :  { %1446 = vmatpush1.bf16.msra.mxu0 %v8637_v16  ;;  %1613 = vmatpush1.bf16.msra.mxu1 %v8637_v16 }
 0x1f4   :  { %1447 = vmatprep.subr.bf16.mxu0 %v8639_v17  ;;  %1614 = vmatprep.subr.bf16.mxu1 %v8639_v17  ;;  %v12883_v17 = vld [vmem:[#allocation11_spill] sm:$0xff] }
 0x1f7   :  { %1448 = vmatpush1.bf16.msra.mxu0 %v8647_v18  ;;  %1615 = vmatpush1.bf16.msra.mxu1 %v8647_v18 }
 0x1f8   :  { %1449 = vmatprep.subr.bf16.mxu0 %v8651_v19  ;;  %1616 = vmatprep.subr.bf16.mxu1 %v8651_v19 }
 0x1fb   :  { %1450 = vmatpush1.bf16.msra.mxu0 %v8655_v20  ;;  %1617 = vmatpush1.bf16.msra.mxu1 %v8655_v20 }
 0x1fc   :  { %1451 = vmatprep.subr.bf16.mxu0 %v8659_v21  ;;  %1618 = vmatprep.subr.bf16.mxu1 %v8659_v21 }
 0x1ff   :  { %1452 = vmatpush1.bf16.msra.mxu0 %v8663_v22  ;;  %1619 = vmatpush1.bf16.msra.mxu1 %v8663_v22 }
 0x200   :  { %1453 = vmatprep.subr.bf16.mxu0 %v8667_v23  ;;  %1620 = vmatprep.subr.bf16.mxu1 %v8667_v23 }
 0x203   :  { %1454 = vmatpush1.bf16.msra.mxu0 %v12838_v34  ;;  %1621 = vmatpush1.bf16.msra.mxu1 %v12838_v34  ;;  %v12884_v34 = vld [vmem:[#allocation14_spill] sm:$0xff] }
 0x204   :  { %1691 = vmatprep.subr.bf16.mxu0 %v8683_v35  ;;  %1858 = vmatprep.subr.bf16.mxu1 %v8683_v35 }
 0x206   :  { %1472 = vmatmul.mubr.bf16.vlgmr.msra.gmra.mrb[8].mxu0 %v7668_v2  ;;  %1639 = vmatmul.mubr.bf16.vlgmr.msra.gmra.mrb[8].mxu1 %v7669_v3 }
 0x207   :  { %1692 = vmatpush1.bf16.msra.mxu0 %v8687_v36  ;;  %1859 = vmatpush1.bf16.msra.mxu1 %v8687_v36 }
 0x208   :  { %1693 = vmatprep.subr.bf16.mxu0 %v8691_v14  ;;  %1860 = vmatprep.subr.bf16.mxu1 %v8691_v14  ;;  %v12882_v14 = vld [vmem:[#allocation13_spill] sm:$0xff] }
 0x209   :  { %1723 = vmatprep.mubr.bf16.mxu0 %v9042_v26  ;;  %1890 = vmatprep.mubr.bf16.mxu1 %v9047_v56 }
 0x20b   :  { %1694 = vmatpush1.bf16.msra.mxu0 %v12839_v37  ;;  %1861 = vmatpush1.bf16.msra.mxu1 %v12839_v37 }
 0x20c   :  { %1695 = vmatprep.subr.bf16.mxu0 %v12840_v38  ;;  %1862 = vmatprep.subr.bf16.mxu1 %v12840_v38 }
 0x20f   :  { %1696 = vmatpush1.bf16.msra.mxu0 %v12841_v41  ;;  %1863 = vmatpush1.bf16.msra.mxu1 %v12841_v41 }
 0x210   :  { %1697 = vmatprep.subr.bf16.mxu0 %v12842_v42  ;;  %1864 = vmatprep.subr.bf16.mxu1 %v12842_v42 }
 0x213   :  { %1698 = vmatpush1.bf16.msra.mxu0 %v12843_v43  ;;  %1865 = vmatpush1.bf16.msra.mxu1 %v12843_v43 }
 0x214   :  { %1699 = vmatprep.subr.bf16.mxu0 %v12844_v44  ;;  %1866 = vmatprep.subr.bf16.mxu1 %v12844_v44 }
 0x217   :  { %1700 = vmatpush1.bf16.msra.mxu0 %v12845_v45  ;;  %1867 = vmatpush1.bf16.msra.mxu1 %v12845_v45 }
 0x218   :  { %1701 = vmatprep.subr.bf16.mxu0 %v12846_v46  ;;  %1868 = vmatprep.subr.bf16.mxu1 %v12846_v46 }
 0x21b   :  { %1702 = vmatpush1.bf16.msra.mxu0 %v12847_v47  ;;  %1869 = vmatpush1.bf16.msra.mxu1 %v12847_v47 }
 0x21c   :  { %1703 = vmatprep.subr.bf16.mxu0 %v12848_v48  ;;  %1870 = vmatprep.subr.bf16.mxu1 %v12848_v48 }
 0x21f   :  { %1704 = vmatpush1.bf16.msra.mxu0 %v12849_v49  ;;  %1871 = vmatpush1.bf16.msra.mxu1 %v12849_v49 }
 0x220   :  { %1705 = vmatprep.subr.bf16.mxu0 %v12850_v50  ;;  %1872 = vmatprep.subr.bf16.mxu1 %v12850_v50 }
 0x223   :  { %1706 = vmatpush1.bf16.msra.mxu0 %v12851_v51  ;;  %1873 = vmatpush1.bf16.msra.mxu1 %v12851_v51 }
 0x224   :  { %1707 = vmatprep.subr.bf16.mxu0 %v12852_v52  ;;  %1874 = vmatprep.subr.bf16.mxu1 %v12852_v52 }
 0x227   :  { %1708 = vmatpush1.bf16.msra.mxu0 %v12853_v53  ;;  %1875 = vmatpush1.bf16.msra.mxu1 %v12853_v53 }
 0x228   :  { %1709 = vmatprep.subr.bf16.mxu0 %v12874_v4  ;;  %1876 = vmatprep.subr.bf16.mxu1 %v12874_v4 }
 0x22b   :  { %1710 = vmatpush1.bf16.msra.mxu0 %v12875_v5  ;;  %1877 = vmatpush1.bf16.msra.mxu1 %v12875_v5  ;;  %v9300_v5 = vld [vmem:[%s12305_s0 + $0x24] ss:$112 sps:$4 sm:$0xff]  }
 0x22c   :  { %1711 = vmatprep.subr.bf16.mxu0 %v12876_v6  ;;  %1878 = vmatprep.subr.bf16.mxu1 %v12876_v6  ;;  %v9305_v6 = vld [vmem:[%s12305_s0 + $0x28] ss:$112 sps:$4 sm:$0xff]  }
 0x22f   :  { %1712 = vmatpush1.bf16.msra.mxu0 %v12877_v9  ;;  %1879 = vmatpush1.bf16.msra.mxu1 %v12877_v9 }
 0x230   :  { %1713 = vmatprep.subr.bf16.mxu0 %v12878_v10  ;;  %1880 = vmatprep.subr.bf16.mxu1 %v12878_v10  ;;  %v12888_v10 = vld [vmem:[#allocation18_spill] sm:$0xff] }
 0x233   :  { %1714 = vmatpush1.bf16.msra.mxu0 %v12879_v11  ;;  %1881 = vmatpush1.bf16.msra.mxu1 %v12879_v11  ;;  %v12889_v11 = vld [vmem:[#allocation19_spill] sm:$0xff] }
 0x234   :  { %1715 = vmatprep.subr.bf16.mxu0 %v12880_v12  ;;  %1882 = vmatprep.subr.bf16.mxu1 %v12880_v12  ;;  %v12890_v12 = vld [vmem:[#allocation20_spill] sm:$0xff] }
 0x237   :  { %1716 = vmatpush1.bf16.msra.mxu0 %v12881_v13  ;;  %1883 = vmatpush1.bf16.msra.mxu1 %v12881_v13 }
 0x238   :  { %1717 = vmatprep.subr.bf16.mxu0 %v12882_v14  ;;  %1884 = vmatprep.subr.bf16.mxu1 %v12882_v14 }
 0x239   :  { %v1135_v15 = vpop.f32.mrb[4].mxu0  ;;  %v1302_v16 = vpop.f32.mrb[4].mxu1 }
 0x23a   :  { %v7137_v18 = vadd.f32 %v1135_v15, %v12883_v17  ;;  %v7141_v19 = vadd.f32 %v1302_v16, %v12883_v17  ;;  %v1137_v20 = vpop.f32.mrb[5].mxu0  ;;  %v1304_v21 = vpop.f32.mrb[5].mxu1  ;;  %v12891_v15 = vld [vmem:[#allocation21_spill] sm:$0xff]  ;;  %v12892_v16 = vld [vmem:[#allocation22_spill] sm:$0xff] }
 0x23b   :  { %v7138_v22 = vadd.f32 %v1137_v20, %v8999_v63  ;;  %v7142_v23 = vadd.f32 %v1304_v21, %v8999_v63  ;;  %v1139_v35 = vpop.f32.mrb[6].mxu0  ;;  %v1306_v36 = vpop.f32.mrb[6].mxu1  ;;  %1718 = vmatpush1.bf16.msra.mxu0 %v12884_v34  ;;  %1885 = vmatpush1.bf16.msra.mxu1 %v12884_v34  ;;  %v12895_v20 = vld [vmem:[#allocation25_spill] sm:$0xff] }
 0x23c   :  { %v1144_v37 = vmax.f32 %v7137_v18, 0.0  ;;  %v1311_v38 = vmax.f32 %v7141_v19, 0.0  ;;  %v7139_v41 = vadd.f32 %v1139_v35, %v12883_v17  ;;  %v7143_v42 = vadd.f32 %v1306_v36, %v12883_v17  ;;  %v1141_v43 = vpop.f32.mrb[7].mxu0  ;;  %v1308_v44 = vpop.f32.mrb[7].mxu1  ;;  %1719 = vmatprep.subr.bf16.mxu0 %v9015_v40  ;;  %1886 = vmatprep.subr.bf16.mxu1 %v9015_v40  ;;  %v12893_v18 = vld [vmem:[#allocation23_spill] sm:$0xff]  ;;  %v12894_v19 = vld [vmem:[#allocation24_spill] sm:$0xff] }
 0x23d   :  { %v1145_v45 = vmax.f32 %v7138_v22, 0.0  ;;  %v1312_v46 = vmax.f32 %v7142_v23, 0.0  ;;  %v7140_v47 = vadd.f32 %v1141_v43, %v8999_v63  ;;  %v7144_v48 = vadd.f32 %v1308_v44, %v8999_v63  ;;  %v12896_v21 = vld [vmem:[#allocation33_spill] sm:$0xff]  ;;  %v12897_v22 = vld [vmem:[#allocation34_spill] sm:$0xff] }
 0x23e   :  { %v1146_v49 = vmax.f32 %v7139_v41, 0.0  ;;  %v1313_v50 = vmax.f32 %v7143_v42, 0.0  ;;  %v9367_v23 = vld [vmem:[#allocation4 + $0x1e4] ss:$8 sps:$4 sm:$0xff]   ;;  %v9371_v35 = vld [vmem:[#allocation4 + $0x1e0] ss:$8 sps:$4 sm:$0xff]  }
 0x23f   :  { %v1148_v51 = vmax.f32 %v1144_v37, %v1145_v45  ;;  %v1315_v52 = vmax.f32 %v1311_v38, %v1312_v46  ;;  %v1147_v53 = vmax.f32 %v7140_v47, 0.0  ;;  %v1314_v26 = vmax.f32 %v7144_v48, 0.0  ;;  %1720 = vmatpush1.bf16.msra.mxu0 %v9021_v61  ;;  %1887 = vmatpush1.bf16.msra.mxu1 %v9021_v61  ;;  %v9375_v36 = vld [vmem:[#allocation4 + $0x1f4] ss:$8 sps:$4 sm:$0xff]   ;;  %v9382_v37 = vld [vmem:[%s12305_s0 + $0x20] ss:$112 sps:$4 sm:$0xff]  }
 0x240   :  { %1721 = vmatprep.subr.bf16.mxu0 %v9025_v54  ;;  %1888 = vmatprep.subr.bf16.mxu1 %v9025_v54  ;;  %v9387_v38 = vld [vmem:[%s12305_s0 + $0x24] ss:$112 sps:$4 sm:$0xff]   ;;  %v9389_v41 = vld [vmem:[#allocation4 + $0x1f0] ss:$8 sps:$4 sm:$0xff]   ;;  %v9399_v43 = vld [vmem:[#allocation4 + $0x200] ss:$8 sps:$4 sm:$0xff]  }
 0x241   :  { %v1317_v56 = vmax.f32 %v1148_v51, %v1315_v52  ;;  %v1149_v2 = vmax.f32 %v1146_v49, %v1147_v53  ;;  %v1316_v3 = vmax.f32 %v1313_v50, %v1314_v26  ;;  %v9393_v42 = vld [vmem:[#allocation4 + $0x204] ss:$8 sps:$4 sm:$0xff]   ;;  %v9403_v44 = vld [vmem:[#allocation4 + $0x214] ss:$8 sps:$4 sm:$0xff]   ;;  %v9409_v45 = vld [vmem:[#allocation4 + $0x210] ss:$8 sps:$4 sm:$0xff]  }
 0x242   :  { %v9413_v46 = vld [vmem:[#allocation4 + $0x224] ss:$8 sps:$4 sm:$0xff]   ;;  %v9417_v47 = vld [vmem:[#allocation4 + $0x220] ss:$8 sps:$4 sm:$0xff]   ;;  %v9421_v48 = vld [vmem:[#allocation4 + $0x234] ss:$8 sps:$4 sm:$0xff]  }
 0x243   :  { %v1318_v4 = vmax.f32 %v1149_v2, %v1316_v3  ;;  %1722 = vmatpush1.bf16.msra.mxu0 %v9029_v0  ;;  %1889 = vmatpush1.bf16.msra.mxu1 %v9029_v0  ;;  %12898 = vst [vmem:[#allocation27_spill] sm:$0xff] %v9413_v46  ;;  %12899 = vst [vmem:[#allocation28_spill] sm:$0xff] %v9417_v47  ;;  %v9425_v49 = vld [vmem:[#allocation4 + $0x230] ss:$8 sps:$4 sm:$0xff]   ;;  %v9429_v50 = vld [vmem:[#allocation4 + $0x244] ss:$8 sps:$4 sm:$0xff]  }
 0x244   :  { %1734 = vmatprep.subr.bf16.mxu0 %v9033_v39  ;;  %1901 = vmatprep.subr.bf16.mxu1 %v9033_v39  ;;  %12900 = vst [vmem:[#allocation29_spill] sm:$0xff] %v9421_v48  ;;  %12901 = vst [vmem:[#allocation30_spill] sm:$0xff] %v9425_v49  ;;  %v9433_v51 = vld [vmem:[#allocation4 + $0x240] ss:$8 sps:$4 sm:$0xff]   ;;  %v9437_v52 = vld [vmem:[#allocation4 + $0x254] ss:$8 sps:$4 sm:$0xff]  }
 0x245   :  { %v9307_v9 = vpack.c.bf16 %v1318_v4, %v1317_v56  ;;  %12902 = vst [vmem:[#allocation31_spill] sm:$0xff] %v9429_v50  ;;  %12903 = vst [vmem:[#allocation32_spill] sm:$0xff] %v9433_v51  ;;  %v9441_v53 = vld [vmem:[#allocation4 + $0x250] ss:$8 sps:$4 sm:$0xff]   ;;  %v9445_v26 = vld [vmem:[#allocation4 + $0x264] ss:$8 sps:$4 sm:$0xff]  }
 0x246   :  { %1724 = vmatmul.mubr.bf16.vlgmr.msra.gmra.mrb[12].mxu0 %v9170_v1  ;;  %1891 = vmatmul.mubr.bf16.vlgmr.msra.gmra.mrb[12].mxu1 %v9175_v24  ;;  %v12886_v24 = vld [vmem:[#allocation16_spill] sm:$0xff]  ;;  %v12887_v1 = vld [vmem:[#allocation17_spill] sm:$0xff]  ;;  %12904 = vst [vmem:[#allocation12_spill] sm:$0xff] %v9437_v52  ;;  %12905 = vst [vmem:[#allocation13_spill] sm:$0xff] %v9441_v53 }
 0x247   :  { %12885 = vst [vmem:[#allocation26_spill] sm:$0xff] %v9307_v9  ;;  %1735 = vmatpush1.bf16.msra.mxu0 %v9051_v62  ;;  %1902 = vmatpush1.bf16.msra.mxu1 %v9051_v62  ;;  %12906 = vst [vmem:[#allocation14_spill] sm:$0xff] %v9445_v26  ;;  %v9449_v56 = vld [vmem:[#allocation4 + $0x260] ss:$8 sps:$4 sm:$0xff]   ;;  %v9453_v2 = vld [vmem:[#allocation4 + $0x274] ss:$8 sps:$4 sm:$0xff]  }
 0x248   :  { %1736 = vmatprep.subr.bf16.mxu0 %v9055_v7  ;;  %1903 = vmatprep.subr.bf16.mxu1 %v9055_v7  ;;  %12907 = vst [vmem:[#allocation16_spill] sm:$0xff] %v9449_v56  ;;  %12908 = vst [vmem:[#allocation17_spill] sm:$0xff] %v9453_v2  ;;  %v7676_v3 = vld [vmem:[%s12305_s0 + $0x28] ss:$112 sps:$4 sm:$0xff]   ;;  %v7677_v4 = vld [vmem:[%s12305_s0 + $0x2c] ss:$112 sps:$4 sm:$0xff]  }
 0x249   :  { %1766 = vmatprep.mubr.bf16.mxu0 %v9300_v5  ;;  %1933 = vmatprep.mubr.bf16.mxu1 %v9305_v6  ;;  %v9463_v9 = vld [vmem:[#allocation4 + $0x270] ss:$8 sps:$4 sm:$0xff]  }
 0x24a   :  { %12909 = vst [vmem:[#allocation18_spill] sm:$0xff] %v9463_v9 }
 0x24b   :  { %1737 = vmatpush1.bf16.msra.mxu0 %v9061_v8  ;;  %1904 = vmatpush1.bf16.msra.mxu1 %v9061_v8 }
 0x24c   :  { %1738 = vmatprep.subr.bf16.mxu0 %v9065_v29  ;;  %1905 = vmatprep.subr.bf16.mxu1 %v9065_v29 }
 0x24f   :  { %1739 = vmatpush1.bf16.msra.mxu0 %v9069_v30  ;;  %1906 = vmatpush1.bf16.msra.mxu1 %v9069_v30 }
 0x250   :  { %1740 = vmatprep.subr.bf16.mxu0 %v9073_v32  ;;  %1907 = vmatprep.subr.bf16.mxu1 %v9073_v32 }
 0x253   :  { %1741 = vmatpush1.bf16.msra.mxu0 %v9077_v33  ;;  %1908 = vmatpush1.bf16.msra.mxu1 %v9077_v33 }
 0x254   :  { %1742 = vmatprep.subr.bf16.mxu0 %v9081_v27  ;;  %1909 = vmatprep.subr.bf16.mxu1 %v9081_v27 }
 0x257   :  { %1743 = vmatpush1.bf16.msra.mxu0 %v9085_v28  ;;  %1910 = vmatpush1.bf16.msra.mxu1 %v9085_v28 }
 0x258   :  { %1744 = vmatprep.subr.bf16.mxu0 %v9089_v59  ;;  %1911 = vmatprep.subr.bf16.mxu1 %v9089_v59 }
 0x25b   :  { %1745 = vmatpush1.bf16.msra.mxu0 %v9093_v60  ;;  %1912 = vmatpush1.bf16.msra.mxu1 %v9093_v60 }
 0x25c   :  { %1746 = vmatprep.subr.bf16.mxu0 %v12886_v24  ;;  %1913 = vmatprep.subr.bf16.mxu1 %v12886_v24 }
 0x25f   :  { %1747 = vmatpush1.bf16.msra.mxu0 %v12887_v1  ;;  %1914 = vmatpush1.bf16.msra.mxu1 %v12887_v1 }
 0x260   :  { %1748 = vmatprep.subr.bf16.mxu0 %v12888_v10  ;;  %1915 = vmatprep.subr.bf16.mxu1 %v12888_v10 }
 0x263   :  { %1749 = vmatpush1.bf16.msra.mxu0 %v12889_v11  ;;  %1916 = vmatpush1.bf16.msra.mxu1 %v12889_v11 }
 0x264   :  { %1750 = vmatprep.subr.bf16.mxu0 %v12890_v12  ;;  %1917 = vmatprep.subr.bf16.mxu1 %v12890_v12 }
 0x267   :  { %1751 = vmatpush1.bf16.msra.mxu0 %v12891_v15  ;;  %1918 = vmatpush1.bf16.msra.mxu1 %v12891_v15 }
 0x268   :  { %1752 = vmatprep.subr.bf16.mxu0 %v12892_v16  ;;  %1919 = vmatprep.subr.bf16.mxu1 %v12892_v16 }
 0x26b   :  { %1753 = vmatpush1.bf16.msra.mxu0 %v12893_v18  ;;  %1920 = vmatpush1.bf16.msra.mxu1 %v12893_v18 }
 0x26c   :  { %1754 = vmatprep.subr.bf16.mxu0 %v12894_v19  ;;  %1921 = vmatprep.subr.bf16.mxu1 %v12894_v19 }
 0x26f   :  { %1755 = vmatpush1.bf16.msra.mxu0 %v12895_v20  ;;  %1922 = vmatpush1.bf16.msra.mxu1 %v12895_v20 }
 0x270   :  { %1756 = vmatprep.subr.bf16.mxu0 %v9137_v25  ;;  %1923 = vmatprep.subr.bf16.mxu1 %v9137_v25 }
 0x273   :  { %1757 = vmatpush1.bf16.msra.mxu0 %v12896_v21  ;;  %1924 = vmatpush1.bf16.msra.mxu1 %v12896_v21 }
 0x274   :  { %1758 = vmatprep.subr.bf16.mxu0 %v9145_v55  ;;  %1925 = vmatprep.subr.bf16.mxu1 %v9145_v55 }
 0x277   :  { %1759 = vmatpush1.bf16.msra.mxu0 %v9149_v58  ;;  %1926 = vmatpush1.bf16.msra.mxu1 %v9149_v58 }
 0x278   :  { %1760 = vmatprep.subr.bf16.mxu0 %v9153_v57  ;;  %1927 = vmatprep.subr.bf16.mxu1 %v9153_v57 }
 0x27b   :  { %1761 = vmatpush1.bf16.msra.mxu0 %v12897_v22  ;;  %1928 = vmatpush1.bf16.msra.mxu1 %v12897_v22 }
 0x27c   :  { %1762 = vmatprep.subr.bf16.mxu0 %v9367_v23  ;;  %1929 = vmatprep.subr.bf16.mxu1 %v9367_v23 }
 0x27f   :  { %1763 = vmatpush1.bf16.msra.mxu0 %v9371_v35  ;;  %1930 = vmatpush1.bf16.msra.mxu1 %v9371_v35 }
 0x280   :  { %1764 = vmatprep.subr.bf16.mxu0 %v9375_v36  ;;  %1931 = vmatprep.subr.bf16.mxu1 %v9375_v36 }
 0x283   :  { %1765 = vmatpush1.bf16.msra.mxu0 %v9389_v41  ;;  %1932 = vmatpush1.bf16.msra.mxu1 %v9389_v41 }
 0x284   :  { %1777 = vmatprep.subr.bf16.mxu0 %v9393_v42  ;;  %1944 = vmatprep.subr.bf16.mxu1 %v9393_v42 }
 0x286   :  { %1767 = vmatmul.mubr.bf16.vlgmr.msra.gmra.mrb[12].mxu0 %v9382_v37  ;;  %1934 = vmatmul.mubr.bf16.vlgmr.msra.gmra.mrb[12].mxu1 %v9387_v38 }
 0x287   :  { %1778 = vmatpush1.bf16.msra.mxu0 %v9399_v43  ;;  %1945 = vmatpush1.bf16.msra.mxu1 %v9399_v43 }
 0x288   :  { %1779 = vmatprep.subr.bf16.mxu0 %v9403_v44  ;;  %1946 = vmatprep.subr.bf16.mxu1 %v9403_v44 }
 0x289   :  { %1809 = vmatprep.mubr.bf16.mxu0 %v12837_v31  ;;  %1976 = vmatprep.mubr.bf16.mxu1 %v12837_v31 }
 0x28b   :  { %1780 = vmatpush1.bf16.msra.mxu0 %v9409_v45  ;;  %1947 = vmatpush1.bf16.msra.mxu1 %v9409_v45 }
 0x28c   :  { %1781 = vmatprep.subr.bf16.mxu0 %v9413_v46  ;;  %1948 = vmatprep.subr.bf16.mxu1 %v9413_v46 }
 0x28f   :  { %1782 = vmatpush1.bf16.msra.mxu0 %v9417_v47  ;;  %1949 = vmatpush1.bf16.msra.mxu1 %v9417_v47 }
 0x290   :  { %1783 = vmatprep.subr.bf16.mxu0 %v9421_v48  ;;  %1950 = vmatprep.subr.bf16.mxu1 %v9421_v48 }
 0x293   :  { %1784 = vmatpush1.bf16.msra.mxu0 %v9425_v49  ;;  %1951 = vmatpush1.bf16.msra.mxu1 %v9425_v49 }
 0x294   :  { %1785 = vmatprep.subr.bf16.mxu0 %v9429_v50  ;;  %1952 = vmatprep.subr.bf16.mxu1 %v9429_v50 }
 0x297   :  { %1786 = vmatpush1.bf16.msra.mxu0 %v9433_v51  ;;  %1953 = vmatpush1.bf16.msra.mxu1 %v9433_v51 }
 0x298   :  { %1787 = vmatprep.subr.bf16.mxu0 %v9437_v52  ;;  %1954 = vmatprep.subr.bf16.mxu1 %v9437_v52 }
 0x29b   :  { %1788 = vmatpush1.bf16.msra.mxu0 %v9441_v53  ;;  %1955 = vmatpush1.bf16.msra.mxu1 %v9441_v53 }
 0x29c   :  { %1789 = vmatprep.subr.bf16.mxu0 %v9445_v26  ;;  %1956 = vmatprep.subr.bf16.mxu1 %v9445_v26  ;;  %v9475_v26 = vld [vmem:[#allocation4 + $0x14] ss:$8 sps:$4 sm:$0xff]  }
 0x29d   :  { %12912 = vst [vmem:[#allocation21_spill] sm:$0xff] %v9475_v26 }
 0x29f   :  { %1790 = vmatpush1.bf16.msra.mxu0 %v9449_v56  ;;  %1957 = vmatpush1.bf16.msra.mxu1 %v9449_v56  ;;  %v9467_v56 = vld [vmem:[#allocation4 + $0x4] ss:$8 sps:$4 sm:$0xff]  }
 0x2a0   :  { %1791 = vmatprep.subr.bf16.mxu0 %v9453_v2  ;;  %1958 = vmatprep.subr.bf16.mxu1 %v9453_v2  ;;  %12910 = vst [vmem:[#allocation19_spill] sm:$0xff] %v9467_v56  ;;  %v9471_v2 = vld [vmem:[#allocation4] ss:$8 sps:$4 sm:$0xff]  }
 0x2a1   :  { %12911 = vst [vmem:[#allocation20_spill] sm:$0xff] %v9471_v2 }
 0x2a3   :  { %1792 = vmatpush1.bf16.msra.mxu0 %v9463_v9  ;;  %1959 = vmatpush1.bf16.msra.mxu1 %v9463_v9  ;;  %v9481_v9 = vld [vmem:[#allocation4 + $0x10] ss:$8 sps:$4 sm:$0xff]  }
 0x2a4   :  { %2029 = vmatprep.subr.bf16.mxu0 %v9467_v56  ;;  %2196 = vmatprep.subr.bf16.mxu1 %v9467_v56  ;;  %12913 = vst [vmem:[#allocation22_spill] sm:$0xff] %v9481_v9 }
 0x2a6   :  { %1810 = vmatmul.mubr.bf16.vlgmr.msra.gmra.mrb[12].mxu0 %v7676_v3  ;;  %1977 = vmatmul.mubr.bf16.vlgmr.msra.gmra.mrb[12].mxu1 %v7677_v4  ;;  %v9485_v3 = vld [vmem:[#allocation4 + $0x24] ss:$8 sps:$4 sm:$0xff]   ;;  %v9489_v4 = vld [vmem:[#allocation4 + $0x20] ss:$8 sps:$4 sm:$0xff]  }
 0x2a7   :  { %2030 = vmatpush1.bf16.msra.mxu0 %v9471_v2  ;;  %2197 = vmatpush1.bf16.msra.mxu1 %v9471_v2  ;;  %12914 = vst [vmem:[#allocation23_spill] sm:$0xff] %v9485_v3  ;;  %12915 = vst [vmem:[#allocation24_spill] sm:$0xff] %v9489_v4 }
 0x2a8   :  { %2031 = vmatprep.subr.bf16.mxu0 %v9475_v26  ;;  %2198 = vmatprep.subr.bf16.mxu1 %v9475_v26 }
 0x2a9   :  { %2061 = vmatprep.mubr.bf16.mxu0 %v9300_v5  ;;  %2228 = vmatprep.mubr.bf16.mxu1 %v9305_v6  ;;  %v9493_v5 = vld [vmem:[#allocation4 + $0x34] ss:$8 sps:$4 sm:$0xff]   ;;  %v9497_v6 = vld [vmem:[#allocation4 + $0x30] ss:$8 sps:$4 sm:$0xff]  }
 0x2aa   :  { %12916 = vst [vmem:[#allocation25_spill] sm:$0xff] %v9493_v5  ;;  %12917 = vst [vmem:[#allocation33_spill] sm:$0xff] %v9497_v6 }
 0x2ab   :  { %2032 = vmatpush1.bf16.msra.mxu0 %v9481_v9  ;;  %2199 = vmatpush1.bf16.msra.mxu1 %v9481_v9  ;;  %v9501_v9 = vld [vmem:[#allocation4 + $0x44] ss:$8 sps:$4 sm:$0xff]  }
 0x2ac   :  { %2033 = vmatprep.subr.bf16.mxu0 %v9485_v3  ;;  %2200 = vmatprep.subr.bf16.mxu1 %v9485_v3  ;;  %12918 = vst [vmem:[#allocation34_spill] sm:$0xff] %v9501_v9  ;;  %v9505_v3 = vld [vmem:[#allocation4 + $0x40] ss:$8 sps:$4 sm:$0xff]  }
 0x2ad   :  { %12919 = vst [vmem:[#allocation35_spill] sm:$0xff] %v9505_v3 }
 0x2af   :  { %2034 = vmatpush1.bf16.msra.mxu0 %v9489_v4  ;;  %2201 = vmatpush1.bf16.msra.mxu1 %v9489_v4  ;;  %v9509_v4 = vld [vmem:[#allocation4 + $0x54] ss:$8 sps:$4 sm:$0xff]  }
 0x2b0   :  { %2035 = vmatprep.subr.bf16.mxu0 %v9493_v5  ;;  %2202 = vmatprep.subr.bf16.mxu1 %v9493_v5  ;;  %12920 = vst [vmem:[#allocation36_spill] sm:$0xff] %v9509_v4  ;;  %v9513_v5 = vld [vmem:[#allocation4 + $0x50] ss:$8 sps:$4 sm:$0xff]  }
 0x2b1   :  { %12921 = vst [vmem:[#allocation37_spill] sm:$0xff] %v9513_v5 }
 0x2b3   :  { %2036 = vmatpush1.bf16.msra.mxu0 %v9497_v6  ;;  %2203 = vmatpush1.bf16.msra.mxu1 %v9497_v6  ;;  %v9517_v6 = vld [vmem:[#allocation4 + $0x64] ss:$8 sps:$4 sm:$0xff]  }
 0x2b4   :  { %2037 = vmatprep.subr.bf16.mxu0 %v9501_v9  ;;  %2204 = vmatprep.subr.bf16.mxu1 %v9501_v9  ;;  %12922 = vst [vmem:[#allocation38_spill] sm:$0xff] %v9517_v6  ;;  %v9521_v9 = vld [vmem:[#allocation4 + $0x60] ss:$8 sps:$4 sm:$0xff]  }
 0x2b5   :  { %12923 = vst [vmem:[#allocation39_spill] sm:$0xff] %v9521_v9 }
 0x2b7   :  { %2038 = vmatpush1.bf16.msra.mxu0 %v9505_v3  ;;  %2205 = vmatpush1.bf16.msra.mxu1 %v9505_v3  ;;  %v9525_v3 = vld [vmem:[#allocation4 + $0x74] ss:$8 sps:$4 sm:$0xff]  }
 0x2b8   :  { %2039 = vmatprep.subr.bf16.mxu0 %v9509_v4  ;;  %2206 = vmatprep.subr.bf16.mxu1 %v9509_v4  ;;  %12924 = vst [vmem:[#allocation40_spill] sm:$0xff] %v9525_v3  ;;  %v9529_v4 = vld [vmem:[#allocation4 + $0x70] ss:$8 sps:$4 sm:$0xff]  }
 0x2b9   :  { %12925 = vst [vmem:[#allocation41_spill] sm:$0xff] %v9529_v4 }
 0x2bb   :  { %2040 = vmatpush1.bf16.msra.mxu0 %v9513_v5  ;;  %2207 = vmatpush1.bf16.msra.mxu1 %v9513_v5  ;;  %v9533_v5 = vld [vmem:[#allocation4 + $0x84] ss:$8 sps:$4 sm:$0xff]  }
 0x2bc   :  { %2041 = vmatprep.subr.bf16.mxu0 %v9517_v6  ;;  %2208 = vmatprep.subr.bf16.mxu1 %v9517_v6  ;;  %12926 = vst [vmem:[#allocation42_spill] sm:$0xff] %v9533_v5  ;;  %v9537_v6 = vld [vmem:[#allocation4 + $0x80] ss:$8 sps:$4 sm:$0xff]  }
 0x2bd   :  { %12927 = vst [vmem:[#allocation43_spill] sm:$0xff] %v9537_v6 }
 0x2bf   :  { %2042 = vmatpush1.bf16.msra.mxu0 %v9521_v9  ;;  %2209 = vmatpush1.bf16.msra.mxu1 %v9521_v9  ;;  %v9541_v9 = vld [vmem:[#allocation4 + $0x94] ss:$8 sps:$4 sm:$0xff]  }
 0x2c0   :  { %2043 = vmatprep.subr.bf16.mxu0 %v9525_v3  ;;  %2210 = vmatprep.subr.bf16.mxu1 %v9525_v3  ;;  %12928 = vst [vmem:[#allocation44_spill] sm:$0xff] %v9541_v9  ;;  %v9545_v3 = vld [vmem:[#allocation4 + $0x90] ss:$8 sps:$4 sm:$0xff]  }
 0x2c1   :  { %12929 = vst [vmem:[#allocation45_spill] sm:$0xff] %v9545_v3 }
 0x2c3   :  { %2044 = vmatpush1.bf16.msra.mxu0 %v9529_v4  ;;  %2211 = vmatpush1.bf16.msra.mxu1 %v9529_v4  ;;  %v9549_v4 = vld [vmem:[#allocation4 + $0xa4] ss:$8 sps:$4 sm:$0xff]  }
 0x2c4   :  { %2045 = vmatprep.subr.bf16.mxu0 %v9533_v5  ;;  %2212 = vmatprep.subr.bf16.mxu1 %v9533_v5  ;;  %12930 = vst [vmem:[#allocation46_spill] sm:$0xff] %v9549_v4  ;;  %v9553_v5 = vld [vmem:[#allocation4 + $0xa0] ss:$8 sps:$4 sm:$0xff]  }
 0x2c5   :  { %12931 = vst [vmem:[#allocation47_spill] sm:$0xff] %v9553_v5 }
 0x2c7   :  { %2046 = vmatpush1.bf16.msra.mxu0 %v9537_v6  ;;  %2213 = vmatpush1.bf16.msra.mxu1 %v9537_v6  ;;  %v9557_v6 = vld [vmem:[#allocation4 + $0xb4] ss:$8 sps:$4 sm:$0xff]  }
 0x2c8   :  { %2047 = vmatprep.subr.bf16.mxu0 %v9541_v9  ;;  %2214 = vmatprep.subr.bf16.mxu1 %v9541_v9  ;;  %12932 = vst [vmem:[#allocation48_spill] sm:$0xff] %v9557_v6  ;;  %v9561_v9 = vld [vmem:[#allocation4 + $0xb0] ss:$8 sps:$4 sm:$0xff]  }
 0x2c9   :  { %12933 = vst [vmem:[#allocation49_spill] sm:$0xff] %v9561_v9 }
 0x2cb   :  { %2048 = vmatpush1.bf16.msra.mxu0 %v9545_v3  ;;  %2215 = vmatpush1.bf16.msra.mxu1 %v9545_v3  ;;  %v9565_v3 = vld [vmem:[#allocation4 + $0xc4] ss:$8 sps:$4 sm:$0xff]  }
 0x2cc   :  { %2049 = vmatprep.subr.bf16.mxu0 %v9549_v4  ;;  %2216 = vmatprep.subr.bf16.mxu1 %v9549_v4  ;;  %12934 = vst [vmem:[#allocation50_spill] sm:$0xff] %v9565_v3 }
 0x2cf   :  { %2050 = vmatpush1.bf16.msra.mxu0 %v9553_v5  ;;  %2217 = vmatpush1.bf16.msra.mxu1 %v9553_v5 }
 0x2d0   :  { %2051 = vmatprep.subr.bf16.mxu0 %v9557_v6  ;;  %2218 = vmatprep.subr.bf16.mxu1 %v9557_v6 }
 0x2d3   :  { %2052 = vmatpush1.bf16.msra.mxu0 %v9561_v9  ;;  %2219 = vmatpush1.bf16.msra.mxu1 %v9561_v9 }
 0x2d4   :  { %2053 = vmatprep.subr.bf16.mxu0 %v9565_v3  ;;  %2220 = vmatprep.subr.bf16.mxu1 %v9565_v3 }
 0x2d7   :  { %2054 = vmatpush1.bf16.msra.mxu0 %v12881_v13  ;;  %2221 = vmatpush1.bf16.msra.mxu1 %v12881_v13 }
 0x2d8   :  { %2055 = vmatprep.subr.bf16.mxu0 %v12882_v14  ;;  %2222 = vmatprep.subr.bf16.mxu1 %v12882_v14 }
 0x2d9   :  { %v1473_v6 = vpop.f32.mrb[8].mxu0  ;;  %v1640_v5 = vpop.f32.mrb[8].mxu1 }
 0x2da   :  { %v7145_v4 = vadd.f32 %v1473_v6, %v12883_v17  ;;  %v7149_v9 = vadd.f32 %v1640_v5, %v12883_v17  ;;  %v1475_v26 = vpop.f32.mrb[9].mxu0  ;;  %v1642_v2 = vpop.f32.mrb[9].mxu1 }
 0x2db   :  { %v7146_v56 = vadd.f32 %v1475_v26, %v8999_v63  ;;  %v7150_v3 = vadd.f32 %v1642_v2, %v8999_v63  ;;  %v1477_v53 = vpop.f32.mrb[10].mxu0  ;;  %v1644_v52 = vpop.f32.mrb[10].mxu1  ;;  %2056 = vmatpush1.bf16.msra.mxu0 %v12884_v34  ;;  %2223 = vmatpush1.bf16.msra.mxu1 %v12884_v34 }
 0x2dc   :  { %v1482_v13 = vmax.f32 %v7145_v4, 0.0  ;;  %v1649_v14 = vmax.f32 %v7149_v9, 0.0  ;;  %v7147_v51 = vadd.f32 %v1477_v53, %v12883_v17  ;;  %v7151_v6 = vadd.f32 %v1644_v52, %v12883_v17  ;;  %v1479_v50 = vpop.f32.mrb[11].mxu0  ;;  %v1646_v5 = vpop.f32.mrb[11].mxu1  ;;  %2057 = vmatprep.subr.bf16.mxu0 %v9015_v40  ;;  %2224 = vmatprep.subr.bf16.mxu1 %v9015_v40 }
 0x2dd   :  { %v1483_v26 = vmax.f32 %v7146_v56, 0.0  ;;  %v1650_v2 = vmax.f32 %v7150_v3, 0.0  ;;  %v7148_v49 = vadd.f32 %v1479_v50, %v8999_v63  ;;  %v7152_v48 = vadd.f32 %v1646_v5, %v8999_v63  ;;  %v12967_v3 = vld [vmem:[#allocation45_spill] sm:$0xff] }
 0x2de   :  { %v1484_v47 = vmax.f32 %v7147_v51, 0.0  ;;  %v1651_v34 = vmax.f32 %v7151_v6, 0.0  ;;  %v12966_v51 = vld [vmem:[#allocation44_spill] sm:$0xff]  ;;  %v12971_v5 = vld [vmem:[#allocation49_spill] sm:$0xff] }
 0x2df   :  { %v1486_v4 = vmax.f32 %v1482_v13, %v1483_v26  ;;  %v1653_v9 = vmax.f32 %v1649_v14, %v1650_v2  ;;  %v1485_v46 = vmax.f32 %v7148_v49, 0.0  ;;  %v1652_v53 = vmax.f32 %v7152_v48, 0.0  ;;  %2058 = vmatpush1.bf16.msra.mxu0 %v9021_v61  ;;  %2225 = vmatpush1.bf16.msra.mxu1 %v9021_v61  ;;  %v9596_v61 = vld [vmem:[%s12305_s0 + $0x2c] ss:$112 sps:$4 sm:$0xff]   ;;  %v12964_v48 = vld [vmem:[#allocation42_spill] sm:$0xff]  ;;  %v12970_v6 = vld [vmem:[#allocation48_spill] sm:$0xff] }
 0x2e0   :  { %2059 = vmatprep.subr.bf16.mxu0 %v9025_v54  ;;  %2226 = vmatprep.subr.bf16.mxu1 %v9025_v54  ;;  %v9601_v54 = vld [vmem:[%s12305_s0 + $0x30] ss:$112 sps:$4 sm:$0xff]   ;;  %v12965_v49 = vld [vmem:[#allocation43_spill] sm:$0xff] }
 0x2e1   :  { %v1655_v40 = vmax.f32 %v1486_v4, %v1653_v9  ;;  %v1487_v52 = vmax.f32 %v1484_v47, %v1485_v46  ;;  %v1654_v56 = vmax.f32 %v1651_v34, %v1652_v53  ;;  %v12963_v47 = vld [vmem:[#allocation41_spill] sm:$0xff]  ;;  %v12968_v13 = vld [vmem:[#allocation46_spill] sm:$0xff]  ;;  %v12969_v14 = vld [vmem:[#allocation47_spill] sm:$0xff] }
 0x2e2   :  { %v12972_v26 = vld [vmem:[#allocation50_spill] sm:$0xff]  ;;  %v9779_v34 = vld [vmem:[#allocation4 + $0xd4] ss:$8 sps:$4 sm:$0xff]  }
 0x2e3   :  { %v1656_v50 = vmax.f32 %v1487_v52, %v1654_v56  ;;  %2060 = vmatpush1.bf16.msra.mxu0 %v9029_v0  ;;  %2227 = vmatpush1.bf16.msra.mxu1 %v9029_v0  ;;  %v9672_v0 = vld [vmem:[%s12305_s0 + $0x28] ss:$112 sps:$4 sm:$0xff]  }
 0x2e4   :  { %2072 = vmatprep.subr.bf16.mxu0 %v9033_v39  ;;  %2239 = vmatprep.subr.bf16.mxu1 %v9033_v39  ;;  %v9677_v39 = vld [vmem:[%s12305_s0 + $0x2c] ss:$112 sps:$4 sm:$0xff]   ;;  %v9775_v2 = vld [vmem:[#allocation4 + $0xc0] ss:$8 sps:$4 sm:$0xff]  }
 0x2e5   :  { %v9603_v46 = vpack.c.bf16 %v1656_v50, %v1655_v40 }
 0x2e6   :  { %2062 = vmatmul.mubr.bf16.vlgmr.msra.gmra.mrb[16].mxu0 %v9382_v37  ;;  %2229 = vmatmul.mubr.bf16.vlgmr.msra.gmra.mrb[16].mxu1 %v9387_v38  ;;  %v12961_v37 = vld [vmem:[#allocation39_spill] sm:$0xff]  ;;  %v12962_v38 = vld [vmem:[#allocation40_spill] sm:$0xff] }
 0x2e7   :  { %12935 = vst [vmem:[#allocation51_spill] sm:$0xff] %v9603_v46  ;;  %2073 = vmatpush1.bf16.msra.mxu0 %v9051_v62  ;;  %2240 = vmatpush1.bf16.msra.mxu1 %v9051_v62  ;;  %v12937_v62 = vld [vmem:[#allocation28_spill] sm:$0xff] }
 0x2e8   :  { %2074 = vmatprep.subr.bf16.mxu0 %v9055_v7  ;;  %2241 = vmatprep.subr.bf16.mxu1 %v9055_v7  ;;  %v12938_v7 = vld [vmem:[#allocation29_spill] sm:$0xff]  ;;  %12974 = vst [vmem:[#allocation28_spill] sm:$0xff] %v9779_v34 }
 0x2e9   :  { %2104 = vmatprep.mubr.bf16.mxu0 %v9596_v61  ;;  %2271 = vmatprep.mubr.bf16.mxu1 %v9601_v54 }
 0x2eb   :  { %2075 = vmatpush1.bf16.msra.mxu0 %v9061_v8  ;;  %2242 = vmatpush1.bf16.msra.mxu1 %v9061_v8  ;;  %v12939_v8 = vld [vmem:[#allocation30_spill] sm:$0xff] }
 0x2ec   :  { %2076 = vmatprep.subr.bf16.mxu0 %v9065_v29  ;;  %2243 = vmatprep.subr.bf16.mxu1 %v9065_v29  ;;  %v12940_v29 = vld [vmem:[#allocation31_spill] sm:$0xff] }
 0x2ef   :  { %2077 = vmatpush1.bf16.msra.mxu0 %v9069_v30  ;;  %2244 = vmatpush1.bf16.msra.mxu1 %v9069_v30  ;;  %v12941_v30 = vld [vmem:[#allocation32_spill] sm:$0xff] }
 0x2f0   :  { %2078 = vmatprep.subr.bf16.mxu0 %v9073_v32  ;;  %2245 = vmatprep.subr.bf16.mxu1 %v9073_v32  ;;  %v12942_v32 = vld [vmem:[#allocation12_spill] sm:$0xff] }
 0x2f3   :  { %2079 = vmatpush1.bf16.msra.mxu0 %v9077_v33  ;;  %2246 = vmatpush1.bf16.msra.mxu1 %v9077_v33  ;;  %v12943_v33 = vld [vmem:[#allocation13_spill] sm:$0xff] }
 0x2f4   :  { %2080 = vmatprep.subr.bf16.mxu0 %v9081_v27  ;;  %2247 = vmatprep.subr.bf16.mxu1 %v9081_v27  ;;  %v12944_v27 = vld [vmem:[#allocation14_spill] sm:$0xff] }
 0x2f7   :  { %2081 = vmatpush1.bf16.msra.mxu0 %v9085_v28  ;;  %2248 = vmatpush1.bf16.msra.mxu1 %v9085_v28  ;;  %v12945_v28 = vld [vmem:[#allocation16_spill] sm:$0xff] }
 0x2f8   :  { %2082 = vmatprep.subr.bf16.mxu0 %v9089_v59  ;;  %2249 = vmatprep.subr.bf16.mxu1 %v9089_v59  ;;  %v12946_v59 = vld [vmem:[#allocation17_spill] sm:$0xff] }
 0x2fb   :  { %2083 = vmatpush1.bf16.msra.mxu0 %v9093_v60  ;;  %2250 = vmatpush1.bf16.msra.mxu1 %v9093_v60  ;;  %v7684_v60 = vld [vmem:[%s12305_s0 + $0x30] ss:$112 sps:$4 sm:$0xff]  }
 0x2fc   :  { %2084 = vmatprep.subr.bf16.mxu0 %v12886_v24  ;;  %2251 = vmatprep.subr.bf16.mxu1 %v12886_v24  ;;  %v12949_v24 = vld [vmem:[#allocation20_spill] sm:$0xff] }
 0x2ff   :  { %2085 = vmatpush1.bf16.msra.mxu0 %v12887_v1  ;;  %2252 = vmatpush1.bf16.msra.mxu1 %v12887_v1  ;;  %v12950_v1 = vld [vmem:[#allocation21_spill] sm:$0xff] }
 0x300   :  { %2086 = vmatprep.subr.bf16.mxu0 %v12888_v10  ;;  %2253 = vmatprep.subr.bf16.mxu1 %v12888_v10  ;;  %v12951_v10 = vld [vmem:[#allocation22_spill] sm:$0xff] }
 0x303   :  { %2087 = vmatpush1.bf16.msra.mxu0 %v12889_v11  ;;  %2254 = vmatpush1.bf16.msra.mxu1 %v12889_v11  ;;  %v12952_v11 = vld [vmem:[#allocation23_spill] sm:$0xff] }
 0x304   :  { %2088 = vmatprep.subr.bf16.mxu0 %v12890_v12  ;;  %2255 = vmatprep.subr.bf16.mxu1 %v12890_v12  ;;  %v12953_v12 = vld [vmem:[#allocation24_spill] sm:$0xff] }
 0x307   :  { %2089 = vmatpush1.bf16.msra.mxu0 %v12891_v15  ;;  %2256 = vmatpush1.bf16.msra.mxu1 %v12891_v15  ;;  %v12954_v15 = vld [vmem:[#allocation25_spill] sm:$0xff] }
 0x308   :  { %2090 = vmatprep.subr.bf16.mxu0 %v12892_v16  ;;  %2257 = vmatprep.subr.bf16.mxu1 %v12892_v16  ;;  %v12955_v16 = vld [vmem:[#allocation33_spill] sm:$0xff] }
 0x30b   :  { %2091 = vmatpush1.bf16.msra.mxu0 %v12893_v18  ;;  %2258 = vmatpush1.bf16.msra.mxu1 %v12893_v18  ;;  %v12956_v18 = vld [vmem:[#allocation34_spill] sm:$0xff] }
 0x30c   :  { %2092 = vmatprep.subr.bf16.mxu0 %v12894_v19  ;;  %2259 = vmatprep.subr.bf16.mxu1 %v12894_v19  ;;  %v12957_v19 = vld [vmem:[#allocation35_spill] sm:$0xff] }
 0x30f   :  { %2093 = vmatpush1.bf16.msra.mxu0 %v12895_v20  ;;  %2260 = vmatpush1.bf16.msra.mxu1 %v12895_v20  ;;  %v12958_v20 = vld [vmem:[#allocation36_spill] sm:$0xff] }
 0x310   :  { %2094 = vmatprep.subr.bf16.mxu0 %v9137_v25  ;;  %2261 = vmatprep.subr.bf16.mxu1 %v9137_v25  ;;  %v7685_v25 = vld [vmem:[%s12305_s0 + $0x34] ss:$112 sps:$4 sm:$0xff]  }
 0x313   :  { %2095 = vmatpush1.bf16.msra.mxu0 %v12896_v21  ;;  %2262 = vmatpush1.bf16.msra.mxu1 %v12896_v21  ;;  %v12959_v21 = vld [vmem:[#allocation37_spill] sm:$0xff] }
 0x314   :  { %2096 = vmatprep.subr.bf16.mxu0 %v9145_v55  ;;  %2263 = vmatprep.subr.bf16.mxu1 %v9145_v55  ;;  %v12947_v55 = vld [vmem:[#allocation18_spill] sm:$0xff] }
 0x317   :  { %2097 = vmatpush1.bf16.msra.mxu0 %v9149_v58  ;;  %2264 = vmatpush1.bf16.msra.mxu1 %v9149_v58  ;;  %v12948_v58 = vld [vmem:[#allocation19_spill] sm:$0xff] }
 0x318   :  { %2098 = vmatprep.subr.bf16.mxu0 %v9153_v57  ;;  %2265 = vmatprep.subr.bf16.mxu1 %v9153_v57  ;;  %v12936_v57 = vld [vmem:[#allocation27_spill] sm:$0xff] }
 0x319   :  { %12973 = vst [vmem:[#allocation27_spill] sm:$0xff] %v9775_v2 }
 0x31b   :  { %2099 = vmatpush1.bf16.msra.mxu0 %v12897_v22  ;;  %2266 = vmatpush1.bf16.msra.mxu1 %v12897_v22  ;;  %v12960_v22 = vld [vmem:[#allocation38_spill] sm:$0xff] }
 0x31c   :  { %2100 = vmatprep.subr.bf16.mxu0 %v9367_v23  ;;  %2267 = vmatprep.subr.bf16.mxu1 %v9367_v23 }
 0x31f   :  { %2101 = vmatpush1.bf16.msra.mxu0 %v9371_v35  ;;  %2268 = vmatpush1.bf16.msra.mxu1 %v9371_v35 }
 0x320   :  { %2102 = vmatprep.subr.bf16.mxu0 %v9375_v36  ;;  %2269 = vmatprep.subr.bf16.mxu1 %v9375_v36 }
 0x323   :  { %2103 = vmatpush1.bf16.msra.mxu0 %v9389_v41  ;;  %2270 = vmatpush1.bf16.msra.mxu1 %v9389_v41 }
 0x324   :  { %2115 = vmatprep.subr.bf16.mxu0 %v9393_v42  ;;  %2282 = vmatprep.subr.bf16.mxu1 %v9393_v42 }
 0x326   :  { %2105 = vmatmul.mubr.bf16.vlgmr.msra.gmra.mrb[16].mxu0 %v9672_v0  ;;  %2272 = vmatmul.mubr.bf16.vlgmr.msra.gmra.mrb[16].mxu1 %v9677_v39 }
 0x327   :  { %2116 = vmatpush1.bf16.msra.mxu0 %v9399_v43  ;;  %2283 = vmatpush1.bf16.msra.mxu1 %v9399_v43 }
 0x328   :  { %2117 = vmatprep.subr.bf16.mxu0 %v9403_v44  ;;  %2284 = vmatprep.subr.bf16.mxu1 %v9403_v44 }
 0x329   :  { %2147 = vmatprep.mubr.bf16.mxu0 %v12837_v31  ;;  %2314 = vmatprep.mubr.bf16.mxu1 %v12837_v31 }
 0x32b   :  { %2118 = vmatpush1.bf16.msra.mxu0 %v9409_v45  ;;  %2285 = vmatpush1.bf16.msra.mxu1 %v9409_v45 }
 0x32c   :  { %2119 = vmatprep.subr.bf16.mxu0 %v12936_v57  ;;  %2286 = vmatprep.subr.bf16.mxu1 %v12936_v57 }
 0x32f   :  { %2120 = vmatpush1.bf16.msra.mxu0 %v12937_v62  ;;  %2287 = vmatpush1.bf16.msra.mxu1 %v12937_v62 }
 0x330   :  { %2121 = vmatprep.subr.bf16.mxu0 %v12938_v7  ;;  %2288 = vmatprep.subr.bf16.mxu1 %v12938_v7 }
 0x333   :  { %2122 = vmatpush1.bf16.msra.mxu0 %v12939_v8  ;;  %2289 = vmatpush1.bf16.msra.mxu1 %v12939_v8 }
 0x334   :  { %2123 = vmatprep.subr.bf16.mxu0 %v12940_v29  ;;  %2290 = vmatprep.subr.bf16.mxu1 %v12940_v29 }
 0x337   :  { %2124 = vmatpush1.bf16.msra.mxu0 %v12941_v30  ;;  %2291 = vmatpush1.bf16.msra.mxu1 %v12941_v30 }
 0x338   :  { %2125 = vmatprep.subr.bf16.mxu0 %v12942_v32  ;;  %2292 = vmatprep.subr.bf16.mxu1 %v12942_v32 }
 0x33b   :  { %2126 = vmatpush1.bf16.msra.mxu0 %v12943_v33  ;;  %2293 = vmatpush1.bf16.msra.mxu1 %v12943_v33 }
 0x33c   :  { %2127 = vmatprep.subr.bf16.mxu0 %v12944_v27  ;;  %2294 = vmatprep.subr.bf16.mxu1 %v12944_v27 }
 0x33f   :  { %2128 = vmatpush1.bf16.msra.mxu0 %v12945_v28  ;;  %2295 = vmatpush1.bf16.msra.mxu1 %v12945_v28 }
 0x340   :  { %2129 = vmatprep.subr.bf16.mxu0 %v12946_v59  ;;  %2296 = vmatprep.subr.bf16.mxu1 %v12946_v59 }
 0x343   :  { %2130 = vmatpush1.bf16.msra.mxu0 %v12947_v55  ;;  %2297 = vmatpush1.bf16.msra.mxu1 %v12947_v55 }
 0x344   :  { %2367 = vmatprep.subr.bf16.mxu0 %v12948_v58  ;;  %2534 = vmatprep.subr.bf16.mxu1 %v12948_v58 }
 0x346   :  { %2148 = vmatmul.mubr.bf16.vlgmr.msra.gmra.mrb[16].mxu0 %v7684_v60  ;;  %2315 = vmatmul.mubr.bf16.vlgmr.msra.gmra.mrb[16].mxu1 %v7685_v25  ;;  %v9787_v25 = vld [vmem:[#allocation4 + $0xd0] ss:$8 sps:$4 sm:$0xff]  }
 0x347   :  { %2368 = vmatpush1.bf16.msra.mxu0 %v12949_v24  ;;  %2535 = vmatpush1.bf16.msra.mxu1 %v12949_v24  ;;  %12975 = vst [vmem:[#allocation29_spill] sm:$0xff] %v9787_v25 }
 0x348   :  { %2369 = vmatprep.subr.bf16.mxu0 %v12950_v1  ;;  %2536 = vmatprep.subr.bf16.mxu1 %v12950_v1 }
 0x349   :  { %2399 = vmatprep.mubr.bf16.mxu0 %v9596_v61  ;;  %2566 = vmatprep.mubr.bf16.mxu1 %v9601_v54 }
 0x34b   :  { %2370 = vmatpush1.bf16.msra.mxu0 %v12951_v10  ;;  %2537 = vmatpush1.bf16.msra.mxu1 %v12951_v10 }
 0x34c   :  { %2371 = vmatprep.subr.bf16.mxu0 %v12952_v11  ;;  %2538 = vmatprep.subr.bf16.mxu1 %v12952_v11 }
 0x34f   :  { %2372 = vmatpush1.bf16.msra.mxu0 %v12953_v12  ;;  %2539 = vmatpush1.bf16.msra.mxu1 %v12953_v12 }
 0x350   :  { %2373 = vmatprep.subr.bf16.mxu0 %v12954_v15  ;;  %2540 = vmatprep.subr.bf16.mxu1 %v12954_v15 }
 0x353   :  { %2374 = vmatpush1.bf16.msra.mxu0 %v12955_v16  ;;  %2541 = vmatpush1.bf16.msra.mxu1 %v12955_v16 }
 0x354   :  { %2375 = vmatprep.subr.bf16.mxu0 %v12956_v18  ;;  %2542 = vmatprep.subr.bf16.mxu1 %v12956_v18 }
 0x357   :  { %2376 = vmatpush1.bf16.msra.mxu0 %v12957_v19  ;;  %2543 = vmatpush1.bf16.msra.mxu1 %v12957_v19 }
 0x358   :  { %2377 = vmatprep.subr.bf16.mxu0 %v12958_v20  ;;  %2544 = vmatprep.subr.bf16.mxu1 %v12958_v20 }
 0x35b   :  { %2378 = vmatpush1.bf16.msra.mxu0 %v12959_v21  ;;  %2545 = vmatpush1.bf16.msra.mxu1 %v12959_v21 }
 0x35c   :  { %2379 = vmatprep.subr.bf16.mxu0 %v12960_v22  ;;  %2546 = vmatprep.subr.bf16.mxu1 %v12960_v22 }
 0x35f   :  { %2380 = vmatpush1.bf16.msra.mxu0 %v12961_v37  ;;  %2547 = vmatpush1.bf16.msra.mxu1 %v12961_v37 }
 0x360   :  { %2381 = vmatprep.subr.bf16.mxu0 %v12962_v38  ;;  %2548 = vmatprep.subr.bf16.mxu1 %v12962_v38 }
 0x363   :  { %2382 = vmatpush1.bf16.msra.mxu0 %v12963_v47  ;;  %2549 = vmatpush1.bf16.msra.mxu1 %v12963_v47 }
 0x364   :  { %2383 = vmatprep.subr.bf16.mxu0 %v12964_v48  ;;  %2550 = vmatprep.subr.bf16.mxu1 %v12964_v48 }
 0x367   :  { %2384 = vmatpush1.bf16.msra.mxu0 %v12965_v49  ;;  %2551 = vmatpush1.bf16.msra.mxu1 %v12965_v49 }
 0x368   :  { %2385 = vmatprep.subr.bf16.mxu0 %v12966_v51  ;;  %2552 = vmatprep.subr.bf16.mxu1 %v12966_v51 }
 0x36b   :  { %2386 = vmatpush1.bf16.msra.mxu0 %v12967_v3  ;;  %2553 = vmatpush1.bf16.msra.mxu1 %v12967_v3  ;;  %v9803_v3 = vld [vmem:[#allocation4 + $0xf4] ss:$8 sps:$4 sm:$0xff]  }
 0x36c   :  { %2387 = vmatprep.subr.bf16.mxu0 %v12968_v13  ;;  %2554 = vmatprep.subr.bf16.mxu1 %v12968_v13 }
 0x36f   :  { %2388 = vmatpush1.bf16.msra.mxu0 %v12969_v14  ;;  %2555 = vmatpush1.bf16.msra.mxu1 %v12969_v14 }
 0x370   :  { %2389 = vmatprep.subr.bf16.mxu0 %v12970_v6  ;;  %2556 = vmatprep.subr.bf16.mxu1 %v12970_v6 }
 0x373   :  { %2390 = vmatpush1.bf16.msra.mxu0 %v12971_v5  ;;  %2557 = vmatpush1.bf16.msra.mxu1 %v12971_v5  ;;  %v9793_v5 = vld [vmem:[#allocation4 + $0xe4] ss:$8 sps:$4 sm:$0xff]  }
 0x374   :  { %2391 = vmatprep.subr.bf16.mxu0 %v12972_v26  ;;  %2558 = vmatprep.subr.bf16.mxu1 %v12972_v26 }
 0x377   :  { %2392 = vmatpush1.bf16.msra.mxu0 %v9775_v2  ;;  %2559 = vmatpush1.bf16.msra.mxu1 %v9775_v2 }
 0x378   :  { %2393 = vmatprep.subr.bf16.mxu0 %v9779_v34  ;;  %2560 = vmatprep.subr.bf16.mxu1 %v9779_v34 }
 0x379   :  { %v1811_v4 = vpop.f32.mrb[12].mxu0  ;;  %v1978_v9 = vpop.f32.mrb[12].mxu1 }
 0x37a   :  { %v7153_v53 = vadd.f32 %v1811_v4, %v12883_v17  ;;  %v7157_v40 = vadd.f32 %v1978_v9, %v12883_v17  ;;  %v1813_v52 = vpop.f32.mrb[13].mxu0  ;;  %v1980_v56 = vpop.f32.mrb[13].mxu1 }
 0x37b   :  { %v7154_v50 = vadd.f32 %v1813_v52, %v8999_v63  ;;  %v7158_v61 = vadd.f32 %v1980_v56, %v8999_v63  ;;  %v1815_v54 = vpop.f32.mrb[14].mxu0  ;;  %v1982_v60 = vpop.f32.mrb[14].mxu1  ;;  %2394 = vmatpush1.bf16.msra.mxu0 %v9787_v25  ;;  %2561 = vmatpush1.bf16.msra.mxu1 %v9787_v25 }
 0x37c   :  { %v1820_v46 = vmax.f32 %v7153_v53, 0.0  ;;  %v1987_v34 = vmax.f32 %v7157_v40, 0.0  ;;  %v7155_v4 = vadd.f32 %v1815_v54, %v12883_v17  ;;  %v7159_v9 = vadd.f32 %v1982_v60, %v12883_v17  ;;  %v1817_v2 = vpop.f32.mrb[15].mxu0  ;;  %v1984_v26 = vpop.f32.mrb[15].mxu1  ;;  %2395 = vmatprep.subr.bf16.mxu0 %v9793_v5  ;;  %2562 = vmatprep.subr.bf16.mxu1 %v9793_v5  ;;  %v9799_v17 = vld [vmem:[#allocation4 + $0xe0] ss:$8 sps:$4 sm:$0xff]  }
 0x37d   :  { %v1821_v52 = vmax.f32 %v7154_v50, 0.0  ;;  %v1988_v56 = vmax.f32 %v7158_v61, 0.0  ;;  %v7156_v6 = vadd.f32 %v1817_v2, %v8999_v63  ;;  %v7160_v25 = vadd.f32 %v1984_v26, %v8999_v63 }
 0x37e   :  { %v1822_v53 = vmax.f32 %v7155_v4, 0.0  ;;  %v1989_v40 = vmax.f32 %v7159_v9, 0.0  ;;  %v9833_v4 = vld [vmem:[#allocation4 + $0x114] ss:$8 sps:$4 sm:$0xff]   ;;  %v9839_v9 = vld [vmem:[#allocation4 + $0x110] ss:$8 sps:$4 sm:$0xff]  }
 0x37f   :  { %v1824_v14 = vmax.f32 %v1820_v46, %v1821_v52  ;;  %v1991_v54 = vmax.f32 %v1987_v34, %v1988_v56  ;;  %v1823_v13 = vmax.f32 %v7156_v6, 0.0  ;;  %v1990_v60 = vmax.f32 %v7160_v25, 0.0  ;;  %2396 = vmatpush1.bf16.msra.mxu0 %v9799_v17  ;;  %2563 = vmatpush1.bf16.msra.mxu1 %v9799_v17  ;;  %v9807_v46 = vld [vmem:[#allocation4 + $0xf0] ss:$8 sps:$4 sm:$0xff]   ;;  %v9811_v6 = vld [vmem:[#allocation4 + $0x104] ss:$8 sps:$4 sm:$0xff]  }
 0x380   :  { %2397 = vmatprep.subr.bf16.mxu0 %v9803_v3  ;;  %2564 = vmatprep.subr.bf16.mxu1 %v9803_v3  ;;  %v9829_v25 = vld [vmem:[#allocation4 + $0x100] ss:$8 sps:$4 sm:$0xff]   ;;  %v9851_v52 = vld [vmem:[#allocation4 + $0x134] ss:$8 sps:$4 sm:$0xff]   ;;  %v9855_v56 = vld [vmem:[#allocation4 + $0x130] ss:$8 sps:$4 sm:$0xff]  }
 0x381   :  { %v1993_v2 = vmax.f32 %v1824_v14, %v1991_v54  ;;  %v1825_v26 = vmax.f32 %v1822_v53, %v1823_v13  ;;  %v1992_v50 = vmax.f32 %v1989_v40, %v1990_v60  ;;  %v9820_v13 = vld [vmem:[%s12305_s0 + $0x34] ss:$112 sps:$4 sm:$0xff]   ;;  %v9825_v14 = vld [vmem:[%s12305_s0 + $0x38] ss:$112 sps:$4 sm:$0xff]  }
 0x382   :  { %v9859_v53 = vld [vmem:[#allocation4 + $0x144] ss:$8 sps:$4 sm:$0xff]   ;;  %v9863_v40 = vld [vmem:[#allocation4 + $0x140] ss:$8 sps:$4 sm:$0xff]   ;;  %v9867_v54 = vld [vmem:[#allocation4 + $0x154] ss:$8 sps:$4 sm:$0xff]  }
 0x383   :  { %v1994_v61 = vmax.f32 %v1825_v26, %v1992_v50  ;;  %2398 = vmatpush1.bf16.msra.mxu0 %v9807_v46  ;;  %2565 = vmatpush1.bf16.msra.mxu1 %v9807_v46  ;;  %v9871_v60 = vld [vmem:[#allocation4 + $0x150] ss:$8 sps:$4 sm:$0xff]   ;;  %v9879_v26 = vld [vmem:[#allocation4 + $0x160] ss:$8 sps:$4 sm:$0xff]   ;;  %v9883_v50 = vld [vmem:[#allocation4 + $0x174] ss:$8 sps:$4 sm:$0xff]  }
 0x384   :  { %2410 = vmatprep.subr.bf16.mxu0 %v9811_v6  ;;  %2577 = vmatprep.subr.bf16.mxu1 %v9811_v6  ;;  %12978 = vst [vmem:[#allocation32_spill] sm:$0xff] %v9879_v26  ;;  %12979 = vst [vmem:[#allocation12_spill] sm:$0xff] %v9883_v50 }
 0x385   :  { %v9815_v34 = vpack.c.bf16 %v1994_v61, %v1993_v2  ;;  %v9875_v2 = vld [vmem:[#allocation4 + $0x164] ss:$8 sps:$4 sm:$0xff]   ;;  %v9887_v61 = vld [vmem:[#allocation4 + $0x170] ss:$8 sps:$4 sm:$0xff]  }
 0x386   :  { %2400 = vmatmul.mubr.bf16.vlgmr.msra.gmra.mrb[20].mxu0 %v9672_v0  ;;  %2567 = vmatmul.mubr.bf16.vlgmr.msra.gmra.mrb[20].mxu1 %v9677_v39  ;;  %v9843_v0 = vld [vmem:[#allocation4 + $0x124] ss:$8 sps:$4 sm:$0xff]   ;;  %v9847_v39 = vld [vmem:[#allocation4 + $0x120] ss:$8 sps:$4 sm:$0xff]   ;;  %12977 = vst [vmem:[#allocation31_spill] sm:$0xff] %v9875_v2  ;;  %12980 = vst [vmem:[#allocation13_spill] sm:$0xff] %v9887_v61 }
 0x387   :  { %12976 = vst [vmem:[#allocation30_spill] sm:$0xff] %v9815_v34  ;;  %2411 = vmatpush1.bf16.msra.mxu0 %v9829_v25  ;;  %2578 = vmatpush1.bf16.msra.mxu1 %v9829_v25  ;;  %v9891_v34 = vld [vmem:[#allocation4 + $0x184] ss:$8 sps:$4 sm:$0xff]  }
 0x388   :  { %2412 = vmatprep.subr.bf16.mxu0 %v9833_v4  ;;  %2579 = vmatprep.subr.bf16.mxu1 %v9833_v4  ;;  %12981 = vst [vmem:[#allocation14_spill] sm:$0xff] %v9891_v34 }
 0x389   :  { %2442 = vmatprep.mubr.bf16.mxu0 %v9820_v13  ;;  %2609 = vmatprep.mubr.bf16.mxu1 %v9825_v14 }
 0x38b   :  { %2413 = vmatpush1.bf16.msra.mxu0 %v9839_v9  ;;  %2580 = vmatpush1.bf16.msra.mxu1 %v9839_v9 }
 0x38c   :  { %2414 = vmatprep.subr.bf16.mxu0 %v9843_v0  ;;  %2581 = vmatprep.subr.bf16.mxu1 %v9843_v0 }
 0x38f   :  { %2415 = vmatpush1.bf16.msra.mxu0 %v9847_v39  ;;  %2582 = vmatpush1.bf16.msra.mxu1 %v9847_v39 }
 0x390   :  { %2416 = vmatprep.subr.bf16.mxu0 %v9851_v52  ;;  %2583 = vmatprep.subr.bf16.mxu1 %v9851_v52 }
 0x393   :  { %2417 = vmatpush1.bf16.msra.mxu0 %v9855_v56  ;;  %2584 = vmatpush1.bf16.msra.mxu1 %v9855_v56 }
 0x394   :  { %2418 = vmatprep.subr.bf16.mxu0 %v9859_v53  ;;  %2585 = vmatprep.subr.bf16.mxu1 %v9859_v53 }
 0x397   :  { %2419 = vmatpush1.bf16.msra.mxu0 %v9863_v40  ;;  %2586 = vmatpush1.bf16.msra.mxu1 %v9863_v40 }
 0x398   :  { %2420 = vmatprep.subr.bf16.mxu0 %v9867_v54  ;;  %2587 = vmatprep.subr.bf16.mxu1 %v9867_v54 }
 0x39b   :  { %2421 = vmatpush1.bf16.msra.mxu0 %v9871_v60  ;;  %2588 = vmatpush1.bf16.msra.mxu1 %v9871_v60 }
 0x39c   :  { %2422 = vmatprep.subr.bf16.mxu0 %v9875_v2  ;;  %2589 = vmatprep.subr.bf16.mxu1 %v9875_v2  ;;  %v9895_v2 = vld [vmem:[#allocation4 + $0x180] ss:$8 sps:$4 sm:$0xff]  }
 0x39d   :  { %12982 = vst [vmem:[#allocation16_spill] sm:$0xff] %v9895_v2 }
 0x39f   :  { %2423 = vmatpush1.bf16.msra.mxu0 %v9879_v26  ;;  %2590 = vmatpush1.bf16.msra.mxu1 %v9879_v26  ;;  %v9899_v26 = vld [vmem:[#allocation4 + $0x194] ss:$8 sps:$4 sm:$0xff]  }
 0x3a0   :  { %2424 = vmatprep.subr.bf16.mxu0 %v9883_v50  ;;  %2591 = vmatprep.subr.bf16.mxu1 %v9883_v50  ;;  %12983 = vst [vmem:[#allocation17_spill] sm:$0xff] %v9899_v26  ;;  %v9903_v50 = vld [vmem:[#allocation4 + $0x190] ss:$8 sps:$4 sm:$0xff]  }
 0x3a1   :  { %12984 = vst [vmem:[#allocation18_spill] sm:$0xff] %v9903_v50 }
 0x3a3   :  { %2425 = vmatpush1.bf16.msra.mxu0 %v9887_v61  ;;  %2592 = vmatpush1.bf16.msra.mxu1 %v9887_v61  ;;  %v9907_v61 = vld [vmem:[#allocation4 + $0x1a4] ss:$8 sps:$4 sm:$0xff]  }
 0x3a4   :  { %2426 = vmatprep.subr.bf16.mxu0 %v9891_v34  ;;  %2593 = vmatprep.subr.bf16.mxu1 %v9891_v34  ;;  %12985 = vst [vmem:[#allocation19_spill] sm:$0xff] %v9907_v61  ;;  %v9911_v34 = vld [vmem:[#allocation4 + $0x1a0] ss:$8 sps:$4 sm:$0xff]  }
 0x3a5   :  { %12986 = vst [vmem:[#allocation20_spill] sm:$0xff] %v9911_v34 }
 0x3a7   :  { %2427 = vmatpush1.bf16.msra.mxu0 %v9895_v2  ;;  %2594 = vmatpush1.bf16.msra.mxu1 %v9895_v2  ;;  %v9915_v2 = vld [vmem:[#allocation4 + $0x1b4] ss:$8 sps:$4 sm:$0xff]  }
 0x3a8   :  { %2428 = vmatprep.subr.bf16.mxu0 %v9899_v26  ;;  %2595 = vmatprep.subr.bf16.mxu1 %v9899_v26  ;;  %12987 = vst [vmem:[#allocation21_spill] sm:$0xff] %v9915_v2  ;;  %v9919_v26 = vld [vmem:[#allocation4 + $0x1b0] ss:$8 sps:$4 sm:$0xff]  }
 0x3ab   :  { %2429 = vmatpush1.bf16.msra.mxu0 %v9903_v50  ;;  %2596 = vmatpush1.bf16.msra.mxu1 %v9903_v50  ;;  %v9923_v50 = vld [vmem:[#allocation4 + $0x1c4] ss:$8 sps:$4 sm:$0xff]  }
 0x3ac   :  { %2430 = vmatprep.subr.bf16.mxu0 %v9907_v61  ;;  %2597 = vmatprep.subr.bf16.mxu1 %v9907_v61  ;;  %v9927_v61 = vld [vmem:[#allocation4 + $0x1c0] ss:$8 sps:$4 sm:$0xff]  }
 0x3af   :  { %2431 = vmatpush1.bf16.msra.mxu0 %v9911_v34  ;;  %2598 = vmatpush1.bf16.msra.mxu1 %v9911_v34  ;;  %v9931_v34 = vld [vmem:[#allocation4 + $0x1d4] ss:$8 sps:$4 sm:$0xff]  }
 0x3b0   :  { %2432 = vmatprep.subr.bf16.mxu0 %v9915_v2  ;;  %2599 = vmatprep.subr.bf16.mxu1 %v9915_v2  ;;  %12988 = vst [vmem:[#allocation22_spill] sm:$0xff] %v9931_v34  ;;  %v9935_v2 = vld [vmem:[#allocation4 + $0x1d0] ss:$8 sps:$4 sm:$0xff]  }
 0x3b1   :  { %12989 = vst [vmem:[#allocation23_spill] sm:$0xff] %v9935_v2 }
 0x3b3   :  { %2433 = vmatpush1.bf16.msra.mxu0 %v9919_v26  ;;  %2600 = vmatpush1.bf16.msra.mxu1 %v9919_v26 }
 0x3b4   :  { %2434 = vmatprep.subr.bf16.mxu0 %v9923_v50  ;;  %2601 = vmatprep.subr.bf16.mxu1 %v9923_v50 }
 0x3b7   :  { %2435 = vmatpush1.bf16.msra.mxu0 %v9927_v61  ;;  %2602 = vmatpush1.bf16.msra.mxu1 %v9927_v61 }
 0x3b8   :  { %2436 = vmatprep.subr.bf16.mxu0 %v9931_v34  ;;  %2603 = vmatprep.subr.bf16.mxu1 %v9931_v34  ;;  %v9948_v34 = vld [vmem:[%s12305_s0 + $0x30] ss:$112 sps:$4 sm:$0xff]  }
 0x3bb   :  { %2437 = vmatpush1.bf16.msra.mxu0 %v9935_v2  ;;  %2604 = vmatpush1.bf16.msra.mxu1 %v9935_v2  ;;  %v9953_v2 = vld [vmem:[%s12305_s0 + $0x34] ss:$112 sps:$4 sm:$0xff]  }
 0x3bc   :  { %2438 = vmatprep.subr.bf16.mxu0 %v9367_v23  ;;  %2605 = vmatprep.subr.bf16.mxu1 %v9367_v23  ;;  %v7692_v23 = vld [vmem:[%s12305_s0 + $0x38] ss:$112 sps:$4 sm:$0xff]  }
 0x3bf   :  { %2439 = vmatpush1.bf16.msra.mxu0 %v9371_v35  ;;  %2606 = vmatpush1.bf16.msra.mxu1 %v9371_v35  ;;  %v7693_v35 = vld [vmem:[%s12305_s0 + $0x3c] ss:$112 sps:$4 sm:$0xff]  }
 0x3c0   :  { %2440 = vmatprep.subr.bf16.mxu0 %v9375_v36  ;;  %2607 = vmatprep.subr.bf16.mxu1 %v9375_v36  ;;  %v12990_v36 = vld [vmem:[#allocation45_spill] sm:$0xff] }
 0x3c3   :  { %2441 = vmatpush1.bf16.msra.mxu0 %v9389_v41  ;;  %2608 = vmatpush1.bf16.msra.mxu1 %v9389_v41  ;;  %v12991_v41 = vld [vmem:[#allocation46_spill] sm:$0xff] }
 0x3c4   :  { %2453 = vmatprep.subr.bf16.mxu0 %v9393_v42  ;;  %2620 = vmatprep.subr.bf16.mxu1 %v9393_v42  ;;  %v12992_v42 = vld [vmem:[#allocation47_spill] sm:$0xff] }
 0x3c6   :  { %2443 = vmatmul.mubr.bf16.vlgmr.msra.gmra.mrb[20].mxu0 %v9948_v34  ;;  %2610 = vmatmul.mubr.bf16.vlgmr.msra.gmra.mrb[20].mxu1 %v9953_v2 }
 0x3c7   :  { %2454 = vmatpush1.bf16.msra.mxu0 %v9399_v43  ;;  %2621 = vmatpush1.bf16.msra.mxu1 %v9399_v43  ;;  %v12993_v43 = vld [vmem:[#allocation48_spill] sm:$0xff] }
 0x3c8   :  { %2455 = vmatprep.subr.bf16.mxu0 %v9403_v44  ;;  %2622 = vmatprep.subr.bf16.mxu1 %v9403_v44  ;;  %v12994_v44 = vld [vmem:[#allocation49_spill] sm:$0xff] }
 0x3c9   :  { %2485 = vmatprep.mubr.bf16.mxu0 %v12837_v31  ;;  %2652 = vmatprep.mubr.bf16.mxu1 %v12837_v31 }
 0x3cb   :  { %2456 = vmatpush1.bf16.msra.mxu0 %v9409_v45  ;;  %2623 = vmatpush1.bf16.msra.mxu1 %v9409_v45  ;;  %v12995_v45 = vld [vmem:[#allocation50_spill] sm:$0xff] }
 0x3cc   :  { %2457 = vmatprep.subr.bf16.mxu0 %v12936_v57  ;;  %2624 = vmatprep.subr.bf16.mxu1 %v12936_v57  ;;  %v12996_v57 = vld [vmem:[#allocation27_spill] sm:$0xff] }
 0x3cf   :  { %2458 = vmatpush1.bf16.msra.mxu0 %v12937_v62  ;;  %2625 = vmatpush1.bf16.msra.mxu1 %v12937_v62  ;;  %v12997_v62 = vld [vmem:[#allocation28_spill] sm:$0xff] }
 0x3d0   :  { %2459 = vmatprep.subr.bf16.mxu0 %v12938_v7  ;;  %2626 = vmatprep.subr.bf16.mxu1 %v12938_v7 }
 0x3d3   :  { %2460 = vmatpush1.bf16.msra.mxu0 %v12939_v8  ;;  %2627 = vmatpush1.bf16.msra.mxu1 %v12939_v8 }
 0x3d4   :  { %2461 = vmatprep.subr.bf16.mxu0 %v12940_v29  ;;  %2628 = vmatprep.subr.bf16.mxu1 %v12940_v29  ;;  %v12998_v29 = vld [vmem:[#allocation11_spill] sm:$0xff] }
 0x3d7   :  { %2462 = vmatpush1.bf16.msra.mxu0 %v12941_v30  ;;  %2629 = vmatpush1.bf16.msra.mxu1 %v12941_v30 }
 0x3d8   :  { %2463 = vmatprep.subr.bf16.mxu0 %v12942_v32  ;;  %2630 = vmatprep.subr.bf16.mxu1 %v12942_v32 }
 0x3db   :  { %2464 = vmatpush1.bf16.msra.mxu0 %v12943_v33  ;;  %2631 = vmatpush1.bf16.msra.mxu1 %v12943_v33 }
 0x3dc   :  { %2465 = vmatprep.subr.bf16.mxu0 %v12944_v27  ;;  %2632 = vmatprep.subr.bf16.mxu1 %v12944_v27 }
 0x3df   :  { %2466 = vmatpush1.bf16.msra.mxu0 %v12945_v28  ;;  %2633 = vmatpush1.bf16.msra.mxu1 %v12945_v28 }
 0x3e0   :  { %2467 = vmatprep.subr.bf16.mxu0 %v12946_v59  ;;  %2634 = vmatprep.subr.bf16.mxu1 %v12946_v59 }
 0x3e3   :  { %2468 = vmatpush1.bf16.msra.mxu0 %v12947_v55  ;;  %2635 = vmatpush1.bf16.msra.mxu1 %v12947_v55 }
 0x3e4   :  { %2705 = vmatprep.subr.bf16.mxu0 %v12948_v58  ;;  %2872 = vmatprep.subr.bf16.mxu1 %v12948_v58 }
 0x3e6   :  { %2486 = vmatmul.mubr.bf16.vlgmr.msra.gmra.mrb[20].mxu0 %v7692_v23  ;;  %2653 = vmatmul.mubr.bf16.vlgmr.msra.gmra.mrb[20].mxu1 %v7693_v35 }
 0x3e7   :  { %2706 = vmatpush1.bf16.msra.mxu0 %v12949_v24  ;;  %2873 = vmatpush1.bf16.msra.mxu1 %v12949_v24  ;;  %v12999_v24 = vld [vmem:[#allocation29_spill] sm:$0xff] }
 0x3e8   :  { %2707 = vmatprep.subr.bf16.mxu0 %v12950_v1  ;;  %2874 = vmatprep.subr.bf16.mxu1 %v12950_v1 }
 0x3e9   :  { %2737 = vmatprep.mubr.bf16.mxu0 %v9820_v13  ;;  %2904 = vmatprep.mubr.bf16.mxu1 %v9825_v14 }
 0x3eb   :  { %2708 = vmatpush1.bf16.msra.mxu0 %v12951_v10  ;;  %2875 = vmatpush1.bf16.msra.mxu1 %v12951_v10 }
 0x3ec   :  { %2709 = vmatprep.subr.bf16.mxu0 %v12952_v11  ;;  %2876 = vmatprep.subr.bf16.mxu1 %v12952_v11 }
 0x3ef   :  { %2710 = vmatpush1.bf16.msra.mxu0 %v12953_v12  ;;  %2877 = vmatpush1.bf16.msra.mxu1 %v12953_v12 }
 0x3f0   :  { %2711 = vmatprep.subr.bf16.mxu0 %v12954_v15  ;;  %2878 = vmatprep.subr.bf16.mxu1 %v12954_v15 }
 0x3f3   :  { %2712 = vmatpush1.bf16.msra.mxu0 %v12955_v16  ;;  %2879 = vmatpush1.bf16.msra.mxu1 %v12955_v16 }
 0x3f4   :  { %2713 = vmatprep.subr.bf16.mxu0 %v12956_v18  ;;  %2880 = vmatprep.subr.bf16.mxu1 %v12956_v18 }
 0x3f7   :  { %2714 = vmatpush1.bf16.msra.mxu0 %v12957_v19  ;;  %2881 = vmatpush1.bf16.msra.mxu1 %v12957_v19 }
 0x3f8   :  { %2715 = vmatprep.subr.bf16.mxu0 %v12958_v20  ;;  %2882 = vmatprep.subr.bf16.mxu1 %v12958_v20 }
 0x3fb   :  { %2716 = vmatpush1.bf16.msra.mxu0 %v12959_v21  ;;  %2883 = vmatpush1.bf16.msra.mxu1 %v12959_v21 }
 0x3fc   :  { %2717 = vmatprep.subr.bf16.mxu0 %v12960_v22  ;;  %2884 = vmatprep.subr.bf16.mxu1 %v12960_v22 }
 0x3ff   :  { %2718 = vmatpush1.bf16.msra.mxu0 %v12961_v37  ;;  %2885 = vmatpush1.bf16.msra.mxu1 %v12961_v37 }
 0x400   :  { %2719 = vmatprep.subr.bf16.mxu0 %v12962_v38  ;;  %2886 = vmatprep.subr.bf16.mxu1 %v12962_v38 }
 0x403   :  { %2720 = vmatpush1.bf16.msra.mxu0 %v12963_v47  ;;  %2887 = vmatpush1.bf16.msra.mxu1 %v12963_v47 }
 0x404   :  { %2721 = vmatprep.subr.bf16.mxu0 %v12964_v48  ;;  %2888 = vmatprep.subr.bf16.mxu1 %v12964_v48 }
 0x407   :  { %2722 = vmatpush1.bf16.msra.mxu0 %v12965_v49  ;;  %2889 = vmatpush1.bf16.msra.mxu1 %v12965_v49 }
 0x408   :  { %2723 = vmatprep.subr.bf16.mxu0 %v12966_v51  ;;  %2890 = vmatprep.subr.bf16.mxu1 %v12966_v51 }
 0x40b   :  { %2724 = vmatpush1.bf16.msra.mxu0 %v12990_v36  ;;  %2891 = vmatpush1.bf16.msra.mxu1 %v12990_v36  ;;  %v10080_v36 = vld [vmem:[%s12305_s0 + $0x3c] ss:$112 sps:$4 sm:$0xff]  }
 0x40c   :  { %2725 = vmatprep.subr.bf16.mxu0 %v12991_v41  ;;  %2892 = vmatprep.subr.bf16.mxu1 %v12991_v41  ;;  %v10085_v41 = vld [vmem:[%s12305_s0 + $0x40] ss:$112 sps:$4 sm:$0xff]  }
 0x40f   :  { %2726 = vmatpush1.bf16.msra.mxu0 %v12992_v42  ;;  %2893 = vmatpush1.bf16.msra.mxu1 %v12992_v42  ;;  %v13003_v42 = vld [vmem:[#allocation12_spill] sm:$0xff] }
 0x410   :  { %2727 = vmatprep.subr.bf16.mxu0 %v12993_v43  ;;  %2894 = vmatprep.subr.bf16.mxu1 %v12993_v43  ;;  %v13004_v43 = vld [vmem:[#allocation13_spill] sm:$0xff] }
 0x413   :  { %2728 = vmatpush1.bf16.msra.mxu0 %v12994_v44  ;;  %2895 = vmatpush1.bf16.msra.mxu1 %v12994_v44  ;;  %v13005_v44 = vld [vmem:[#allocation14_spill] sm:$0xff] }
 0x414   :  { %2729 = vmatprep.subr.bf16.mxu0 %v12995_v45  ;;  %2896 = vmatprep.subr.bf16.mxu1 %v12995_v45  ;;  %v13006_v45 = vld [vmem:[#allocation16_spill] sm:$0xff] }
 0x417   :  { %2730 = vmatpush1.bf16.msra.mxu0 %v12996_v57  ;;  %2897 = vmatpush1.bf16.msra.mxu1 %v12996_v57 }
 0x418   :  { %2731 = vmatprep.subr.bf16.mxu0 %v12997_v62  ;;  %2898 = vmatprep.subr.bf16.mxu1 %v12997_v62 }
 0x419   :  { %v2149_v7 = vpop.f32.mrb[16].mxu0  ;;  %v2316_v8 = vpop.f32.mrb[16].mxu1 }
 0x41a   :  { %v7161_v30 = vadd.f32 %v2149_v7, %v12998_v29  ;;  %v7165_v32 = vadd.f32 %v2316_v8, %v12998_v29  ;;  %v2151_v33 = vpop.f32.mrb[17].mxu0  ;;  %v2318_v27 = vpop.f32.mrb[17].mxu1  ;;  %v13007_v7 = vld [vmem:[#allocation17_spill] sm:$0xff]  ;;  %v13008_v8 = vld [vmem:[#allocation18_spill] sm:$0xff] }
 0x41b   :  { %v7162_v28 = vadd.f32 %v2151_v33, %v8999_v63  ;;  %v7166_v59 = vadd.f32 %v2318_v27, %v8999_v63  ;;  %v2153_v55 = vpop.f32.mrb[18].mxu0  ;;  %v2320_v58 = vpop.f32.mrb[18].mxu1  ;;  %2732 = vmatpush1.bf16.msra.mxu0 %v12999_v24  ;;  %2899 = vmatpush1.bf16.msra.mxu1 %v12999_v24  ;;  %v13011_v33 = vld [vmem:[#allocation21_spill] sm:$0xff]  ;;  %v13012_v27 = vld [vmem:[#allocation22_spill] sm:$0xff] }
 0x41c   :  { %v2158_v1 = vmax.f32 %v7161_v30, 0.0  ;;  %v2325_v10 = vmax.f32 %v7165_v32, 0.0  ;;  %v7163_v11 = vadd.f32 %v2153_v55, %v12998_v29  ;;  %v7167_v12 = vadd.f32 %v2320_v58, %v12998_v29  ;;  %v2155_v15 = vpop.f32.mrb[19].mxu0  ;;  %v2322_v16 = vpop.f32.mrb[19].mxu1  ;;  %2733 = vmatprep.subr.bf16.mxu0 %v9793_v5  ;;  %2900 = vmatprep.subr.bf16.mxu1 %v9793_v5  ;;  %v13009_v30 = vld [vmem:[#allocation19_spill] sm:$0xff]  ;;  %v13010_v32 = vld [vmem:[#allocation20_spill] sm:$0xff] }
 0x41d   :  { %v2159_v18 = vmax.f32 %v7162_v28, 0.0  ;;  %v2326_v19 = vmax.f32 %v7166_v59, 0.0  ;;  %v7164_v20 = vadd.f32 %v2155_v15, %v8999_v63  ;;  %v7168_v21 = vadd.f32 %v2322_v16, %v8999_v63  ;;  %v13013_v28 = vld [vmem:[#allocation23_spill] sm:$0xff]  ;;  %v10153_v58 = vld [vmem:[#allocation4 + $0x1f4] ss:$8 sps:$4 sm:$0xff]  }
 0x41e   :  { %v2160_v22 = vmax.f32 %v7163_v11, 0.0  ;;  %v2327_v37 = vmax.f32 %v7167_v12, 0.0  ;;  %v10145_v59 = vld [vmem:[#allocation4 + $0x1e4] ss:$8 sps:$4 sm:$0xff]   ;;  %v10149_v55 = vld [vmem:[#allocation4 + $0x1e0] ss:$8 sps:$4 sm:$0xff]  }
 0x41f   :  { %v2162_v38 = vmax.f32 %v2158_v1, %v2159_v18  ;;  %v2329_v47 = vmax.f32 %v2325_v10, %v2326_v19  ;;  %v2161_v48 = vmax.f32 %v7164_v20, 0.0  ;;  %v2328_v49 = vmax.f32 %v7168_v21, 0.0  ;;  %2734 = vmatpush1.bf16.msra.mxu0 %v9799_v17  ;;  %2901 = vmatpush1.bf16.msra.mxu1 %v9799_v17  ;;  %v10160_v1 = vld [vmem:[%s12305_s0 + $0x38] ss:$112 sps:$4 sm:$0xff]   ;;  %v10165_v10 = vld [vmem:[%s12305_s0 + $0x3c] ss:$112 sps:$4 sm:$0xff]  }
 0x420   :  { %2735 = vmatprep.subr.bf16.mxu0 %v9803_v3  ;;  %2902 = vmatprep.subr.bf16.mxu1 %v9803_v3  ;;  %v10167_v11 = vld [vmem:[#allocation4 + $0x1f0] ss:$8 sps:$4 sm:$0xff]   ;;  %v10171_v12 = vld [vmem:[#allocation4 + $0x204] ss:$8 sps:$4 sm:$0xff]   ;;  %v10177_v15 = vld [vmem:[#allocation4 + $0x200] ss:$8 sps:$4 sm:$0xff]  }
 0x421   :  { %v2331_v51 = vmax.f32 %v2162_v38, %v2329_v47  ;;  %v2163_v13 = vmax.f32 %v2160_v22, %v2161_v48  ;;  %v2330_v14 = vmax.f32 %v2327_v37, %v2328_v49  ;;  %v10181_v16 = vld [vmem:[#allocation4 + $0x214] ss:$8 sps:$4 sm:$0xff]   ;;  %v10187_v18 = vld [vmem:[#allocation4 + $0x210] ss:$8 sps:$4 sm:$0xff]   ;;  %v10191_v19 = vld [vmem:[#allocation4 + $0x224] ss:$8 sps:$4 sm:$0xff]  }
 0x422   :  { %13014 = vst [vmem:[#allocation25_spill] sm:$0xff] %v10191_v19  ;;  %v10195_v20 = vld [vmem:[#allocation4 + $0x220] ss:$8 sps:$4 sm:$0xff]   ;;  %v10199_v21 = vld [vmem:[#allocation4 + $0x234] ss:$8 sps:$4 sm:$0xff]  }
 0x423   :  { %v2332_v23 = vmax.f32 %v2163_v13, %v2330_v14  ;;  %2736 = vmatpush1.bf16.msra.mxu0 %v9807_v46  ;;  %2903 = vmatpush1.bf16.msra.mxu1 %v9807_v46  ;;  %13015 = vst [vmem:[#allocation33_spill] sm:$0xff] %v10195_v20  ;;  %13016 = vst [vmem:[#allocation34_spill] sm:$0xff] %v10199_v21  ;;  %v10203_v22 = vld [vmem:[#allocation4 + $0x230] ss:$8 sps:$4 sm:$0xff]   ;;  %v10207_v37 = vld [vmem:[#allocation4 + $0x244] ss:$8 sps:$4 sm:$0xff]  }
 0x424   :  { %2748 = vmatprep.subr.bf16.mxu0 %v9811_v6  ;;  %2915 = vmatprep.subr.bf16.mxu1 %v9811_v6  ;;  %13017 = vst [vmem:[#allocation35_spill] sm:$0xff] %v10203_v22  ;;  %13018 = vst [vmem:[#allocation36_spill] sm:$0xff] %v10207_v37  ;;  %v10211_v38 = vld [vmem:[#allocation4 + $0x240] ss:$8 sps:$4 sm:$0xff]   ;;  %v10215_v47 = vld [vmem:[#allocation4 + $0x254] ss:$8 sps:$4 sm:$0xff]  }
 0x425   :  { %v10075_v35 = vpack.c.bf16 %v2332_v23, %v2331_v51  ;;  %13019 = vst [vmem:[#allocation37_spill] sm:$0xff] %v10211_v38  ;;  %13020 = vst [vmem:[#allocation38_spill] sm:$0xff] %v10215_v47  ;;  %v10219_v48 = vld [vmem:[#allocation4 + $0x250] ss:$8 sps:$4 sm:$0xff]   ;;  %v10223_v49 = vld [vmem:[#allocation4 + $0x264] ss:$8 sps:$4 sm:$0xff]  }
 0x426   :  { %2738 = vmatmul.mubr.bf16.vlgmr.msra.gmra.mrb[24].mxu0 %v9948_v34  ;;  %2905 = vmatmul.mubr.bf16.vlgmr.msra.gmra.mrb[24].mxu1 %v9953_v2  ;;  %v13001_v34 = vld [vmem:[#allocation31_spill] sm:$0xff]  ;;  %v13002_v2 = vld [vmem:[#allocation32_spill] sm:$0xff]  ;;  %13021 = vst [vmem:[#allocation39_spill] sm:$0xff] %v10219_v48  ;;  %13022 = vst [vmem:[#allocation40_spill] sm:$0xff] %v10223_v49 }
 0x427   :  { %13000 = vst [vmem:[#allocation24_spill] sm:$0xff] %v10075_v35  ;;  %2749 = vmatpush1.bf16.msra.mxu0 %v9829_v25  ;;  %2916 = vmatpush1.bf16.msra.mxu1 %v9829_v25  ;;  %v10227_v51 = vld [vmem:[#allocation4 + $0x260] ss:$8 sps:$4 sm:$0xff]   ;;  %v10231_v13 = vld [vmem:[#allocation4 + $0x274] ss:$8 sps:$4 sm:$0xff]  }
 0x428   :  { %2750 = vmatprep.subr.bf16.mxu0 %v9833_v4  ;;  %2917 = vmatprep.subr.bf16.mxu1 %v9833_v4  ;;  %13023 = vst [vmem:[#allocation41_spill] sm:$0xff] %v10227_v51  ;;  %13024 = vst [vmem:[#allocation42_spill] sm:$0xff] %v10231_v13  ;;  %v7700_v14 = vld [vmem:[%s12305_s0 + $0x40] ss:$112 sps:$4 sm:$0xff]   ;;  %v7701_v23 = vld [vmem:[%s12305_s0 + $0x44] ss:$112 sps:$4 sm:$0xff]  }
 0x429   :  { %2780 = vmatprep.mubr.bf16.mxu0 %v10080_v36  ;;  %2947 = vmatprep.mubr.bf16.mxu1 %v10085_v41  ;;  %v10241_v35 = vld [vmem:[#allocation4 + $0x270] ss:$8 sps:$4 sm:$0xff]  }
 0x42a   :  { %13025 = vst [vmem:[#allocation43_spill] sm:$0xff] %v10241_v35 }
 0x42b   :  { %2751 = vmatpush1.bf16.msra.mxu0 %v9839_v9  ;;  %2918 = vmatpush1.bf16.msra.mxu1 %v9839_v9 }
 0x42c   :  { %2752 = vmatprep.subr.bf16.mxu0 %v9843_v0  ;;  %2919 = vmatprep.subr.bf16.mxu1 %v9843_v0 }
 0x42f   :  { %2753 = vmatpush1.bf16.msra.mxu0 %v9847_v39  ;;  %2920 = vmatpush1.bf16.msra.mxu1 %v9847_v39 }
 0x430   :  { %2754 = vmatprep.subr.bf16.mxu0 %v9851_v52  ;;  %2921 = vmatprep.subr.bf16.mxu1 %v9851_v52 }
 0x433   :  { %2755 = vmatpush1.bf16.msra.mxu0 %v9855_v56  ;;  %2922 = vmatpush1.bf16.msra.mxu1 %v9855_v56 }
 0x434   :  { %2756 = vmatprep.subr.bf16.mxu0 %v9859_v53  ;;  %2923 = vmatprep.subr.bf16.mxu1 %v9859_v53 }
 0x437   :  { %2757 = vmatpush1.bf16.msra.mxu0 %v9863_v40  ;;  %2924 = vmatpush1.bf16.msra.mxu1 %v9863_v40 }
 0x438   :  { %2758 = vmatprep.subr.bf16.mxu0 %v9867_v54  ;;  %2925 = vmatprep.subr.bf16.mxu1 %v9867_v54 }
 0x43b   :  { %2759 = vmatpush1.bf16.msra.mxu0 %v9871_v60  ;;  %2926 = vmatpush1.bf16.msra.mxu1 %v9871_v60 }
 0x43c   :  { %2760 = vmatprep.subr.bf16.mxu0 %v13001_v34  ;;  %2927 = vmatprep.subr.bf16.mxu1 %v13001_v34 }
 0x43f   :  { %2761 = vmatpush1.bf16.msra.mxu0 %v13002_v2  ;;  %2928 = vmatpush1.bf16.msra.mxu1 %v13002_v2 }
 0x440   :  { %2762 = vmatprep.subr.bf16.mxu0 %v13003_v42  ;;  %2929 = vmatprep.subr.bf16.mxu1 %v13003_v42 }
 0x443   :  { %2763 = vmatpush1.bf16.msra.mxu0 %v13004_v43  ;;  %2930 = vmatpush1.bf16.msra.mxu1 %v13004_v43 }
 0x444   :  { %2764 = vmatprep.subr.bf16.mxu0 %v13005_v44  ;;  %2931 = vmatprep.subr.bf16.mxu1 %v13005_v44 }
 0x447   :  { %2765 = vmatpush1.bf16.msra.mxu0 %v13006_v45  ;;  %2932 = vmatpush1.bf16.msra.mxu1 %v13006_v45 }
 0x448   :  { %2766 = vmatprep.subr.bf16.mxu0 %v13007_v7  ;;  %2933 = vmatprep.subr.bf16.mxu1 %v13007_v7 }
 0x44b   :  { %2767 = vmatpush1.bf16.msra.mxu0 %v13008_v8  ;;  %2934 = vmatpush1.bf16.msra.mxu1 %v13008_v8 }
 0x44c   :  { %2768 = vmatprep.subr.bf16.mxu0 %v13009_v30  ;;  %2935 = vmatprep.subr.bf16.mxu1 %v13009_v30 }
 0x44f   :  { %2769 = vmatpush1.bf16.msra.mxu0 %v13010_v32  ;;  %2936 = vmatpush1.bf16.msra.mxu1 %v13010_v32 }
 0x450   :  { %2770 = vmatprep.subr.bf16.mxu0 %v13011_v33  ;;  %2937 = vmatprep.subr.bf16.mxu1 %v13011_v33 }
 0x453   :  { %2771 = vmatpush1.bf16.msra.mxu0 %v9919_v26  ;;  %2938 = vmatpush1.bf16.msra.mxu1 %v9919_v26 }
 0x454   :  { %2772 = vmatprep.subr.bf16.mxu0 %v9923_v50  ;;  %2939 = vmatprep.subr.bf16.mxu1 %v9923_v50 }
 0x457   :  { %2773 = vmatpush1.bf16.msra.mxu0 %v9927_v61  ;;  %2940 = vmatpush1.bf16.msra.mxu1 %v9927_v61 }
 0x458   :  { %2774 = vmatprep.subr.bf16.mxu0 %v13012_v27  ;;  %2941 = vmatprep.subr.bf16.mxu1 %v13012_v27 }
 0x45b   :  { %2775 = vmatpush1.bf16.msra.mxu0 %v13013_v28  ;;  %2942 = vmatpush1.bf16.msra.mxu1 %v13013_v28 }
 0x45c   :  { %2776 = vmatprep.subr.bf16.mxu0 %v10145_v59  ;;  %2943 = vmatprep.subr.bf16.mxu1 %v10145_v59 }
 0x45f   :  { %2777 = vmatpush1.bf16.msra.mxu0 %v10149_v55  ;;  %2944 = vmatpush1.bf16.msra.mxu1 %v10149_v55 }
 0x460   :  { %2778 = vmatprep.subr.bf16.mxu0 %v10153_v58  ;;  %2945 = vmatprep.subr.bf16.mxu1 %v10153_v58 }
 0x463   :  { %2779 = vmatpush1.bf16.msra.mxu0 %v10167_v11  ;;  %2946 = vmatpush1.bf16.msra.mxu1 %v10167_v11 }
 0x464   :  { %2791 = vmatprep.subr.bf16.mxu0 %v10171_v12  ;;  %2958 = vmatprep.subr.bf16.mxu1 %v10171_v12 }
 0x466   :  { %2781 = vmatmul.mubr.bf16.vlgmr.msra.gmra.mrb[24].mxu0 %v10160_v1  ;;  %2948 = vmatmul.mubr.bf16.vlgmr.msra.gmra.mrb[24].mxu1 %v10165_v10 }
 0x467   :  { %2792 = vmatpush1.bf16.msra.mxu0 %v10177_v15  ;;  %2959 = vmatpush1.bf16.msra.mxu1 %v10177_v15 }
 0x468   :  { %2793 = vmatprep.subr.bf16.mxu0 %v10181_v16  ;;  %2960 = vmatprep.subr.bf16.mxu1 %v10181_v16 }
 0x469   :  { %2823 = vmatprep.mubr.bf16.mxu0 %v12837_v31  ;;  %2990 = vmatprep.mubr.bf16.mxu1 %v12837_v31 }
 0x46b   :  { %2794 = vmatpush1.bf16.msra.mxu0 %v10187_v18  ;;  %2961 = vmatpush1.bf16.msra.mxu1 %v10187_v18 }
 0x46c   :  { %2795 = vmatprep.subr.bf16.mxu0 %v10191_v19  ;;  %2962 = vmatprep.subr.bf16.mxu1 %v10191_v19 }
 0x46f   :  { %2796 = vmatpush1.bf16.msra.mxu0 %v10195_v20  ;;  %2963 = vmatpush1.bf16.msra.mxu1 %v10195_v20 }
 0x470   :  { %2797 = vmatprep.subr.bf16.mxu0 %v10199_v21  ;;  %2964 = vmatprep.subr.bf16.mxu1 %v10199_v21 }
 0x473   :  { %2798 = vmatpush1.bf16.msra.mxu0 %v10203_v22  ;;  %2965 = vmatpush1.bf16.msra.mxu1 %v10203_v22 }
 0x474   :  { %2799 = vmatprep.subr.bf16.mxu0 %v10207_v37  ;;  %2966 = vmatprep.subr.bf16.mxu1 %v10207_v37 }
 0x477   :  { %2800 = vmatpush1.bf16.msra.mxu0 %v10211_v38  ;;  %2967 = vmatpush1.bf16.msra.mxu1 %v10211_v38 }
 0x478   :  { %2801 = vmatprep.subr.bf16.mxu0 %v10215_v47  ;;  %2968 = vmatprep.subr.bf16.mxu1 %v10215_v47 }
 0x47b   :  { %2802 = vmatpush1.bf16.msra.mxu0 %v10219_v48  ;;  %2969 = vmatpush1.bf16.msra.mxu1 %v10219_v48 }
 0x47c   :  { %2803 = vmatprep.subr.bf16.mxu0 %v10223_v49  ;;  %2970 = vmatprep.subr.bf16.mxu1 %v10223_v49  ;;  %v10253_v49 = vld [vmem:[#allocation4 + $0x14] ss:$8 sps:$4 sm:$0xff]  }
 0x47d   :  { %13028 = vst [vmem:[#allocation46_spill] sm:$0xff] %v10253_v49 }
 0x47f   :  { %2804 = vmatpush1.bf16.msra.mxu0 %v10227_v51  ;;  %2971 = vmatpush1.bf16.msra.mxu1 %v10227_v51  ;;  %v10245_v51 = vld [vmem:[#allocation4 + $0x4] ss:$8 sps:$4 sm:$0xff]  }
 0x480   :  { %2805 = vmatprep.subr.bf16.mxu0 %v10231_v13  ;;  %2972 = vmatprep.subr.bf16.mxu1 %v10231_v13  ;;  %13026 = vst [vmem:[#allocation44_spill] sm:$0xff] %v10245_v51  ;;  %v10249_v13 = vld [vmem:[#allocation4] ss:$8 sps:$4 sm:$0xff]  }
 0x481   :  { %13027 = vst [vmem:[#allocation45_spill] sm:$0xff] %v10249_v13 }
 0x483   :  { %2806 = vmatpush1.bf16.msra.mxu0 %v10241_v35  ;;  %2973 = vmatpush1.bf16.msra.mxu1 %v10241_v35  ;;  %v10259_v35 = vld [vmem:[#allocation4 + $0x10] ss:$8 sps:$4 sm:$0xff]  }
 0x484   :  { %3043 = vmatprep.subr.bf16.mxu0 %v10245_v51  ;;  %3210 = vmatprep.subr.bf16.mxu1 %v10245_v51  ;;  %13029 = vst [vmem:[#allocation47_spill] sm:$0xff] %v10259_v35 }
 0x486   :  { %2824 = vmatmul.mubr.bf16.vlgmr.msra.gmra.mrb[24].mxu0 %v7700_v14  ;;  %2991 = vmatmul.mubr.bf16.vlgmr.msra.gmra.mrb[24].mxu1 %v7701_v23  ;;  %v10263_v14 = vld [vmem:[#allocation4 + $0x24] ss:$8 sps:$4 sm:$0xff]   ;;  %v10267_v23 = vld [vmem:[#allocation4 + $0x20] ss:$8 sps:$4 sm:$0xff]  }
 0x487   :  { %3044 = vmatpush1.bf16.msra.mxu0 %v10249_v13  ;;  %3211 = vmatpush1.bf16.msra.mxu1 %v10249_v13  ;;  %13030 = vst [vmem:[#allocation48_spill] sm:$0xff] %v10263_v14  ;;  %13031 = vst [vmem:[#allocation49_spill] sm:$0xff] %v10267_v23 }
 0x488   :  { %3045 = vmatprep.subr.bf16.mxu0 %v10253_v49  ;;  %3212 = vmatprep.subr.bf16.mxu1 %v10253_v49 }
 0x489   :  { %3075 = vmatprep.mubr.bf16.mxu0 %v10080_v36  ;;  %3242 = vmatprep.mubr.bf16.mxu1 %v10085_v41  ;;  %v10271_v36 = vld [vmem:[#allocation4 + $0x34] ss:$8 sps:$4 sm:$0xff]   ;;  %v10275_v41 = vld [vmem:[#allocation4 + $0x30] ss:$8 sps:$4 sm:$0xff]  }
 0x48a   :  { %13032 = vst [vmem:[#allocation50_spill] sm:$0xff] %v10271_v36  ;;  %13033 = vst [vmem:[#allocation27_spill] sm:$0xff] %v10275_v41 }
 0x48b   :  { %3046 = vmatpush1.bf16.msra.mxu0 %v10259_v35  ;;  %3213 = vmatpush1.bf16.msra.mxu1 %v10259_v35  ;;  %v10279_v35 = vld [vmem:[#allocation4 + $0x44] ss:$8 sps:$4 sm:$0xff]  }
 0x48c   :  { %3047 = vmatprep.subr.bf16.mxu0 %v10263_v14  ;;  %3214 = vmatprep.subr.bf16.mxu1 %v10263_v14  ;;  %13034 = vst [vmem:[#allocation28_spill] sm:$0xff] %v10279_v35  ;;  %v10283_v14 = vld [vmem:[#allocation4 + $0x40] ss:$8 sps:$4 sm:$0xff]  }
 0x48d   :  { %13035 = vst [vmem:[#allocation29_spill] sm:$0xff] %v10283_v14 }
 0x48f   :  { %3048 = vmatpush1.bf16.msra.mxu0 %v10267_v23  ;;  %3215 = vmatpush1.bf16.msra.mxu1 %v10267_v23  ;;  %v10287_v23 = vld [vmem:[#allocation4 + $0x54] ss:$8 sps:$4 sm:$0xff]  }
 0x490   :  { %3049 = vmatprep.subr.bf16.mxu0 %v10271_v36  ;;  %3216 = vmatprep.subr.bf16.mxu1 %v10271_v36  ;;  %13036 = vst [vmem:[#allocation31_spill] sm:$0xff] %v10287_v23  ;;  %v10291_v36 = vld [vmem:[#allocation4 + $0x50] ss:$8 sps:$4 sm:$0xff]  }
 0x491   :  { %13037 = vst [vmem:[#allocation32_spill] sm:$0xff] %v10291_v36 }
 0x493   :  { %3050 = vmatpush1.bf16.msra.mxu0 %v10275_v41  ;;  %3217 = vmatpush1.bf16.msra.mxu1 %v10275_v41  ;;  %v10295_v41 = vld [vmem:[#allocation4 + $0x64] ss:$8 sps:$4 sm:$0xff]  }
 0x494   :  { %3051 = vmatprep.subr.bf16.mxu0 %v10279_v35  ;;  %3218 = vmatprep.subr.bf16.mxu1 %v10279_v35  ;;  %13038 = vst [vmem:[#allocation12_spill] sm:$0xff] %v10295_v41  ;;  %v10299_v35 = vld [vmem:[#allocation4 + $0x60] ss:$8 sps:$4 sm:$0xff]  }
 0x495   :  { %13039 = vst [vmem:[#allocation13_spill] sm:$0xff] %v10299_v35 }
 0x497   :  { %3052 = vmatpush1.bf16.msra.mxu0 %v10283_v14  ;;  %3219 = vmatpush1.bf16.msra.mxu1 %v10283_v14  ;;  %v10303_v14 = vld [vmem:[#allocation4 + $0x74] ss:$8 sps:$4 sm:$0xff]  }
 0x498   :  { %3053 = vmatprep.subr.bf16.mxu0 %v10287_v23  ;;  %3220 = vmatprep.subr.bf16.mxu1 %v10287_v23  ;;  %13040 = vst [vmem:[#allocation14_spill] sm:$0xff] %v10303_v14  ;;  %v10307_v23 = vld [vmem:[#allocation4 + $0x70] ss:$8 sps:$4 sm:$0xff]  }
 0x499   :  { %13041 = vst [vmem:[#allocation16_spill] sm:$0xff] %v10307_v23 }
 0x49b   :  { %3054 = vmatpush1.bf16.msra.mxu0 %v10291_v36  ;;  %3221 = vmatpush1.bf16.msra.mxu1 %v10291_v36  ;;  %v10311_v36 = vld [vmem:[#allocation4 + $0x84] ss:$8 sps:$4 sm:$0xff]  }
 0x49c   :  { %3055 = vmatprep.subr.bf16.mxu0 %v10295_v41  ;;  %3222 = vmatprep.subr.bf16.mxu1 %v10295_v41  ;;  %13042 = vst [vmem:[#allocation17_spill] sm:$0xff] %v10311_v36  ;;  %v10315_v41 = vld [vmem:[#allocation4 + $0x80] ss:$8 sps:$4 sm:$0xff]  }
 0x49d   :  { %13043 = vst [vmem:[#allocation18_spill] sm:$0xff] %v10315_v41 }
 0x49f   :  { %3056 = vmatpush1.bf16.msra.mxu0 %v10299_v35  ;;  %3223 = vmatpush1.bf16.msra.mxu1 %v10299_v35  ;;  %v10319_v35 = vld [vmem:[#allocation4 + $0x94] ss:$8 sps:$4 sm:$0xff]  }
 0x4a0   :  { %3057 = vmatprep.subr.bf16.mxu0 %v10303_v14  ;;  %3224 = vmatprep.subr.bf16.mxu1 %v10303_v14  ;;  %13044 = vst [vmem:[#allocation19_spill] sm:$0xff] %v10319_v35  ;;  %v10323_v14 = vld [vmem:[#allocation4 + $0x90] ss:$8 sps:$4 sm:$0xff]  }
 0x4a1   :  { %13045 = vst [vmem:[#allocation20_spill] sm:$0xff] %v10323_v14 }
 0x4a3   :  { %3058 = vmatpush1.bf16.msra.mxu0 %v10307_v23  ;;  %3225 = vmatpush1.bf16.msra.mxu1 %v10307_v23  ;;  %v10327_v23 = vld [vmem:[#allocation4 + $0xa4] ss:$8 sps:$4 sm:$0xff]  }
 0x4a4   :  { %3059 = vmatprep.subr.bf16.mxu0 %v10311_v36  ;;  %3226 = vmatprep.subr.bf16.mxu1 %v10311_v36  ;;  %13046 = vst [vmem:[#allocation21_spill] sm:$0xff] %v10327_v23  ;;  %v10331_v36 = vld [vmem:[#allocation4 + $0xa0] ss:$8 sps:$4 sm:$0xff]  }
 0x4a5   :  { %13047 = vst [vmem:[#allocation22_spill] sm:$0xff] %v10331_v36 }
 0x4a7   :  { %3060 = vmatpush1.bf16.msra.mxu0 %v10315_v41  ;;  %3227 = vmatpush1.bf16.msra.mxu1 %v10315_v41  ;;  %v10335_v41 = vld [vmem:[#allocation4 + $0xb4] ss:$8 sps:$4 sm:$0xff]  }
 0x4a8   :  { %3061 = vmatprep.subr.bf16.mxu0 %v10319_v35  ;;  %3228 = vmatprep.subr.bf16.mxu1 %v10319_v35  ;;  %13048 = vst [vmem:[#allocation23_spill] sm:$0xff] %v10335_v41  ;;  %v10339_v35 = vld [vmem:[#allocation4 + $0xb0] ss:$8 sps:$4 sm:$0xff]  }
 0x4a9   :  { %13049 = vst [vmem:[#allocation52_spill] sm:$0xff] %v10339_v35 }
 0x4ab   :  { %3062 = vmatpush1.bf16.msra.mxu0 %v10323_v14  ;;  %3229 = vmatpush1.bf16.msra.mxu1 %v10323_v14  ;;  %v10343_v14 = vld [vmem:[#allocation4 + $0xc4] ss:$8 sps:$4 sm:$0xff]  }
 0x4ac   :  { %3063 = vmatprep.subr.bf16.mxu0 %v10327_v23  ;;  %3230 = vmatprep.subr.bf16.mxu1 %v10327_v23  ;;  %13050 = vst [vmem:[#allocation53_spill] sm:$0xff] %v10343_v14 }
 0x4af   :  { %3064 = vmatpush1.bf16.msra.mxu0 %v10331_v36  ;;  %3231 = vmatpush1.bf16.msra.mxu1 %v10331_v36 }
 0x4b0   :  { %3065 = vmatprep.subr.bf16.mxu0 %v10335_v41  ;;  %3232 = vmatprep.subr.bf16.mxu1 %v10335_v41 }
 0x4b3   :  { %3066 = vmatpush1.bf16.msra.mxu0 %v10339_v35  ;;  %3233 = vmatpush1.bf16.msra.mxu1 %v10339_v35 }
 0x4b4   :  { %3067 = vmatprep.subr.bf16.mxu0 %v10343_v14  ;;  %3234 = vmatprep.subr.bf16.mxu1 %v10343_v14 }
 0x4b7   :  { %3068 = vmatpush1.bf16.msra.mxu0 %v12996_v57  ;;  %3235 = vmatpush1.bf16.msra.mxu1 %v12996_v57 }
 0x4b8   :  { %3069 = vmatprep.subr.bf16.mxu0 %v12997_v62  ;;  %3236 = vmatprep.subr.bf16.mxu1 %v12997_v62 }
 0x4b9   :  { %v2487_v41 = vpop.f32.mrb[20].mxu0  ;;  %v2654_v36 = vpop.f32.mrb[20].mxu1 }
 0x4ba   :  { %v7169_v23 = vadd.f32 %v2487_v41, %v12998_v29  ;;  %v7173_v35 = vadd.f32 %v2654_v36, %v12998_v29  ;;  %v2489_v49 = vpop.f32.mrb[21].mxu0  ;;  %v2656_v13 = vpop.f32.mrb[21].mxu1 }
 0x4bb   :  { %v7170_v51 = vadd.f32 %v2489_v49, %v8999_v63  ;;  %v7174_v14 = vadd.f32 %v2656_v13, %v8999_v63  ;;  %v2491_v48 = vpop.f32.mrb[22].mxu0  ;;  %v2658_v47 = vpop.f32.mrb[22].mxu1  ;;  %3070 = vmatpush1.bf16.msra.mxu0 %v12999_v24  ;;  %3237 = vmatpush1.bf16.msra.mxu1 %v12999_v24 }
 0x4bc   :  { %v2496_v57 = vmax.f32 %v7169_v23, 0.0  ;;  %v2663_v62 = vmax.f32 %v7173_v35, 0.0  ;;  %v7171_v38 = vadd.f32 %v2491_v48, %v12998_v29  ;;  %v7175_v41 = vadd.f32 %v2658_v47, %v12998_v29  ;;  %v2493_v37 = vpop.f32.mrb[23].mxu0  ;;  %v2660_v36 = vpop.f32.mrb[23].mxu1  ;;  %3071 = vmatprep.subr.bf16.mxu0 %v9793_v5  ;;  %3238 = vmatprep.subr.bf16.mxu1 %v9793_v5 }
 0x4bd   :  { %v2497_v49 = vmax.f32 %v7170_v51, 0.0  ;;  %v2664_v13 = vmax.f32 %v7174_v14, 0.0  ;;  %v7172_v22 = vadd.f32 %v2493_v37, %v8999_v63  ;;  %v7176_v21 = vadd.f32 %v2660_v36, %v8999_v63  ;;  %v13083_v14 = vld [vmem:[#allocation20_spill] sm:$0xff] }
 0x4be   :  { %v2498_v20 = vmax.f32 %v7171_v38, 0.0  ;;  %v2665_v24 = vmax.f32 %v7175_v41, 0.0  ;;  %v13082_v38 = vld [vmem:[#allocation19_spill] sm:$0xff]  ;;  %v13087_v36 = vld [vmem:[#allocation52_spill] sm:$0xff] }
 0x4bf   :  { %v2500_v23 = vmax.f32 %v2496_v57, %v2497_v49  ;;  %v2667_v35 = vmax.f32 %v2663_v62, %v2664_v13  ;;  %v2499_v19 = vmax.f32 %v7172_v22, 0.0  ;;  %v2666_v48 = vmax.f32 %v7176_v21, 0.0  ;;  %3072 = vmatpush1.bf16.msra.mxu0 %v9799_v17  ;;  %3239 = vmatpush1.bf16.msra.mxu1 %v9799_v17  ;;  %v10376_v17 = vld [vmem:[%s12305_s0 + $0x44] ss:$112 sps:$4 sm:$0xff]   ;;  %v13084_v57 = vld [vmem:[#allocation21_spill] sm:$0xff]  ;;  %v13086_v41 = vld [vmem:[#allocation23_spill] sm:$0xff] }
 0x4c0   :  { %3073 = vmatprep.subr.bf16.mxu0 %v9803_v3  ;;  %3240 = vmatprep.subr.bf16.mxu1 %v9803_v3  ;;  %v10381_v3 = vld [vmem:[%s12305_s0 + $0x48] ss:$112 sps:$4 sm:$0xff]   ;;  %v13081_v22 = vld [vmem:[#allocation18_spill] sm:$0xff] }
 0x4c1   :  { %v2669_v5 = vmax.f32 %v2500_v23, %v2667_v35  ;;  %v2501_v47 = vmax.f32 %v2498_v20, %v2499_v19  ;;  %v2668_v51 = vmax.f32 %v2665_v24, %v2666_v48  ;;  %v13079_v19 = vld [vmem:[#allocation16_spill] sm:$0xff]  ;;  %v13080_v20 = vld [vmem:[#allocation17_spill] sm:$0xff]  ;;  %v13085_v62 = vld [vmem:[#allocation22_spill] sm:$0xff] }
 0x4c2   :  { %v13088_v49 = vld [vmem:[#allocation53_spill] sm:$0xff]  ;;  %v10553_v13 = vld [vmem:[#allocation4 + $0xc0] ss:$8 sps:$4 sm:$0xff]  }
 0x4c3   :  { %v2670_v37 = vmax.f32 %v2501_v47, %v2668_v51  ;;  %3074 = vmatpush1.bf16.msra.mxu0 %v9807_v46  ;;  %3241 = vmatpush1.bf16.msra.mxu1 %v9807_v46  ;;  %v10450_v46 = vld [vmem:[%s12305_s0 + $0x40] ss:$112 sps:$4 sm:$0xff]   ;;  %v10557_v24 = vld [vmem:[#allocation4 + $0xd4] ss:$8 sps:$4 sm:$0xff]  }
 0x4c4   :  { %3086 = vmatprep.subr.bf16.mxu0 %v9811_v6  ;;  %3253 = vmatprep.subr.bf16.mxu1 %v9811_v6  ;;  %v10455_v6 = vld [vmem:[%s12305_s0 + $0x44] ss:$112 sps:$4 sm:$0xff]  }
 0x4c5   :  { %v10371_v21 = vpack.c.bf16 %v2670_v37, %v2669_v5 }
 0x4c6   :  { %3076 = vmatmul.mubr.bf16.vlgmr.msra.gmra.mrb[28].mxu0 %v10160_v1  ;;  %3243 = vmatmul.mubr.bf16.vlgmr.msra.gmra.mrb[28].mxu1 %v10165_v10  ;;  %v13077_v1 = vld [vmem:[#allocation13_spill] sm:$0xff]  ;;  %v13078_v10 = vld [vmem:[#allocation14_spill] sm:$0xff] }
 0x4c7   :  { %13051 = vst [vmem:[#allocation54_spill] sm:$0xff] %v10371_v21  ;;  %3087 = vmatpush1.bf16.msra.mxu0 %v9829_v25  ;;  %3254 = vmatpush1.bf16.msra.mxu1 %v9829_v25  ;;  %v13052_v25 = vld [vmem:[#allocation25_spill] sm:$0xff] }
 0x4c8   :  { %3088 = vmatprep.subr.bf16.mxu0 %v9833_v4  ;;  %3255 = vmatprep.subr.bf16.mxu1 %v9833_v4  ;;  %v13053_v4 = vld [vmem:[#allocation33_spill] sm:$0xff]  ;;  %13089 = vst [vmem:[#allocation25_spill] sm:$0xff] %v10553_v13 }
 0x4c9   :  { %3118 = vmatprep.mubr.bf16.mxu0 %v10376_v17  ;;  %3285 = vmatprep.mubr.bf16.mxu1 %v10381_v3  ;;  %13090 = vst [vmem:[#allocation33_spill] sm:$0xff] %v10557_v24 }
 0x4cb   :  { %3089 = vmatpush1.bf16.msra.mxu0 %v9839_v9  ;;  %3256 = vmatpush1.bf16.msra.mxu1 %v9839_v9  ;;  %v13054_v9 = vld [vmem:[#allocation34_spill] sm:$0xff] }
 0x4cc   :  { %3090 = vmatprep.subr.bf16.mxu0 %v9843_v0  ;;  %3257 = vmatprep.subr.bf16.mxu1 %v9843_v0  ;;  %v13055_v0 = vld [vmem:[#allocation35_spill] sm:$0xff] }
 0x4cf   :  { %3091 = vmatpush1.bf16.msra.mxu0 %v9847_v39  ;;  %3258 = vmatpush1.bf16.msra.mxu1 %v9847_v39  ;;  %v13056_v39 = vld [vmem:[#allocation36_spill] sm:$0xff] }
 0x4d0   :  { %3092 = vmatprep.subr.bf16.mxu0 %v9851_v52  ;;  %3259 = vmatprep.subr.bf16.mxu1 %v9851_v52  ;;  %v13057_v52 = vld [vmem:[#allocation37_spill] sm:$0xff] }
 0x4d3   :  { %3093 = vmatpush1.bf16.msra.mxu0 %v9855_v56  ;;  %3260 = vmatpush1.bf16.msra.mxu1 %v9855_v56  ;;  %v13058_v56 = vld [vmem:[#allocation38_spill] sm:$0xff] }
 0x4d4   :  { %3094 = vmatprep.subr.bf16.mxu0 %v9859_v53  ;;  %3261 = vmatprep.subr.bf16.mxu1 %v9859_v53  ;;  %v13059_v53 = vld [vmem:[#allocation39_spill] sm:$0xff] }
 0x4d7   :  { %3095 = vmatpush1.bf16.msra.mxu0 %v9863_v40  ;;  %3262 = vmatpush1.bf16.msra.mxu1 %v9863_v40  ;;  %v13060_v40 = vld [vmem:[#allocation40_spill] sm:$0xff] }
 0x4d8   :  { %3096 = vmatprep.subr.bf16.mxu0 %v9867_v54  ;;  %3263 = vmatprep.subr.bf16.mxu1 %v9867_v54  ;;  %v13061_v54 = vld [vmem:[#allocation41_spill] sm:$0xff] }
 0x4db   :  { %3097 = vmatpush1.bf16.msra.mxu0 %v9871_v60  ;;  %3264 = vmatpush1.bf16.msra.mxu1 %v9871_v60  ;;  %v13062_v60 = vld [vmem:[#allocation42_spill] sm:$0xff] }
 0x4dc   :  { %3098 = vmatprep.subr.bf16.mxu0 %v13001_v34  ;;  %3265 = vmatprep.subr.bf16.mxu1 %v13001_v34  ;;  %v13064_v34 = vld [vmem:[#allocation44_spill] sm:$0xff] }
 0x4df   :  { %3099 = vmatpush1.bf16.msra.mxu0 %v13002_v2  ;;  %3266 = vmatpush1.bf16.msra.mxu1 %v13002_v2  ;;  %v13065_v2 = vld [vmem:[#allocation45_spill] sm:$0xff] }
 0x4e0   :  { %3100 = vmatprep.subr.bf16.mxu0 %v13003_v42  ;;  %3267 = vmatprep.subr.bf16.mxu1 %v13003_v42  ;;  %v13066_v42 = vld [vmem:[#allocation46_spill] sm:$0xff] }
 0x4e3   :  { %3101 = vmatpush1.bf16.msra.mxu0 %v13004_v43  ;;  %3268 = vmatpush1.bf16.msra.mxu1 %v13004_v43  ;;  %v13067_v43 = vld [vmem:[#allocation47_spill] sm:$0xff] }
 0x4e4   :  { %3102 = vmatprep.subr.bf16.mxu0 %v13005_v44  ;;  %3269 = vmatprep.subr.bf16.mxu1 %v13005_v44  ;;  %v13068_v44 = vld [vmem:[#allocation48_spill] sm:$0xff] }
 0x4e7   :  { %3103 = vmatpush1.bf16.msra.mxu0 %v13006_v45  ;;  %3270 = vmatpush1.bf16.msra.mxu1 %v13006_v45  ;;  %v13069_v45 = vld [vmem:[#allocation49_spill] sm:$0xff] }
 0x4e8   :  { %3104 = vmatprep.subr.bf16.mxu0 %v13007_v7  ;;  %3271 = vmatprep.subr.bf16.mxu1 %v13007_v7  ;;  %v13070_v7 = vld [vmem:[#allocation50_spill] sm:$0xff] }
 0x4eb   :  { %3105 = vmatpush1.bf16.msra.mxu0 %v13008_v8  ;;  %3272 = vmatpush1.bf16.msra.mxu1 %v13008_v8  ;;  %v13071_v8 = vld [vmem:[#allocation27_spill] sm:$0xff] }
 0x4ec   :  { %3106 = vmatprep.subr.bf16.mxu0 %v13009_v30  ;;  %3273 = vmatprep.subr.bf16.mxu1 %v13009_v30  ;;  %v13072_v30 = vld [vmem:[#allocation28_spill] sm:$0xff] }
 0x4ef   :  { %3107 = vmatpush1.bf16.msra.mxu0 %v13010_v32  ;;  %3274 = vmatpush1.bf16.msra.mxu1 %v13010_v32  ;;  %v13073_v32 = vld [vmem:[#allocation29_spill] sm:$0xff] }
 0x4f0   :  { %3108 = vmatprep.subr.bf16.mxu0 %v13011_v33  ;;  %3275 = vmatprep.subr.bf16.mxu1 %v13011_v33  ;;  %v13074_v33 = vld [vmem:[#allocation31_spill] sm:$0xff] }
 0x4f3   :  { %3109 = vmatpush1.bf16.msra.mxu0 %v9919_v26  ;;  %3276 = vmatpush1.bf16.msra.mxu1 %v9919_v26  ;;  %v7708_v26 = vld [vmem:[%s12305_s0 + $0x48] ss:$112 sps:$4 sm:$0xff]  }
 0x4f4   :  { %3110 = vmatprep.subr.bf16.mxu0 %v9923_v50  ;;  %3277 = vmatprep.subr.bf16.mxu1 %v9923_v50  ;;  %v7709_v50 = vld [vmem:[%s12305_s0 + $0x4c] ss:$112 sps:$4 sm:$0xff]  }
 0x4f7   :  { %3111 = vmatpush1.bf16.msra.mxu0 %v9927_v61  ;;  %3278 = vmatpush1.bf16.msra.mxu1 %v9927_v61  ;;  %v13063_v61 = vld [vmem:[#allocation43_spill] sm:$0xff] }
 0x4f8   :  { %3112 = vmatprep.subr.bf16.mxu0 %v13012_v27  ;;  %3279 = vmatprep.subr.bf16.mxu1 %v13012_v27  ;;  %v13075_v27 = vld [vmem:[#allocation32_spill] sm:$0xff] }
 0x4fb   :  { %3113 = vmatpush1.bf16.msra.mxu0 %v13013_v28  ;;  %3280 = vmatpush1.bf16.msra.mxu1 %v13013_v28  ;;  %v13076_v28 = vld [vmem:[#allocation12_spill] sm:$0xff] }
 0x4fc   :  { %3114 = vmatprep.subr.bf16.mxu0 %v10145_v59  ;;  %3281 = vmatprep.subr.bf16.mxu1 %v10145_v59 }
 0x4ff   :  { %3115 = vmatpush1.bf16.msra.mxu0 %v10149_v55  ;;  %3282 = vmatpush1.bf16.msra.mxu1 %v10149_v55 }
 0x500   :  { %3116 = vmatprep.subr.bf16.mxu0 %v10153_v58  ;;  %3283 = vmatprep.subr.bf16.mxu1 %v10153_v58 }
 0x503   :  { %3117 = vmatpush1.bf16.msra.mxu0 %v10167_v11  ;;  %3284 = vmatpush1.bf16.msra.mxu1 %v10167_v11 }
 0x504   :  { %3129 = vmatprep.subr.bf16.mxu0 %v10171_v12  ;;  %3296 = vmatprep.subr.bf16.mxu1 %v10171_v12 }
 0x506   :  { %3119 = vmatmul.mubr.bf16.vlgmr.msra.gmra.mrb[28].mxu0 %v10450_v46  ;;  %3286 = vmatmul.mubr.bf16.vlgmr.msra.gmra.mrb[28].mxu1 %v10455_v6 }
 0x507   :  { %3130 = vmatpush1.bf16.msra.mxu0 %v10177_v15  ;;  %3297 = vmatpush1.bf16.msra.mxu1 %v10177_v15 }
 0x508   :  { %3131 = vmatprep.subr.bf16.mxu0 %v10181_v16  ;;  %3298 = vmatprep.subr.bf16.mxu1 %v10181_v16 }
 0x509   :  { %3161 = vmatprep.mubr.bf16.mxu0 %v12837_v31  ;;  %3328 = vmatprep.mubr.bf16.mxu1 %v12837_v31 }
 0x50b   :  { %3132 = vmatpush1.bf16.msra.mxu0 %v10187_v18  ;;  %3299 = vmatpush1.bf16.msra.mxu1 %v10187_v18 }
 0x50c   :  { %3133 = vmatprep.subr.bf16.mxu0 %v13052_v25  ;;  %3300 = vmatprep.subr.bf16.mxu1 %v13052_v25 }
 0x50f   :  { %3134 = vmatpush1.bf16.msra.mxu0 %v13053_v4  ;;  %3301 = vmatpush1.bf16.msra.mxu1 %v13053_v4 }
 0x510   :  { %3135 = vmatprep.subr.bf16.mxu0 %v13054_v9  ;;  %3302 = vmatprep.subr.bf16.mxu1 %v13054_v9 }
 0x513   :  { %3136 = vmatpush1.bf16.msra.mxu0 %v13055_v0  ;;  %3303 = vmatpush1.bf16.msra.mxu1 %v13055_v0 }
 0x514   :  { %3137 = vmatprep.subr.bf16.mxu0 %v13056_v39  ;;  %3304 = vmatprep.subr.bf16.mxu1 %v13056_v39 }
 0x517   :  { %3138 = vmatpush1.bf16.msra.mxu0 %v13057_v52  ;;  %3305 = vmatpush1.bf16.msra.mxu1 %v13057_v52 }
 0x518   :  { %3139 = vmatprep.subr.bf16.mxu0 %v13058_v56  ;;  %3306 = vmatprep.subr.bf16.mxu1 %v13058_v56 }
 0x51b   :  { %3140 = vmatpush1.bf16.msra.mxu0 %v13059_v53  ;;  %3307 = vmatpush1.bf16.msra.mxu1 %v13059_v53 }
 0x51c   :  { %3141 = vmatprep.subr.bf16.mxu0 %v13060_v40  ;;  %3308 = vmatprep.subr.bf16.mxu1 %v13060_v40 }
 0x51f   :  { %3142 = vmatpush1.bf16.msra.mxu0 %v13061_v54  ;;  %3309 = vmatpush1.bf16.msra.mxu1 %v13061_v54 }
 0x520   :  { %3143 = vmatprep.subr.bf16.mxu0 %v13062_v60  ;;  %3310 = vmatprep.subr.bf16.mxu1 %v13062_v60 }
 0x523   :  { %3144 = vmatpush1.bf16.msra.mxu0 %v13063_v61  ;;  %3311 = vmatpush1.bf16.msra.mxu1 %v13063_v61 }
 0x524   :  { %3381 = vmatprep.subr.bf16.mxu0 %v13064_v34  ;;  %3548 = vmatprep.subr.bf16.mxu1 %v13064_v34 }
 0x526   :  { %3162 = vmatmul.mubr.bf16.vlgmr.msra.gmra.mrb[28].mxu0 %v7708_v26  ;;  %3329 = vmatmul.mubr.bf16.vlgmr.msra.gmra.mrb[28].mxu1 %v7709_v50  ;;  %v10565_v50 = vld [vmem:[#allocation4 + $0xd0] ss:$8 sps:$4 sm:$0xff]  }
 0x527   :  { %3382 = vmatpush1.bf16.msra.mxu0 %v13065_v2  ;;  %3549 = vmatpush1.bf16.msra.mxu1 %v13065_v2  ;;  %13091 = vst [vmem:[#allocation34_spill] sm:$0xff] %v10565_v50 }
 0x528   :  { %3383 = vmatprep.subr.bf16.mxu0 %v13066_v42  ;;  %3550 = vmatprep.subr.bf16.mxu1 %v13066_v42 }
 0x529   :  { %3413 = vmatprep.mubr.bf16.mxu0 %v10376_v17  ;;  %3580 = vmatprep.mubr.bf16.mxu1 %v10381_v3 }
 0x52b   :  { %3384 = vmatpush1.bf16.msra.mxu0 %v13067_v43  ;;  %3551 = vmatpush1.bf16.msra.mxu1 %v13067_v43 }
 0x52c   :  { %3385 = vmatprep.subr.bf16.mxu0 %v13068_v44  ;;  %3552 = vmatprep.subr.bf16.mxu1 %v13068_v44 }
 0x52f   :  { %3386 = vmatpush1.bf16.msra.mxu0 %v13069_v45  ;;  %3553 = vmatpush1.bf16.msra.mxu1 %v13069_v45 }
 0x530   :  { %3387 = vmatprep.subr.bf16.mxu0 %v13070_v7  ;;  %3554 = vmatprep.subr.bf16.mxu1 %v13070_v7 }
 0x533   :  { %3388 = vmatpush1.bf16.msra.mxu0 %v13071_v8  ;;  %3555 = vmatpush1.bf16.msra.mxu1 %v13071_v8 }
 0x534   :  { %3389 = vmatprep.subr.bf16.mxu0 %v13072_v30  ;;  %3556 = vmatprep.subr.bf16.mxu1 %v13072_v30 }
 0x537   :  { %3390 = vmatpush1.bf16.msra.mxu0 %v13073_v32  ;;  %3557 = vmatpush1.bf16.msra.mxu1 %v13073_v32 }
 0x538   :  { %3391 = vmatprep.subr.bf16.mxu0 %v13074_v33  ;;  %3558 = vmatprep.subr.bf16.mxu1 %v13074_v33 }
 0x53b   :  { %3392 = vmatpush1.bf16.msra.mxu0 %v13075_v27  ;;  %3559 = vmatpush1.bf16.msra.mxu1 %v13075_v27 }
 0x53c   :  { %3393 = vmatprep.subr.bf16.mxu0 %v13076_v28  ;;  %3560 = vmatprep.subr.bf16.mxu1 %v13076_v28 }
 0x53f   :  { %3394 = vmatpush1.bf16.msra.mxu0 %v13077_v1  ;;  %3561 = vmatpush1.bf16.msra.mxu1 %v13077_v1 }
 0x540   :  { %3395 = vmatprep.subr.bf16.mxu0 %v13078_v10  ;;  %3562 = vmatprep.subr.bf16.mxu1 %v13078_v10 }
 0x543   :  { %3396 = vmatpush1.bf16.msra.mxu0 %v13079_v19  ;;  %3563 = vmatpush1.bf16.msra.mxu1 %v13079_v19 }
 0x544   :  { %3397 = vmatprep.subr.bf16.mxu0 %v13080_v20  ;;  %3564 = vmatprep.subr.bf16.mxu1 %v13080_v20 }
 0x547   :  { %3398 = vmatpush1.bf16.msra.mxu0 %v13081_v22  ;;  %3565 = vmatpush1.bf16.msra.mxu1 %v13081_v22 }
 0x548   :  { %3399 = vmatprep.subr.bf16.mxu0 %v13082_v38  ;;  %3566 = vmatprep.subr.bf16.mxu1 %v13082_v38 }
 0x54b   :  { %3400 = vmatpush1.bf16.msra.mxu0 %v13083_v14  ;;  %3567 = vmatpush1.bf16.msra.mxu1 %v13083_v14  ;;  %v10581_v14 = vld [vmem:[#allocation4 + $0xf4] ss:$8 sps:$4 sm:$0xff]  }
 0x54c   :  { %3401 = vmatprep.subr.bf16.mxu0 %v13084_v57  ;;  %3568 = vmatprep.subr.bf16.mxu1 %v13084_v57 }
 0x54f   :  { %3402 = vmatpush1.bf16.msra.mxu0 %v13085_v62  ;;  %3569 = vmatpush1.bf16.msra.mxu1 %v13085_v62 }
 0x550   :  { %3403 = vmatprep.subr.bf16.mxu0 %v13086_v41  ;;  %3570 = vmatprep.subr.bf16.mxu1 %v13086_v41 }
 0x553   :  { %3404 = vmatpush1.bf16.msra.mxu0 %v13087_v36  ;;  %3571 = vmatpush1.bf16.msra.mxu1 %v13087_v36  ;;  %v10571_v36 = vld [vmem:[#allocation4 + $0xe4] ss:$8 sps:$4 sm:$0xff]  }
 0x554   :  { %3405 = vmatprep.subr.bf16.mxu0 %v13088_v49  ;;  %3572 = vmatprep.subr.bf16.mxu1 %v13088_v49 }
 0x557   :  { %3406 = vmatpush1.bf16.msra.mxu0 %v10553_v13  ;;  %3573 = vmatpush1.bf16.msra.mxu1 %v10553_v13 }
 0x558   :  { %3407 = vmatprep.subr.bf16.mxu0 %v10557_v24  ;;  %3574 = vmatprep.subr.bf16.mxu1 %v10557_v24 }
 0x559   :  { %v2825_v23 = vpop.f32.mrb[24].mxu0  ;;  %v2992_v35 = vpop.f32.mrb[24].mxu1 }
 0x55a   :  { %v7177_v48 = vadd.f32 %v2825_v23, %v12998_v29  ;;  %v7181_v5 = vadd.f32 %v2992_v35, %v12998_v29  ;;  %v2827_v47 = vpop.f32.mrb[25].mxu0  ;;  %v2994_v51 = vpop.f32.mrb[25].mxu1 }
 0x55b   :  { %v7178_v37 = vadd.f32 %v2827_v47, %v8999_v63  ;;  %v7182_v17 = vadd.f32 %v2994_v51, %v8999_v63  ;;  %v2829_v3 = vpop.f32.mrb[26].mxu0  ;;  %v2996_v26 = vpop.f32.mrb[26].mxu1  ;;  %3408 = vmatpush1.bf16.msra.mxu0 %v10565_v50  ;;  %3575 = vmatpush1.bf16.msra.mxu1 %v10565_v50 }
 0x55c   :  { %v2834_v21 = vmax.f32 %v7177_v48, 0.0  ;;  %v3001_v24 = vmax.f32 %v7181_v5, 0.0  ;;  %v7179_v23 = vadd.f32 %v2829_v3, %v12998_v29  ;;  %v7183_v35 = vadd.f32 %v2996_v26, %v12998_v29  ;;  %v2831_v13 = vpop.f32.mrb[27].mxu0  ;;  %v2998_v49 = vpop.f32.mrb[27].mxu1  ;;  %3409 = vmatprep.subr.bf16.mxu0 %v10571_v36  ;;  %3576 = vmatprep.subr.bf16.mxu1 %v10571_v36  ;;  %v10577_v29 = vld [vmem:[#allocation4 + $0xe0] ss:$8 sps:$4 sm:$0xff]  }
 0x55d   :  { %v2835_v47 = vmax.f32 %v7178_v37, 0.0  ;;  %v3002_v51 = vmax.f32 %v7182_v17, 0.0  ;;  %v7180_v41 = vadd.f32 %v2831_v13, %v8999_v63  ;;  %v7184_v50 = vadd.f32 %v2998_v49, %v8999_v63 }
 0x55e   :  { %v2836_v48 = vmax.f32 %v7179_v23, 0.0  ;;  %v3003_v5 = vmax.f32 %v7183_v35, 0.0  ;;  %v10611_v23 = vld [vmem:[#allocation4 + $0x114] ss:$8 sps:$4 sm:$0xff]   ;;  %v10617_v35 = vld [vmem:[#allocation4 + $0x110] ss:$8 sps:$4 sm:$0xff]  }
 0x55f   :  { %v2838_v62 = vmax.f32 %v2834_v21, %v2835_v47  ;;  %v3005_v3 = vmax.f32 %v3001_v24, %v3002_v51  ;;  %v2837_v57 = vmax.f32 %v7180_v41, 0.0  ;;  %v3004_v26 = vmax.f32 %v7184_v50, 0.0  ;;  %3410 = vmatpush1.bf16.msra.mxu0 %v10577_v29  ;;  %3577 = vmatpush1.bf16.msra.mxu1 %v10577_v29  ;;  %v10585_v21 = vld [vmem:[#allocation4 + $0xf0] ss:$8 sps:$4 sm:$0xff]   ;;  %v10589_v41 = vld [vmem:[#allocation4 + $0x104] ss:$8 sps:$4 sm:$0xff]  }
 0x560   :  { %3411 = vmatprep.subr.bf16.mxu0 %v10581_v14  ;;  %3578 = vmatprep.subr.bf16.mxu1 %v10581_v14  ;;  %v10607_v50 = vld [vmem:[#allocation4 + $0x100] ss:$8 sps:$4 sm:$0xff]   ;;  %v10629_v47 = vld [vmem:[#allocation4 + $0x134] ss:$8 sps:$4 sm:$0xff]   ;;  %v10633_v51 = vld [vmem:[#allocation4 + $0x130] ss:$8 sps:$4 sm:$0xff]  }
 0x561   :  { %v3007_v13 = vmax.f32 %v2838_v62, %v3005_v3  ;;  %v2839_v49 = vmax.f32 %v2836_v48, %v2837_v57  ;;  %v3006_v37 = vmax.f32 %v3003_v5, %v3004_v26  ;;  %v10598_v57 = vld [vmem:[%s12305_s0 + $0x4c] ss:$112 sps:$4 sm:$0xff]   ;;  %v10603_v62 = vld [vmem:[%s12305_s0 + $0x50] ss:$112 sps:$4 sm:$0xff]  }
 0x562   :  { %v10637_v48 = vld [vmem:[#allocation4 + $0x144] ss:$8 sps:$4 sm:$0xff]   ;;  %v10641_v5 = vld [vmem:[#allocation4 + $0x140] ss:$8 sps:$4 sm:$0xff]   ;;  %v10645_v3 = vld [vmem:[#allocation4 + $0x154] ss:$8 sps:$4 sm:$0xff]  }
 0x563   :  { %v3008_v17 = vmax.f32 %v2839_v49, %v3006_v37  ;;  %3412 = vmatpush1.bf16.msra.mxu0 %v10585_v21  ;;  %3579 = vmatpush1.bf16.msra.mxu1 %v10585_v21  ;;  %v10649_v26 = vld [vmem:[#allocation4 + $0x150] ss:$8 sps:$4 sm:$0xff]   ;;  %v10657_v49 = vld [vmem:[#allocation4 + $0x160] ss:$8 sps:$4 sm:$0xff]   ;;  %v10661_v37 = vld [vmem:[#allocation4 + $0x174] ss:$8 sps:$4 sm:$0xff]  }
 0x564   :  { %3424 = vmatprep.subr.bf16.mxu0 %v10589_v41  ;;  %3591 = vmatprep.subr.bf16.mxu1 %v10589_v41  ;;  %13094 = vst [vmem:[#allocation37_spill] sm:$0xff] %v10657_v49  ;;  %13095 = vst [vmem:[#allocation38_spill] sm:$0xff] %v10661_v37 }
 0x565   :  { %v10593_v24 = vpack.c.bf16 %v3008_v17, %v3007_v13  ;;  %v10653_v13 = vld [vmem:[#allocation4 + $0x164] ss:$8 sps:$4 sm:$0xff]   ;;  %v10665_v17 = vld [vmem:[#allocation4 + $0x170] ss:$8 sps:$4 sm:$0xff]  }
 0x566   :  { %3414 = vmatmul.mubr.bf16.vlgmr.msra.gmra.mrb[32].mxu0 %v10450_v46  ;;  %3581 = vmatmul.mubr.bf16.vlgmr.msra.gmra.mrb[32].mxu1 %v10455_v6  ;;  %v10621_v46 = vld [vmem:[#allocation4 + $0x124] ss:$8 sps:$4 sm:$0xff]   ;;  %v10625_v6 = vld [vmem:[#allocation4 + $0x120] ss:$8 sps:$4 sm:$0xff]   ;;  %13093 = vst [vmem:[#allocation36_spill] sm:$0xff] %v10653_v13  ;;  %13096 = vst [vmem:[#allocation39_spill] sm:$0xff] %v10665_v17 }
 0x567   :  { %13092 = vst [vmem:[#allocation35_spill] sm:$0xff] %v10593_v24  ;;  %3425 = vmatpush1.bf16.msra.mxu0 %v10607_v50  ;;  %3592 = vmatpush1.bf16.msra.mxu1 %v10607_v50  ;;  %v10669_v24 = vld [vmem:[#allocation4 + $0x184] ss:$8 sps:$4 sm:$0xff]  }
 0x568   :  { %3426 = vmatprep.subr.bf16.mxu0 %v10611_v23  ;;  %3593 = vmatprep.subr.bf16.mxu1 %v10611_v23  ;;  %13097 = vst [vmem:[#allocation40_spill] sm:$0xff] %v10669_v24 }
 0x569   :  { %3456 = vmatprep.mubr.bf16.mxu0 %v10598_v57  ;;  %3623 = vmatprep.mubr.bf16.mxu1 %v10603_v62 }
 0x56b   :  { %3427 = vmatpush1.bf16.msra.mxu0 %v10617_v35  ;;  %3594 = vmatpush1.bf16.msra.mxu1 %v10617_v35 }
 0x56c   :  { %3428 = vmatprep.subr.bf16.mxu0 %v10621_v46  ;;  %3595 = vmatprep.subr.bf16.mxu1 %v10621_v46 }
 0x56f   :  { %3429 = vmatpush1.bf16.msra.mxu0 %v10625_v6  ;;  %3596 = vmatpush1.bf16.msra.mxu1 %v10625_v6 }
 0x570   :  { %3430 = vmatprep.subr.bf16.mxu0 %v10629_v47  ;;  %3597 = vmatprep.subr.bf16.mxu1 %v10629_v47 }
 0x573   :  { %3431 = vmatpush1.bf16.msra.mxu0 %v10633_v51  ;;  %3598 = vmatpush1.bf16.msra.mxu1 %v10633_v51 }
 0x574   :  { %3432 = vmatprep.subr.bf16.mxu0 %v10637_v48  ;;  %3599 = vmatprep.subr.bf16.mxu1 %v10637_v48 }
 0x577   :  { %3433 = vmatpush1.bf16.msra.mxu0 %v10641_v5  ;;  %3600 = vmatpush1.bf16.msra.mxu1 %v10641_v5 }
 0x578   :  { %3434 = vmatprep.subr.bf16.mxu0 %v10645_v3  ;;  %3601 = vmatprep.subr.bf16.mxu1 %v10645_v3 }
 0x57b   :  { %3435 = vmatpush1.bf16.msra.mxu0 %v10649_v26  ;;  %3602 = vmatpush1.bf16.msra.mxu1 %v10649_v26 }
 0x57c   :  { %3436 = vmatprep.subr.bf16.mxu0 %v10653_v13  ;;  %3603 = vmatprep.subr.bf16.mxu1 %v10653_v13  ;;  %v10673_v13 = vld [vmem:[#allocation4 + $0x180] ss:$8 sps:$4 sm:$0xff]  }
 0x57d   :  { %13098 = vst [vmem:[#allocation41_spill] sm:$0xff] %v10673_v13 }
 0x57f   :  { %3437 = vmatpush1.bf16.msra.mxu0 %v10657_v49  ;;  %3604 = vmatpush1.bf16.msra.mxu1 %v10657_v49  ;;  %v10677_v49 = vld [vmem:[#allocation4 + $0x194] ss:$8 sps:$4 sm:$0xff]  }
 0x580   :  { %3438 = vmatprep.subr.bf16.mxu0 %v10661_v37  ;;  %3605 = vmatprep.subr.bf16.mxu1 %v10661_v37  ;;  %13099 = vst [vmem:[#allocation42_spill] sm:$0xff] %v10677_v49  ;;  %v10681_v37 = vld [vmem:[#allocation4 + $0x190] ss:$8 sps:$4 sm:$0xff]  }
 0x581   :  { %13100 = vst [vmem:[#allocation43_spill] sm:$0xff] %v10681_v37 }
 0x583   :  { %3439 = vmatpush1.bf16.msra.mxu0 %v10665_v17  ;;  %3606 = vmatpush1.bf16.msra.mxu1 %v10665_v17  ;;  %v10685_v17 = vld [vmem:[#allocation4 + $0x1a4] ss:$8 sps:$4 sm:$0xff]  }
 0x584   :  { %3440 = vmatprep.subr.bf16.mxu0 %v10669_v24  ;;  %3607 = vmatprep.subr.bf16.mxu1 %v10669_v24  ;;  %13101 = vst [vmem:[#allocation44_spill] sm:$0xff] %v10685_v17  ;;  %v10689_v24 = vld [vmem:[#allocation4 + $0x1a0] ss:$8 sps:$4 sm:$0xff]  }
 0x585   :  { %13102 = vst [vmem:[#allocation45_spill] sm:$0xff] %v10689_v24 }
 0x587   :  { %3441 = vmatpush1.bf16.msra.mxu0 %v10673_v13  ;;  %3608 = vmatpush1.bf16.msra.mxu1 %v10673_v13  ;;  %v10693_v13 = vld [vmem:[#allocation4 + $0x1b4] ss:$8 sps:$4 sm:$0xff]  }
 0x588   :  { %3442 = vmatprep.subr.bf16.mxu0 %v10677_v49  ;;  %3609 = vmatprep.subr.bf16.mxu1 %v10677_v49  ;;  %13103 = vst [vmem:[#allocation46_spill] sm:$0xff] %v10693_v13  ;;  %v10697_v49 = vld [vmem:[#allocation4 + $0x1b0] ss:$8 sps:$4 sm:$0xff]  }
 0x58b   :  { %3443 = vmatpush1.bf16.msra.mxu0 %v10681_v37  ;;  %3610 = vmatpush1.bf16.msra.mxu1 %v10681_v37  ;;  %v10701_v37 = vld [vmem:[#allocation4 + $0x1c4] ss:$8 sps:$4 sm:$0xff]  }
 0x58c   :  { %3444 = vmatprep.subr.bf16.mxu0 %v10685_v17  ;;  %3611 = vmatprep.subr.bf16.mxu1 %v10685_v17  ;;  %v10705_v17 = vld [vmem:[#allocation4 + $0x1c0] ss:$8 sps:$4 sm:$0xff]  }
 0x58f   :  { %3445 = vmatpush1.bf16.msra.mxu0 %v10689_v24  ;;  %3612 = vmatpush1.bf16.msra.mxu1 %v10689_v24  ;;  %v10709_v24 = vld [vmem:[#allocation4 + $0x1d4] ss:$8 sps:$4 sm:$0xff]  }
 0x590   :  { %3446 = vmatprep.subr.bf16.mxu0 %v10693_v13  ;;  %3613 = vmatprep.subr.bf16.mxu1 %v10693_v13  ;;  %13104 = vst [vmem:[#allocation47_spill] sm:$0xff] %v10709_v24  ;;  %v10713_v13 = vld [vmem:[#allocation4 + $0x1d0] ss:$8 sps:$4 sm:$0xff]  }
 0x591   :  { %13105 = vst [vmem:[#allocation48_spill] sm:$0xff] %v10713_v13 }
 0x593   :  { %3447 = vmatpush1.bf16.msra.mxu0 %v10697_v49  ;;  %3614 = vmatpush1.bf16.msra.mxu1 %v10697_v49 }
 0x594   :  { %3448 = vmatprep.subr.bf16.mxu0 %v10701_v37  ;;  %3615 = vmatprep.subr.bf16.mxu1 %v10701_v37 }
 0x597   :  { %3449 = vmatpush1.bf16.msra.mxu0 %v10705_v17  ;;  %3616 = vmatpush1.bf16.msra.mxu1 %v10705_v17 }
 0x598   :  { %3450 = vmatprep.subr.bf16.mxu0 %v10709_v24  ;;  %3617 = vmatprep.subr.bf16.mxu1 %v10709_v24  ;;  %v10726_v24 = vld [vmem:[%s12305_s0 + $0x48] ss:$112 sps:$4 sm:$0xff]  }
 0x59b   :  { %3451 = vmatpush1.bf16.msra.mxu0 %v10713_v13  ;;  %3618 = vmatpush1.bf16.msra.mxu1 %v10713_v13  ;;  %v10731_v13 = vld [vmem:[%s12305_s0 + $0x4c] ss:$112 sps:$4 sm:$0xff]  }
 0x59c   :  { %3452 = vmatprep.subr.bf16.mxu0 %v10145_v59  ;;  %3619 = vmatprep.subr.bf16.mxu1 %v10145_v59  ;;  %v7716_v59 = vld [vmem:[%s12305_s0 + $0x50] ss:$112 sps:$4 sm:$0xff]  }
 0x59f   :  { %3453 = vmatpush1.bf16.msra.mxu0 %v10149_v55  ;;  %3620 = vmatpush1.bf16.msra.mxu1 %v10149_v55  ;;  %v7717_v55 = vld [vmem:[%s12305_s0 + $0x54] ss:$112 sps:$4 sm:$0xff]  }
 0x5a0   :  { %3454 = vmatprep.subr.bf16.mxu0 %v10153_v58  ;;  %3621 = vmatprep.subr.bf16.mxu1 %v10153_v58  ;;  %v13106_v58 = vld [vmem:[#allocation20_spill] sm:$0xff] }
 0x5a3   :  { %3455 = vmatpush1.bf16.msra.mxu0 %v10167_v11  ;;  %3622 = vmatpush1.bf16.msra.mxu1 %v10167_v11  ;;  %v13107_v11 = vld [vmem:[#allocation21_spill] sm:$0xff] }
 0x5a4   :  { %3467 = vmatprep.subr.bf16.mxu0 %v10171_v12  ;;  %3634 = vmatprep.subr.bf16.mxu1 %v10171_v12  ;;  %v13108_v12 = vld [vmem:[#allocation22_spill] sm:$0xff] }
 0x5a6   :  { %3457 = vmatmul.mubr.bf16.vlgmr.msra.gmra.mrb[32].mxu0 %v10726_v24  ;;  %3624 = vmatmul.mubr.bf16.vlgmr.msra.gmra.mrb[32].mxu1 %v10731_v13 }
 0x5a7   :  { %3468 = vmatpush1.bf16.msra.mxu0 %v10177_v15  ;;  %3635 = vmatpush1.bf16.msra.mxu1 %v10177_v15  ;;  %v13109_v15 = vld [vmem:[#allocation23_spill] sm:$0xff] }
 0x5a8   :  { %3469 = vmatprep.subr.bf16.mxu0 %v10181_v16  ;;  %3636 = vmatprep.subr.bf16.mxu1 %v10181_v16  ;;  %v13110_v16 = vld [vmem:[#allocation52_spill] sm:$0xff] }
 0x5a9   :  { %3499 = vmatprep.mubr.bf16.mxu0 %v12837_v31  ;;  %3666 = vmatprep.mubr.bf16.mxu1 %v12837_v31 }
 0x5ab   :  { %3470 = vmatpush1.bf16.msra.mxu0 %v10187_v18  ;;  %3637 = vmatpush1.bf16.msra.mxu1 %v10187_v18  ;;  %v13111_v18 = vld [vmem:[#allocation53_spill] sm:$0xff] }
 0x5ac   :  { %3471 = vmatprep.subr.bf16.mxu0 %v13052_v25  ;;  %3638 = vmatprep.subr.bf16.mxu1 %v13052_v25  ;;  %v13112_v25 = vld [vmem:[#allocation25_spill] sm:$0xff] }
 0x5af   :  { %3472 = vmatpush1.bf16.msra.mxu0 %v13053_v4  ;;  %3639 = vmatpush1.bf16.msra.mxu1 %v13053_v4  ;;  %v13113_v4 = vld [vmem:[#allocation33_spill] sm:$0xff] }
 0x5b0   :  { %3473 = vmatprep.subr.bf16.mxu0 %v13054_v9  ;;  %3640 = vmatprep.subr.bf16.mxu1 %v13054_v9 }
 0x5b3   :  { %3474 = vmatpush1.bf16.msra.mxu0 %v13055_v0  ;;  %3641 = vmatpush1.bf16.msra.mxu1 %v13055_v0 }
 0x5b4   :  { %3475 = vmatprep.subr.bf16.mxu0 %v13056_v39  ;;  %3642 = vmatprep.subr.bf16.mxu1 %v13056_v39  ;;  %v13114_v39 = vld [vmem:[#allocation11_spill] sm:$0xff] }
 0x5b7   :  { %3476 = vmatpush1.bf16.msra.mxu0 %v13057_v52  ;;  %3643 = vmatpush1.bf16.msra.mxu1 %v13057_v52 }
 0x5b8   :  { %3477 = vmatprep.subr.bf16.mxu0 %v13058_v56  ;;  %3644 = vmatprep.subr.bf16.mxu1 %v13058_v56 }
 0x5bb   :  { %3478 = vmatpush1.bf16.msra.mxu0 %v13059_v53  ;;  %3645 = vmatpush1.bf16.msra.mxu1 %v13059_v53 }
 0x5bc   :  { %3479 = vmatprep.subr.bf16.mxu0 %v13060_v40  ;;  %3646 = vmatprep.subr.bf16.mxu1 %v13060_v40 }
 0x5bf   :  { %3480 = vmatpush1.bf16.msra.mxu0 %v13061_v54  ;;  %3647 = vmatpush1.bf16.msra.mxu1 %v13061_v54 }
 0x5c0   :  { %3481 = vmatprep.subr.bf16.mxu0 %v13062_v60  ;;  %3648 = vmatprep.subr.bf16.mxu1 %v13062_v60 }
 0x5c3   :  { %3482 = vmatpush1.bf16.msra.mxu0 %v13063_v61  ;;  %3649 = vmatpush1.bf16.msra.mxu1 %v13063_v61 }
 0x5c4   :  { %3719 = vmatprep.subr.bf16.mxu0 %v13064_v34  ;;  %3886 = vmatprep.subr.bf16.mxu1 %v13064_v34 }
 0x5c6   :  { %3500 = vmatmul.mubr.bf16.vlgmr.msra.gmra.mrb[32].mxu0 %v7716_v59  ;;  %3667 = vmatmul.mubr.bf16.vlgmr.msra.gmra.mrb[32].mxu1 %v7717_v55 }
 0x5c7   :  { %3720 = vmatpush1.bf16.msra.mxu0 %v13065_v2  ;;  %3887 = vmatpush1.bf16.msra.mxu1 %v13065_v2  ;;  %v13115_v2 = vld [vmem:[#allocation34_spill] sm:$0xff] }
 0x5c8   :  { %3721 = vmatprep.subr.bf16.mxu0 %v13066_v42  ;;  %3888 = vmatprep.subr.bf16.mxu1 %v13066_v42 }
 0x5c9   :  { %3751 = vmatprep.mubr.bf16.mxu0 %v10598_v57  ;;  %3918 = vmatprep.mubr.bf16.mxu1 %v10603_v62 }
 0x5cb   :  { %3722 = vmatpush1.bf16.msra.mxu0 %v13067_v43  ;;  %3889 = vmatpush1.bf16.msra.mxu1 %v13067_v43 }
 0x5cc   :  { %3723 = vmatprep.subr.bf16.mxu0 %v13068_v44  ;;  %3890 = vmatprep.subr.bf16.mxu1 %v13068_v44 }
 0x5cf   :  { %3724 = vmatpush1.bf16.msra.mxu0 %v13069_v45  ;;  %3891 = vmatpush1.bf16.msra.mxu1 %v13069_v45 }
 0x5d0   :  { %3725 = vmatprep.subr.bf16.mxu0 %v13070_v7  ;;  %3892 = vmatprep.subr.bf16.mxu1 %v13070_v7 }
 0x5d3   :  { %3726 = vmatpush1.bf16.msra.mxu0 %v13071_v8  ;;  %3893 = vmatpush1.bf16.msra.mxu1 %v13071_v8 }
 0x5d4   :  { %3727 = vmatprep.subr.bf16.mxu0 %v13072_v30  ;;  %3894 = vmatprep.subr.bf16.mxu1 %v13072_v30 }
 0x5d7   :  { %3728 = vmatpush1.bf16.msra.mxu0 %v13073_v32  ;;  %3895 = vmatpush1.bf16.msra.mxu1 %v13073_v32 }
 0x5d8   :  { %3729 = vmatprep.subr.bf16.mxu0 %v13074_v33  ;;  %3896 = vmatprep.subr.bf16.mxu1 %v13074_v33 }
 0x5db   :  { %3730 = vmatpush1.bf16.msra.mxu0 %v13075_v27  ;;  %3897 = vmatpush1.bf16.msra.mxu1 %v13075_v27 }
 0x5dc   :  { %3731 = vmatprep.subr.bf16.mxu0 %v13076_v28  ;;  %3898 = vmatprep.subr.bf16.mxu1 %v13076_v28 }
 0x5df   :  { %3732 = vmatpush1.bf16.msra.mxu0 %v13077_v1  ;;  %3899 = vmatpush1.bf16.msra.mxu1 %v13077_v1 }
 0x5e0   :  { %3733 = vmatprep.subr.bf16.mxu0 %v13078_v10  ;;  %3900 = vmatprep.subr.bf16.mxu1 %v13078_v10 }
 0x5e3   :  { %3734 = vmatpush1.bf16.msra.mxu0 %v13079_v19  ;;  %3901 = vmatpush1.bf16.msra.mxu1 %v13079_v19 }
 0x5e4   :  { %3735 = vmatprep.subr.bf16.mxu0 %v13080_v20  ;;  %3902 = vmatprep.subr.bf16.mxu1 %v13080_v20 }
 0x5e7   :  { %3736 = vmatpush1.bf16.msra.mxu0 %v13081_v22  ;;  %3903 = vmatpush1.bf16.msra.mxu1 %v13081_v22 }
 0x5e8   :  { %3737 = vmatprep.subr.bf16.mxu0 %v13082_v38  ;;  %3904 = vmatprep.subr.bf16.mxu1 %v13082_v38 }
 0x5eb   :  { %3738 = vmatpush1.bf16.msra.mxu0 %v13106_v58  ;;  %3905 = vmatpush1.bf16.msra.mxu1 %v13106_v58  ;;  %v10858_v58 = vld [vmem:[%s12305_s0 + $0x54] ss:$112 sps:$4 sm:$0xff]  }
 0x5ec   :  { %3739 = vmatprep.subr.bf16.mxu0 %v13107_v11  ;;  %3906 = vmatprep.subr.bf16.mxu1 %v13107_v11  ;;  %v10863_v11 = vld [vmem:[%s12305_s0 + $0x58] ss:$112 sps:$4 sm:$0xff]  }
 0x5ef   :  { %3740 = vmatpush1.bf16.msra.mxu0 %v13108_v12  ;;  %3907 = vmatpush1.bf16.msra.mxu1 %v13108_v12  ;;  %v13119_v12 = vld [vmem:[#allocation38_spill] sm:$0xff] }
 0x5f0   :  { %3741 = vmatprep.subr.bf16.mxu0 %v13109_v15  ;;  %3908 = vmatprep.subr.bf16.mxu1 %v13109_v15  ;;  %v13120_v15 = vld [vmem:[#allocation39_spill] sm:$0xff] }
 0x5f3   :  { %3742 = vmatpush1.bf16.msra.mxu0 %v13110_v16  ;;  %3909 = vmatpush1.bf16.msra.mxu1 %v13110_v16  ;;  %v13121_v16 = vld [vmem:[#allocation40_spill] sm:$0xff] }
 0x5f4   :  { %3743 = vmatprep.subr.bf16.mxu0 %v13111_v18  ;;  %3910 = vmatprep.subr.bf16.mxu1 %v13111_v18  ;;  %v13122_v18 = vld [vmem:[#allocation41_spill] sm:$0xff] }
 0x5f7   :  { %3744 = vmatpush1.bf16.msra.mxu0 %v13112_v25  ;;  %3911 = vmatpush1.bf16.msra.mxu1 %v13112_v25 }
 0x5f8   :  { %3745 = vmatprep.subr.bf16.mxu0 %v13113_v4  ;;  %3912 = vmatprep.subr.bf16.mxu1 %v13113_v4 }
 0x5f9   :  { %v3163_v9 = vpop.f32.mrb[28].mxu0  ;;  %v3330_v0 = vpop.f32.mrb[28].mxu1 }
 0x5fa   :  { %v7185_v52 = vadd.f32 %v3163_v9, %v13114_v39  ;;  %v7189_v56 = vadd.f32 %v3330_v0, %v13114_v39  ;;  %v3165_v53 = vpop.f32.mrb[29].mxu0  ;;  %v3332_v40 = vpop.f32.mrb[29].mxu1  ;;  %v13123_v9 = vld [vmem:[#allocation42_spill] sm:$0xff]  ;;  %v13124_v0 = vld [vmem:[#allocation43_spill] sm:$0xff] }
 0x5fb   :  { %v7186_v54 = vadd.f32 %v3165_v53, %v8999_v63  ;;  %v7190_v60 = vadd.f32 %v3332_v40, %v8999_v63  ;;  %v3167_v61 = vpop.f32.mrb[30].mxu0  ;;  %v3334_v34 = vpop.f32.mrb[30].mxu1  ;;  %3746 = vmatpush1.bf16.msra.mxu0 %v13115_v2  ;;  %3913 = vmatpush1.bf16.msra.mxu1 %v13115_v2  ;;  %v13127_v53 = vld [vmem:[#allocation46_spill] sm:$0xff]  ;;  %v13128_v40 = vld [vmem:[#allocation47_spill] sm:$0xff] }
 0x5fc   :  { %v3172_v42 = vmax.f32 %v7185_v52, 0.0  ;;  %v3339_v43 = vmax.f32 %v7189_v56, 0.0  ;;  %v7187_v44 = vadd.f32 %v3167_v61, %v13114_v39  ;;  %v7191_v45 = vadd.f32 %v3334_v34, %v13114_v39  ;;  %v3169_v7 = vpop.f32.mrb[31].mxu0  ;;  %v3336_v8 = vpop.f32.mrb[31].mxu1  ;;  %3747 = vmatprep.subr.bf16.mxu0 %v10571_v36  ;;  %3914 = vmatprep.subr.bf16.mxu1 %v10571_v36  ;;  %v13125_v52 = vld [vmem:[#allocation44_spill] sm:$0xff]  ;;  %v13126_v56 = vld [vmem:[#allocation45_spill] sm:$0xff] }
 0x5fd   :  { %v3173_v30 = vmax.f32 %v7186_v54, 0.0  ;;  %v3340_v32 = vmax.f32 %v7190_v60, 0.0  ;;  %v7188_v33 = vadd.f32 %v3169_v7, %v8999_v63  ;;  %v7192_v27 = vadd.f32 %v3336_v8, %v8999_v63  ;;  %v13129_v54 = vld [vmem:[#allocation48_spill] sm:$0xff]  ;;  %v10923_v60 = vld [vmem:[#allocation4 + $0x1e4] ss:$8 sps:$4 sm:$0xff]  }
 0x5fe   :  { %v3174_v28 = vmax.f32 %v7187_v44, 0.0  ;;  %v3341_v1 = vmax.f32 %v7191_v45, 0.0  ;;  %v10927_v61 = vld [vmem:[#allocation4 + $0x1e0] ss:$8 sps:$4 sm:$0xff]   ;;  %v10931_v34 = vld [vmem:[#allocation4 + $0x1f4] ss:$8 sps:$4 sm:$0xff]  }
 0x5ff   :  { %v3176_v10 = vmax.f32 %v3172_v42, %v3173_v30  ;;  %v3343_v19 = vmax.f32 %v3339_v43, %v3340_v32  ;;  %v3175_v20 = vmax.f32 %v7188_v33, 0.0  ;;  %v3342_v22 = vmax.f32 %v7192_v27, 0.0  ;;  %3748 = vmatpush1.bf16.msra.mxu0 %v10577_v29  ;;  %3915 = vmatpush1.bf16.msra.mxu1 %v10577_v29  ;;  %v10938_v42 = vld [vmem:[%s12305_s0 + $0x50] ss:$112 sps:$4 sm:$0xff]   ;;  %v10943_v43 = vld [vmem:[%s12305_s0 + $0x54] ss:$112 sps:$4 sm:$0xff]  }
 0x600   :  { %3749 = vmatprep.subr.bf16.mxu0 %v10581_v14  ;;  %3916 = vmatprep.subr.bf16.mxu1 %v10581_v14  ;;  %v10945_v44 = vld [vmem:[#allocation4 + $0x1f0] ss:$8 sps:$4 sm:$0xff]   ;;  %v10949_v45 = vld [vmem:[#allocation4 + $0x204] ss:$8 sps:$4 sm:$0xff]   ;;  %v10955_v7 = vld [vmem:[#allocation4 + $0x200] ss:$8 sps:$4 sm:$0xff]  }
 0x601   :  { %v3345_v38 = vmax.f32 %v3176_v10, %v3343_v19  ;;  %v3177_v57 = vmax.f32 %v3174_v28, %v3175_v20  ;;  %v3344_v62 = vmax.f32 %v3341_v1, %v3342_v22  ;;  %v10959_v8 = vld [vmem:[#allocation4 + $0x214] ss:$8 sps:$4 sm:$0xff]   ;;  %v10965_v30 = vld [vmem:[#allocation4 + $0x210] ss:$8 sps:$4 sm:$0xff]   ;;  %v10969_v32 = vld [vmem:[#allocation4 + $0x224] ss:$8 sps:$4 sm:$0xff]  }
 0x602   :  { %13130 = vst [vmem:[#allocation50_spill] sm:$0xff] %v10969_v32  ;;  %v10973_v33 = vld [vmem:[#allocation4 + $0x220] ss:$8 sps:$4 sm:$0xff]   ;;  %v10977_v27 = vld [vmem:[#allocation4 + $0x234] ss:$8 sps:$4 sm:$0xff]  }
 0x603   :  { %v3346_v59 = vmax.f32 %v3177_v57, %v3344_v62  ;;  %3750 = vmatpush1.bf16.msra.mxu0 %v10585_v21  ;;  %3917 = vmatpush1.bf16.msra.mxu1 %v10585_v21  ;;  %13131 = vst [vmem:[#allocation27_spill] sm:$0xff] %v10973_v33  ;;  %13132 = vst [vmem:[#allocation28_spill] sm:$0xff] %v10977_v27  ;;  %v10981_v28 = vld [vmem:[#allocation4 + $0x230] ss:$8 sps:$4 sm:$0xff]   ;;  %v10985_v1 = vld [vmem:[#allocation4 + $0x244] ss:$8 sps:$4 sm:$0xff]  }
 0x604   :  { %3762 = vmatprep.subr.bf16.mxu0 %v10589_v41  ;;  %3929 = vmatprep.subr.bf16.mxu1 %v10589_v41  ;;  %13133 = vst [vmem:[#allocation29_spill] sm:$0xff] %v10981_v28  ;;  %13134 = vst [vmem:[#allocation31_spill] sm:$0xff] %v10985_v1  ;;  %v10989_v10 = vld [vmem:[#allocation4 + $0x240] ss:$8 sps:$4 sm:$0xff]   ;;  %v10993_v19 = vld [vmem:[#allocation4 + $0x254] ss:$8 sps:$4 sm:$0xff]  }
 0x605   :  { %v10853_v55 = vpack.c.bf16 %v3346_v59, %v3345_v38  ;;  %13135 = vst [vmem:[#allocation32_spill] sm:$0xff] %v10989_v10  ;;  %13136 = vst [vmem:[#allocation12_spill] sm:$0xff] %v10993_v19  ;;  %v10997_v20 = vld [vmem:[#allocation4 + $0x250] ss:$8 sps:$4 sm:$0xff]   ;;  %v11001_v22 = vld [vmem:[#allocation4 + $0x264] ss:$8 sps:$4 sm:$0xff]  }
 0x606   :  { %3752 = vmatmul.mubr.bf16.vlgmr.msra.gmra.mrb[36].mxu0 %v10726_v24  ;;  %3919 = vmatmul.mubr.bf16.vlgmr.msra.gmra.mrb[36].mxu1 %v10731_v13  ;;  %v13117_v24 = vld [vmem:[#allocation36_spill] sm:$0xff]  ;;  %v13118_v13 = vld [vmem:[#allocation37_spill] sm:$0xff]  ;;  %13137 = vst [vmem:[#allocation13_spill] sm:$0xff] %v10997_v20  ;;  %13138 = vst [vmem:[#allocation14_spill] sm:$0xff] %v11001_v22 }
 0x607   :  { %13116 = vst [vmem:[#allocation49_spill] sm:$0xff] %v10853_v55  ;;  %3763 = vmatpush1.bf16.msra.mxu0 %v10607_v50  ;;  %3930 = vmatpush1.bf16.msra.mxu1 %v10607_v50  ;;  %v11005_v38 = vld [vmem:[#allocation4 + $0x260] ss:$8 sps:$4 sm:$0xff]   ;;  %v11009_v57 = vld [vmem:[#allocation4 + $0x274] ss:$8 sps:$4 sm:$0xff]  }
 0x608   :  { %3764 = vmatprep.subr.bf16.mxu0 %v10611_v23  ;;  %3931 = vmatprep.subr.bf16.mxu1 %v10611_v23  ;;  %13139 = vst [vmem:[#allocation16_spill] sm:$0xff] %v11005_v38  ;;  %13140 = vst [vmem:[#allocation17_spill] sm:$0xff] %v11009_v57  ;;  %v7724_v62 = vld [vmem:[%s12305_s0 + $0x58] ss:$112 sps:$4 sm:$0xff]   ;;  %v7725_v59 = vld [vmem:[%s12305_s0 + $0x5c] ss:$112 sps:$4 sm:$0xff]  }
 0x609   :  { %3794 = vmatprep.mubr.bf16.mxu0 %v10858_v58  ;;  %3961 = vmatprep.mubr.bf16.mxu1 %v10863_v11  ;;  %v11019_v55 = vld [vmem:[#allocation4 + $0x270] ss:$8 sps:$4 sm:$0xff]  }
 0x60a   :  { %13141 = vst [vmem:[#allocation18_spill] sm:$0xff] %v11019_v55 }
 0x60b   :  { %3765 = vmatpush1.bf16.msra.mxu0 %v10617_v35  ;;  %3932 = vmatpush1.bf16.msra.mxu1 %v10617_v35 }
 0x60c   :  { %3766 = vmatprep.subr.bf16.mxu0 %v10621_v46  ;;  %3933 = vmatprep.subr.bf16.mxu1 %v10621_v46 }
 0x60f   :  { %3767 = vmatpush1.bf16.msra.mxu0 %v10625_v6  ;;  %3934 = vmatpush1.bf16.msra.mxu1 %v10625_v6 }
 0x610   :  { %3768 = vmatprep.subr.bf16.mxu0 %v10629_v47  ;;  %3935 = vmatprep.subr.bf16.mxu1 %v10629_v47 }
 0x613   :  { %3769 = vmatpush1.bf16.msra.mxu0 %v10633_v51  ;;  %3936 = vmatpush1.bf16.msra.mxu1 %v10633_v51 }
 0x614   :  { %3770 = vmatprep.subr.bf16.mxu0 %v10637_v48  ;;  %3937 = vmatprep.subr.bf16.mxu1 %v10637_v48 }
 0x617   :  { %3771 = vmatpush1.bf16.msra.mxu0 %v10641_v5  ;;  %3938 = vmatpush1.bf16.msra.mxu1 %v10641_v5 }
 0x618   :  { %3772 = vmatprep.subr.bf16.mxu0 %v10645_v3  ;;  %3939 = vmatprep.subr.bf16.mxu1 %v10645_v3 }
 0x61b   :  { %3773 = vmatpush1.bf16.msra.mxu0 %v10649_v26  ;;  %3940 = vmatpush1.bf16.msra.mxu1 %v10649_v26 }
 0x61c   :  { %3774 = vmatprep.subr.bf16.mxu0 %v13117_v24  ;;  %3941 = vmatprep.subr.bf16.mxu1 %v13117_v24 }
 0x61f   :  { %3775 = vmatpush1.bf16.msra.mxu0 %v13118_v13  ;;  %3942 = vmatpush1.bf16.msra.mxu1 %v13118_v13 }
 0x620   :  { %3776 = vmatprep.subr.bf16.mxu0 %v13119_v12  ;;  %3943 = vmatprep.subr.bf16.mxu1 %v13119_v12 }
 0x623   :  { %3777 = vmatpush1.bf16.msra.mxu0 %v13120_v15  ;;  %3944 = vmatpush1.bf16.msra.mxu1 %v13120_v15 }
 0x624   :  { %3778 = vmatprep.subr.bf16.mxu0 %v13121_v16  ;;  %3945 = vmatprep.subr.bf16.mxu1 %v13121_v16 }
 0x627   :  { %3779 = vmatpush1.bf16.msra.mxu0 %v13122_v18  ;;  %3946 = vmatpush1.bf16.msra.mxu1 %v13122_v18 }
 0x628   :  { %3780 = vmatprep.subr.bf16.mxu0 %v13123_v9  ;;  %3947 = vmatprep.subr.bf16.mxu1 %v13123_v9 }
 0x62b   :  { %3781 = vmatpush1.bf16.msra.mxu0 %v13124_v0  ;;  %3948 = vmatpush1.bf16.msra.mxu1 %v13124_v0 }
 0x62c   :  { %3782 = vmatprep.subr.bf16.mxu0 %v13125_v52  ;;  %3949 = vmatprep.subr.bf16.mxu1 %v13125_v52 }
 0x62f   :  { %3783 = vmatpush1.bf16.msra.mxu0 %v13126_v56  ;;  %3950 = vmatpush1.bf16.msra.mxu1 %v13126_v56 }
 0x630   :  { %3784 = vmatprep.subr.bf16.mxu0 %v13127_v53  ;;  %3951 = vmatprep.subr.bf16.mxu1 %v13127_v53 }
 0x633   :  { %3785 = vmatpush1.bf16.msra.mxu0 %v10697_v49  ;;  %3952 = vmatpush1.bf16.msra.mxu1 %v10697_v49 }
 0x634   :  { %3786 = vmatprep.subr.bf16.mxu0 %v10701_v37  ;;  %3953 = vmatprep.subr.bf16.mxu1 %v10701_v37 }
 0x637   :  { %3787 = vmatpush1.bf16.msra.mxu0 %v10705_v17  ;;  %3954 = vmatpush1.bf16.msra.mxu1 %v10705_v17 }
 0x638   :  { %3788 = vmatprep.subr.bf16.mxu0 %v13128_v40  ;;  %3955 = vmatprep.subr.bf16.mxu1 %v13128_v40 }
 0x63b   :  { %3789 = vmatpush1.bf16.msra.mxu0 %v13129_v54  ;;  %3956 = vmatpush1.bf16.msra.mxu1 %v13129_v54 }
 0x63c   :  { %3790 = vmatprep.subr.bf16.mxu0 %v10923_v60  ;;  %3957 = vmatprep.subr.bf16.mxu1 %v10923_v60 }
 0x63f   :  { %3791 = vmatpush1.bf16.msra.mxu0 %v10927_v61  ;;  %3958 = vmatpush1.bf16.msra.mxu1 %v10927_v61 }
 0x640   :  { %3792 = vmatprep.subr.bf16.mxu0 %v10931_v34  ;;  %3959 = vmatprep.subr.bf16.mxu1 %v10931_v34 }
 0x643   :  { %3793 = vmatpush1.bf16.msra.mxu0 %v10945_v44  ;;  %3960 = vmatpush1.bf16.msra.mxu1 %v10945_v44 }
 0x644   :  { %3805 = vmatprep.subr.bf16.mxu0 %v10949_v45  ;;  %3972 = vmatprep.subr.bf16.mxu1 %v10949_v45 }
 0x646   :  { %3795 = vmatmul.mubr.bf16.vlgmr.msra.gmra.mrb[36].mxu0 %v10938_v42  ;;  %3962 = vmatmul.mubr.bf16.vlgmr.msra.gmra.mrb[36].mxu1 %v10943_v43 }
 0x647   :  { %3806 = vmatpush1.bf16.msra.mxu0 %v10955_v7  ;;  %3973 = vmatpush1.bf16.msra.mxu1 %v10955_v7 }
 0x648   :  { %3807 = vmatprep.subr.bf16.mxu0 %v10959_v8  ;;  %3974 = vmatprep.subr.bf16.mxu1 %v10959_v8 }
 0x649   :  { %3837 = vmatprep.mubr.bf16.mxu0 %v12837_v31  ;;  %4004 = vmatprep.mubr.bf16.mxu1 %v12837_v31 }
 0x64b   :  { %3808 = vmatpush1.bf16.msra.mxu0 %v10965_v30  ;;  %3975 = vmatpush1.bf16.msra.mxu1 %v10965_v30 }
 0x64c   :  { %3809 = vmatprep.subr.bf16.mxu0 %v10969_v32  ;;  %3976 = vmatprep.subr.bf16.mxu1 %v10969_v32 }
 0x64f   :  { %3810 = vmatpush1.bf16.msra.mxu0 %v10973_v33  ;;  %3977 = vmatpush1.bf16.msra.mxu1 %v10973_v33 }
 0x650   :  { %3811 = vmatprep.subr.bf16.mxu0 %v10977_v27  ;;  %3978 = vmatprep.subr.bf16.mxu1 %v10977_v27 }
 0x653   :  { %3812 = vmatpush1.bf16.msra.mxu0 %v10981_v28  ;;  %3979 = vmatpush1.bf16.msra.mxu1 %v10981_v28 }
 0x654   :  { %3813 = vmatprep.subr.bf16.mxu0 %v10985_v1  ;;  %3980 = vmatprep.subr.bf16.mxu1 %v10985_v1 }
 0x657   :  { %3814 = vmatpush1.bf16.msra.mxu0 %v10989_v10  ;;  %3981 = vmatpush1.bf16.msra.mxu1 %v10989_v10 }
 0x658   :  { %3815 = vmatprep.subr.bf16.mxu0 %v10993_v19  ;;  %3982 = vmatprep.subr.bf16.mxu1 %v10993_v19 }
 0x65b   :  { %3816 = vmatpush1.bf16.msra.mxu0 %v10997_v20  ;;  %3983 = vmatpush1.bf16.msra.mxu1 %v10997_v20 }
 0x65c   :  { %3817 = vmatprep.subr.bf16.mxu0 %v11001_v22  ;;  %3984 = vmatprep.subr.bf16.mxu1 %v11001_v22  ;;  %v11031_v22 = vld [vmem:[#allocation4 + $0x14] ss:$8 sps:$4 sm:$0xff]  }
 0x65d   :  { %13144 = vst [vmem:[#allocation21_spill] sm:$0xff] %v11031_v22 }
 0x65f   :  { %3818 = vmatpush1.bf16.msra.mxu0 %v11005_v38  ;;  %3985 = vmatpush1.bf16.msra.mxu1 %v11005_v38  ;;  %v11023_v38 = vld [vmem:[#allocation4 + $0x4] ss:$8 sps:$4 sm:$0xff]  }
 0x660   :  { %3819 = vmatprep.subr.bf16.mxu0 %v11009_v57  ;;  %3986 = vmatprep.subr.bf16.mxu1 %v11009_v57  ;;  %13142 = vst [vmem:[#allocation19_spill] sm:$0xff] %v11023_v38  ;;  %v11027_v57 = vld [vmem:[#allocation4] ss:$8 sps:$4 sm:$0xff]  }
 0x661   :  { %13143 = vst [vmem:[#allocation20_spill] sm:$0xff] %v11027_v57 }
 0x663   :  { %3820 = vmatpush1.bf16.msra.mxu0 %v11019_v55  ;;  %3987 = vmatpush1.bf16.msra.mxu1 %v11019_v55  ;;  %v11037_v55 = vld [vmem:[#allocation4 + $0x10] ss:$8 sps:$4 sm:$0xff]  }
 0x664   :  { %4057 = vmatprep.subr.bf16.mxu0 %v11023_v38  ;;  %4224 = vmatprep.subr.bf16.mxu1 %v11023_v38  ;;  %13145 = vst [vmem:[#allocation22_spill] sm:$0xff] %v11037_v55 }
 0x666   :  { %3838 = vmatmul.mubr.bf16.vlgmr.msra.gmra.mrb[36].mxu0 %v7724_v62  ;;  %4005 = vmatmul.mubr.bf16.vlgmr.msra.gmra.mrb[36].mxu1 %v7725_v59  ;;  %v11041_v62 = vld [vmem:[#allocation4 + $0x24] ss:$8 sps:$4 sm:$0xff]   ;;  %v11045_v59 = vld [vmem:[#allocation4 + $0x20] ss:$8 sps:$4 sm:$0xff]  }
 0x667   :  { %4058 = vmatpush1.bf16.msra.mxu0 %v11027_v57  ;;  %4225 = vmatpush1.bf16.msra.mxu1 %v11027_v57  ;;  %13146 = vst [vmem:[#allocation23_spill] sm:$0xff] %v11041_v62  ;;  %13147 = vst [vmem:[#allocation52_spill] sm:$0xff] %v11045_v59 }
 0x668   :  { %4059 = vmatprep.subr.bf16.mxu0 %v11031_v22  ;;  %4226 = vmatprep.subr.bf16.mxu1 %v11031_v22 }
 0x669   :  { %4089 = vmatprep.mubr.bf16.mxu0 %v10858_v58  ;;  %4256 = vmatprep.mubr.bf16.mxu1 %v10863_v11  ;;  %v11049_v58 = vld [vmem:[#allocation4 + $0x34] ss:$8 sps:$4 sm:$0xff]   ;;  %v11053_v11 = vld [vmem:[#allocation4 + $0x30] ss:$8 sps:$4 sm:$0xff]  }
 0x66a   :  { %13148 = vst [vmem:[#allocation53_spill] sm:$0xff] %v11049_v58  ;;  %13149 = vst [vmem:[#allocation25_spill] sm:$0xff] %v11053_v11 }
 0x66b   :  { %4060 = vmatpush1.bf16.msra.mxu0 %v11037_v55  ;;  %4227 = vmatpush1.bf16.msra.mxu1 %v11037_v55  ;;  %v11057_v55 = vld [vmem:[#allocation4 + $0x44] ss:$8 sps:$4 sm:$0xff]  }
 0x66c   :  { %4061 = vmatprep.subr.bf16.mxu0 %v11041_v62  ;;  %4228 = vmatprep.subr.bf16.mxu1 %v11041_v62  ;;  %13150 = vst [vmem:[#allocation33_spill] sm:$0xff] %v11057_v55  ;;  %v11061_v62 = vld [vmem:[#allocation4 + $0x40] ss:$8 sps:$4 sm:$0xff]  }
 0x66d   :  { %13151 = vst [vmem:[#allocation11_spill] sm:$0xff] %v11061_v62 }
 0x66f   :  { %4062 = vmatpush1.bf16.msra.mxu0 %v11045_v59  ;;  %4229 = vmatpush1.bf16.msra.mxu1 %v11045_v59  ;;  %v11065_v59 = vld [vmem:[#allocation4 + $0x54] ss:$8 sps:$4 sm:$0xff]  }
 0x670   :  { %4063 = vmatprep.subr.bf16.mxu0 %v11049_v58  ;;  %4230 = vmatprep.subr.bf16.mxu1 %v11049_v58  ;;  %13152 = vst [vmem:[#allocation34_spill] sm:$0xff] %v11065_v59  ;;  %v11069_v58 = vld [vmem:[#allocation4 + $0x50] ss:$8 sps:$4 sm:$0xff]  }
 0x671   :  { %13153 = vst [vmem:[#allocation36_spill] sm:$0xff] %v11069_v58 }
 0x673   :  { %4064 = vmatpush1.bf16.msra.mxu0 %v11053_v11  ;;  %4231 = vmatpush1.bf16.msra.mxu1 %v11053_v11  ;;  %v11073_v11 = vld [vmem:[#allocation4 + $0x64] ss:$8 sps:$4 sm:$0xff]  }
 0x674   :  { %4065 = vmatprep.subr.bf16.mxu0 %v11057_v55  ;;  %4232 = vmatprep.subr.bf16.mxu1 %v11057_v55  ;;  %13154 = vst [vmem:[#allocation37_spill] sm:$0xff] %v11073_v11  ;;  %v11077_v55 = vld [vmem:[#allocation4 + $0x60] ss:$8 sps:$4 sm:$0xff]  }
 0x675   :  { %13155 = vst [vmem:[#allocation38_spill] sm:$0xff] %v11077_v55 }
 0x677   :  { %4066 = vmatpush1.bf16.msra.mxu0 %v11061_v62  ;;  %4233 = vmatpush1.bf16.msra.mxu1 %v11061_v62  ;;  %v11081_v62 = vld [vmem:[#allocation4 + $0x74] ss:$8 sps:$4 sm:$0xff]  }
 0x678   :  { %4067 = vmatprep.subr.bf16.mxu0 %v11065_v59  ;;  %4234 = vmatprep.subr.bf16.mxu1 %v11065_v59  ;;  %13156 = vst [vmem:[#allocation39_spill] sm:$0xff] %v11081_v62  ;;  %v11085_v59 = vld [vmem:[#allocation4 + $0x70] ss:$8 sps:$4 sm:$0xff]  }
 0x679   :  { %13157 = vst [vmem:[#allocation40_spill] sm:$0xff] %v11085_v59 }
 0x67b   :  { %4068 = vmatpush1.bf16.msra.mxu0 %v11069_v58  ;;  %4235 = vmatpush1.bf16.msra.mxu1 %v11069_v58  ;;  %v11089_v58 = vld [vmem:[#allocation4 + $0x84] ss:$8 sps:$4 sm:$0xff]  }
 0x67c   :  { %4069 = vmatprep.subr.bf16.mxu0 %v11073_v11  ;;  %4236 = vmatprep.subr.bf16.mxu1 %v11073_v11  ;;  %13158 = vst [vmem:[#allocation41_spill] sm:$0xff] %v11089_v58  ;;  %v11093_v11 = vld [vmem:[#allocation4 + $0x80] ss:$8 sps:$4 sm:$0xff]  }
 0x67d   :  { %13159 = vst [vmem:[#allocation42_spill] sm:$0xff] %v11093_v11 }
 0x67f   :  { %4070 = vmatpush1.bf16.msra.mxu0 %v11077_v55  ;;  %4237 = vmatpush1.bf16.msra.mxu1 %v11077_v55  ;;  %v11097_v55 = vld [vmem:[#allocation4 + $0x94] ss:$8 sps:$4 sm:$0xff]  }
 0x680   :  { %4071 = vmatprep.subr.bf16.mxu0 %v11081_v62  ;;  %4238 = vmatprep.subr.bf16.mxu1 %v11081_v62  ;;  %13160 = vst [vmem:[#allocation43_spill] sm:$0xff] %v11097_v55  ;;  %v11101_v62 = vld [vmem:[#allocation4 + $0x90] ss:$8 sps:$4 sm:$0xff]  }
 0x681   :  { %13161 = vst [vmem:[#allocation44_spill] sm:$0xff] %v11101_v62 }
 0x683   :  { %4072 = vmatpush1.bf16.msra.mxu0 %v11085_v59  ;;  %4239 = vmatpush1.bf16.msra.mxu1 %v11085_v59  ;;  %v11105_v59 = vld [vmem:[#allocation4 + $0xa4] ss:$8 sps:$4 sm:$0xff]  }
 0x684   :  { %4073 = vmatprep.subr.bf16.mxu0 %v11089_v58  ;;  %4240 = vmatprep.subr.bf16.mxu1 %v11089_v58  ;;  %13162 = vst [vmem:[#allocation45_spill] sm:$0xff] %v11105_v59  ;;  %v11109_v58 = vld [vmem:[#allocation4 + $0xa0] ss:$8 sps:$4 sm:$0xff]  }
 0x685   :  { %13163 = vst [vmem:[#allocation46_spill] sm:$0xff] %v11109_v58 }
 0x687   :  { %4074 = vmatpush1.bf16.msra.mxu0 %v11093_v11  ;;  %4241 = vmatpush1.bf16.msra.mxu1 %v11093_v11  ;;  %v11113_v11 = vld [vmem:[#allocation4 + $0xb4] ss:$8 sps:$4 sm:$0xff]  }
 0x688   :  { %4075 = vmatprep.subr.bf16.mxu0 %v11097_v55  ;;  %4242 = vmatprep.subr.bf16.mxu1 %v11097_v55  ;;  %13164 = vst [vmem:[#allocation47_spill] sm:$0xff] %v11113_v11  ;;  %v11117_v55 = vld [vmem:[#allocation4 + $0xb0] ss:$8 sps:$4 sm:$0xff]  }
 0x689   :  { %13165 = vst [vmem:[#allocation48_spill] sm:$0xff] %v11117_v55 }
 0x68b   :  { %4076 = vmatpush1.bf16.msra.mxu0 %v11101_v62  ;;  %4243 = vmatpush1.bf16.msra.mxu1 %v11101_v62  ;;  %v11121_v62 = vld [vmem:[#allocation4 + $0xc4] ss:$8 sps:$4 sm:$0xff]  }
 0x68c   :  { %4077 = vmatprep.subr.bf16.mxu0 %v11105_v59  ;;  %4244 = vmatprep.subr.bf16.mxu1 %v11105_v59  ;;  %13166 = vst [vmem:[#allocation55_spill] sm:$0xff] %v11121_v62 }
 0x68f   :  { %4078 = vmatpush1.bf16.msra.mxu0 %v11109_v58  ;;  %4245 = vmatpush1.bf16.msra.mxu1 %v11109_v58 }
 0x690   :  { %4079 = vmatprep.subr.bf16.mxu0 %v11113_v11  ;;  %4246 = vmatprep.subr.bf16.mxu1 %v11113_v11 }
 0x693   :  { %4080 = vmatpush1.bf16.msra.mxu0 %v11117_v55  ;;  %4247 = vmatpush1.bf16.msra.mxu1 %v11117_v55 }
 0x694   :  { %4081 = vmatprep.subr.bf16.mxu0 %v11121_v62  ;;  %4248 = vmatprep.subr.bf16.mxu1 %v11121_v62 }
 0x697   :  { %4082 = vmatpush1.bf16.msra.mxu0 %v13112_v25  ;;  %4249 = vmatpush1.bf16.msra.mxu1 %v13112_v25 }
 0x698   :  { %4083 = vmatprep.subr.bf16.mxu0 %v13113_v4  ;;  %4250 = vmatprep.subr.bf16.mxu1 %v13113_v4 }
 0x699   :  { %v3501_v11 = vpop.f32.mrb[32].mxu0  ;;  %v3668_v58 = vpop.f32.mrb[32].mxu1 }
 0x69a   :  { %v7193_v59 = vadd.f32 %v3501_v11, %v13114_v39  ;;  %v7197_v55 = vadd.f32 %v3668_v58, %v13114_v39  ;;  %v3503_v22 = vpop.f32.mrb[33].mxu0  ;;  %v3670_v57 = vpop.f32.mrb[33].mxu1 }
 0x69b   :  { %v7194_v38 = vadd.f32 %v3503_v22, %v8999_v63  ;;  %v7198_v62 = vadd.f32 %v3670_v57, %v8999_v63  ;;  %v3505_v20 = vpop.f32.mrb[34].mxu0  ;;  %v3672_v19 = vpop.f32.mrb[34].mxu1  ;;  %4084 = vmatpush1.bf16.msra.mxu0 %v13115_v2  ;;  %4251 = vmatpush1.bf16.msra.mxu1 %v13115_v2 }
 0x69c   :  { %v3510_v25 = vmax.f32 %v7193_v59, 0.0  ;;  %v3677_v4 = vmax.f32 %v7197_v55, 0.0  ;;  %v7195_v10 = vadd.f32 %v3505_v20, %v13114_v39  ;;  %v7199_v11 = vadd.f32 %v3672_v19, %v13114_v39  ;;  %v3507_v1 = vpop.f32.mrb[35].mxu0  ;;  %v3674_v58 = vpop.f32.mrb[35].mxu1  ;;  %4085 = vmatprep.subr.bf16.mxu0 %v10571_v36  ;;  %4252 = vmatprep.subr.bf16.mxu1 %v10571_v36 }
 0x69d   :  { %v3511_v22 = vmax.f32 %v7194_v38, 0.0  ;;  %v3678_v57 = vmax.f32 %v7198_v62, 0.0  ;;  %v7196_v28 = vadd.f32 %v3507_v1, %v8999_v63  ;;  %v7200_v27 = vadd.f32 %v3674_v58, %v8999_v63  ;;  %v13199_v62 = vld [vmem:[#allocation44_spill] sm:$0xff] }
 0x69e   :  { %v3512_v33 = vmax.f32 %v7195_v10, 0.0  ;;  %v3679_v2 = vmax.f32 %v7199_v11, 0.0  ;;  %v13198_v10 = vld [vmem:[#allocation43_spill] sm:$0xff]  ;;  %v13203_v58 = vld [vmem:[#allocation48_spill] sm:$0xff] }
 0x69f   :  { %v3514_v59 = vmax.f32 %v3510_v25, %v3511_v22  ;;  %v3681_v55 = vmax.f32 %v3677_v4, %v3678_v57  ;;  %v3513_v32 = vmax.f32 %v7196_v28, 0.0  ;;  %v3680_v20 = vmax.f32 %v7200_v27, 0.0  ;;  %4086 = vmatpush1.bf16.msra.mxu0 %v10577_v29  ;;  %4253 = vmatpush1.bf16.msra.mxu1 %v10577_v29  ;;  %v11154_v29 = vld [vmem:[%s12305_s0 + $0x5c] ss:$112 sps:$4 sm:$0xff]   ;;  %v13197_v28 = vld [vmem:[#allocation42_spill] sm:$0xff] }
 0x6a0   :  { %4087 = vmatprep.subr.bf16.mxu0 %v10581_v14  ;;  %4254 = vmatprep.subr.bf16.mxu1 %v10581_v14  ;;  %v11159_v14 = vld [vmem:[%s12305_s0 + $0x60] ss:$112 sps:$4 sm:$0xff]   ;;  %v13200_v25 = vld [vmem:[#allocation45_spill] sm:$0xff]  ;;  %v13202_v11 = vld [vmem:[#allocation47_spill] sm:$0xff] }
 0x6a1   :  { %v3683_v36 = vmax.f32 %v3514_v59, %v3681_v55  ;;  %v3515_v19 = vmax.f32 %v3512_v33, %v3513_v32  ;;  %v3682_v38 = vmax.f32 %v3679_v2, %v3680_v20  ;;  %v13195_v32 = vld [vmem:[#allocation40_spill] sm:$0xff]  ;;  %v13196_v33 = vld [vmem:[#allocation41_spill] sm:$0xff]  ;;  %v13201_v4 = vld [vmem:[#allocation46_spill] sm:$0xff] }
 0x6a2   :  { %v13204_v22 = vld [vmem:[#allocation55_spill] sm:$0xff]  ;;  %v8176_v2 = vld [vmem:[#allocation4 + $0xd4] ss:$8 sps:$4 sm:$0xff]  }
 0x6a3   :  { %v3684_v1 = vmax.f32 %v3515_v19, %v3682_v38  ;;  %4088 = vmatpush1.bf16.msra.mxu0 %v10585_v21  ;;  %4255 = vmatpush1.bf16.msra.mxu1 %v10585_v21  ;;  %v11228_v21 = vld [vmem:[%s12305_s0 + $0x58] ss:$112 sps:$4 sm:$0xff]  }
 0x6a4   :  { %4100 = vmatprep.subr.bf16.mxu0 %v10589_v41  ;;  %4267 = vmatprep.subr.bf16.mxu1 %v10589_v41  ;;  %v11233_v41 = vld [vmem:[%s12305_s0 + $0x5c] ss:$112 sps:$4 sm:$0xff]   ;;  %v8175_v57 = vld [vmem:[#allocation4 + $0xc0] ss:$8 sps:$4 sm:$0xff]  }
 0x6a5   :  { %v11149_v27 = vpack.c.bf16 %v3684_v1, %v3683_v36 }
 0x6a6   :  { %4090 = vmatmul.mubr.bf16.vlgmr.msra.gmra.mrb[40].mxu0 %v10938_v42  ;;  %4257 = vmatmul.mubr.bf16.vlgmr.msra.gmra.mrb[40].mxu1 %v10943_v43  ;;  %v13193_v42 = vld [vmem:[#allocation38_spill] sm:$0xff]  ;;  %v13194_v43 = vld [vmem:[#allocation39_spill] sm:$0xff] }
 0x6a7   :  { %13167 = vst [vmem:[#allocation56_spill] sm:$0xff] %v11149_v27  ;;  %4101 = vmatpush1.bf16.msra.mxu0 %v10607_v50  ;;  %4268 = vmatpush1.bf16.msra.mxu1 %v10607_v50  ;;  %v13168_v50 = vld [vmem:[#allocation50_spill] sm:$0xff] }
 0x6a8   :  { %4102 = vmatprep.subr.bf16.mxu0 %v10611_v23  ;;  %4269 = vmatprep.subr.bf16.mxu1 %v10611_v23  ;;  %v13169_v23 = vld [vmem:[#allocation27_spill] sm:$0xff] }
 0x6a9   :  { %4132 = vmatprep.mubr.bf16.mxu0 %v11154_v29  ;;  %4299 = vmatprep.mubr.bf16.mxu1 %v11159_v14  ;;  %v11644_v27 = vld [vmem:[#allocation6 + $0x1c0] ss:$8 sps:$4 sm:$0xff]  }
 0x6aa   :  { %13235 = vst [vmem:[#allocation38_spill] sm:$0xff] %v11644_v27 }
 0x6ab   :  { %4103 = vmatpush1.bf16.msra.mxu0 %v10617_v35  ;;  %4270 = vmatpush1.bf16.msra.mxu1 %v10617_v35  ;;  %v13170_v35 = vld [vmem:[#allocation28_spill] sm:$0xff] }
 0x6ac   :  { %4104 = vmatprep.subr.bf16.mxu0 %v10621_v46  ;;  %4271 = vmatprep.subr.bf16.mxu1 %v10621_v46  ;;  %v13171_v46 = vld [vmem:[#allocation29_spill] sm:$0xff] }
 0x6af   :  { %4105 = vmatpush1.bf16.msra.mxu0 %v10625_v6  ;;  %4272 = vmatpush1.bf16.msra.mxu1 %v10625_v6  ;;  %v13172_v6 = vld [vmem:[#allocation31_spill] sm:$0xff] }
 0x6b0   :  { %4106 = vmatprep.subr.bf16.mxu0 %v10629_v47  ;;  %4273 = vmatprep.subr.bf16.mxu1 %v10629_v47  ;;  %v13173_v47 = vld [vmem:[#allocation32_spill] sm:$0xff] }
 0x6b3   :  { %4107 = vmatpush1.bf16.msra.mxu0 %v10633_v51  ;;  %4274 = vmatpush1.bf16.msra.mxu1 %v10633_v51  ;;  %v13174_v51 = vld [vmem:[#allocation12_spill] sm:$0xff] }
 0x6b4   :  { %4108 = vmatprep.subr.bf16.mxu0 %v10637_v48  ;;  %4275 = vmatprep.subr.bf16.mxu1 %v10637_v48  ;;  %v13175_v48 = vld [vmem:[#allocation13_spill] sm:$0xff] }
 0x6b7   :  { %4109 = vmatpush1.bf16.msra.mxu0 %v10641_v5  ;;  %4276 = vmatpush1.bf16.msra.mxu1 %v10641_v5  ;;  %v13176_v5 = vld [vmem:[#allocation14_spill] sm:$0xff] }
 0x6b8   :  { %4110 = vmatprep.subr.bf16.mxu0 %v10645_v3  ;;  %4277 = vmatprep.subr.bf16.mxu1 %v10645_v3  ;;  %v13177_v3 = vld [vmem:[#allocation16_spill] sm:$0xff] }
 0x6bb   :  { %4111 = vmatpush1.bf16.msra.mxu0 %v10649_v26  ;;  %4278 = vmatpush1.bf16.msra.mxu1 %v10649_v26  ;;  %v13178_v26 = vld [vmem:[#allocation17_spill] sm:$0xff] }
 0x6bc   :  { %4112 = vmatprep.subr.bf16.mxu0 %v13117_v24  ;;  %4279 = vmatprep.subr.bf16.mxu1 %v13117_v24  ;;  %v13180_v24 = vld [vmem:[#allocation19_spill] sm:$0xff] }
 0x6bf   :  { %4113 = vmatpush1.bf16.msra.mxu0 %v13118_v13  ;;  %4280 = vmatpush1.bf16.msra.mxu1 %v13118_v13  ;;  %v13181_v13 = vld [vmem:[#allocation20_spill] sm:$0xff] }
 0x6c0   :  { %4114 = vmatprep.subr.bf16.mxu0 %v13119_v12  ;;  %4281 = vmatprep.subr.bf16.mxu1 %v13119_v12  ;;  %v13182_v12 = vld [vmem:[#allocation21_spill] sm:$0xff] }
 0x6c3   :  { %4115 = vmatpush1.bf16.msra.mxu0 %v13120_v15  ;;  %4282 = vmatpush1.bf16.msra.mxu1 %v13120_v15  ;;  %v13183_v15 = vld [vmem:[#allocation22_spill] sm:$0xff] }
 0x6c4   :  { %4116 = vmatprep.subr.bf16.mxu0 %v13121_v16  ;;  %4283 = vmatprep.subr.bf16.mxu1 %v13121_v16  ;;  %v13184_v16 = vld [vmem:[#allocation23_spill] sm:$0xff] }
 0x6c7   :  { %4117 = vmatpush1.bf16.msra.mxu0 %v13122_v18  ;;  %4284 = vmatpush1.bf16.msra.mxu1 %v13122_v18  ;;  %v13185_v18 = vld [vmem:[#allocation52_spill] sm:$0xff] }
 0x6c8   :  { %4118 = vmatprep.subr.bf16.mxu0 %v13123_v9  ;;  %4285 = vmatprep.subr.bf16.mxu1 %v13123_v9  ;;  %v13186_v9 = vld [vmem:[#allocation53_spill] sm:$0xff] }
 0x6cb   :  { %4119 = vmatpush1.bf16.msra.mxu0 %v13124_v0  ;;  %4286 = vmatpush1.bf16.msra.mxu1 %v13124_v0  ;;  %v13187_v0 = vld [vmem:[#allocation25_spill] sm:$0xff] }
 0x6cc   :  { %4120 = vmatprep.subr.bf16.mxu0 %v13125_v52  ;;  %4287 = vmatprep.subr.bf16.mxu1 %v13125_v52  ;;  %v13188_v52 = vld [vmem:[#allocation33_spill] sm:$0xff] }
 0x6cf   :  { %4121 = vmatpush1.bf16.msra.mxu0 %v13126_v56  ;;  %4288 = vmatpush1.bf16.msra.mxu1 %v13126_v56  ;;  %v13189_v56 = vld [vmem:[#allocation11_spill] sm:$0xff] }
 0x6d0   :  { %4122 = vmatprep.subr.bf16.mxu0 %v13127_v53  ;;  %4289 = vmatprep.subr.bf16.mxu1 %v13127_v53  ;;  %v13190_v53 = vld [vmem:[#allocation34_spill] sm:$0xff] }
 0x6d3   :  { %4123 = vmatpush1.bf16.msra.mxu0 %v10697_v49  ;;  %4290 = vmatpush1.bf16.msra.mxu1 %v10697_v49  ;;  %v7732_v49 = vld [vmem:[%s12305_s0 + $0x60] ss:$112 sps:$4 sm:$0xff]  }
 0x6d4   :  { %4124 = vmatprep.subr.bf16.mxu0 %v10701_v37  ;;  %4291 = vmatprep.subr.bf16.mxu1 %v10701_v37  ;;  %v7733_v37 = vld [vmem:[%s12305_s0 + $0x64] ss:$112 sps:$4 sm:$0xff]  }
 0x6d7   :  { %4125 = vmatpush1.bf16.msra.mxu0 %v10705_v17  ;;  %4292 = vmatpush1.bf16.msra.mxu1 %v10705_v17  ;;  %v13179_v17 = vld [vmem:[#allocation18_spill] sm:$0xff] }
 0x6d8   :  { %4126 = vmatprep.subr.bf16.mxu0 %v13128_v40  ;;  %4293 = vmatprep.subr.bf16.mxu1 %v13128_v40  ;;  %v13191_v40 = vld [vmem:[#allocation36_spill] sm:$0xff] }
 0x6db   :  { %4127 = vmatpush1.bf16.msra.mxu0 %v13129_v54  ;;  %4294 = vmatpush1.bf16.msra.mxu1 %v13129_v54  ;;  %v13192_v54 = vld [vmem:[#allocation37_spill] sm:$0xff] }
 0x6dc   :  { %4128 = vmatprep.subr.bf16.mxu0 %v10923_v60  ;;  %4295 = vmatprep.subr.bf16.mxu1 %v10923_v60 }
 0x6df   :  { %4129 = vmatpush1.bf16.msra.mxu0 %v10927_v61  ;;  %4296 = vmatpush1.bf16.msra.mxu1 %v10927_v61 }
 0x6e0   :  { %4130 = vmatprep.subr.bf16.mxu0 %v10931_v34  ;;  %4297 = vmatprep.subr.bf16.mxu1 %v10931_v34 }
 0x6e3   :  { %4131 = vmatpush1.bf16.msra.mxu0 %v10945_v44  ;;  %4298 = vmatpush1.bf16.msra.mxu1 %v10945_v44 }
 0x6e4   :  { %4143 = vmatprep.subr.bf16.mxu0 %v10949_v45  ;;  %4310 = vmatprep.subr.bf16.mxu1 %v10949_v45 }
 0x6e6   :  { %4133 = vmatmul.mubr.bf16.vlgmr.msra.gmra.mrb[40].mxu0 %v11228_v21  ;;  %4300 = vmatmul.mubr.bf16.vlgmr.msra.gmra.mrb[40].mxu1 %v11233_v41 }
 0x6e7   :  { %4144 = vmatpush1.bf16.msra.mxu0 %v10955_v7  ;;  %4311 = vmatpush1.bf16.msra.mxu1 %v10955_v7 }
 0x6e8   :  { %4145 = vmatprep.subr.bf16.mxu0 %v10959_v8  ;;  %4312 = vmatprep.subr.bf16.mxu1 %v10959_v8 }
 0x6e9   :  { %4175 = vmatprep.mubr.bf16.mxu0 %v12837_v31  ;;  %4342 = vmatprep.mubr.bf16.mxu1 %v12837_v31 }
 0x6eb   :  { %4146 = vmatpush1.bf16.msra.mxu0 %v10965_v30  ;;  %4313 = vmatpush1.bf16.msra.mxu1 %v10965_v30 }
 0x6ec   :  { %4147 = vmatprep.subr.bf16.mxu0 %v13168_v50  ;;  %4314 = vmatprep.subr.bf16.mxu1 %v13168_v50 }
 0x6ef   :  { %4148 = vmatpush1.bf16.msra.mxu0 %v13169_v23  ;;  %4315 = vmatpush1.bf16.msra.mxu1 %v13169_v23 }
 0x6f0   :  { %4149 = vmatprep.subr.bf16.mxu0 %v13170_v35  ;;  %4316 = vmatprep.subr.bf16.mxu1 %v13170_v35 }
 0x6f3   :  { %4150 = vmatpush1.bf16.msra.mxu0 %v13171_v46  ;;  %4317 = vmatpush1.bf16.msra.mxu1 %v13171_v46 }
 0x6f4   :  { %4151 = vmatprep.subr.bf16.mxu0 %v13172_v6  ;;  %4318 = vmatprep.subr.bf16.mxu1 %v13172_v6 }
 0x6f7   :  { %4152 = vmatpush1.bf16.msra.mxu0 %v13173_v47  ;;  %4319 = vmatpush1.bf16.msra.mxu1 %v13173_v47 }
 0x6f8   :  { %4153 = vmatprep.subr.bf16.mxu0 %v13174_v51  ;;  %4320 = vmatprep.subr.bf16.mxu1 %v13174_v51 }
 0x6fb   :  { %4154 = vmatpush1.bf16.msra.mxu0 %v13175_v48  ;;  %4321 = vmatpush1.bf16.msra.mxu1 %v13175_v48 }
 0x6fc   :  { %4155 = vmatprep.subr.bf16.mxu0 %v13176_v5  ;;  %4322 = vmatprep.subr.bf16.mxu1 %v13176_v5 }
 0x6ff   :  { %4156 = vmatpush1.bf16.msra.mxu0 %v13177_v3  ;;  %4323 = vmatpush1.bf16.msra.mxu1 %v13177_v3 }
 0x700   :  { %4157 = vmatprep.subr.bf16.mxu0 %v13178_v26  ;;  %4324 = vmatprep.subr.bf16.mxu1 %v13178_v26 }
 0x703   :  { %4158 = vmatpush1.bf16.msra.mxu0 %v13179_v17  ;;  %4325 = vmatpush1.bf16.msra.mxu1 %v13179_v17 }
 0x704   :  { %4395 = vmatprep.subr.bf16.mxu0 %v13180_v24  ;;  %4562 = vmatprep.subr.bf16.mxu1 %v13180_v24 }
 0x706   :  { %4176 = vmatmul.mubr.bf16.vlgmr.msra.gmra.mrb[40].mxu0 %v7732_v49  ;;  %4343 = vmatmul.mubr.bf16.vlgmr.msra.gmra.mrb[40].mxu1 %v7733_v37  ;;  %v8177_v37 = vld [vmem:[#allocation4 + $0xd0] ss:$8 sps:$4 sm:$0xff]  }
 0x707   :  { %4396 = vmatpush1.bf16.msra.mxu0 %v13181_v13  ;;  %4563 = vmatpush1.bf16.msra.mxu1 %v13181_v13 }
 0x708   :  { %4397 = vmatprep.subr.bf16.mxu0 %v13182_v12  ;;  %4564 = vmatprep.subr.bf16.mxu1 %v13182_v12 }
 0x709   :  { %4427 = vmatprep.mubr.bf16.mxu0 %v11154_v29  ;;  %4594 = vmatprep.mubr.bf16.mxu1 %v11159_v14 }
 0x70b   :  { %4398 = vmatpush1.bf16.msra.mxu0 %v13183_v15  ;;  %4565 = vmatpush1.bf16.msra.mxu1 %v13183_v15 }
 0x70c   :  { %4399 = vmatprep.subr.bf16.mxu0 %v13184_v16  ;;  %4566 = vmatprep.subr.bf16.mxu1 %v13184_v16 }
 0x70f   :  { %4400 = vmatpush1.bf16.msra.mxu0 %v13185_v18  ;;  %4567 = vmatpush1.bf16.msra.mxu1 %v13185_v18 }
 0x710   :  { %4401 = vmatprep.subr.bf16.mxu0 %v13186_v9  ;;  %4568 = vmatprep.subr.bf16.mxu1 %v13186_v9  ;;  %v8178_v9 = vld [vmem:[#allocation4 + $0xe4] ss:$8 sps:$4 sm:$0xff]  }
 0x713   :  { %4402 = vmatpush1.bf16.msra.mxu0 %v13187_v0  ;;  %4569 = vmatpush1.bf16.msra.mxu1 %v13187_v0 }
 0x714   :  { %4403 = vmatprep.subr.bf16.mxu0 %v13188_v52  ;;  %4570 = vmatprep.subr.bf16.mxu1 %v13188_v52 }
 0x717   :  { %4404 = vmatpush1.bf16.msra.mxu0 %v13189_v56  ;;  %4571 = vmatpush1.bf16.msra.mxu1 %v13189_v56 }
 0x718   :  { %4405 = vmatprep.subr.bf16.mxu0 %v13190_v53  ;;  %4572 = vmatprep.subr.bf16.mxu1 %v13190_v53 }
 0x71b   :  { %4406 = vmatpush1.bf16.msra.mxu0 %v13191_v40  ;;  %4573 = vmatpush1.bf16.msra.mxu1 %v13191_v40 }
 0x71c   :  { %4407 = vmatprep.subr.bf16.mxu0 %v13192_v54  ;;  %4574 = vmatprep.subr.bf16.mxu1 %v13192_v54 }
 0x71f   :  { %4408 = vmatpush1.bf16.msra.mxu0 %v13193_v42  ;;  %4575 = vmatpush1.bf16.msra.mxu1 %v13193_v42 }
 0x720   :  { %4409 = vmatprep.subr.bf16.mxu0 %v13194_v43  ;;  %4576 = vmatprep.subr.bf16.mxu1 %v13194_v43 }
 0x723   :  { %4410 = vmatpush1.bf16.msra.mxu0 %v13195_v32  ;;  %4577 = vmatpush1.bf16.msra.mxu1 %v13195_v32 }
 0x724   :  { %4411 = vmatprep.subr.bf16.mxu0 %v13196_v33  ;;  %4578 = vmatprep.subr.bf16.mxu1 %v13196_v33 }
 0x727   :  { %4412 = vmatpush1.bf16.msra.mxu0 %v13197_v28  ;;  %4579 = vmatpush1.bf16.msra.mxu1 %v13197_v28  ;;  %v8179_v28 = vld [vmem:[#allocation4 + $0xe0] ss:$8 sps:$4 sm:$0xff]  }
 0x728   :  { %4413 = vmatprep.subr.bf16.mxu0 %v13198_v10  ;;  %4580 = vmatprep.subr.bf16.mxu1 %v13198_v10  ;;  %v8180_v10 = vld [vmem:[#allocation4 + $0xf4] ss:$8 sps:$4 sm:$0xff]  }
 0x72b   :  { %4414 = vmatpush1.bf16.msra.mxu0 %v13199_v62  ;;  %4581 = vmatpush1.bf16.msra.mxu1 %v13199_v62 }
 0x72c   :  { %4415 = vmatprep.subr.bf16.mxu0 %v13200_v25  ;;  %4582 = vmatprep.subr.bf16.mxu1 %v13200_v25 }
 0x72f   :  { %4416 = vmatpush1.bf16.msra.mxu0 %v13201_v4  ;;  %4583 = vmatpush1.bf16.msra.mxu1 %v13201_v4 }
 0x730   :  { %4417 = vmatprep.subr.bf16.mxu0 %v13202_v11  ;;  %4584 = vmatprep.subr.bf16.mxu1 %v13202_v11 }
 0x733   :  { %4418 = vmatpush1.bf16.msra.mxu0 %v13203_v58  ;;  %4585 = vmatpush1.bf16.msra.mxu1 %v13203_v58  ;;  %v8181_v58 = vld [vmem:[#allocation4 + $0xf0] ss:$8 sps:$4 sm:$0xff]  }
 0x734   :  { %4419 = vmatprep.subr.bf16.mxu0 %v13204_v22  ;;  %4586 = vmatprep.subr.bf16.mxu1 %v13204_v22  ;;  %v8182_v22 = vld [vmem:[#allocation4 + $0x104] ss:$8 sps:$4 sm:$0xff]  }
 0x737   :  { %4420 = vmatpush1.bf16.msra.mxu0 %v8175_v57  ;;  %4587 = vmatpush1.bf16.msra.mxu1 %v8175_v57 }
 0x738   :  { %4421 = vmatprep.subr.bf16.mxu0 %v8176_v2  ;;  %4588 = vmatprep.subr.bf16.mxu1 %v8176_v2  ;;  %v7736_v2 = vld [vmem:[%s12305_s0 + $0x64] ss:$112 sps:$4 sm:$0xff]  }
 0x739   :  { %v3839_v59 = vpop.f32.mrb[36].mxu0  ;;  %v4006_v55 = vpop.f32.mrb[36].mxu1 }
 0x73a   :  { %v7201_v20 = vadd.f32 %v3839_v59, %v13114_v39  ;;  %v7205_v36 = vadd.f32 %v4006_v55, %v13114_v39  ;;  %v3841_v19 = vpop.f32.mrb[37].mxu0  ;;  %v4008_v38 = vpop.f32.mrb[37].mxu1  ;;  %v7739_v59 = vld [vmem:[%s12305_s0 + $0x68] ss:$112 sps:$4 sm:$0xff]  }
 0x73b   :  { %v7202_v1 = vadd.f32 %v3841_v19, %v8999_v63  ;;  %v7206_v29 = vadd.f32 %v4008_v38, %v8999_v63  ;;  %v3843_v14 = vpop.f32.mrb[38].mxu0  ;;  %v4010_v49 = vpop.f32.mrb[38].mxu1  ;;  %4422 = vmatpush1.bf16.msra.mxu0 %v8177_v37  ;;  %4589 = vmatpush1.bf16.msra.mxu1 %v8177_v37  ;;  %v8183_v55 = vld [vmem:[#allocation4 + $0x100] ss:$8 sps:$4 sm:$0xff]   ;;  %v8186_v19 = vld [vmem:[#allocation4 + $0x124] ss:$8 sps:$4 sm:$0xff]  }
 0x73c   :  { %v3848_v24 = vmax.f32 %v7201_v20, 0.0  ;;  %v4015_v13 = vmax.f32 %v7205_v36, 0.0  ;;  %v7203_v12 = vadd.f32 %v3843_v14, %v13114_v39  ;;  %v7207_v15 = vadd.f32 %v4010_v49, %v13114_v39  ;;  %v3845_v16 = vpop.f32.mrb[39].mxu0  ;;  %v4012_v18 = vpop.f32.mrb[39].mxu1  ;;  %4423 = vmatprep.subr.bf16.mxu0 %v8178_v9  ;;  %4590 = vmatprep.subr.bf16.mxu1 %v8178_v9  ;;  %v8184_v20 = vld [vmem:[#allocation4 + $0x114] ss:$8 sps:$4 sm:$0xff]  }
 0x73d   :  { %v3849_v0 = vmax.f32 %v7202_v1, 0.0  ;;  %v4016_v52 = vmax.f32 %v7206_v29, 0.0  ;;  %v7204_v56 = vadd.f32 %v3845_v16, %v8999_v63  ;;  %v7208_v53 = vadd.f32 %v4012_v18, %v8999_v63  ;;  %v8185_v36 = vld [vmem:[#allocation4 + $0x110] ss:$8 sps:$4 sm:$0xff]   ;;  %v8187_v38 = vld [vmem:[#allocation4 + $0x120] ss:$8 sps:$4 sm:$0xff]  }
 0x73e   :  { %v3850_v40 = vmax.f32 %v7203_v12, 0.0  ;;  %v4017_v54 = vmax.f32 %v7207_v15, 0.0  ;;  %v8190_v1 = vld [vmem:[#allocation4 + $0x144] ss:$8 sps:$4 sm:$0xff]   ;;  %v8191_v29 = vld [vmem:[#allocation4 + $0x140] ss:$8 sps:$4 sm:$0xff]  }
 0x73f   :  { %v3852_v42 = vmax.f32 %v3848_v24, %v3849_v0  ;;  %v4019_v43 = vmax.f32 %v4015_v13, %v4016_v52  ;;  %v3851_v32 = vmax.f32 %v7204_v56, 0.0  ;;  %v4018_v33 = vmax.f32 %v7208_v53, 0.0  ;;  %4424 = vmatpush1.bf16.msra.mxu0 %v8179_v28  ;;  %4591 = vmatpush1.bf16.msra.mxu1 %v8179_v28  ;;  %v8192_v14 = vld [vmem:[#allocation4 + $0x154] ss:$8 sps:$4 sm:$0xff]   ;;  %v8193_v49 = vld [vmem:[#allocation4 + $0x150] ss:$8 sps:$4 sm:$0xff]  }
 0x740   :  { %4425 = vmatprep.subr.bf16.mxu0 %v8180_v10  ;;  %4592 = vmatprep.subr.bf16.mxu1 %v8180_v10  ;;  %v8194_v37 = vld [vmem:[#allocation4 + $0x164] ss:$8 sps:$4 sm:$0xff]   ;;  %v8195_v24 = vld [vmem:[#allocation4 + $0x160] ss:$8 sps:$4 sm:$0xff]   ;;  %v8196_v13 = vld [vmem:[#allocation4 + $0x174] ss:$8 sps:$4 sm:$0xff]  }
 0x741   :  { %v4021_v62 = vmax.f32 %v3852_v42, %v4019_v43  ;;  %v3853_v25 = vmax.f32 %v3850_v40, %v3851_v32  ;;  %v4020_v4 = vmax.f32 %v4017_v54, %v4018_v33  ;;  %v8197_v12 = vld [vmem:[#allocation4 + $0x170] ss:$8 sps:$4 sm:$0xff]   ;;  %v8198_v15 = vld [vmem:[#allocation4 + $0x184] ss:$8 sps:$4 sm:$0xff]   ;;  %v8199_v16 = vld [vmem:[#allocation4 + $0x180] ss:$8 sps:$4 sm:$0xff]  }
 0x742   :  { %v8200_v18 = vld [vmem:[#allocation4 + $0x194] ss:$8 sps:$4 sm:$0xff]   ;;  %v8201_v9 = vld [vmem:[#allocation4 + $0x190] ss:$8 sps:$4 sm:$0xff]   ;;  %v8202_v0 = vld [vmem:[#allocation4 + $0x1a4] ss:$8 sps:$4 sm:$0xff]  }
 0x743   :  { %v4022_v11 = vmax.f32 %v3853_v25, %v4020_v4  ;;  %4426 = vmatpush1.bf16.msra.mxu0 %v8181_v58  ;;  %4593 = vmatpush1.bf16.msra.mxu1 %v8181_v58  ;;  %v8203_v52 = vld [vmem:[#allocation4 + $0x1a0] ss:$8 sps:$4 sm:$0xff]   ;;  %v8204_v56 = vld [vmem:[#allocation4 + $0x1b4] ss:$8 sps:$4 sm:$0xff]   ;;  %v8205_v53 = vld [vmem:[#allocation4 + $0x1b0] ss:$8 sps:$4 sm:$0xff]  }
 0x744   :  { %4438 = vmatprep.subr.bf16.mxu0 %v8182_v22  ;;  %4605 = vmatprep.subr.bf16.mxu1 %v8182_v22  ;;  %v8206_v40 = vld [vmem:[#allocation4 + $0x1c4] ss:$8 sps:$4 sm:$0xff]   ;;  %v8207_v54 = vld [vmem:[#allocation4 + $0x1c0] ss:$8 sps:$4 sm:$0xff]   ;;  %v8208_v42 = vld [vmem:[#allocation4 + $0x1d4] ss:$8 sps:$4 sm:$0xff]  }
 0x745   :  { %v11339_v57 = vpack.c.bf16 %v4022_v11, %v4021_v62  ;;  %v8209_v43 = vld [vmem:[#allocation4 + $0x1d0] ss:$8 sps:$4 sm:$0xff]   ;;  %v7737_v33 = vld [vmem:[%s12305_s0 + $0x64] ss:$112 sps:$4 sm:$0xff]   ;;  %v11470_v10 = vld [vmem:[#allocation6 + $0x80] ss:$8 sps:$4 sm:$0xff]  }
 0x746   :  { %4428 = vmatmul.mubr.bf16.vlgmr.msra.gmra.mrb[44].mxu0 %v11228_v21  ;;  %4595 = vmatmul.mubr.bf16.vlgmr.msra.gmra.mrb[44].mxu1 %v11233_v41  ;;  %v8188_v21 = vld [vmem:[#allocation4 + $0x134] ss:$8 sps:$4 sm:$0xff]   ;;  %v8189_v41 = vld [vmem:[#allocation4 + $0x130] ss:$8 sps:$4 sm:$0xff]   ;;  %v11466_v28 = vld [vmem:[#allocation6 + $0x84] ss:$8 sps:$4 sm:$0xff]  }
 0x747   :  { %13205 = vst [vmem:[#allocation50_spill] sm:$0xff] %v11339_v57  ;;  %4439 = vmatpush1.bf16.msra.mxu0 %v8183_v55  ;;  %4606 = vmatpush1.bf16.msra.mxu1 %v8183_v55  ;;  %v7734_v32 = vld [vmem:[%s12305_s0 + $0x60] ss:$112 sps:$4 sm:$0xff]   ;;  %13215 = vst [vmem:[#allocation14_spill] sm:$0xff] %v11466_v28  ;;  %v11474_v62 = vld [vmem:[#allocation6 + $0x94] ss:$8 sps:$4 sm:$0xff]  }
 0x748   :  { %4440 = vmatprep.subr.bf16.mxu0 %v8184_v20  ;;  %4607 = vmatprep.subr.bf16.mxu1 %v8184_v20  ;;  %13216 = vst [vmem:[#allocation16_spill] sm:$0xff] %v11470_v10  ;;  %13217 = vst [vmem:[#allocation17_spill] sm:$0xff] %v11474_v62  ;;  %v11478_v25 = vld [vmem:[#allocation6 + $0x90] ss:$8 sps:$4 sm:$0xff]   ;;  %v11482_v4 = vld [vmem:[#allocation6 + $0xa4] ss:$8 sps:$4 sm:$0xff]  }
 0x749   :  { %4470 = vmatprep.mubr.bf16.mxu0 %v7736_v2  ;;  %4637 = vmatprep.mubr.bf16.mxu1 %v7739_v59  ;;  %13218 = vst [vmem:[#allocation18_spill] sm:$0xff] %v11478_v25  ;;  %13219 = vst [vmem:[#allocation19_spill] sm:$0xff] %v11482_v4  ;;  %v11486_v11 = vld [vmem:[#allocation6 + $0xa0] ss:$8 sps:$4 sm:$0xff]   ;;  %v11490_v58 = vld [vmem:[#allocation6 + $0xb4] ss:$8 sps:$4 sm:$0xff]  }
 0x74a   :  { %13220 = vst [vmem:[#allocation20_spill] sm:$0xff] %v11486_v11  ;;  %13221 = vst [vmem:[#allocation21_spill] sm:$0xff] %v11490_v58  ;;  %v11494_v22 = vld [vmem:[#allocation6 + $0xb0] ss:$8 sps:$4 sm:$0xff]   ;;  %v11498_v2 = vld [vmem:[#allocation6 + $0xc4] ss:$8 sps:$4 sm:$0xff]  }
 0x74b   :  { %4441 = vmatpush1.bf16.msra.mxu0 %v8185_v36  ;;  %4608 = vmatpush1.bf16.msra.mxu1 %v8185_v36  ;;  %13222 = vst [vmem:[#allocation22_spill] sm:$0xff] %v11494_v22  ;;  %13223 = vst [vmem:[#allocation23_spill] sm:$0xff] %v11498_v2  ;;  %v11502_v59 = vld [vmem:[#allocation6 + $0xc0] ss:$8 sps:$4 sm:$0xff]   ;;  %v11506_v55 = vld [vmem:[#allocation6 + $0xd4] ss:$8 sps:$4 sm:$0xff]  }
 0x74c   :  { %4442 = vmatprep.subr.bf16.mxu0 %v8186_v19  ;;  %4609 = vmatprep.subr.bf16.mxu1 %v8186_v19  ;;  %13224 = vst [vmem:[#allocation52_spill] sm:$0xff] %v11502_v59  ;;  %13225 = vst [vmem:[#allocation53_spill] sm:$0xff] %v11506_v55  ;;  %v11510_v20 = vld [vmem:[#allocation6 + $0xd0] ss:$8 sps:$4 sm:$0xff]   ;;  %v11514_v36 = vld [vmem:[#allocation6 + $0xe4] ss:$8 sps:$4 sm:$0xff]  }
 0x74d   :  { %v11640_v57 = vld [vmem:[#allocation6 + $0x1c4] ss:$8 sps:$4 sm:$0xff]  }
 0x74e   :  { %13234 = vst [vmem:[#allocation37_spill] sm:$0xff] %v11640_v57 }
 0x74f   :  { %4443 = vmatpush1.bf16.msra.mxu0 %v8187_v38  ;;  %4610 = vmatpush1.bf16.msra.mxu1 %v8187_v38 }
 0x750   :  { %4444 = vmatprep.subr.bf16.mxu0 %v8188_v21  ;;  %4611 = vmatprep.subr.bf16.mxu1 %v8188_v21 }
 0x753   :  { %4445 = vmatpush1.bf16.msra.mxu0 %v8189_v41  ;;  %4612 = vmatpush1.bf16.msra.mxu1 %v8189_v41 }
 0x754   :  { %4446 = vmatprep.subr.bf16.mxu0 %v8190_v1  ;;  %4613 = vmatprep.subr.bf16.mxu1 %v8190_v1 }
 0x757   :  { %4447 = vmatpush1.bf16.msra.mxu0 %v8191_v29  ;;  %4614 = vmatpush1.bf16.msra.mxu1 %v8191_v29 }
 0x758   :  { %4448 = vmatprep.subr.bf16.mxu0 %v8192_v14  ;;  %4615 = vmatprep.subr.bf16.mxu1 %v8192_v14 }
 0x75b   :  { %4449 = vmatpush1.bf16.msra.mxu0 %v8193_v49  ;;  %4616 = vmatpush1.bf16.msra.mxu1 %v8193_v49 }
 0x75c   :  { %4450 = vmatprep.subr.bf16.mxu0 %v8194_v37  ;;  %4617 = vmatprep.subr.bf16.mxu1 %v8194_v37 }
 0x75f   :  { %4451 = vmatpush1.bf16.msra.mxu0 %v8195_v24  ;;  %4618 = vmatpush1.bf16.msra.mxu1 %v8195_v24 }
 0x760   :  { %4452 = vmatprep.subr.bf16.mxu0 %v8196_v13  ;;  %4619 = vmatprep.subr.bf16.mxu1 %v8196_v13  ;;  %v11522_v13 = vld [vmem:[#allocation6 + $0xe0] ss:$8 sps:$4 sm:$0xff]  }
 0x763   :  { %4453 = vmatpush1.bf16.msra.mxu0 %v8197_v12  ;;  %4620 = vmatpush1.bf16.msra.mxu1 %v8197_v12 }
 0x764   :  { %4454 = vmatprep.subr.bf16.mxu0 %v8198_v15  ;;  %4621 = vmatprep.subr.bf16.mxu1 %v8198_v15 }
 0x767   :  { %4455 = vmatpush1.bf16.msra.mxu0 %v8199_v16  ;;  %4622 = vmatpush1.bf16.msra.mxu1 %v8199_v16 }
 0x768   :  { %4456 = vmatprep.subr.bf16.mxu0 %v8200_v18  ;;  %4623 = vmatprep.subr.bf16.mxu1 %v8200_v18 }
 0x76b   :  { %4457 = vmatpush1.bf16.msra.mxu0 %v8201_v9  ;;  %4624 = vmatpush1.bf16.msra.mxu1 %v8201_v9 }
 0x76c   :  { %4458 = vmatprep.subr.bf16.mxu0 %v8202_v0  ;;  %4625 = vmatprep.subr.bf16.mxu1 %v8202_v0 }
 0x76f   :  { %4459 = vmatpush1.bf16.msra.mxu0 %v8203_v52  ;;  %4626 = vmatpush1.bf16.msra.mxu1 %v8203_v52  ;;  %v11528_v52 = vld [vmem:[#allocation6 + $0xf4] ss:$8 sps:$4 sm:$0xff]  }
 0x770   :  { %4460 = vmatprep.subr.bf16.mxu0 %v8204_v56  ;;  %4627 = vmatprep.subr.bf16.mxu1 %v8204_v56 }
 0x773   :  { %4461 = vmatpush1.bf16.msra.mxu0 %v8205_v53  ;;  %4628 = vmatpush1.bf16.msra.mxu1 %v8205_v53 }
 0x774   :  { %4462 = vmatprep.subr.bf16.mxu0 %v8206_v40  ;;  %4629 = vmatprep.subr.bf16.mxu1 %v8206_v40 }
 0x777   :  { %4463 = vmatpush1.bf16.msra.mxu0 %v8207_v54  ;;  %4630 = vmatpush1.bf16.msra.mxu1 %v8207_v54 }
 0x778   :  { %4464 = vmatprep.subr.bf16.mxu0 %v8208_v42  ;;  %4631 = vmatprep.subr.bf16.mxu1 %v8208_v42 }
 0x77b   :  { %4465 = vmatpush1.bf16.msra.mxu0 %v8209_v43  ;;  %4632 = vmatpush1.bf16.msra.mxu1 %v8209_v43 }
 0x77c   :  { %4466 = vmatprep.subr.bf16.mxu0 %v10923_v60  ;;  %4633 = vmatprep.subr.bf16.mxu1 %v10923_v60  ;;  %v11395_v60 = vld [vmem:[#allocation6 + $0x4] ss:$8 sps:$4 sm:$0xff]  }
 0x77f   :  { %4467 = vmatpush1.bf16.msra.mxu0 %v10927_v61  ;;  %4634 = vmatpush1.bf16.msra.mxu1 %v10927_v61  ;;  %v7740_v61 = vld [vmem:[%s12305_s0 + $0x68] ss:$112 sps:$4 sm:$0xff]  }
 0x780   :  { %4468 = vmatprep.subr.bf16.mxu0 %v10931_v34  ;;  %4635 = vmatprep.subr.bf16.mxu1 %v10931_v34  ;;  %v7741_v34 = vld [vmem:[%s12305_s0 + $0x6c] ss:$112 sps:$4 sm:$0xff]  }
 0x783   :  { %4469 = vmatpush1.bf16.msra.mxu0 %v10945_v44  ;;  %4636 = vmatpush1.bf16.msra.mxu1 %v10945_v44  ;;  %v11405_v44 = vld [vmem:[#allocation6] ss:$8 sps:$4 sm:$0xff]  }
 0x784   :  { %4481 = vmatprep.subr.bf16.mxu0 %v10949_v45  ;;  %4648 = vmatprep.subr.bf16.mxu1 %v10949_v45  ;;  %v11409_v45 = vld [vmem:[#allocation6 + $0x14] ss:$8 sps:$4 sm:$0xff]  }
 0x786   :  { %4471 = vmatmul.mubr.bf16.vlgmr.msra.gmra.mrb[44].mxu0 %v7734_v32  ;;  %4638 = vmatmul.mubr.bf16.vlgmr.msra.gmra.mrb[44].mxu1 %v7737_v33 }
 0x787   :  { %4482 = vmatpush1.bf16.msra.mxu0 %v10955_v7  ;;  %4649 = vmatpush1.bf16.msra.mxu1 %v10955_v7  ;;  %v13206_v7 = vld [vmem:[#allocation26_spill] sm:$0xff] }
 0x788   :  { %4483 = vmatprep.subr.bf16.mxu0 %v10959_v8  ;;  %4650 = vmatprep.subr.bf16.mxu1 %v10959_v8  ;;  %v11413_v8 = vld [vmem:[#allocation6 + $0x10] ss:$8 sps:$4 sm:$0xff]  }
 0x789   :  { %4513 = vmatprep.mubr.bf16.mxu0 %v12837_v31  ;;  %4680 = vmatprep.mubr.bf16.mxu1 %v12837_v31 }
 0x78b   :  { %4484 = vmatpush1.bf16.msra.mxu0 %v10965_v30  ;;  %4651 = vmatpush1.bf16.msra.mxu1 %v10965_v30  ;;  %v13207_v30 = vld [vmem:[#allocation51_spill] sm:$0xff] }
 0x78c   :  { %4485 = vmatprep.subr.bf16.mxu0 %v13168_v50  ;;  %4652 = vmatprep.subr.bf16.mxu1 %v13168_v50  ;;  %v11417_v50 = vld [vmem:[#allocation6 + $0x24] ss:$8 sps:$4 sm:$0xff]  }
 0x78f   :  { %4486 = vmatpush1.bf16.msra.mxu0 %v13169_v23  ;;  %4653 = vmatpush1.bf16.msra.mxu1 %v13169_v23  ;;  %v11422_v23 = vld [vmem:[#allocation6 + $0x20] ss:$8 sps:$4 sm:$0xff]  }
 0x790   :  { %4487 = vmatprep.subr.bf16.mxu0 %v13170_v35  ;;  %4654 = vmatprep.subr.bf16.mxu1 %v13170_v35  ;;  %v11426_v35 = vld [vmem:[#allocation6 + $0x34] ss:$8 sps:$4 sm:$0xff]  }
 0x793   :  { %4488 = vmatpush1.bf16.msra.mxu0 %v13171_v46  ;;  %4655 = vmatpush1.bf16.msra.mxu1 %v13171_v46  ;;  %v11430_v46 = vld [vmem:[#allocation6 + $0x30] ss:$8 sps:$4 sm:$0xff]  }
 0x794   :  { %4489 = vmatprep.subr.bf16.mxu0 %v13172_v6  ;;  %4656 = vmatprep.subr.bf16.mxu1 %v13172_v6  ;;  %v11434_v6 = vld [vmem:[#allocation6 + $0x44] ss:$8 sps:$4 sm:$0xff]  }
 0x797   :  { %4490 = vmatpush1.bf16.msra.mxu0 %v13173_v47  ;;  %4657 = vmatpush1.bf16.msra.mxu1 %v13173_v47  ;;  %v11438_v47 = vld [vmem:[#allocation6 + $0x40] ss:$8 sps:$4 sm:$0xff]  }
 0x798   :  { %4491 = vmatprep.subr.bf16.mxu0 %v13174_v51  ;;  %4658 = vmatprep.subr.bf16.mxu1 %v13174_v51  ;;  %13208 = vst [vmem:[#allocation27_spill] sm:$0xff] %v11438_v47  ;;  %v11442_v51 = vld [vmem:[#allocation6 + $0x54] ss:$8 sps:$4 sm:$0xff]  }
 0x799   :  { %13209 = vst [vmem:[#allocation28_spill] sm:$0xff] %v11442_v51 }
 0x79b   :  { %4492 = vmatpush1.bf16.msra.mxu0 %v13175_v48  ;;  %4659 = vmatpush1.bf16.msra.mxu1 %v13175_v48  ;;  %v11446_v48 = vld [vmem:[#allocation6 + $0x50] ss:$8 sps:$4 sm:$0xff]  }
 0x79c   :  { %4493 = vmatprep.subr.bf16.mxu0 %v13176_v5  ;;  %4660 = vmatprep.subr.bf16.mxu1 %v13176_v5  ;;  %13210 = vst [vmem:[#allocation29_spill] sm:$0xff] %v11446_v48  ;;  %v11450_v5 = vld [vmem:[#allocation6 + $0x64] ss:$8 sps:$4 sm:$0xff]  }
 0x79d   :  { %13211 = vst [vmem:[#allocation31_spill] sm:$0xff] %v11450_v5 }
 0x79f   :  { %4494 = vmatpush1.bf16.msra.mxu0 %v13177_v3  ;;  %4661 = vmatpush1.bf16.msra.mxu1 %v13177_v3  ;;  %v11454_v3 = vld [vmem:[#allocation6 + $0x60] ss:$8 sps:$4 sm:$0xff]  }
 0x7a0   :  { %4495 = vmatprep.subr.bf16.mxu0 %v13178_v26  ;;  %4662 = vmatprep.subr.bf16.mxu1 %v13178_v26  ;;  %13212 = vst [vmem:[#allocation32_spill] sm:$0xff] %v11454_v3  ;;  %v11458_v26 = vld [vmem:[#allocation6 + $0x74] ss:$8 sps:$4 sm:$0xff]  }
 0x7a1   :  { %13213 = vst [vmem:[#allocation12_spill] sm:$0xff] %v11458_v26 }
 0x7a3   :  { %4496 = vmatpush1.bf16.msra.mxu0 %v13179_v17  ;;  %4663 = vmatpush1.bf16.msra.mxu1 %v13179_v17  ;;  %v11462_v17 = vld [vmem:[#allocation6 + $0x70] ss:$8 sps:$4 sm:$0xff]  }
 0x7a4   :  { %5106 = vmatprep.subr.bf16.mxu0 %v11395_v60  ;;  %5246 = vmatprep.subr.bf16.mxu1 %v11395_v60  ;;  %13214 = vst [vmem:[#allocation13_spill] sm:$0xff] %v11462_v17 }
 0x7a6   :  { %4514 = vmatmul.mubr.bf16.vlgmr.msra.gmra.mrb[44].mxu0 %v7740_v61  ;;  %4681 = vmatmul.mubr.bf16.vlgmr.msra.gmra.mrb[44].mxu1 %v7741_v34 }
 0x7a7   :  { %5107 = vmatpush1.bf16.msra.mxu0 %v11405_v44  ;;  %5138 = vmatprep.mubr.bf16.mxu0 %v13206_v7 }
 0x7a8   :  { %5247 = vmatpush1.bf16.msra.mxu1 %v11405_v44  ;;  %5278 = vmatprep.mubr.bf16.mxu1 %v13207_v30 }
 0x7a9   :  { %5108 = vmatprep.subr.bf16.mxu0 %v11409_v45  ;;  %5248 = vmatprep.subr.bf16.mxu1 %v11409_v45 }
 0x7ab   :  { %5109 = vmatpush1.bf16.msra.mxu0 %v11413_v8 }
 0x7ac   :  { %5249 = vmatpush1.bf16.msra.mxu1 %v11413_v8  ;;  %5110 = vmatprep.subr.bf16.mxu0 %v11417_v50 }
 0x7ad   :  { %5250 = vmatprep.subr.bf16.mxu1 %v11417_v50 }
 0x7af   :  { %5111 = vmatpush1.bf16.msra.mxu0 %v11422_v23 }
 0x7b0   :  { %5251 = vmatpush1.bf16.msra.mxu1 %v11422_v23  ;;  %5112 = vmatprep.subr.bf16.mxu0 %v11426_v35 }
 0x7b1   :  { %5252 = vmatprep.subr.bf16.mxu1 %v11426_v35 }
 0x7b3   :  { %5113 = vmatpush1.bf16.msra.mxu0 %v11430_v46 }
 0x7b4   :  { %5253 = vmatpush1.bf16.msra.mxu1 %v11430_v46  ;;  %5114 = vmatprep.subr.bf16.mxu0 %v11434_v6 }
 0x7b5   :  { %5254 = vmatprep.subr.bf16.mxu1 %v11434_v6 }
 0x7b7   :  { %5115 = vmatpush1.bf16.msra.mxu0 %v11438_v47 }
 0x7b8   :  { %5255 = vmatpush1.bf16.msra.mxu1 %v11438_v47  ;;  %5116 = vmatprep.subr.bf16.mxu0 %v11442_v51 }
 0x7b9   :  { %5256 = vmatprep.subr.bf16.mxu1 %v11442_v51 }
 0x7bb   :  { %5117 = vmatpush1.bf16.msra.mxu0 %v11446_v48 }
 0x7bc   :  { %5257 = vmatpush1.bf16.msra.mxu1 %v11446_v48  ;;  %5118 = vmatprep.subr.bf16.mxu0 %v11450_v5 }
 0x7bd   :  { %5258 = vmatprep.subr.bf16.mxu1 %v11450_v5 }
 0x7bf   :  { %5119 = vmatpush1.bf16.msra.mxu0 %v11454_v3 }
 0x7c0   :  { %5259 = vmatpush1.bf16.msra.mxu1 %v11454_v3  ;;  %5120 = vmatprep.subr.bf16.mxu0 %v11458_v26 }
 0x7c1   :  { %5260 = vmatprep.subr.bf16.mxu1 %v11458_v26 }
 0x7c3   :  { %5121 = vmatpush1.bf16.msra.mxu0 %v11462_v17 }
 0x7c4   :  { %5261 = vmatpush1.bf16.msra.mxu1 %v11462_v17  ;;  %5122 = vmatprep.subr.bf16.mxu0 %v11466_v28 }
 0x7c5   :  { %5262 = vmatprep.subr.bf16.mxu1 %v11466_v28 }
 0x7c7   :  { %5123 = vmatpush1.bf16.msra.mxu0 %v11470_v10 }
 0x7c8   :  { %5263 = vmatpush1.bf16.msra.mxu1 %v11470_v10  ;;  %5124 = vmatprep.subr.bf16.mxu0 %v11474_v62 }
 0x7c9   :  { %5264 = vmatprep.subr.bf16.mxu1 %v11474_v62 }
 0x7cb   :  { %5125 = vmatpush1.bf16.msra.mxu0 %v11478_v25 }
 0x7cc   :  { %5265 = vmatpush1.bf16.msra.mxu1 %v11478_v25  ;;  %5126 = vmatprep.subr.bf16.mxu0 %v11482_v4 }
 0x7cd   :  { %5266 = vmatprep.subr.bf16.mxu1 %v11482_v4 }
 0x7cf   :  { %5127 = vmatpush1.bf16.msra.mxu0 %v11486_v11 }
 0x7d0   :  { %5267 = vmatpush1.bf16.msra.mxu1 %v11486_v11  ;;  %5128 = vmatprep.subr.bf16.mxu0 %v11490_v58 }
 0x7d1   :  { %5268 = vmatprep.subr.bf16.mxu1 %v11490_v58 }
 0x7d3   :  { %5129 = vmatpush1.bf16.msra.mxu0 %v11494_v22 }
 0x7d4   :  { %5269 = vmatpush1.bf16.msra.mxu1 %v11494_v22  ;;  %5130 = vmatprep.subr.bf16.mxu0 %v11498_v2 }
 0x7d5   :  { %5270 = vmatprep.subr.bf16.mxu1 %v11498_v2 }
 0x7d7   :  { %5131 = vmatpush1.bf16.msra.mxu0 %v11502_v59 }
 0x7d8   :  { %5271 = vmatpush1.bf16.msra.mxu1 %v11502_v59  ;;  %5132 = vmatprep.subr.bf16.mxu0 %v11506_v55 }
 0x7d9   :  { %v4177_v19 = vpop.f32.mrb[40].mxu0  ;;  %v4344_v38 = vpop.f32.mrb[40].mxu1  ;;  %5272 = vmatprep.subr.bf16.mxu1 %v11506_v55 }
 0x7da   :  { %v7209_v21 = vadd.f32 %v4177_v19, %v13114_v39  ;;  %v7213_v41 = vadd.f32 %v4344_v38, %v13114_v39  ;;  %v4179_v1 = vpop.f32.mrb[41].mxu0  ;;  %v4346_v29 = vpop.f32.mrb[41].mxu1  ;;  %v11534_v19 = vld [vmem:[#allocation6 + $0xf0] ss:$8 sps:$4 sm:$0xff]   ;;  %v11538_v38 = vld [vmem:[#allocation6 + $0x104] ss:$8 sps:$4 sm:$0xff]  }
 0x7db   :  { %v7210_v14 = vadd.f32 %v4179_v1, %v8999_v63  ;;  %v7214_v49 = vadd.f32 %v4346_v29, %v8999_v63  ;;  %v4181_v37 = vpop.f32.mrb[42].mxu0  ;;  %v4348_v24 = vpop.f32.mrb[42].mxu1  ;;  %5133 = vmatpush1.bf16.msra.mxu0 %v11510_v20 }
 0x7dc   :  { %v4186_v12 = vmax.f32 %v7209_v21, 0.0  ;;  %v4353_v15 = vmax.f32 %v7213_v41, 0.0  ;;  %v7211_v16 = vadd.f32 %v4181_v37, %v13114_v39  ;;  %v7215_v18 = vadd.f32 %v4348_v24, %v13114_v39  ;;  %5273 = vmatpush1.bf16.msra.mxu1 %v11510_v20  ;;  %v4183_v9 = vpop.f32.mrb[43].mxu0  ;;  %v4350_v0 = vpop.f32.mrb[43].mxu1  ;;  %5134 = vmatprep.subr.bf16.mxu0 %v11514_v36  ;;  %v13227_v24 = vld [vmem:[#allocation15_spill] sm:$0xff] }
 0x7dd   :  { %v4187_v56 = vmax.f32 %v7210_v14, 0.0  ;;  %v4354_v53 = vmax.f32 %v7214_v49, 0.0  ;;  %v7212_v40 = vadd.f32 %v4183_v9, %v8999_v63  ;;  %v7216_v54 = vadd.f32 %v4350_v0, %v8999_v63  ;;  %5274 = vmatprep.subr.bf16.mxu1 %v11514_v36  ;;  %v11542_v14 = vld [vmem:[#allocation6 + $0x100] ss:$8 sps:$4 sm:$0xff]   ;;  %v11547_v49 = vld [vmem:[#allocation6 + $0x114] ss:$8 sps:$4 sm:$0xff]  }
 0x7de   :  { %v4188_v42 = vmax.f32 %v7211_v16, 0.0  ;;  %v4355_v43 = vmax.f32 %v7215_v18, 0.0  ;;  %v11558_v16 = vld [vmem:[#allocation6 + $0x124] ss:$8 sps:$4 sm:$0xff]   ;;  %v13229_v18 = vld [vmem:[#allocation24_spill] sm:$0xff] }
 0x7df   :  { %v4190_v32 = vmax.f32 %v4186_v12, %v4187_v56  ;;  %v4357_v33 = vmax.f32 %v4353_v15, %v4354_v53  ;;  %v4189_v61 = vmax.f32 %v7212_v40, 0.0  ;;  %v4356_v34 = vmax.f32 %v7216_v54, 0.0  ;;  %5135 = vmatpush1.bf16.msra.mxu0 %v11522_v13  ;;  %v11554_v12 = vld [vmem:[#allocation6 + $0x110] ss:$8 sps:$4 sm:$0xff]   ;;  %v13228_v15 = vld [vmem:[#allocation30_spill] sm:$0xff] }
 0x7e0   :  { %5275 = vmatpush1.bf16.msra.mxu1 %v11522_v13  ;;  %5136 = vmatprep.subr.bf16.mxu0 %v11528_v52  ;;  %v11564_v9 = vld [vmem:[#allocation6 + $0x120] ss:$8 sps:$4 sm:$0xff]   ;;  %v11572_v0 = vld [vmem:[#allocation6 + $0x130] ss:$8 sps:$4 sm:$0xff]   ;;  %v11576_v56 = vld [vmem:[#allocation6 + $0x144] ss:$8 sps:$4 sm:$0xff]  }
 0x7e1   :  { %v4359_v21 = vmax.f32 %v4190_v32, %v4357_v33  ;;  %v4191_v41 = vmax.f32 %v4188_v42, %v4189_v61  ;;  %v4358_v1 = vmax.f32 %v4355_v43, %v4356_v34  ;;  %5276 = vmatprep.subr.bf16.mxu1 %v11528_v52  ;;  %v11580_v53 = vld [vmem:[#allocation6 + $0x140] ss:$8 sps:$4 sm:$0xff]   ;;  %v11584_v40 = vld [vmem:[#allocation6 + $0x154] ss:$8 sps:$4 sm:$0xff]   ;;  %v11588_v54 = vld [vmem:[#allocation6 + $0x150] ss:$8 sps:$4 sm:$0xff]  }
 0x7e2   :  { %v11592_v42 = vld [vmem:[#allocation6 + $0x164] ss:$8 sps:$4 sm:$0xff]   ;;  %v11596_v43 = vld [vmem:[#allocation6 + $0x160] ss:$8 sps:$4 sm:$0xff]   ;;  %v11600_v32 = vld [vmem:[#allocation6 + $0x174] ss:$8 sps:$4 sm:$0xff]  }
 0x7e3   :  { %v4360_v29 = vmax.f32 %v4191_v41, %v4358_v1  ;;  %5137 = vmatpush1.bf16.msra.mxu0 %v11534_v19  ;;  %v11604_v33 = vld [vmem:[#allocation6 + $0x170] ss:$8 sps:$4 sm:$0xff]   ;;  %v11608_v61 = vld [vmem:[#allocation6 + $0x184] ss:$8 sps:$4 sm:$0xff]   ;;  %v11612_v34 = vld [vmem:[#allocation6 + $0x180] ss:$8 sps:$4 sm:$0xff]  }
 0x7e4   :  { %5277 = vmatpush1.bf16.msra.mxu1 %v11534_v19  ;;  %5149 = vmatprep.subr.bf16.mxu0 %v11538_v38  ;;  %v11620_v41 = vld [vmem:[#allocation6 + $0x190] ss:$8 sps:$4 sm:$0xff]   ;;  %v11624_v1 = vld [vmem:[#allocation6 + $0x1a4] ss:$8 sps:$4 sm:$0xff]  }
 0x7e5   :  { %5289 = vmatprep.subr.bf16.mxu1 %v11538_v38  ;;  %v11549_v37 = vpack.c.bf16 %v4360_v29, %v4359_v21  ;;  %v11616_v21 = vld [vmem:[#allocation6 + $0x194] ss:$8 sps:$4 sm:$0xff]   ;;  %13230 = vst [vmem:[#allocation33_spill] sm:$0xff] %v11624_v1  ;;  %v11628_v29 = vld [vmem:[#allocation6 + $0x1a0] ss:$8 sps:$4 sm:$0xff]  }
 0x7e6   :  { %5139 = vmatmul.mubr.bf16.vlgmr.msra.gmra.mrb[48].mxu0 %v13227_v24  ;;  %13231 = vst [vmem:[#allocation11_spill] sm:$0xff] %v11628_v29  ;;  %v11632_v24 = vld [vmem:[#allocation6 + $0x1b4] ss:$8 sps:$4 sm:$0xff]  }
 0x7e7   :  { %13226 = vst [vmem:[#allocation25_spill] sm:$0xff] %v11549_v37  ;;  %5279 = vmatmul.mubr.bf16.vlgmr.msra.gmra.mrb[48].mxu1 %v13206_v7  ;;  %5150 = vmatpush1.bf16.msra.mxu0 %v11542_v14  ;;  %v11568_v7 = vld [vmem:[#allocation6 + $0x134] ss:$8 sps:$4 sm:$0xff]   ;;  %13232 = vst [vmem:[#allocation34_spill] sm:$0xff] %v11632_v24  ;;  %v11636_v37 = vld [vmem:[#allocation6 + $0x1b0] ss:$8 sps:$4 sm:$0xff]  }
 0x7e8   :  { %5181 = vmatprep.mubr.bf16.mxu0 %v13228_v15  ;;  %5290 = vmatpush1.bf16.msra.mxu1 %v11542_v14  ;;  %13233 = vst [vmem:[#allocation36_spill] sm:$0xff] %v11636_v37 }
 0x7e9   :  { %5321 = vmatprep.mubr.bf16.mxu1 %v13229_v18  ;;  %5151 = vmatprep.subr.bf16.mxu0 %v11547_v49 }
 0x7ea   :  { %5291 = vmatprep.subr.bf16.mxu1 %v11547_v49 }
 0x7eb   :  { %5152 = vmatpush1.bf16.msra.mxu0 %v11554_v12 }
 0x7ec   :  { %5292 = vmatpush1.bf16.msra.mxu1 %v11554_v12  ;;  %5153 = vmatprep.subr.bf16.mxu0 %v11558_v16 }
 0x7ed   :  { %5293 = vmatprep.subr.bf16.mxu1 %v11558_v16 }
 0x7ef   :  { %5154 = vmatpush1.bf16.msra.mxu0 %v11564_v9 }
 0x7f0   :  { %5294 = vmatpush1.bf16.msra.mxu1 %v11564_v9  ;;  %5155 = vmatprep.subr.bf16.mxu0 %v11568_v7 }
 0x7f1   :  { %5295 = vmatprep.subr.bf16.mxu1 %v11568_v7 }
 0x7f3   :  { %5156 = vmatpush1.bf16.msra.mxu0 %v11572_v0 }
 0x7f4   :  { %5296 = vmatpush1.bf16.msra.mxu1 %v11572_v0  ;;  %5157 = vmatprep.subr.bf16.mxu0 %v11576_v56 }
 0x7f5   :  { %5297 = vmatprep.subr.bf16.mxu1 %v11576_v56 }
 0x7f7   :  { %5158 = vmatpush1.bf16.msra.mxu0 %v11580_v53 }
 0x7f8   :  { %5298 = vmatpush1.bf16.msra.mxu1 %v11580_v53  ;;  %5159 = vmatprep.subr.bf16.mxu0 %v11584_v40 }
 0x7f9   :  { %5299 = vmatprep.subr.bf16.mxu1 %v11584_v40 }
 0x7fb   :  { %5160 = vmatpush1.bf16.msra.mxu0 %v11588_v54 }
 0x7fc   :  { %5300 = vmatpush1.bf16.msra.mxu1 %v11588_v54  ;;  %5161 = vmatprep.subr.bf16.mxu0 %v11592_v42 }
 0x7fd   :  { %5301 = vmatprep.subr.bf16.mxu1 %v11592_v42 }
 0x7ff   :  { %5162 = vmatpush1.bf16.msra.mxu0 %v11596_v43 }
 0x800   :  { %5302 = vmatpush1.bf16.msra.mxu1 %v11596_v43  ;;  %5163 = vmatprep.subr.bf16.mxu0 %v11600_v32 }
 0x801   :  { %5303 = vmatprep.subr.bf16.mxu1 %v11600_v32 }
 0x803   :  { %5164 = vmatpush1.bf16.msra.mxu0 %v11604_v33 }
 0x804   :  { %5304 = vmatpush1.bf16.msra.mxu1 %v11604_v33  ;;  %5165 = vmatprep.subr.bf16.mxu0 %v11608_v61 }
 0x805   :  { %5305 = vmatprep.subr.bf16.mxu1 %v11608_v61 }
 0x807   :  { %5166 = vmatpush1.bf16.msra.mxu0 %v11612_v34 }
 0x808   :  { %5306 = vmatpush1.bf16.msra.mxu1 %v11612_v34  ;;  %5167 = vmatprep.subr.bf16.mxu0 %v11616_v21 }
 0x809   :  { %5307 = vmatprep.subr.bf16.mxu1 %v11616_v21 }
 0x80b   :  { %5168 = vmatpush1.bf16.msra.mxu0 %v11620_v41 }
 0x80c   :  { %5308 = vmatpush1.bf16.msra.mxu1 %v11620_v41  ;;  %5169 = vmatprep.subr.bf16.mxu0 %v11624_v1 }
 0x80d   :  { %5309 = vmatprep.subr.bf16.mxu1 %v11624_v1  ;;  %v11648_v1 = vld [vmem:[#allocation6 + $0x1d4] ss:$8 sps:$4 sm:$0xff]  }
 0x80e   :  { %13236 = vst [vmem:[#allocation39_spill] sm:$0xff] %v11648_v1 }
 0x80f   :  { %5170 = vmatpush1.bf16.msra.mxu0 %v11628_v29 }
 0x810   :  { %5310 = vmatpush1.bf16.msra.mxu1 %v11628_v29  ;;  %5171 = vmatprep.subr.bf16.mxu0 %v11632_v24  ;;  %v11652_v29 = vld [vmem:[#allocation6 + $0x1d0] ss:$8 sps:$4 sm:$0xff]  }
 0x811   :  { %5311 = vmatprep.subr.bf16.mxu1 %v11632_v24  ;;  %13237 = vst [vmem:[#allocation40_spill] sm:$0xff] %v11652_v29  ;;  %v11656_v24 = vld [vmem:[#allocation6 + $0x1e4] ss:$8 sps:$4 sm:$0xff]  }
 0x812   :  { %13238 = vst [vmem:[#allocation41_spill] sm:$0xff] %v11656_v24 }
 0x813   :  { %5172 = vmatpush1.bf16.msra.mxu0 %v11636_v37 }
 0x814   :  { %5312 = vmatpush1.bf16.msra.mxu1 %v11636_v37  ;;  %5173 = vmatprep.subr.bf16.mxu0 %v11640_v57  ;;  %v11660_v37 = vld [vmem:[#allocation6 + $0x1e0] ss:$8 sps:$4 sm:$0xff]  }
 0x815   :  { %5313 = vmatprep.subr.bf16.mxu1 %v11640_v57  ;;  %13239 = vst [vmem:[#allocation42_spill] sm:$0xff] %v11660_v37  ;;  %v11664_v57 = vld [vmem:[#allocation6 + $0x1f4] ss:$8 sps:$4 sm:$0xff]  }
 0x816   :  { %13240 = vst [vmem:[#allocation43_spill] sm:$0xff] %v11664_v57 }
 0x817   :  { %5174 = vmatpush1.bf16.msra.mxu0 %v11644_v27 }
 0x818   :  { %5314 = vmatpush1.bf16.msra.mxu1 %v11644_v27  ;;  %5175 = vmatprep.subr.bf16.mxu0 %v11648_v1  ;;  %v11668_v27 = vld [vmem:[#allocation6 + $0x1f0] ss:$8 sps:$4 sm:$0xff]  }
 0x819   :  { %5315 = vmatprep.subr.bf16.mxu1 %v11648_v1  ;;  %13241 = vst [vmem:[#allocation44_spill] sm:$0xff] %v11668_v27  ;;  %v11672_v1 = vld [vmem:[#allocation6 + $0x204] ss:$8 sps:$4 sm:$0xff]  }
 0x81a   :  { %13242 = vst [vmem:[#allocation45_spill] sm:$0xff] %v11672_v1 }
 0x81b   :  { %5176 = vmatpush1.bf16.msra.mxu0 %v11652_v29 }
 0x81c   :  { %5316 = vmatpush1.bf16.msra.mxu1 %v11652_v29  ;;  %5177 = vmatprep.subr.bf16.mxu0 %v11656_v24  ;;  %v11676_v29 = vld [vmem:[#allocation6 + $0x200] ss:$8 sps:$4 sm:$0xff]  }
 0x81d   :  { %5317 = vmatprep.subr.bf16.mxu1 %v11656_v24  ;;  %13243 = vst [vmem:[#allocation46_spill] sm:$0xff] %v11676_v29  ;;  %v11680_v24 = vld [vmem:[#allocation6 + $0x214] ss:$8 sps:$4 sm:$0xff]  }
 0x81e   :  { %13244 = vst [vmem:[#allocation47_spill] sm:$0xff] %v11680_v24 }
 0x81f   :  { %5178 = vmatpush1.bf16.msra.mxu0 %v11660_v37 }
 0x820   :  { %5318 = vmatpush1.bf16.msra.mxu1 %v11660_v37  ;;  %5179 = vmatprep.subr.bf16.mxu0 %v11664_v57  ;;  %v11686_v37 = vld [vmem:[#allocation6 + $0x210] ss:$8 sps:$4 sm:$0xff]  }
 0x821   :  { %5319 = vmatprep.subr.bf16.mxu1 %v11664_v57  ;;  %13245 = vst [vmem:[#allocation48_spill] sm:$0xff] %v11686_v37  ;;  %v11690_v57 = vld [vmem:[#allocation6 + $0x224] ss:$8 sps:$4 sm:$0xff]  }
 0x822   :  { %13246 = vst [vmem:[#allocation55_spill] sm:$0xff] %v11690_v57 }
 0x823   :  { %5180 = vmatpush1.bf16.msra.mxu0 %v11668_v27 }
 0x824   :  { %5320 = vmatpush1.bf16.msra.mxu1 %v11668_v27  ;;  %5192 = vmatprep.subr.bf16.mxu0 %v11672_v1  ;;  %v11700_v27 = vld [vmem:[#allocation6 + $0x234] ss:$8 sps:$4 sm:$0xff]  }
 0x825   :  { %5332 = vmatprep.subr.bf16.mxu1 %v11672_v1  ;;  %v11696_v1 = vld [vmem:[#allocation6 + $0x220] ss:$8 sps:$4 sm:$0xff]   ;;  %13248 = vst [vmem:[#allocation51_spill] sm:$0xff] %v11700_v27 }
 0x826   :  { %5182 = vmatmul.mubr.bf16.vlgmr.msra.gmra.mrb[48].mxu0 %v13207_v30  ;;  %13247 = vst [vmem:[#allocation26_spill] sm:$0xff] %v11696_v1 }
 0x827   :  { %5322 = vmatmul.mubr.bf16.vlgmr.msra.gmra.mrb[48].mxu1 %v13228_v15  ;;  %5193 = vmatpush1.bf16.msra.mxu0 %v11676_v29 }
 0x828   :  { %5333 = vmatpush1.bf16.msra.mxu1 %v11676_v29  ;;  %5194 = vmatprep.subr.bf16.mxu0 %v11680_v24  ;;  %v11704_v29 = vld [vmem:[#allocation6 + $0x230] ss:$8 sps:$4 sm:$0xff]  }
 0x829   :  { %5334 = vmatprep.subr.bf16.mxu1 %v11680_v24  ;;  %5224 = vmatprep.mubr.bf16.mxu0 %v12837_v31  ;;  %13249 = vst [vmem:[#allocation15_spill] sm:$0xff] %v11704_v29 }
 0x82a   :  { %5364 = vmatprep.mubr.bf16.mxu1 %v12837_v31  ;;  %v11708_v31 = vld [vmem:[#allocation6 + $0x244] ss:$8 sps:$4 sm:$0xff]  }
 0x82b   :  { %5195 = vmatpush1.bf16.msra.mxu0 %v11686_v37  ;;  %13250 = vst [vmem:[#allocation30_spill] sm:$0xff] %v11708_v31 }
 0x82c   :  { %5335 = vmatpush1.bf16.msra.mxu1 %v11686_v37  ;;  %5196 = vmatprep.subr.bf16.mxu0 %v11690_v57  ;;  %v11712_v37 = vld [vmem:[#allocation6 + $0x240] ss:$8 sps:$4 sm:$0xff]  }
 0x82d   :  { %5336 = vmatprep.subr.bf16.mxu1 %v11690_v57  ;;  %13251 = vst [vmem:[#allocation24_spill] sm:$0xff] %v11712_v37  ;;  %v11716_v57 = vld [vmem:[#allocation6 + $0x254] ss:$8 sps:$4 sm:$0xff]  }
 0x82e   :  { %13252 = vst [vmem:[#allocation57_spill] sm:$0xff] %v11716_v57 }
 0x82f   :  { %5197 = vmatpush1.bf16.msra.mxu0 %v11696_v1 }
 0x830   :  { %5337 = vmatpush1.bf16.msra.mxu1 %v11696_v1  ;;  %5198 = vmatprep.subr.bf16.mxu0 %v11700_v27  ;;  %v11720_v1 = vld [vmem:[#allocation6 + $0x250] ss:$8 sps:$4 sm:$0xff]  }
 0x831   :  { %5338 = vmatprep.subr.bf16.mxu1 %v11700_v27  ;;  %13253 = vst [vmem:[#allocation58_spill] sm:$0xff] %v11720_v1  ;;  %v11724_v27 = vld [vmem:[#allocation6 + $0x264] ss:$8 sps:$4 sm:$0xff]  }
 0x832   :  { %13254 = vst [vmem:[#allocation59_spill] sm:$0xff] %v11724_v27 }
 0x833   :  { %5199 = vmatpush1.bf16.msra.mxu0 %v11704_v29 }
 0x834   :  { %5339 = vmatpush1.bf16.msra.mxu1 %v11704_v29  ;;  %5200 = vmatprep.subr.bf16.mxu0 %v11708_v31  ;;  %v11728_v29 = vld [vmem:[#allocation6 + $0x260] ss:$8 sps:$4 sm:$0xff]  }
 0x835   :  { %5340 = vmatprep.subr.bf16.mxu1 %v11708_v31  ;;  %13255 = vst [vmem:[#allocation60_spill] sm:$0xff] %v11728_v29  ;;  %v11732_v31 = vld [vmem:[#allocation6 + $0x274] ss:$8 sps:$4 sm:$0xff]  }
 0x836   :  { %13256 = vst [vmem:[#allocation61_spill] sm:$0xff] %v11732_v31 }
 0x837   :  { %5201 = vmatpush1.bf16.msra.mxu0 %v11712_v37 }
 0x838   :  { %5341 = vmatpush1.bf16.msra.mxu1 %v11712_v37  ;;  %5202 = vmatprep.subr.bf16.mxu0 %v11716_v57  ;;  %v11736_v37 = vld [vmem:[#allocation6 + $0x270] ss:$8 sps:$4 sm:$0xff]  }
 0x839   :  { %5342 = vmatprep.subr.bf16.mxu1 %v11716_v57  ;;  %13257 = vst [vmem:[#allocation62_spill] sm:$0xff] %v11736_v37 }
 0x83b   :  { %5203 = vmatpush1.bf16.msra.mxu0 %v11720_v1 }
 0x83c   :  { %5343 = vmatpush1.bf16.msra.mxu1 %v11720_v1  ;;  %5204 = vmatprep.subr.bf16.mxu0 %v11724_v27 }
 0x83d   :  { %5344 = vmatprep.subr.bf16.mxu1 %v11724_v27  ;;  %v13258_v27 = vld [vmem:[#allocation54_spill] sm:$0xff] }
 0x83f   :  { %5205 = vmatpush1.bf16.msra.mxu0 %v11728_v29 }
 0x840   :  { %5345 = vmatpush1.bf16.msra.mxu1 %v11728_v29  ;;  %5206 = vmatprep.subr.bf16.mxu0 %v11732_v31 }
 0x841   :  { %5346 = vmatprep.subr.bf16.mxu1 %v11732_v31 }
 0x843   :  { %5207 = vmatpush1.bf16.msra.mxu0 %v11736_v37 }
 0x844   :  { %5347 = vmatpush1.bf16.msra.mxu1 %v11736_v37  ;;  %5390 = vmatprep.subr.bf16.mxu0 %v11395_v60 }
 0x845   :  { %5530 = vmatprep.subr.bf16.mxu1 %v11395_v60 }
 0x846   :  { %5225 = vmatmul.mubr.bf16.vlgmr.msra.gmra.mrb[48].mxu0 %v13229_v18 }
 0x847   :  { %5365 = vmatmul.mubr.bf16.vlgmr.msra.gmra.mrb[48].mxu1 %v13258_v27  ;;  %5391 = vmatpush1.bf16.msra.mxu0 %v11405_v44 }
 0x848   :  { %5422 = vmatprep.mubr.bf16.mxu0 %v13228_v15  ;;  %5531 = vmatpush1.bf16.msra.mxu1 %v11405_v44 }
 0x849   :  { %5562 = vmatprep.mubr.bf16.mxu1 %v13229_v18  ;;  %5392 = vmatprep.subr.bf16.mxu0 %v11409_v45 }
 0x84a   :  { %5532 = vmatprep.subr.bf16.mxu1 %v11409_v45 }
 0x84b   :  { %5393 = vmatpush1.bf16.msra.mxu0 %v11413_v8 }
 0x84c   :  { %5533 = vmatpush1.bf16.msra.mxu1 %v11413_v8  ;;  %5394 = vmatprep.subr.bf16.mxu0 %v11417_v50 }
 0x84d   :  { %5534 = vmatprep.subr.bf16.mxu1 %v11417_v50 }
 0x84f   :  { %5395 = vmatpush1.bf16.msra.mxu0 %v11422_v23 }
 0x850   :  { %5535 = vmatpush1.bf16.msra.mxu1 %v11422_v23  ;;  %5396 = vmatprep.subr.bf16.mxu0 %v11426_v35 }
 0x851   :  { %5536 = vmatprep.subr.bf16.mxu1 %v11426_v35 }
 0x853   :  { %5397 = vmatpush1.bf16.msra.mxu0 %v11430_v46 }
 0x854   :  { %5537 = vmatpush1.bf16.msra.mxu1 %v11430_v46  ;;  %5398 = vmatprep.subr.bf16.mxu0 %v11434_v6 }
 0x855   :  { %5538 = vmatprep.subr.bf16.mxu1 %v11434_v6 }
 0x857   :  { %5399 = vmatpush1.bf16.msra.mxu0 %v11438_v47 }
 0x858   :  { %5539 = vmatpush1.bf16.msra.mxu1 %v11438_v47  ;;  %5400 = vmatprep.subr.bf16.mxu0 %v11442_v51 }
 0x859   :  { %5540 = vmatprep.subr.bf16.mxu1 %v11442_v51 }
 0x85b   :  { %5401 = vmatpush1.bf16.msra.mxu0 %v11446_v48 }
 0x85c   :  { %5541 = vmatpush1.bf16.msra.mxu1 %v11446_v48  ;;  %5402 = vmatprep.subr.bf16.mxu0 %v11450_v5 }
 0x85d   :  { %5542 = vmatprep.subr.bf16.mxu1 %v11450_v5 }
 0x85f   :  { %5403 = vmatpush1.bf16.msra.mxu0 %v11454_v3 }
 0x860   :  { %5543 = vmatpush1.bf16.msra.mxu1 %v11454_v3  ;;  %5404 = vmatprep.subr.bf16.mxu0 %v11458_v26 }
 0x861   :  { %5544 = vmatprep.subr.bf16.mxu1 %v11458_v26 }
 0x863   :  { %5405 = vmatpush1.bf16.msra.mxu0 %v11462_v17 }
 0x864   :  { %5545 = vmatpush1.bf16.msra.mxu1 %v11462_v17  ;;  %5406 = vmatprep.subr.bf16.mxu0 %v11466_v28 }
 0x865   :  { %5546 = vmatprep.subr.bf16.mxu1 %v11466_v28 }
 0x867   :  { %5407 = vmatpush1.bf16.msra.mxu0 %v11470_v10 }
 0x868   :  { %5547 = vmatpush1.bf16.msra.mxu1 %v11470_v10  ;;  %5408 = vmatprep.subr.bf16.mxu0 %v11474_v62 }
 0x869   :  { %5548 = vmatprep.subr.bf16.mxu1 %v11474_v62 }
 0x86b   :  { %5409 = vmatpush1.bf16.msra.mxu0 %v11478_v25 }
 0x86c   :  { %5549 = vmatpush1.bf16.msra.mxu1 %v11478_v25  ;;  %5410 = vmatprep.subr.bf16.mxu0 %v11482_v4 }
 0x86d   :  { %5550 = vmatprep.subr.bf16.mxu1 %v11482_v4 }
 0x86f   :  { %5411 = vmatpush1.bf16.msra.mxu0 %v11486_v11 }
 0x870   :  { %5551 = vmatpush1.bf16.msra.mxu1 %v11486_v11  ;;  %5412 = vmatprep.subr.bf16.mxu0 %v11490_v58 }
 0x871   :  { %5552 = vmatprep.subr.bf16.mxu1 %v11490_v58 }
 0x873   :  { %5413 = vmatpush1.bf16.msra.mxu0 %v11494_v22 }
 0x874   :  { %5553 = vmatpush1.bf16.msra.mxu1 %v11494_v22  ;;  %5414 = vmatprep.subr.bf16.mxu0 %v11498_v2 }
 0x875   :  { %5554 = vmatprep.subr.bf16.mxu1 %v11498_v2 }
 0x877   :  { %5415 = vmatpush1.bf16.msra.mxu0 %v11502_v59 }
 0x878   :  { %5555 = vmatpush1.bf16.msra.mxu1 %v11502_v59  ;;  %5416 = vmatprep.subr.bf16.mxu0 %v11506_v55 }
 0x879   :  { %v4515_v4 = vpop.f32.mrb[44].mxu0  ;;  %v4682_v11 = vpop.f32.mrb[44].mxu1  ;;  %5556 = vmatprep.subr.bf16.mxu1 %v11506_v55 }
 0x87a   :  { %v7217_v58 = vadd.f32 %v4515_v4, %v13114_v39  ;;  %v7221_v25 = vadd.f32 %v4682_v11, %v13114_v39  ;;  %v4517_v62 = vpop.f32.mrb[45].mxu0  ;;  %v4684_v22 = vpop.f32.mrb[45].mxu1 }
 0x87b   :  { %v7218_v10 = vadd.f32 %v4517_v62, %v8999_v63  ;;  %v7222_v2 = vadd.f32 %v4684_v22, %v8999_v63  ;;  %v4519_v28 = vpop.f32.mrb[46].mxu0  ;;  %v4686_v17 = vpop.f32.mrb[46].mxu1  ;;  %5417 = vmatpush1.bf16.msra.mxu0 %v11510_v20 }
 0x87c   :  { %v4524_v59 = vmax.f32 %v7217_v58, 0.0  ;;  %v4691_v26 = vmax.f32 %v7221_v25, 0.0  ;;  %v7219_v3 = vadd.f32 %v4519_v28, %v13114_v39  ;;  %v7223_v55 = vadd.f32 %v4686_v17, %v13114_v39  ;;  %5557 = vmatpush1.bf16.msra.mxu1 %v11510_v20  ;;  %v4521_v4 = vpop.f32.mrb[47].mxu0  ;;  %v4688_v11 = vpop.f32.mrb[47].mxu1  ;;  %5418 = vmatprep.subr.bf16.mxu0 %v11514_v36 }
 0x87d   :  { %v4525_v5 = vmax.f32 %v7218_v10, 0.0  ;;  %v4692_v62 = vmax.f32 %v7222_v2, 0.0  ;;  %v7220_v22 = vadd.f32 %v4521_v4, %v8999_v63  ;;  %v7224_v48 = vadd.f32 %v4688_v11, %v8999_v63  ;;  %5558 = vmatprep.subr.bf16.mxu1 %v11514_v36  ;;  %v13269_v4 = vld [vmem:[#allocation41_spill] sm:$0xff]  ;;  %v13270_v11 = vld [vmem:[#allocation42_spill] sm:$0xff] }
 0x87e   :  { %v4526_v58 = vmax.f32 %v7219_v3, 0.0  ;;  %v4693_v25 = vmax.f32 %v7223_v55, 0.0  ;;  %v13264_v3 = vld [vmem:[#allocation36_spill] sm:$0xff]  ;;  %v13267_v55 = vld [vmem:[#allocation39_spill] sm:$0xff] }
 0x87f   :  { %v4528_v51 = vmax.f32 %v4524_v59, %v4525_v5  ;;  %v4695_v28 = vmax.f32 %v4691_v26, %v4692_v62  ;;  %v4527_v47 = vmax.f32 %v7220_v22, 0.0  ;;  %v4694_v39 = vmax.f32 %v7224_v48, 0.0  ;;  %5419 = vmatpush1.bf16.msra.mxu0 %v11522_v13  ;;  %v13263_v48 = vld [vmem:[#allocation34_spill] sm:$0xff]  ;;  %v13265_v26 = vld [vmem:[#allocation37_spill] sm:$0xff]  ;;  %v13271_v62 = vld [vmem:[#allocation43_spill] sm:$0xff] }
 0x880   :  { %5559 = vmatpush1.bf16.msra.mxu1 %v11522_v13  ;;  %5420 = vmatprep.subr.bf16.mxu0 %v11528_v52  ;;  %v13266_v59 = vld [vmem:[#allocation38_spill] sm:$0xff]  ;;  %v13272_v22 = vld [vmem:[#allocation44_spill] sm:$0xff] }
 0x881   :  { %v4697_v17 = vmax.f32 %v4528_v51, %v4695_v28  ;;  %v4529_v10 = vmax.f32 %v4526_v58, %v4527_v47  ;;  %v4696_v2 = vmax.f32 %v4693_v25, %v4694_v39  ;;  %5560 = vmatprep.subr.bf16.mxu1 %v11528_v52  ;;  %v13260_v47 = vld [vmem:[#allocation35_spill] sm:$0xff]  ;;  %v13273_v58 = vld [vmem:[#allocation45_spill] sm:$0xff]  ;;  %v13274_v25 = vld [vmem:[#allocation46_spill] sm:$0xff]  ;;  %v13275_v28 = vmov 0  }
 0x882   :  { %v13262_v51 = vld [vmem:[#allocation11_spill] sm:$0xff]  ;;  %v13276_v39 = vld [vmem:[#allocation48_spill] sm:$0xff] }
 0x883   :  { %v4698_v63 = vmax.f32 %v4529_v10, %v4696_v2  ;;  %5421 = vmatpush1.bf16.msra.mxu0 %v11534_v19  ;;  %v13278_v10 = vld [vmem:[#allocation26_spill] sm:$0xff]  ;;  %v13279_v2 = vld [vmem:[#allocation51_spill] sm:$0xff] }
 0x884   :  { %5561 = vmatpush1.bf16.msra.mxu1 %v11534_v19  ;;  %5433 = vmatprep.subr.bf16.mxu0 %v11538_v38 }
 0x885   :  { %v11820_v5 = vpack.c.bf16 %v4698_v63, %v4697_v17  ;;  %5573 = vmatprep.subr.bf16.mxu1 %v11538_v38  ;;  %v13277_v17 = vld [vmem:[#allocation55_spill] sm:$0xff] }
 0x886   :  { %5423 = vmatmul.mubr.bf16.vlgmr.msra.gmra.mrb[52].mxu0 %v13207_v30  ;;  %v13261_v30 = vld [vmem:[#allocation33_spill] sm:$0xff]  ;;  %v13280_v63 = vld [vmem:[#allocation15_spill] sm:$0xff] }
 0x887   :  { %13259 = vst [vmem:[#allocation54_spill] sm:$0xff] %v11820_v5  ;;  %5563 = vmatmul.mubr.bf16.vlgmr.msra.gmra.mrb[52].mxu1 %v13228_v15  ;;  %5434 = vmatpush1.bf16.msra.mxu0 %v11542_v14  ;;  %v13268_v15 = vld [vmem:[#allocation40_spill] sm:$0xff]  ;;  %v13281_v5 = vld [vmem:[#allocation30_spill] sm:$0xff] }
 0x888   :  { %5465 = vmatprep.mubr.bf16.mxu0 %v13258_v27  ;;  %5574 = vmatpush1.bf16.msra.mxu1 %v11542_v14 }
 0x889   :  { %5605 = vmatprep.mubr.bf16.mxu1 %v13260_v47  ;;  %5435 = vmatprep.subr.bf16.mxu0 %v11547_v49 }
 0x88a   :  { %5575 = vmatprep.subr.bf16.mxu1 %v11547_v49 }
 0x88b   :  { %5436 = vmatpush1.bf16.msra.mxu0 %v11554_v12 }
 0x88c   :  { %5576 = vmatpush1.bf16.msra.mxu1 %v11554_v12  ;;  %5437 = vmatprep.subr.bf16.mxu0 %v11558_v16 }
 0x88d   :  { %5577 = vmatprep.subr.bf16.mxu1 %v11558_v16 }
 0x88f   :  { %5438 = vmatpush1.bf16.msra.mxu0 %v11564_v9 }
 0x890   :  { %5578 = vmatpush1.bf16.msra.mxu1 %v11564_v9  ;;  %5439 = vmatprep.subr.bf16.mxu0 %v11568_v7 }
 0x891   :  { %5579 = vmatprep.subr.bf16.mxu1 %v11568_v7 }
 0x893   :  { %5440 = vmatpush1.bf16.msra.mxu0 %v11572_v0 }
 0x894   :  { %5580 = vmatpush1.bf16.msra.mxu1 %v11572_v0  ;;  %5441 = vmatprep.subr.bf16.mxu0 %v11576_v56 }
 0x895   :  { %5581 = vmatprep.subr.bf16.mxu1 %v11576_v56 }
 0x897   :  { %5442 = vmatpush1.bf16.msra.mxu0 %v11580_v53 }
 0x898   :  { %5582 = vmatpush1.bf16.msra.mxu1 %v11580_v53  ;;  %5443 = vmatprep.subr.bf16.mxu0 %v11584_v40 }
 0x899   :  { %5583 = vmatprep.subr.bf16.mxu1 %v11584_v40 }
 0x89b   :  { %5444 = vmatpush1.bf16.msra.mxu0 %v11588_v54 }
 0x89c   :  { %5584 = vmatpush1.bf16.msra.mxu1 %v11588_v54  ;;  %5445 = vmatprep.subr.bf16.mxu0 %v11592_v42 }
 0x89d   :  { %5585 = vmatprep.subr.bf16.mxu1 %v11592_v42 }
 0x89f   :  { %5446 = vmatpush1.bf16.msra.mxu0 %v11596_v43 }
 0x8a0   :  { %5586 = vmatpush1.bf16.msra.mxu1 %v11596_v43  ;;  %5447 = vmatprep.subr.bf16.mxu0 %v11600_v32 }
 0x8a1   :  { %5587 = vmatprep.subr.bf16.mxu1 %v11600_v32 }
 0x8a3   :  { %5448 = vmatpush1.bf16.msra.mxu0 %v11604_v33 }
 0x8a4   :  { %5588 = vmatpush1.bf16.msra.mxu1 %v11604_v33  ;;  %5449 = vmatprep.subr.bf16.mxu0 %v11608_v61 }
 0x8a5   :  { %5589 = vmatprep.subr.bf16.mxu1 %v11608_v61 }
 0x8a7   :  { %5450 = vmatpush1.bf16.msra.mxu0 %v11612_v34 }
 0x8a8   :  { %5590 = vmatpush1.bf16.msra.mxu1 %v11612_v34  ;;  %5451 = vmatprep.subr.bf16.mxu0 %v11616_v21 }
 0x8a9   :  { %5591 = vmatprep.subr.bf16.mxu1 %v11616_v21 }
 0x8ab   :  { %5452 = vmatpush1.bf16.msra.mxu0 %v11620_v41 }
 0x8ac   :  { %5592 = vmatpush1.bf16.msra.mxu1 %v11620_v41  ;;  %5453 = vmatprep.subr.bf16.mxu0 %v13261_v30 }
 0x8ad   :  { %5593 = vmatprep.subr.bf16.mxu1 %v13261_v30 }
 0x8af   :  { %5454 = vmatpush1.bf16.msra.mxu0 %v13262_v51 }
 0x8b0   :  { %5594 = vmatpush1.bf16.msra.mxu1 %v13262_v51  ;;  %5455 = vmatprep.subr.bf16.mxu0 %v13263_v48 }
 0x8b1   :  { %5595 = vmatprep.subr.bf16.mxu1 %v13263_v48 }
 0x8b3   :  { %5456 = vmatpush1.bf16.msra.mxu0 %v13264_v3 }
 0x8b4   :  { %5596 = vmatpush1.bf16.msra.mxu1 %v13264_v3  ;;  %5457 = vmatprep.subr.bf16.mxu0 %v13265_v26 }
 0x8b5   :  { %5597 = vmatprep.subr.bf16.mxu1 %v13265_v26 }
 0x8b7   :  { %5458 = vmatpush1.bf16.msra.mxu0 %v13266_v59 }
 0x8b8   :  { %5598 = vmatpush1.bf16.msra.mxu1 %v13266_v59  ;;  %5459 = vmatprep.subr.bf16.mxu0 %v13267_v55 }
 0x8b9   :  { %5599 = vmatprep.subr.bf16.mxu1 %v13267_v55 }
 0x8bb   :  { %5460 = vmatpush1.bf16.msra.mxu0 %v13268_v15 }
 0x8bc   :  { %5600 = vmatpush1.bf16.msra.mxu1 %v13268_v15  ;;  %5461 = vmatprep.subr.bf16.mxu0 %v13269_v4 }
 0x8bd   :  { %5601 = vmatprep.subr.bf16.mxu1 %v13269_v4 }
 0x8bf   :  { %5462 = vmatpush1.bf16.msra.mxu0 %v13270_v11 }
 0x8c0   :  { %5602 = vmatpush1.bf16.msra.mxu1 %v13270_v11  ;;  %5463 = vmatprep.subr.bf16.mxu0 %v13271_v62 }
 0x8c1   :  { %5603 = vmatprep.subr.bf16.mxu1 %v13271_v62 }
 0x8c3   :  { %5464 = vmatpush1.bf16.msra.mxu0 %v13272_v22 }
 0x8c4   :  { %5604 = vmatpush1.bf16.msra.mxu1 %v13272_v22  ;;  %5476 = vmatprep.subr.bf16.mxu0 %v13273_v58 }
 0x8c5   :  { %5616 = vmatprep.subr.bf16.mxu1 %v13273_v58 }
 0x8c6   :  { %5466 = vmatmul.mubr.bf16.vlgmr.msra.gmra.mrb[52].mxu0 %v13229_v18 }
 0x8c7   :  { %5606 = vmatmul.mubr.bf16.vlgmr.msra.gmra.mrb[52].mxu1 %v13258_v27  ;;  %5477 = vmatpush1.bf16.msra.mxu0 %v13274_v25 }
 0x8c8   :  { %5617 = vmatpush1.bf16.msra.mxu1 %v13274_v25  ;;  %5478 = vmatprep.subr.bf16.mxu0 %v11680_v24 }
 0x8c9   :  { %5618 = vmatprep.subr.bf16.mxu1 %v11680_v24  ;;  %5508 = vmatprep.mubr.bf16.mxu0 %v13275_v28 }
 0x8ca   :  { %5648 = vmatprep.mubr.bf16.mxu1 %v13275_v28 }
 0x8cb   :  { %5479 = vmatpush1.bf16.msra.mxu0 %v13276_v39 }
 0x8cc   :  { %5619 = vmatpush1.bf16.msra.mxu1 %v13276_v39  ;;  %5480 = vmatprep.subr.bf16.mxu0 %v13277_v17  ;;  %v13282_v39 = vld [vmem:[#allocation24_spill] sm:$0xff] }
 0x8cd   :  { %5620 = vmatprep.subr.bf16.mxu1 %v13277_v17 }
 0x8cf   :  { %5481 = vmatpush1.bf16.msra.mxu0 %v13278_v10 }
 0x8d0   :  { %5621 = vmatpush1.bf16.msra.mxu1 %v13278_v10  ;;  %5482 = vmatprep.subr.bf16.mxu0 %v13279_v2 }
 0x8d1   :  { %5622 = vmatprep.subr.bf16.mxu1 %v13279_v2  ;;  %v13283_v2 = vld [vmem:[#allocation59_spill] sm:$0xff] }
 0x8d3   :  { %5483 = vmatpush1.bf16.msra.mxu0 %v13280_v63 }
 0x8d4   :  { %5623 = vmatpush1.bf16.msra.mxu1 %v13280_v63  ;;  %5484 = vmatprep.subr.bf16.mxu0 %v13281_v5 }
 0x8d5   :  { %5624 = vmatprep.subr.bf16.mxu1 %v13281_v5 }
 0x8d7   :  { %5485 = vmatpush1.bf16.msra.mxu0 %v13282_v39 }
 0x8d8   :  { %5625 = vmatpush1.bf16.msra.mxu1 %v13282_v39  ;;  %5486 = vmatprep.subr.bf16.mxu0 %v11716_v57 }
 0x8d9   :  { %5626 = vmatprep.subr.bf16.mxu1 %v11716_v57 }
 0x8db   :  { %5487 = vmatpush1.bf16.msra.mxu0 %v11720_v1 }
 0x8dc   :  { %5627 = vmatpush1.bf16.msra.mxu1 %v11720_v1  ;;  %5488 = vmatprep.subr.bf16.mxu0 %v13283_v2  ;;  %v13284_v1 = vld [vmem:[#allocation49_spill] sm:$0xff] }
 0x8dd   :  { %5628 = vmatprep.subr.bf16.mxu1 %v13283_v2 }
 0x8df   :  { %5489 = vmatpush1.bf16.msra.mxu0 %v11728_v29 }
 0x8e0   :  { %5629 = vmatpush1.bf16.msra.mxu1 %v11728_v29  ;;  %5490 = vmatprep.subr.bf16.mxu0 %v11732_v31 }
 0x8e1   :  { %5630 = vmatprep.subr.bf16.mxu1 %v11732_v31 }
 0x8e3   :  { %5491 = vmatpush1.bf16.msra.mxu0 %v11736_v37 }
 0x8e4   :  { %5631 = vmatpush1.bf16.msra.mxu1 %v11736_v37  ;;  %5674 = vmatprep.subr.bf16.mxu0 %v11395_v60  ;;  %v13305_v37 = vld [vmem:[#allocation53_spill] sm:$0xff] }
 0x8e5   :  { %5814 = vmatprep.subr.bf16.mxu1 %v11395_v60  ;;  %v13285_v60 = vld [vmem:[#allocation27_spill] sm:$0xff] }
 0x8e6   :  { %5509 = vmatmul.mubr.bf16.vlgmr.msra.gmra.mrb[52].mxu0 %v13260_v47 }
 0x8e7   :  { %5649 = vmatmul.mubr.bf16.vlgmr.msra.gmra.mrb[52].mxu1 %v13284_v1  ;;  %5675 = vmatpush1.bf16.msra.mxu0 %v11405_v44 }
 0x8e8   :  { %5706 = vmatprep.mubr.bf16.mxu0 %v13258_v27  ;;  %5815 = vmatpush1.bf16.msra.mxu1 %v11405_v44  ;;  %v13286_v44 = vld [vmem:[#allocation28_spill] sm:$0xff] }
 0x8e9   :  { %5846 = vmatprep.mubr.bf16.mxu1 %v13260_v47  ;;  %5676 = vmatprep.subr.bf16.mxu0 %v11409_v45 }
 0x8ea   :  { %5816 = vmatprep.subr.bf16.mxu1 %v11409_v45  ;;  %v13287_v45 = vld [vmem:[#allocation29_spill] sm:$0xff] }
 0x8eb   :  { %5677 = vmatpush1.bf16.msra.mxu0 %v11413_v8 }
 0x8ec   :  { %5817 = vmatpush1.bf16.msra.mxu1 %v11413_v8  ;;  %5678 = vmatprep.subr.bf16.mxu0 %v11417_v50  ;;  %v13288_v8 = vld [vmem:[#allocation31_spill] sm:$0xff] }
 0x8ed   :  { %5818 = vmatprep.subr.bf16.mxu1 %v11417_v50  ;;  %v13289_v50 = vld [vmem:[#allocation32_spill] sm:$0xff] }
 0x8ef   :  { %5679 = vmatpush1.bf16.msra.mxu0 %v11422_v23 }
 0x8f0   :  { %5819 = vmatpush1.bf16.msra.mxu1 %v11422_v23  ;;  %5680 = vmatprep.subr.bf16.mxu0 %v11426_v35  ;;  %v13290_v23 = vld [vmem:[#allocation12_spill] sm:$0xff] }
 0x8f1   :  { %5820 = vmatprep.subr.bf16.mxu1 %v11426_v35  ;;  %v13291_v35 = vld [vmem:[#allocation13_spill] sm:$0xff] }
 0x8f3   :  { %5681 = vmatpush1.bf16.msra.mxu0 %v11430_v46 }
 0x8f4   :  { %5821 = vmatpush1.bf16.msra.mxu1 %v11430_v46  ;;  %5682 = vmatprep.subr.bf16.mxu0 %v11434_v6  ;;  %v13292_v46 = vld [vmem:[#allocation14_spill] sm:$0xff] }
 0x8f5   :  { %5822 = vmatprep.subr.bf16.mxu1 %v11434_v6  ;;  %v13293_v6 = vld [vmem:[#allocation16_spill] sm:$0xff] }
 0x8f7   :  { %5683 = vmatpush1.bf16.msra.mxu0 %v13285_v60 }
 0x8f8   :  { %5823 = vmatpush1.bf16.msra.mxu1 %v13285_v60  ;;  %5684 = vmatprep.subr.bf16.mxu0 %v13286_v44  ;;  %v13294_v60 = vld [vmem:[#allocation17_spill] sm:$0xff] }
 0x8f9   :  { %5824 = vmatprep.subr.bf16.mxu1 %v13286_v44  ;;  %v13295_v44 = vld [vmem:[#allocation18_spill] sm:$0xff] }
 0x8fb   :  { %5685 = vmatpush1.bf16.msra.mxu0 %v13287_v45 }
 0x8fc   :  { %5825 = vmatpush1.bf16.msra.mxu1 %v13287_v45  ;;  %5686 = vmatprep.subr.bf16.mxu0 %v13288_v8  ;;  %v13296_v45 = vld [vmem:[#allocation19_spill] sm:$0xff] }
 0x8fd   :  { %5826 = vmatprep.subr.bf16.mxu1 %v13288_v8  ;;  %v13297_v8 = vld [vmem:[#allocation20_spill] sm:$0xff] }
 0x8ff   :  { %5687 = vmatpush1.bf16.msra.mxu0 %v13289_v50 }
 0x900   :  { %5827 = vmatpush1.bf16.msra.mxu1 %v13289_v50  ;;  %5688 = vmatprep.subr.bf16.mxu0 %v13290_v23  ;;  %v13298_v50 = vld [vmem:[#allocation21_spill] sm:$0xff] }
 0x901   :  { %5828 = vmatprep.subr.bf16.mxu1 %v13290_v23  ;;  %v13299_v23 = vld [vmem:[#allocation22_spill] sm:$0xff] }
 0x903   :  { %5689 = vmatpush1.bf16.msra.mxu0 %v13291_v35 }
 0x904   :  { %5829 = vmatpush1.bf16.msra.mxu1 %v13291_v35  ;;  %5690 = vmatprep.subr.bf16.mxu0 %v13292_v46  ;;  %v233_v35 = vld [vmem:[%s12309_s4] sm:$0x3] }
 0x905   :  { %5830 = vmatprep.subr.bf16.mxu1 %v13292_v46  ;;  %v13300_v46 = vld [vmem:[#allocation23_spill] sm:$0xff] }
 0x907   :  { %5691 = vmatpush1.bf16.msra.mxu0 %v13293_v6 }
 0x908   :  { %5831 = vmatpush1.bf16.msra.mxu1 %v13293_v6  ;;  %5692 = vmatprep.subr.bf16.mxu0 %v13294_v60  ;;  %v13301_v6 = vld [vmem:[#allocation10_spill] sm:$0xff] }
 0x909   :  { %5832 = vmatprep.subr.bf16.mxu1 %v13294_v60  ;;  %v13302_v60 = vsub.s32 0, %v13301_v6 }
 0x90b   :  { %5693 = vmatpush1.bf16.msra.mxu0 %v13295_v44 }
 0x90c   :  { %5833 = vmatpush1.bf16.msra.mxu1 %v13295_v44  ;;  %5694 = vmatprep.subr.bf16.mxu0 %v13296_v45  ;;  %v11984_v44 = vrot.slane %v233_v35, %v13302_v60 }
 0x90d   :  { %5834 = vmatprep.subr.bf16.mxu1 %v13296_v45  ;;  %v13303_v45 = vld [vmem:[#allocation52_spill] sm:$0xff] }
 0x90f   :  { %5695 = vmatpush1.bf16.msra.mxu0 %v13297_v8 }
 0x910   :  { %5835 = vmatpush1.bf16.msra.mxu1 %v13297_v8  ;;  %5696 = vmatprep.subr.bf16.mxu0 %v13298_v50  ;;  %v13304_v8 = vsub.s32 1, %v13301_v6 }
 0x911   :  { %5836 = vmatprep.subr.bf16.mxu1 %v13298_v50 }
 0x912   :  { %v11989_v50 = vrot.slane %v233_v35, %v13304_v8 }
 0x913   :  { %5697 = vmatpush1.bf16.msra.mxu0 %v13299_v23 }
 0x914   :  { %5837 = vmatpush1.bf16.msra.mxu1 %v13299_v23  ;;  %5698 = vmatprep.subr.bf16.mxu0 %v13300_v46 }
 0x915   :  { %5838 = vmatprep.subr.bf16.mxu1 %v13300_v46 }
 0x917   :  { %5699 = vmatpush1.bf16.msra.mxu0 %v13303_v45 }
 0x918   :  { %5839 = vmatpush1.bf16.msra.mxu1 %v13303_v45  ;;  %5700 = vmatprep.subr.bf16.mxu0 %v13305_v37 }
 0x919   :  { %v5226_v31 = vpop.f32.mrb[48].mxu0  ;;  %5840 = vmatprep.subr.bf16.mxu1 %v13305_v37 }
 0x91a   :  { %v7225_v23 = vadd.f32 %v5226_v31, %v11984_v44  ;;  %v5366_v46 = vpop.f32.mrb[48].mxu1  ;;  %v5228_v29 = vpop.f32.mrb[49].mxu0 }
 0x91b   :  { %v7229_v60 = vadd.f32 %v5366_v46, %v11984_v44  ;;  %v7226_v2 = vadd.f32 %v5228_v29, %v11989_v50  ;;  %v5368_v57 = vpop.f32.mrb[49].mxu1  ;;  %v5230_v39 = vpop.f32.mrb[50].mxu0  ;;  %5701 = vmatpush1.bf16.msra.mxu0 %v11510_v20 }
 0x91c   :  { %v5235_v35 = vmax.f32 %v7225_v23, 0.0  ;;  %v7230_v6 = vadd.f32 %v5368_v57, %v11989_v50  ;;  %v7227_v45 = vadd.f32 %v5230_v39, %v11984_v44  ;;  %v5370_v8 = vpop.f32.mrb[50].mxu1  ;;  %5841 = vmatpush1.bf16.msra.mxu1 %v11510_v20  ;;  %v5232_v37 = vpop.f32.mrb[51].mxu0  ;;  %5702 = vmatprep.subr.bf16.mxu0 %v11514_v36 }
 0x91d   :  { %v5375_v31 = vmax.f32 %v7229_v60, 0.0  ;;  %v5236_v5 = vmax.f32 %v7226_v2, 0.0  ;;  %v7231_v46 = vadd.f32 %v5370_v8, %v11984_v44  ;;  %v7228_v29 = vadd.f32 %v5232_v37, %v11989_v50  ;;  %v5372_v63 = vpop.f32.mrb[51].mxu1  ;;  %5842 = vmatprep.subr.bf16.mxu1 %v11514_v36 }
 0x91e   :  { %v5376_v23 = vmax.f32 %v7230_v6, 0.0  ;;  %v5237_v10 = vmax.f32 %v7227_v45, 0.0  ;;  %v7232_v57 = vadd.f32 %v5372_v63, %v11989_v50  ;;  %v8236_v63 = vld [vmem:[#allocation6 + $0xd4] ss:$8 sps:$4 sm:$0xff]  }
 0x91f   :  { %v5239_v39 = vmax.f32 %v5235_v35, %v5236_v5  ;;  %v5377_v17 = vmax.f32 %v7231_v46, 0.0  ;;  %v5238_v28 = vmax.f32 %v7228_v29, 0.0  ;;  %5703 = vmatpush1.bf16.msra.mxu0 %v11522_v13 }
 0x920   :  { %v5379_v20 = vmax.f32 %v5375_v31, %v5376_v23  ;;  %v5378_v24 = vmax.f32 %v7232_v57, 0.0  ;;  %5843 = vmatpush1.bf16.msra.mxu1 %v11522_v13  ;;  %5704 = vmatprep.subr.bf16.mxu0 %v11528_v52  ;;  %v13306_v13 = vld [vmem:[#allocation56_spill] sm:$0xff] }
 0x921   :  { %v5240_v2 = vmax.f32 %v5237_v10, %v5238_v28  ;;  %5844 = vmatprep.subr.bf16.mxu1 %v11528_v52  ;;  %v13308_v52 = vmov 0   ;;  %v8233_v28 = vld [vmem:[#allocation6 + $0xb0] ss:$8 sps:$4 sm:$0xff]   ;;  %v8235_v10 = vld [vmem:[#allocation6 + $0xc0] ss:$8 sps:$4 sm:$0xff]  }
 0x922   :  { %v5381_v60 = vmax.f32 %v5239_v39, %v5379_v20  ;;  %v5380_v36 = vmax.f32 %v5377_v17, %v5378_v24  ;;  %v8218_v24 = vld [vmem:[#allocation6 + $0x44] ss:$8 sps:$4 sm:$0xff]   ;;  %v8237_v57 = vld [vmem:[#allocation6 + $0xd0] ss:$8 sps:$4 sm:$0xff]  }
 0x923   :  { %5705 = vmatpush1.bf16.msra.mxu0 %v11534_v19  ;;  %v8234_v17 = vld [vmem:[#allocation6 + $0xc4] ss:$8 sps:$4 sm:$0xff]  }
 0x924   :  { %v5382_v6 = vmax.f32 %v5240_v2, %v5380_v36  ;;  %5845 = vmatpush1.bf16.msra.mxu1 %v11534_v19  ;;  %5717 = vmatprep.subr.bf16.mxu0 %v11538_v38  ;;  %v13309_v19 = vld [vmem:[#allocation48_spill] sm:$0xff] }
 0x925   :  { %5857 = vmatprep.subr.bf16.mxu1 %v11538_v38  ;;  %v13310_v38 = vld [vmem:[#allocation55_spill] sm:$0xff] }
 0x926   :  { %v12014_v5 = vpack.c.bf16 %v5382_v6, %v5381_v60  ;;  %5707 = vmatmul.mubr.bf16.vlgmr.msra.gmra.mrb[56].mxu0 %v13229_v18  ;;  %v13315_v18 = vld [vmem:[#allocation24_spill] sm:$0xff]  ;;  %v8238_v6 = vld [vmem:[#allocation6 + $0xe4] ss:$8 sps:$4 sm:$0xff]  }
 0x927   :  { %5847 = vmatmul.mubr.bf16.vlgmr.msra.gmra.mrb[56].mxu1 %v13258_v27  ;;  %5718 = vmatpush1.bf16.msra.mxu0 %v11542_v14  ;;  %v13307_v27 = vld [vmem:[#allocation47_spill] sm:$0xff] }
 0x928   :  { %5749 = vmatprep.mubr.bf16.mxu0 %v13284_v1  ;;  %5858 = vmatpush1.bf16.msra.mxu1 %v11542_v14  ;;  %v13311_v14 = vld [vmem:[#allocation26_spill] sm:$0xff] }
 0x929   :  { %5889 = vmatprep.mubr.bf16.mxu1 %v13306_v13  ;;  %5719 = vmatprep.subr.bf16.mxu0 %v11547_v49 }
 0x92a   :  { %5859 = vmatprep.subr.bf16.mxu1 %v11547_v49  ;;  %v13312_v49 = vld [vmem:[#allocation51_spill] sm:$0xff] }
 0x92b   :  { %5720 = vmatpush1.bf16.msra.mxu0 %v11554_v12 }
 0x92c   :  { %5860 = vmatpush1.bf16.msra.mxu1 %v11554_v12  ;;  %5721 = vmatprep.subr.bf16.mxu0 %v11558_v16  ;;  %v13313_v12 = vld [vmem:[#allocation15_spill] sm:$0xff] }
 0x92d   :  { %5861 = vmatprep.subr.bf16.mxu1 %v11558_v16  ;;  %v13314_v16 = vld [vmem:[#allocation30_spill] sm:$0xff] }
 0x92f   :  { %5722 = vmatpush1.bf16.msra.mxu0 %v11564_v9 }
 0x930   :  { %5862 = vmatpush1.bf16.msra.mxu1 %v11564_v9  ;;  %5723 = vmatprep.subr.bf16.mxu0 %v11568_v7  ;;  %v13316_v9 = vld [vmem:[#allocation57_spill] sm:$0xff] }
 0x931   :  { %5863 = vmatprep.subr.bf16.mxu1 %v11568_v7  ;;  %v13317_v7 = vld [vmem:[#allocation58_spill] sm:$0xff] }
 0x933   :  { %5724 = vmatpush1.bf16.msra.mxu0 %v11572_v0 }
 0x934   :  { %5864 = vmatpush1.bf16.msra.mxu1 %v11572_v0  ;;  %5725 = vmatprep.subr.bf16.mxu0 %v11576_v56  ;;  %v13318_v0 = vld [vmem:[#allocation59_spill] sm:$0xff] }
 0x935   :  { %5865 = vmatprep.subr.bf16.mxu1 %v11576_v56  ;;  %v13319_v56 = vld [vmem:[#allocation60_spill] sm:$0xff] }
 0x937   :  { %5726 = vmatpush1.bf16.msra.mxu0 %v11580_v53 }
 0x938   :  { %5866 = vmatpush1.bf16.msra.mxu1 %v11580_v53  ;;  %5727 = vmatprep.subr.bf16.mxu0 %v11584_v40  ;;  %v13320_v53 = vld [vmem:[#allocation61_spill] sm:$0xff] }
 0x939   :  { %5867 = vmatprep.subr.bf16.mxu1 %v11584_v40  ;;  %v13321_v40 = vld [vmem:[#allocation62_spill] sm:$0xff] }
 0x93b   :  { %5728 = vmatpush1.bf16.msra.mxu0 %v11588_v54 }
 0x93c   :  { %5868 = vmatpush1.bf16.msra.mxu1 %v11588_v54  ;;  %5729 = vmatprep.subr.bf16.mxu0 %v11592_v42  ;;  %v8210_v54 = vld [vmem:[#allocation6 + $0x4] ss:$8 sps:$4 sm:$0xff]  }
 0x93d   :  { %5869 = vmatprep.subr.bf16.mxu1 %v11592_v42  ;;  %v13322_v42 = vld [vmem:[#allocation50_spill] sm:$0xff] }
 0x93f   :  { %5730 = vmatpush1.bf16.msra.mxu0 %v11596_v43 }
 0x940   :  { %5870 = vmatpush1.bf16.msra.mxu1 %v11596_v43  ;;  %5731 = vmatprep.subr.bf16.mxu0 %v11600_v32  ;;  %v8211_v43 = vld [vmem:[#allocation6] ss:$8 sps:$4 sm:$0xff]  }
 0x941   :  { %5871 = vmatprep.subr.bf16.mxu1 %v11600_v32  ;;  %v8212_v32 = vld [vmem:[#allocation6 + $0x14] ss:$8 sps:$4 sm:$0xff]  }
 0x943   :  { %5732 = vmatpush1.bf16.msra.mxu0 %v11604_v33 }
 0x944   :  { %5872 = vmatpush1.bf16.msra.mxu1 %v11604_v33  ;;  %5733 = vmatprep.subr.bf16.mxu0 %v11608_v61  ;;  %v8213_v33 = vld [vmem:[#allocation6 + $0x10] ss:$8 sps:$4 sm:$0xff]  }
 0x945   :  { %5873 = vmatprep.subr.bf16.mxu1 %v11608_v61  ;;  %v8214_v61 = vld [vmem:[#allocation6 + $0x24] ss:$8 sps:$4 sm:$0xff]  }
 0x947   :  { %5734 = vmatpush1.bf16.msra.mxu0 %v11612_v34 }
 0x948   :  { %5874 = vmatpush1.bf16.msra.mxu1 %v11612_v34  ;;  %5735 = vmatprep.subr.bf16.mxu0 %v11616_v21  ;;  %v8215_v34 = vld [vmem:[#allocation6 + $0x20] ss:$8 sps:$4 sm:$0xff]  }
 0x949   :  { %5875 = vmatprep.subr.bf16.mxu1 %v11616_v21  ;;  %v8216_v21 = vld [vmem:[#allocation6 + $0x34] ss:$8 sps:$4 sm:$0xff]  }
 0x94b   :  { %5736 = vmatpush1.bf16.msra.mxu0 %v11620_v41 }
 0x94c   :  { %5876 = vmatpush1.bf16.msra.mxu1 %v11620_v41  ;;  %5737 = vmatprep.subr.bf16.mxu0 %v13261_v30  ;;  %v8217_v41 = vld [vmem:[#allocation6 + $0x30] ss:$8 sps:$4 sm:$0xff]  }
 0x94d   :  { %5877 = vmatprep.subr.bf16.mxu1 %v13261_v30  ;;  %v8219_v30 = vld [vmem:[#allocation6 + $0x40] ss:$8 sps:$4 sm:$0xff]  }
 0x94f   :  { %5738 = vmatpush1.bf16.msra.mxu0 %v13262_v51 }
 0x950   :  { %5878 = vmatpush1.bf16.msra.mxu1 %v13262_v51  ;;  %5739 = vmatprep.subr.bf16.mxu0 %v13263_v48  ;;  %v8220_v51 = vld [vmem:[#allocation6 + $0x54] ss:$8 sps:$4 sm:$0xff]  }
 0x951   :  { %5879 = vmatprep.subr.bf16.mxu1 %v13263_v48  ;;  %v8221_v48 = vld [vmem:[#allocation6 + $0x50] ss:$8 sps:$4 sm:$0xff]  }
 0x953   :  { %5740 = vmatpush1.bf16.msra.mxu0 %v13264_v3 }
 0x954   :  { %5880 = vmatpush1.bf16.msra.mxu1 %v13264_v3  ;;  %5741 = vmatprep.subr.bf16.mxu0 %v13265_v26  ;;  %v8222_v3 = vld [vmem:[#allocation6 + $0x64] ss:$8 sps:$4 sm:$0xff]  }
 0x955   :  { %5881 = vmatprep.subr.bf16.mxu1 %v13265_v26  ;;  %v8223_v26 = vld [vmem:[#allocation6 + $0x60] ss:$8 sps:$4 sm:$0xff]  }
 0x957   :  { %5742 = vmatpush1.bf16.msra.mxu0 %v13266_v59 }
 0x958   :  { %5882 = vmatpush1.bf16.msra.mxu1 %v13266_v59  ;;  %5743 = vmatprep.subr.bf16.mxu0 %v13267_v55  ;;  %v8224_v59 = vld [vmem:[#allocation6 + $0x74] ss:$8 sps:$4 sm:$0xff]  }
 0x959   :  { %5883 = vmatprep.subr.bf16.mxu1 %v13267_v55  ;;  %v8225_v55 = vld [vmem:[#allocation6 + $0x70] ss:$8 sps:$4 sm:$0xff]  }
 0x95b   :  { %5744 = vmatpush1.bf16.msra.mxu0 %v13268_v15 }
 0x95c   :  { %5884 = vmatpush1.bf16.msra.mxu1 %v13268_v15  ;;  %5745 = vmatprep.subr.bf16.mxu0 %v13269_v4  ;;  %v8226_v15 = vld [vmem:[#allocation6 + $0x84] ss:$8 sps:$4 sm:$0xff]  }
 0x95d   :  { %5885 = vmatprep.subr.bf16.mxu1 %v13269_v4  ;;  %v8227_v4 = vld [vmem:[#allocation6 + $0x80] ss:$8 sps:$4 sm:$0xff]  }
 0x95f   :  { %5746 = vmatpush1.bf16.msra.mxu0 %v13270_v11 }
 0x960   :  { %5886 = vmatpush1.bf16.msra.mxu1 %v13270_v11  ;;  %5747 = vmatprep.subr.bf16.mxu0 %v13271_v62  ;;  %v8228_v11 = vld [vmem:[#allocation6 + $0x94] ss:$8 sps:$4 sm:$0xff]  }
 0x961   :  { %5887 = vmatprep.subr.bf16.mxu1 %v13271_v62  ;;  %v8229_v62 = vld [vmem:[#allocation6 + $0x90] ss:$8 sps:$4 sm:$0xff]  }
 0x963   :  { %5748 = vmatpush1.bf16.msra.mxu0 %v13272_v22 }
 0x964   :  { %5888 = vmatpush1.bf16.msra.mxu1 %v13272_v22  ;;  %5760 = vmatprep.subr.bf16.mxu0 %v13273_v58  ;;  %v8230_v22 = vld [vmem:[#allocation6 + $0xa4] ss:$8 sps:$4 sm:$0xff]  }
 0x965   :  { %5900 = vmatprep.subr.bf16.mxu1 %v13273_v58  ;;  %v8231_v58 = vld [vmem:[#allocation6 + $0xa0] ss:$8 sps:$4 sm:$0xff]  }
 0x966   :  { %5750 = vmatmul.mubr.bf16.vlgmr.msra.gmra.mrb[56].mxu0 %v13260_v47 }
 0x967   :  { %5890 = vmatmul.mubr.bf16.vlgmr.msra.gmra.mrb[56].mxu1 %v13284_v1  ;;  %5761 = vmatpush1.bf16.msra.mxu0 %v13274_v25 }
 0x968   :  { %5901 = vmatpush1.bf16.msra.mxu1 %v13274_v25  ;;  %5762 = vmatprep.subr.bf16.mxu0 %v13307_v27  ;;  %v8232_v25 = vld [vmem:[#allocation6 + $0xb4] ss:$8 sps:$4 sm:$0xff]  }
 0x969   :  { %5902 = vmatprep.subr.bf16.mxu1 %v13307_v27  ;;  %5792 = vmatprep.mubr.bf16.mxu0 %v13308_v52 }
 0x96a   :  { %5932 = vmatprep.mubr.bf16.mxu1 %v13308_v52 }
 0x96b   :  { %5763 = vmatpush1.bf16.msra.mxu0 %v13309_v19 }
 0x96c   :  { %5903 = vmatpush1.bf16.msra.mxu1 %v13309_v19  ;;  %5764 = vmatprep.subr.bf16.mxu0 %v13310_v38 }
 0x96d   :  { %5904 = vmatprep.subr.bf16.mxu1 %v13310_v38 }
 0x96f   :  { %5765 = vmatpush1.bf16.msra.mxu0 %v13311_v14 }
 0x970   :  { %5905 = vmatpush1.bf16.msra.mxu1 %v13311_v14  ;;  %5766 = vmatprep.subr.bf16.mxu0 %v13312_v49 }
 0x971   :  { %5906 = vmatprep.subr.bf16.mxu1 %v13312_v49 }
 0x973   :  { %5767 = vmatpush1.bf16.msra.mxu0 %v13313_v12 }
 0x974   :  { %5907 = vmatpush1.bf16.msra.mxu1 %v13313_v12  ;;  %5768 = vmatprep.subr.bf16.mxu0 %v13314_v16 }
 0x975   :  { %5908 = vmatprep.subr.bf16.mxu1 %v13314_v16 }
 0x977   :  { %5769 = vmatpush1.bf16.msra.mxu0 %v13315_v18 }
 0x978   :  { %5909 = vmatpush1.bf16.msra.mxu1 %v13315_v18  ;;  %5770 = vmatprep.subr.bf16.mxu0 %v13316_v9 }
 0x979   :  { %5910 = vmatprep.subr.bf16.mxu1 %v13316_v9 }
 0x97b   :  { %5771 = vmatpush1.bf16.msra.mxu0 %v13317_v7 }
 0x97c   :  { %5911 = vmatpush1.bf16.msra.mxu1 %v13317_v7  ;;  %5772 = vmatprep.subr.bf16.mxu0 %v13318_v0 }
 0x97d   :  { %5912 = vmatprep.subr.bf16.mxu1 %v13318_v0 }
 0x97f   :  { %5773 = vmatpush1.bf16.msra.mxu0 %v13319_v56 }
 0x980   :  { %5913 = vmatpush1.bf16.msra.mxu1 %v13319_v56  ;;  %5774 = vmatprep.subr.bf16.mxu0 %v13320_v53  ;;  %v8239_v56 = vld [vmem:[#allocation6 + $0xe0] ss:$8 sps:$4 sm:$0xff]  }
 0x981   :  { %5914 = vmatprep.subr.bf16.mxu1 %v13320_v53 }
 0x983   :  { %5775 = vmatpush1.bf16.msra.mxu0 %v13321_v40 }
 0x984   :  { %5915 = vmatpush1.bf16.msra.mxu1 %v13321_v40  ;;  %5958 = vmatprep.subr.bf16.mxu0 %v8210_v54 }
 0x985   :  { %6098 = vmatprep.subr.bf16.mxu1 %v8210_v54  ;;  %v8240_v54 = vld [vmem:[#allocation6 + $0xf4] ss:$8 sps:$4 sm:$0xff]  }
 0x986   :  { %5793 = vmatmul.mubr.bf16.vlgmr.msra.gmra.mrb[56].mxu0 %v13306_v13 }
 0x987   :  { %5933 = vmatmul.mubr.bf16.vlgmr.msra.gmra.mrb[56].mxu1 %v13322_v42  ;;  %5959 = vmatpush1.bf16.msra.mxu0 %v8211_v43 }
 0x988   :  { %5990 = vmatprep.mubr.bf16.mxu0 %v13284_v1  ;;  %6099 = vmatpush1.bf16.msra.mxu1 %v8211_v43 }
 0x989   :  { %6130 = vmatprep.mubr.bf16.mxu1 %v13306_v13  ;;  %5960 = vmatprep.subr.bf16.mxu0 %v8212_v32 }
 0x98a   :  { %6100 = vmatprep.subr.bf16.mxu1 %v8212_v32 }
 0x98b   :  { %5961 = vmatpush1.bf16.msra.mxu0 %v8213_v33 }
 0x98c   :  { %6101 = vmatpush1.bf16.msra.mxu1 %v8213_v33  ;;  %5962 = vmatprep.subr.bf16.mxu0 %v8214_v61 }
 0x98d   :  { %6102 = vmatprep.subr.bf16.mxu1 %v8214_v61  ;;  %v8241_v61 = vld [vmem:[#allocation6 + $0xf0] ss:$8 sps:$4 sm:$0xff]  }
 0x98f   :  { %5963 = vmatpush1.bf16.msra.mxu0 %v8215_v34 }
 0x990   :  { %6103 = vmatpush1.bf16.msra.mxu1 %v8215_v34  ;;  %5964 = vmatprep.subr.bf16.mxu0 %v8216_v21 }
 0x991   :  { %6104 = vmatprep.subr.bf16.mxu1 %v8216_v21  ;;  %v8242_v21 = vld [vmem:[#allocation6 + $0x104] ss:$8 sps:$4 sm:$0xff]  }
 0x993   :  { %5965 = vmatpush1.bf16.msra.mxu0 %v8217_v41 }
 0x994   :  { %6105 = vmatpush1.bf16.msra.mxu1 %v8217_v41  ;;  %5966 = vmatprep.subr.bf16.mxu0 %v8218_v24 }
 0x995   :  { %6106 = vmatprep.subr.bf16.mxu1 %v8218_v24  ;;  %v8243_v24 = vld [vmem:[#allocation6 + $0x100] ss:$8 sps:$4 sm:$0xff]  }
 0x997   :  { %5967 = vmatpush1.bf16.msra.mxu0 %v8219_v30 }
 0x998   :  { %6107 = vmatpush1.bf16.msra.mxu1 %v8219_v30  ;;  %5968 = vmatprep.subr.bf16.mxu0 %v8220_v51  ;;  %v13323_v30 = vld [vmem:[#allocation25_spill] sm:$0xff] }
 0x999   :  { %6108 = vmatprep.subr.bf16.mxu1 %v8220_v51  ;;  %v8244_v51 = vld [vmem:[#allocation6 + $0x114] ss:$8 sps:$4 sm:$0xff]  }
 0x99b   :  { %5969 = vmatpush1.bf16.msra.mxu0 %v8221_v48 }
 0x99c   :  { %6109 = vmatpush1.bf16.msra.mxu1 %v8221_v48  ;;  %5970 = vmatprep.subr.bf16.mxu0 %v8222_v3  ;;  %v8245_v48 = vld [vmem:[#allocation6 + $0x110] ss:$8 sps:$4 sm:$0xff]  }
 0x99d   :  { %6110 = vmatprep.subr.bf16.mxu1 %v8222_v3  ;;  %v8246_v3 = vld [vmem:[#allocation6 + $0x124] ss:$8 sps:$4 sm:$0xff]  }
 0x99f   :  { %5971 = vmatpush1.bf16.msra.mxu0 %v8223_v26 }
 0x9a0   :  { %6111 = vmatpush1.bf16.msra.mxu1 %v8223_v26  ;;  %5972 = vmatprep.subr.bf16.mxu0 %v8224_v59  ;;  %v8249_v26 = vld [vmem:[#allocation6 + $0x130] ss:$8 sps:$4 sm:$0xff]  }
 0x9a1   :  { %6112 = vmatprep.subr.bf16.mxu1 %v8224_v59  ;;  %v8250_v59 = vld [vmem:[#allocation6 + $0x144] ss:$8 sps:$4 sm:$0xff]  }
 0x9a3   :  { %5973 = vmatpush1.bf16.msra.mxu0 %v8225_v55 }
 0x9a4   :  { %6113 = vmatpush1.bf16.msra.mxu1 %v8225_v55  ;;  %5974 = vmatprep.subr.bf16.mxu0 %v8226_v15  ;;  %v8251_v55 = vld [vmem:[#allocation6 + $0x140] ss:$8 sps:$4 sm:$0xff]  }
 0x9a5   :  { %6114 = vmatprep.subr.bf16.mxu1 %v8226_v15  ;;  %v8252_v15 = vld [vmem:[#allocation6 + $0x154] ss:$8 sps:$4 sm:$0xff]  }
 0x9a7   :  { %5975 = vmatpush1.bf16.msra.mxu0 %v8227_v4 }
 0x9a8   :  { %6115 = vmatpush1.bf16.msra.mxu1 %v8227_v4  ;;  %5976 = vmatprep.subr.bf16.mxu0 %v8228_v11  ;;  %v8253_v4 = vld [vmem:[#allocation6 + $0x150] ss:$8 sps:$4 sm:$0xff]  }
 0x9a9   :  { %6116 = vmatprep.subr.bf16.mxu1 %v8228_v11  ;;  %v8254_v11 = vld [vmem:[#allocation6 + $0x164] ss:$8 sps:$4 sm:$0xff]  }
 0x9ab   :  { %5977 = vmatpush1.bf16.msra.mxu0 %v8229_v62 }
 0x9ac   :  { %6117 = vmatpush1.bf16.msra.mxu1 %v8229_v62  ;;  %5978 = vmatprep.subr.bf16.mxu0 %v8230_v22  ;;  %v8255_v62 = vld [vmem:[#allocation6 + $0x160] ss:$8 sps:$4 sm:$0xff]  }
 0x9ad   :  { %6118 = vmatprep.subr.bf16.mxu1 %v8230_v22  ;;  %v8256_v22 = vld [vmem:[#allocation6 + $0x174] ss:$8 sps:$4 sm:$0xff]  }
 0x9af   :  { %5979 = vmatpush1.bf16.msra.mxu0 %v8231_v58 }
 0x9b0   :  { %6119 = vmatpush1.bf16.msra.mxu1 %v8231_v58  ;;  %5980 = vmatprep.subr.bf16.mxu0 %v8232_v25  ;;  %v8257_v58 = vld [vmem:[#allocation6 + $0x170] ss:$8 sps:$4 sm:$0xff]  }
 0x9b1   :  { %6120 = vmatprep.subr.bf16.mxu1 %v8232_v25  ;;  %v8258_v25 = vld [vmem:[#allocation6 + $0x184] ss:$8 sps:$4 sm:$0xff]  }
 0x9b3   :  { %5981 = vmatpush1.bf16.msra.mxu0 %v8233_v28 }
 0x9b4   :  { %6121 = vmatpush1.bf16.msra.mxu1 %v8233_v28  ;;  %5982 = vmatprep.subr.bf16.mxu0 %v8234_v17  ;;  %v8259_v28 = vld [vmem:[#allocation6 + $0x180] ss:$8 sps:$4 sm:$0xff]  }
 0x9b5   :  { %6122 = vmatprep.subr.bf16.mxu1 %v8234_v17  ;;  %v8260_v17 = vld [vmem:[#allocation6 + $0x194] ss:$8 sps:$4 sm:$0xff]  }
 0x9b7   :  { %5983 = vmatpush1.bf16.msra.mxu0 %v8235_v10 }
 0x9b8   :  { %6123 = vmatpush1.bf16.msra.mxu1 %v8235_v10  ;;  %5984 = vmatprep.subr.bf16.mxu0 %v8236_v63  ;;  %v8261_v10 = vld [vmem:[#allocation6 + $0x190] ss:$8 sps:$4 sm:$0xff]  }
 0x9b9   :  { %v5510_v35 = vpop.f32.mrb[52].mxu0  ;;  %6124 = vmatprep.subr.bf16.mxu1 %v8236_v63  ;;  %v8262_v63 = vld [vmem:[#allocation6 + $0x1a4] ss:$8 sps:$4 sm:$0xff]  }
 0x9ba   :  { %v7233_v45 = vadd.f32 %v5510_v35, %v11984_v44  ;;  %v5650_v8 = vpop.f32.mrb[52].mxu1  ;;  %v5512_v37 = vpop.f32.mrb[53].mxu0  ;;  %v8263_v35 = vld [vmem:[#allocation6 + $0x1a0] ss:$8 sps:$4 sm:$0xff]  }
 0x9bb   :  { %v7237_v31 = vadd.f32 %v5650_v8, %v11984_v44  ;;  %v7234_v46 = vadd.f32 %v5512_v37, %v11989_v50  ;;  %v5652_v29 = vpop.f32.mrb[53].mxu1  ;;  %v5514_v23 = vpop.f32.mrb[54].mxu0  ;;  %5985 = vmatpush1.bf16.msra.mxu0 %v8237_v57  ;;  %v8265_v8 = vld [vmem:[#allocation6 + $0x1b0] ss:$8 sps:$4 sm:$0xff]   ;;  %v8266_v37 = vld [vmem:[#allocation6 + $0x1c4] ss:$8 sps:$4 sm:$0xff]  }
 0x9bc   :  { %v5519_v39 = vmax.f32 %v7233_v45, 0.0  ;;  %v7238_v20 = vadd.f32 %v5652_v29, %v11989_v50  ;;  %v7235_v2 = vadd.f32 %v5514_v23, %v11984_v44  ;;  %v5654_v60 = vpop.f32.mrb[54].mxu1  ;;  %6125 = vmatpush1.bf16.msra.mxu1 %v8237_v57  ;;  %v5516_v36 = vpop.f32.mrb[55].mxu0  ;;  %5986 = vmatprep.subr.bf16.mxu0 %v8238_v6  ;;  %v8264_v45 = vld [vmem:[#allocation6 + $0x1b4] ss:$8 sps:$4 sm:$0xff]  }
 0x9bd   :  { %v5659_v27 = vmax.f32 %v7237_v31, 0.0  ;;  %v5520_v19 = vmax.f32 %v7234_v46, 0.0  ;;  %v7239_v38 = vadd.f32 %v5654_v60, %v11984_v44  ;;  %v7236_v14 = vadd.f32 %v5516_v36, %v11989_v50  ;;  %v5656_v49 = vpop.f32.mrb[55].mxu1  ;;  %6126 = vmatprep.subr.bf16.mxu1 %v8238_v6  ;;  %v8267_v31 = vld [vmem:[#allocation6 + $0x1c0] ss:$8 sps:$4 sm:$0xff]  }
 0x9be   :  { %v5660_v12 = vmax.f32 %v7238_v20, 0.0  ;;  %v5521_v16 = vmax.f32 %v7235_v2, 0.0  ;;  %v7240_v18 = vadd.f32 %v5656_v49, %v11989_v50  ;;  %v8268_v46 = vld [vmem:[#allocation6 + $0x1d4] ss:$8 sps:$4 sm:$0xff]   ;;  %v8269_v29 = vld [vmem:[#allocation6 + $0x1d0] ss:$8 sps:$4 sm:$0xff]  }
 0x9bf   :  { %v5523_v9 = vmax.f32 %v5519_v39, %v5520_v19  ;;  %v5661_v7 = vmax.f32 %v7239_v38, 0.0  ;;  %v5522_v0 = vmax.f32 %v7236_v14, 0.0  ;;  %5987 = vmatpush1.bf16.msra.mxu0 %v8239_v56  ;;  %v8270_v23 = vld [vmem:[#allocation6 + $0x1e4] ss:$8 sps:$4 sm:$0xff]   ;;  %v8271_v57 = vld [vmem:[#allocation6 + $0x1e0] ss:$8 sps:$4 sm:$0xff]  }
 0x9c0   :  { %v5663_v53 = vmax.f32 %v5659_v27, %v5660_v12  ;;  %v5662_v40 = vmax.f32 %v7240_v18, 0.0  ;;  %6127 = vmatpush1.bf16.msra.mxu1 %v8239_v56  ;;  %5988 = vmatprep.subr.bf16.mxu0 %v8240_v54  ;;  %v8272_v39 = vld [vmem:[#allocation6 + $0x1f4] ss:$8 sps:$4 sm:$0xff]   ;;  %v8273_v20 = vld [vmem:[#allocation6 + $0x1f0] ss:$8 sps:$4 sm:$0xff]   ;;  %v7863_v56 = vld [vmem:[%s12310_s5] sm:$0xff]  }
 0x9c1   :  { %v5524_v43 = vmax.f32 %v5521_v16, %v5522_v0  ;;  %6128 = vmatprep.subr.bf16.mxu1 %v8240_v54  ;;  %v8274_v2 = vld [vmem:[#allocation6 + $0x204] ss:$8 sps:$4 sm:$0xff]   ;;  %v8275_v60 = vld [vmem:[#allocation6 + $0x200] ss:$8 sps:$4 sm:$0xff]   ;;  %v8276_v36 = vld [vmem:[#allocation6 + $0x214] ss:$8 sps:$4 sm:$0xff]  }
 0x9c2   :  { %v5665_v32 = vmax.f32 %v5523_v9, %v5663_v53  ;;  %v5664_v33 = vmax.f32 %v5661_v7, %v5662_v40  ;;  %v8277_v6 = vld [vmem:[#allocation6 + $0x210] ss:$8 sps:$4 sm:$0xff]   ;;  %v8278_v27 = vld [vmem:[#allocation6 + $0x224] ss:$8 sps:$4 sm:$0xff]   ;;  %v8279_v19 = vld [vmem:[#allocation6 + $0x220] ss:$8 sps:$4 sm:$0xff]  }
 0x9c3   :  { %5989 = vmatpush1.bf16.msra.mxu0 %v8241_v61  ;;  %v8282_v38 = vld [vmem:[#allocation6 + $0x244] ss:$8 sps:$4 sm:$0xff]   ;;  %v8283_v14 = vld [vmem:[#allocation6 + $0x240] ss:$8 sps:$4 sm:$0xff]   ;;  %v8285_v49 = vld [vmem:[#allocation6 + $0x250] ss:$8 sps:$4 sm:$0xff]  }
 0x9c4   :  { %v5666_v34 = vmax.f32 %v5524_v43, %v5664_v33  ;;  %6129 = vmatpush1.bf16.msra.mxu1 %v8241_v61  ;;  %6001 = vmatprep.subr.bf16.mxu0 %v8242_v21  ;;  %v8286_v12 = vld [vmem:[#allocation6 + $0x264] ss:$8 sps:$4 sm:$0xff]   ;;  %v8287_v16 = vld [vmem:[#allocation6 + $0x260] ss:$8 sps:$4 sm:$0xff]   ;;  %v8288_v18 = vld [vmem:[#allocation6 + $0x274] ss:$8 sps:$4 sm:$0xff]  }
 0x9c5   :  { %6141 = vmatprep.subr.bf16.mxu1 %v8242_v21  ;;  %v7862_v9 = vld [vmem:[%s12310_s5 + $0x40] sm:$0xff]   ;;  %v8289_v0 = vld [vmem:[#allocation6 + $0x270] ss:$8 sps:$4 sm:$0xff]   ;;  %v7864_v53 = vld [vmem:[%s12310_s5 + $0x48] sm:$0xff]  }
 0x9c6   :  { %5991 = vmatmul.mubr.bf16.vlgmr.msra.gmra.mrb[60].mxu0 %v13260_v47  ;;  %v12131_v41 = vpack.c.bf16 %v5666_v34, %v5665_v32  ;;  %v8247_v47 = vld [vmem:[#allocation6 + $0x120] ss:$8 sps:$4 sm:$0xff]   ;;  %v7866_v33 = vld [vmem:[%s12310_s5 + $0x50] sm:$0xff]  }
 0x9c7   :  { %6131 = vmatmul.mubr.bf16.vlgmr.msra.gmra.mrb[60].mxu1 %v13284_v1  ;;  %6002 = vmatpush1.bf16.msra.mxu0 %v8243_v24  ;;  %v8248_v1 = vld [vmem:[#allocation6 + $0x134] ss:$8 sps:$4 sm:$0xff]   ;;  %v7878_v7 = vld [vmem:[%s12310_s5 + $0xc0] sm:$0xff]   ;;  %v7880_v54 = vld [vmem:[%s12310_s5 + $0xc8] sm:$0xff]  }
 0x9c8   :  { %6033 = vmatprep.mubr.bf16.mxu0 %v13322_v42  ;;  %6142 = vmatpush1.bf16.msra.mxu1 %v8243_v24  ;;  %v7879_v40 = vld [vmem:[%s12310_s5 + $0x80] sm:$0xff]   ;;  %v7865_v32 = vld [vmem:[%s12310_s5 + $0x8] sm:$0xff]   ;;  %v7882_v34 = vld [vmem:[%s12310_s5 + $0xd0] sm:$0xff]  }
 0x9c9   :  { %6173 = vmatprep.mubr.bf16.mxu1 %v13323_v30  ;;  %6003 = vmatprep.subr.bf16.mxu0 %v8244_v51  ;;  %v13324_v43 = vld [vmem:[#allocation54_spill] sm:$0xff]  ;;  %v7881_v61 = vld [vmem:[%s12310_s5 + $0x88] sm:$0xff]   ;;  %v7867_v21 = vld [vmem:[%s12310_s5 + $0x10] sm:$0xff]  }
 0x9ca   :  { %6143 = vmatprep.subr.bf16.mxu1 %v8244_v51  ;;  %v7883_v24 = vld [vmem:[%s12310_s5 + $0x90] sm:$0xff]   ;;  %v7869_v51 = vld [vmem:[%s12310_s5 + $0x18] sm:$0xff]  }
 0x9cb   :  { %6004 = vmatpush1.bf16.msra.mxu0 %v8245_v48 }
 0x9cc   :  { %6144 = vmatpush1.bf16.msra.mxu1 %v8245_v48  ;;  %6005 = vmatprep.subr.bf16.mxu0 %v8246_v3  ;;  %v7870_v48 = vld [vmem:[%s12310_s5 + $0x60] sm:$0xff]  }
 0x9cd   :  { %6145 = vmatprep.subr.bf16.mxu1 %v8246_v3  ;;  %v7885_v3 = vld [vmem:[%s12310_s5 + $0x98] sm:$0xff]  }
 0x9cf   :  { %6006 = vmatpush1.bf16.msra.mxu0 %v8247_v47 }
 0x9d0   :  { %6146 = vmatpush1.bf16.msra.mxu1 %v8247_v47  ;;  %6007 = vmatprep.subr.bf16.mxu0 %v8248_v1  ;;  %v7886_v47 = vld [vmem:[%s12310_s5 + $0xe0] sm:$0xff]  }
 0x9d1   :  { %6147 = vmatprep.subr.bf16.mxu1 %v8248_v1  ;;  %v7871_v1 = vld [vmem:[%s12310_s5 + $0x20] sm:$0xff]  }
 0x9d3   :  { %6008 = vmatpush1.bf16.msra.mxu0 %v8249_v26 }
 0x9d4   :  { %6148 = vmatpush1.bf16.msra.mxu1 %v8249_v26  ;;  %6009 = vmatprep.subr.bf16.mxu0 %v8250_v59  ;;  %v7872_v26 = vld [vmem:[%s12310_s5 + $0x68] sm:$0xff]  }
 0x9d5   :  { %6149 = vmatprep.subr.bf16.mxu1 %v8250_v59  ;;  %v7873_v59 = vld [vmem:[%s12310_s5 + $0x28] sm:$0xff]  }
 0x9d7   :  { %6010 = vmatpush1.bf16.msra.mxu0 %v8251_v55 }
 0x9d8   :  { %6150 = vmatpush1.bf16.msra.mxu1 %v8251_v55  ;;  %6011 = vmatprep.subr.bf16.mxu0 %v8252_v15  ;;  %v7874_v55 = vld [vmem:[%s12310_s5 + $0x70] sm:$0xff]  }
 0x9d9   :  { %6151 = vmatprep.subr.bf16.mxu1 %v8252_v15  ;;  %v7875_v15 = vld [vmem:[%s12310_s5 + $0x30] sm:$0xff]  }
 0x9db   :  { %6012 = vmatpush1.bf16.msra.mxu0 %v8253_v4 }
 0x9dc   :  { %6152 = vmatpush1.bf16.msra.mxu1 %v8253_v4  ;;  %6013 = vmatprep.subr.bf16.mxu0 %v8254_v11  ;;  %v7876_v4 = vld [vmem:[%s12310_s5 + $0x78] sm:$0xff]  }
 0x9dd   :  { %6153 = vmatprep.subr.bf16.mxu1 %v8254_v11  ;;  %v7877_v11 = vld [vmem:[%s12310_s5 + $0x38] sm:$0xff]  }
 0x9df   :  { %6014 = vmatpush1.bf16.msra.mxu0 %v8255_v62 }
 0x9e0   :  { %6154 = vmatpush1.bf16.msra.mxu1 %v8255_v62  ;;  %6015 = vmatprep.subr.bf16.mxu0 %v8256_v22 }
 0x9e1   :  { %6155 = vmatprep.subr.bf16.mxu1 %v8256_v22 }
 0x9e3   :  { %6016 = vmatpush1.bf16.msra.mxu0 %v8257_v58 }
 0x9e4   :  { %6156 = vmatpush1.bf16.msra.mxu1 %v8257_v58  ;;  %6017 = vmatprep.subr.bf16.mxu0 %v8258_v25 }
 0x9e5   :  { %6157 = vmatprep.subr.bf16.mxu1 %v8258_v25 }
 0x9e7   :  { %6018 = vmatpush1.bf16.msra.mxu0 %v8259_v28 }
 0x9e8   :  { %6158 = vmatpush1.bf16.msra.mxu1 %v8259_v28  ;;  %6019 = vmatprep.subr.bf16.mxu0 %v8260_v17 }
 0x9e9   :  { %6159 = vmatprep.subr.bf16.mxu1 %v8260_v17 }
 0x9eb   :  { %6020 = vmatpush1.bf16.msra.mxu0 %v8261_v10 }
 0x9ec   :  { %6160 = vmatpush1.bf16.msra.mxu1 %v8261_v10  ;;  %6021 = vmatprep.subr.bf16.mxu0 %v8262_v63 }
 0x9ed   :  { %6161 = vmatprep.subr.bf16.mxu1 %v8262_v63 }
 0x9ef   :  { %6022 = vmatpush1.bf16.msra.mxu0 %v8263_v35 }
 0x9f0   :  { %6162 = vmatpush1.bf16.msra.mxu1 %v8263_v35  ;;  %6023 = vmatprep.subr.bf16.mxu0 %v8264_v45 }
 0x9f1   :  { %6163 = vmatprep.subr.bf16.mxu1 %v8264_v45 }
 0x9f3   :  { %6024 = vmatpush1.bf16.msra.mxu0 %v8265_v8 }
 0x9f4   :  { %6164 = vmatpush1.bf16.msra.mxu1 %v8265_v8  ;;  %6025 = vmatprep.subr.bf16.mxu0 %v8266_v37 }
 0x9f5   :  { %6165 = vmatprep.subr.bf16.mxu1 %v8266_v37 }
 0x9f7   :  { %6026 = vmatpush1.bf16.msra.mxu0 %v8267_v31 }
 0x9f8   :  { %6166 = vmatpush1.bf16.msra.mxu1 %v8267_v31  ;;  %6027 = vmatprep.subr.bf16.mxu0 %v8268_v46 }
 0x9f9   :  { %6167 = vmatprep.subr.bf16.mxu1 %v8268_v46 }
 0x9fb   :  { %6028 = vmatpush1.bf16.msra.mxu0 %v8269_v29 }
 0x9fc   :  { %6168 = vmatpush1.bf16.msra.mxu1 %v8269_v29  ;;  %6029 = vmatprep.subr.bf16.mxu0 %v8270_v23 }
 0x9fd   :  { %6169 = vmatprep.subr.bf16.mxu1 %v8270_v23 }
 0x9ff   :  { %6030 = vmatpush1.bf16.msra.mxu0 %v8271_v57 }
 0xa00   :  { %6170 = vmatpush1.bf16.msra.mxu1 %v8271_v57  ;;  %6031 = vmatprep.subr.bf16.mxu0 %v8272_v39 }
 0xa01   :  { %6171 = vmatprep.subr.bf16.mxu1 %v8272_v39 }
 0xa03   :  { %6032 = vmatpush1.bf16.msra.mxu0 %v8273_v20 }
 0xa04   :  { %6172 = vmatpush1.bf16.msra.mxu1 %v8273_v20  ;;  %6044 = vmatprep.subr.bf16.mxu0 %v8274_v2 }
 0xa05   :  { %6184 = vmatprep.subr.bf16.mxu1 %v8274_v2 }
 0xa06   :  { %6034 = vmatmul.mubr.bf16.vlgmr.msra.gmra.mrb[60].mxu0 %v13306_v13  ;;  %v8280_v13 = vld [vmem:[#allocation6 + $0x234] ss:$8 sps:$4 sm:$0xff]  }
 0xa07   :  { %6174 = vmatmul.mubr.bf16.vlgmr.msra.gmra.mrb[60].mxu1 %v13322_v42  ;;  %6045 = vmatpush1.bf16.msra.mxu0 %v8275_v60  ;;  %v8281_v42 = vld [vmem:[#allocation6 + $0x230] ss:$8 sps:$4 sm:$0xff]  }
 0xa08   :  { %6185 = vmatpush1.bf16.msra.mxu1 %v8275_v60  ;;  %6046 = vmatprep.subr.bf16.mxu0 %v8276_v36 }
 0xa09   :  { %6186 = vmatprep.subr.bf16.mxu1 %v8276_v36  ;;  %6076 = vmatprep.mubr.bf16.mxu0 %v13308_v52 }
 0xa0a   :  { %6216 = vmatprep.mubr.bf16.mxu1 %v13308_v52  ;;  %v8284_v52 = vld [vmem:[#allocation6 + $0x254] ss:$8 sps:$4 sm:$0xff]  }
 0xa0b   :  { %6047 = vmatpush1.bf16.msra.mxu0 %v8277_v6 }
 0xa0c   :  { %6187 = vmatpush1.bf16.msra.mxu1 %v8277_v6  ;;  %6048 = vmatprep.subr.bf16.mxu0 %v8278_v27 }
 0xa0d   :  { %6188 = vmatprep.subr.bf16.mxu1 %v8278_v27 }
 0xa0f   :  { %6049 = vmatpush1.bf16.msra.mxu0 %v8279_v19 }
 0xa10   :  { %6189 = vmatpush1.bf16.msra.mxu1 %v8279_v19  ;;  %6050 = vmatprep.subr.bf16.mxu0 %v8280_v13 }
 0xa11   :  { %6190 = vmatprep.subr.bf16.mxu1 %v8280_v13 }
 0xa13   :  { %6051 = vmatpush1.bf16.msra.mxu0 %v8281_v42 }
 0xa14   :  { %6191 = vmatpush1.bf16.msra.mxu1 %v8281_v42  ;;  %6052 = vmatprep.subr.bf16.mxu0 %v8282_v38 }
 0xa15   :  { %6192 = vmatprep.subr.bf16.mxu1 %v8282_v38 }
 0xa17   :  { %6053 = vmatpush1.bf16.msra.mxu0 %v8283_v14 }
 0xa18   :  { %6193 = vmatpush1.bf16.msra.mxu1 %v8283_v14  ;;  %6054 = vmatprep.subr.bf16.mxu0 %v8284_v52 }
 0xa19   :  { %6194 = vmatprep.subr.bf16.mxu1 %v8284_v52 }
 0xa1b   :  { %6055 = vmatpush1.bf16.msra.mxu0 %v8285_v49 }
 0xa1c   :  { %6195 = vmatpush1.bf16.msra.mxu1 %v8285_v49  ;;  %6056 = vmatprep.subr.bf16.mxu0 %v8286_v12  ;;  %v7887_v49 = vld [vmem:[%s12310_s5 + $0xa0] sm:$0xff]  }
 0xa1d   :  { %6196 = vmatprep.subr.bf16.mxu1 %v8286_v12  ;;  %v7888_v12 = vld [vmem:[%s12310_s5 + $0xe8] sm:$0xff]  }
 0xa1f   :  { %6057 = vmatpush1.bf16.msra.mxu0 %v8287_v16 }
 0xa20   :  { %6197 = vmatpush1.bf16.msra.mxu1 %v8287_v16  ;;  %6058 = vmatprep.subr.bf16.mxu0 %v8288_v18  ;;  %v7889_v16 = vld [vmem:[%s12310_s5 + $0xa8] sm:$0xff]  }
 0xa21   :  { %6198 = vmatprep.subr.bf16.mxu1 %v8288_v18  ;;  %v7890_v18 = vld [vmem:[%s12310_s5 + $0xf0] sm:$0xff]  }
 0xa23   :  { %6059 = vmatpush1.bf16.msra.mxu0 %v8289_v0 }
 0xa24   :  { %6199 = vmatpush1.bf16.msra.mxu1 %v8289_v0  ;;  %7056 = vmatprep.subr.bf16.mxu0 %v7862_v9  ;;  %v7891_v9 = vld [vmem:[%s12310_s5 + $0xb0] sm:$0xff]   ;;  %v7893_v0 = vld [vmem:[%s12310_s5 + $0xb8] sm:$0xff]  }
 0xa25   :  { %7078 = vmatprep.subr.bf16.mxu1 %v7878_v7  ;;  %v7892_v7 = vld [vmem:[%s12310_s5 + $0xf8] sm:$0xff]  }
 0xa26   :  { %6077 = vmatmul.mubr.bf16.vlgmr.msra.gmra.mrb[60].mxu0 %v13323_v30  ;;  %v7884_v30 = vld [vmem:[%s12310_s5 + $0xd8] sm:$0xff]  }
 0xa27   :  { %6217 = vmatmul.mubr.bf16.vlgmr.msra.gmra.mrb[60].mxu1 %v13324_v43  ;;  %7057 = vmatpush3.bf16.msra.mxu0 %v7863_v56  ;;  %v7894_v56 = vld [vmem:[%s12312_s7] sm:$0xff]   ;;  %v7897_v43 = vld [vmem:[%s12312_s7 + $0x18] sm:$0xff]  }
 0xa28   :  { %6536 = vmatprep.mubr.bf16.mxu0 %v12131_v41  ;;  %7058 = vmatprep.subr.bf16.mxu0 %v7864_v53  ;;  %v7868_v41 = vld [vmem:[%s12310_s5 + $0x58] sm:$0xff]   ;;  %v8343_v53 = vmov 0.0  }
 0xa29   :  { %7079 = vmatpush3.bf16.msra.mxu1 %v7879_v40  ;;  %v7895_v40 = vld [vmem:[%s12312_s7 + $0x8] sm:$0xff]  }
 0xa2a   :  { %7080 = vmatprep.subr.bf16.mxu1 %v7880_v54  ;;  %v7896_v54 = vld [vmem:[%s12312_s7 + $0x10] sm:$0xff]  }
 0xa2b   :  { %7059 = vmatpush3.bf16.msra.mxu0 %v7865_v32  ;;  %v7898_v32 = vld [vmem:[%s12312_s7 + $0x20] sm:$0xff]  }
 0xa2c   :  { %7060 = vmatprep.subr.bf16.mxu0 %v7866_v33 }
 0xa2d   :  { %7081 = vmatpush3.bf16.msra.mxu1 %v7881_v61 }
 0xa2e   :  { %7082 = vmatprep.subr.bf16.mxu1 %v7882_v34 }
 0xa2f   :  { %7061 = vmatpush3.bf16.msra.mxu0 %v7867_v21 }
 0xa30   :  { %7062 = vmatprep.subr.bf16.mxu0 %v7868_v41 }
 0xa31   :  { %7083 = vmatpush3.bf16.msra.mxu1 %v7883_v24 }
 0xa32   :  { %7084 = vmatprep.subr.bf16.mxu1 %v7884_v30 }
 0xa33   :  { %7063 = vmatpush3.bf16.msra.mxu0 %v7869_v51 }
 0xa34   :  { %7064 = vmatprep.subr.bf16.mxu0 %v7870_v48 }
 0xa35   :  { %7085 = vmatpush3.bf16.msra.mxu1 %v7885_v3 }
 0xa36   :  { %7086 = vmatprep.subr.bf16.mxu1 %v7886_v47 }
 0xa37   :  { %7065 = vmatpush3.bf16.msra.mxu0 %v7871_v1 }
 0xa38   :  { %7066 = vmatprep.subr.bf16.mxu0 %v7872_v26 }
 0xa39   :  { %7087 = vmatpush3.bf16.msra.mxu1 %v7887_v49 }
 0xa3a   :  { %7088 = vmatprep.subr.bf16.mxu1 %v7888_v12 }
 0xa3b   :  { %7067 = vmatpush3.bf16.msra.mxu0 %v7873_v59 }
 0xa3c   :  { %7068 = vmatprep.subr.bf16.mxu0 %v7874_v55 }
 0xa3d   :  { %7089 = vmatpush3.bf16.msra.mxu1 %v7889_v16 }
 0xa3e   :  { %7090 = vmatprep.subr.bf16.mxu1 %v7890_v18  ;;  %v13325_v18 = vlaneseq }
 0xa3f   :  { %7069 = vmatpush3.bf16.msra.mxu0 %v7875_v15 }
 0xa40   :  { %7070 = vmatprep.subr.bf16.mxu0 %v7876_v4 }
 0xa41   :  { %7091 = vmatpush3.bf16.msra.mxu1 %v7891_v9  ;;  %v6702_v9 = vand.u32 127, %v13325_v18 }
 0xa42   :  { %7092 = vmatprep.subr.bf16.mxu1 %v7892_v7  ;;  %v7047_v7 = vld [vmem:[%s12313_s8] ss:$0 sm:$0xff] }
 0xa43   :  { %7071 = vmatpush3.bf16.msra.mxu0 %v7877_v11  ;;  %vm6703_vm1 = vcmp.lt.s32.totalorder %v6702_v9, 10 }
 0xa44   :  { %7109 = vmatprep.subr.bf16.mxu0 %v8343_v53 }
 0xa45   :  { %7093 = vmatpush3.bf16.msra.mxu1 %v7893_v0 }
 0xa46   :  { %6537 = vmatmul.mubr.bf16.vlgmr.msra.gmra.mrb[64].mxu0 %v12014_v5 }
 0xa47   :  { %7110 = vmatpush3.bf16.msra.mxu0 %v7894_v56  ;;  %7125 = vmatprep.mubr.msk.bf16.mxu0 %vm8344_vm0, %v8343_v53 }
 0xa48   :  { %7111 = vmatprep.subr.bf16.mxu0 %v8343_v53 }
 0xa4b   :  { %7112 = vmatpush3.bf16.msra.mxu0 %v7895_v40 }
 0xa4c   :  { %7113 = vmatprep.subr.bf16.mxu0 %v8343_v53 }
 0xa4f   :  { %7114 = vmatpush3.bf16.msra.mxu0 %v7896_v54 }
 0xa50   :  { %7115 = vmatprep.subr.bf16.mxu0 %v8343_v53 }
 0xa53   :  { %7116 = vmatpush3.bf16.msra.mxu0 %v7897_v43 }
 0xa54   :  { %7117 = vmatprep.subr.bf16.mxu0 %v8343_v53 }
 0xa57   :  { %7118 = vmatpush3.bf16.msra.mxu0 %v7898_v32 }
 0xa58   :  { %7119 = vmatprep.subr.bf16.mxu0 %v8343_v53 }
 0xa59   :  { %v5794_v62 = vpop.f32.mrb[56].mxu0 }
 0xa5a   :  { %v7241_v22 = vadd.f32 %v5794_v62, %v11984_v44  ;;  %v5934_v58 = vpop.f32.mrb[56].mxu1  ;;  %v5796_v25 = vpop.f32.mrb[57].mxu0 }
 0xa5b   :  { %v7245_v28 = vadd.f32 %v5934_v58, %v11984_v44  ;;  %v7242_v17 = vadd.f32 %v5796_v25, %v11989_v50  ;;  %v5936_v10 = vpop.f32.mrb[57].mxu1  ;;  %v5798_v63 = vpop.f32.mrb[58].mxu0 }
 0xa5c   :  { %v5803_v35 = vmax.f32 %v7241_v22, 0.0  ;;  %v7246_v45 = vadd.f32 %v5936_v10, %v11989_v50  ;;  %v7243_v8 = vadd.f32 %v5798_v63, %v11984_v44  ;;  %v5938_v37 = vpop.f32.mrb[58].mxu1  ;;  %v5800_v31 = vpop.f32.mrb[59].mxu0 }
 0xa5d   :  { %v5943_v46 = vmax.f32 %v7245_v28, 0.0  ;;  %v5804_v5 = vmax.f32 %v7242_v17, 0.0  ;;  %v7247_v29 = vadd.f32 %v5938_v37, %v11984_v44  ;;  %v7244_v23 = vadd.f32 %v5800_v31, %v11989_v50  ;;  %v5940_v57 = vpop.f32.mrb[59].mxu1 }
 0xa5e   :  { %v5944_v39 = vmax.f32 %v7246_v45, 0.0  ;;  %v5805_v20 = vmax.f32 %v7243_v8, 0.0  ;;  %v7248_v2 = vadd.f32 %v5940_v57, %v11989_v50 }
 0xa5f   :  { %v5807_v60 = vmax.f32 %v5803_v35, %v5804_v5  ;;  %v5945_v36 = vmax.f32 %v7247_v29, 0.0  ;;  %v5806_v6 = vmax.f32 %v7244_v23, 0.0 }
 0xa60   :  { %v5947_v27 = vmax.f32 %v5943_v46, %v5944_v39  ;;  %v5946_v19 = vmax.f32 %v7248_v2, 0.0  ;;  %v7900_v39 = vld [vmem:[%s12312_s7 + $0x30] sm:$0xff]   ;;  %v7014_v2 = vld [vmem:[%s12311_s6] ss:$0 sm:$0xff] }
 0xa61   :  { %v5808_v13 = vmax.f32 %v5805_v20, %v5806_v6  ;;  %v7901_v20 = vld [vmem:[%s12312_s7 + $0x38] sm:$0xff]  }
 0xa62   :  { %v5949_v42 = vmax.f32 %v5807_v60, %v5947_v27  ;;  %v5948_v38 = vmax.f32 %v5945_v36, %v5946_v19 }
 0xa64   :  { %v5950_v14 = vmax.f32 %v5808_v13, %v5948_v38 }
 0xa66   :  { %v12227_v52 = vpack.c.bf16 %v5950_v14, %v5949_v42 }
 0xaf9   :  { %v6078_v33 = vpop.f32.mrb[60].mxu0 }
 0xafa   :  { %v7249_v61 = vadd.f32 %v6078_v33, %v11984_v44  ;;  %v6218_v34 = vpop.f32.mrb[60].mxu1  ;;  %v6080_v21 = vpop.f32.mrb[61].mxu0 }
 0xafb   :  { %v7253_v41 = vadd.f32 %v6218_v34, %v11984_v44  ;;  %v7250_v24 = vadd.f32 %v6080_v21, %v11989_v50  ;;  %v6220_v30 = vpop.f32.mrb[61].mxu1  ;;  %v6082_v51 = vpop.f32.mrb[62].mxu0 }
 0xafc   :  { %v6087_v48 = vmax.f32 %v7249_v61, 0.0  ;;  %v7254_v3 = vadd.f32 %v6220_v30, %v11989_v50  ;;  %v7251_v47 = vadd.f32 %v6082_v51, %v11984_v44  ;;  %v6222_v1 = vpop.f32.mrb[62].mxu1  ;;  %v6084_v26 = vpop.f32.mrb[63].mxu0 }
 0xafd   :  { %v6227_v59 = vmax.f32 %v7253_v41, 0.0  ;;  %v6088_v55 = vmax.f32 %v7250_v24, 0.0  ;;  %v7255_v15 = vadd.f32 %v6222_v1, %v11984_v44  ;;  %v7252_v4 = vadd.f32 %v6084_v26, %v11989_v50  ;;  %v6224_v11 = vpop.f32.mrb[63].mxu1 }
 0xafe   :  { %v6228_v62 = vmax.f32 %v7254_v3, 0.0  ;;  %v6089_v22 = vmax.f32 %v7251_v47, 0.0  ;;  %v7256_v58 = vadd.f32 %v6224_v11, %v11989_v50  ;;  %v7899_v50 = vld [vmem:[%s12312_s7 + $0x28] sm:$0xff]  }
 0xaff   :  { %v6091_v25 = vmax.f32 %v6087_v48, %v6088_v55  ;;  %v6229_v28 = vmax.f32 %v7255_v15, 0.0  ;;  %v6090_v17 = vmax.f32 %v7252_v4, 0.0  ;;  %7120 = vmatpush3.bf16.msra.mxu0 %v7899_v50 }
 0xb00   :  { %v6231_v10 = vmax.f32 %v6227_v59, %v6228_v62  ;;  %v6230_v63 = vmax.f32 %v7256_v58, 0.0  ;;  %7121 = vmatprep.subr.bf16.mxu0 %v8343_v53 }
 0xb01   :  { %v6092_v35 = vmax.f32 %v6089_v22, %v6090_v17 }
 0xb02   :  { %v6233_v45 = vmax.f32 %v6091_v25, %v6231_v10  ;;  %v6232_v8 = vmax.f32 %v6229_v28, %v6230_v63 }
 0xb03   :  { %7122 = vmatpush3.bf16.msra.mxu0 %v7900_v39 }
 0xb04   :  { %v6234_v37 = vmax.f32 %v6092_v35, %v6232_v8  ;;  %7123 = vmatprep.subr.bf16.mxu0 %v8343_v53 }
 0xb06   :  { %v6235_v31 = vpack.c.bf16 %v6234_v37, %v6233_v45 }
 0xb07   :  { %7124 = vmatpush3.bf16.msra.mxu0 %v7901_v20 }
 0xb08   :  { %6577 = vmatprep.mubr.bf16.mxu1 %v6235_v31 }
 0xb09   :  { %6578 = vmatmul.mubr.bf16.vlgmr.msra.gmra.mrb[64].mxu1 %v12227_v52 }
 0xb19   :  { %v7072_v44 = vpop.f32.mrb[64].mxu0 }
 0xb1a   :  { %v7073_v46 = vpop.f32.mrb[65].mxu0 }
 0xb1b   :  { %v7074_v5 = vadd.f32 %v7073_v46, %v7072_v44  ;;  %v7075_v29 = vpop.f32.mrb[66].mxu0 }
 0xb1c   :  { %v7076_v23 = vpop.f32.mrb[67].mxu0 }
 0xb1d   :  { %v7077_v57 = vadd.f32 %v7076_v23, %v7075_v29  ;;  %v6539_v6 = vadd.f32 %v7074_v5, %v7014_v2 }
 0xb1f   :  { %v6542_v42 = vadd.f32 %v7077_v57, %v7014_v2 }
 0xbdc   :  { %v7094_v60 = vpop.f32.mrb[64].mxu1 }
 0xbdd   :  { %v7095_v36 = vpop.f32.mrb[65].mxu1 }
 0xbde   :  { %v7096_v27 = vadd.f32 %v7095_v36, %v7094_v60  ;;  %v7097_v19 = vpop.f32.mrb[66].mxu1 }
 0xbdf   :  { %v7098_v13 = vpop.f32.mrb[67].mxu1 }
 0xbe0   :  { %v6580_v38 = vadd.f32 %v7096_v27, %v6539_v6  ;;  %v7099_v14 = vadd.f32 %v7098_v13, %v7097_v19 }
 0xbe2   :  { %v6583_v52 = vadd.f32 %v7099_v14, %v6542_v42  ;;  %v6586_v49 = vmax.f32 %v6580_v38, 0.0 }
 0xbe4   :  { %v6587_v12 = vmax.f32 %v6583_v52, 0.0 }
 0xbe6   :  { %v6588_v16 = vpack.c.bf16 %v6587_v12, %v6586_v49 }
 0xbe8   :  { %7126 = vmatmul.mubr.bf16.vlgmr.msra.gmra.mrb[68].mxu0 %v6588_v16 }
 0xcbb   :  { %v6694_v0 = vpop.f32.mrb[68].mxu0 }
 0xcbc   :  { %v6695_v56 = vadd.f32 %v7047_v7, %v6694_v0  ;;  %v7127_v53 = vpop.f32.mrb[69].mxu0 }
 0xcbd   :  { %v6697_v40 = vpop.f32.mrb[70].mxu0 }
 0xcbe   :  { %v6698_v54 = vadd.f32 %v7047_v7, %v6697_v40  ;;  %v7128_v43 = vpop.f32.mrb[71].mxu0  ;;  %v6704_v32 = vsel %vm6703_vm1, %v6695_v56, -1e+30 }
 0xcbf   :  { %6706 = vmax.xlane.f32.xlu0 %v6704_v32 }
 0xcc0   :  { %v6705_v33 = vsel %vm6703_vm1, %v6698_v54, -1e+30 }
 0xcc3   :  { %6708 = vmax.xlane.f32.xlu0 %v6705_v33 }
 0xd4c   :  { %v6707_v61 = vpop.xlane.xlu0 %6706 }
 0xd4d   :  { %v6710_v34 = vsub.f32 %v6704_v32, %v6707_v61 }
 0xd4f   :  { %v6712_v21 = vmul.f32 1.442695, %v6710_v34 }
 0xd50   :  { %v6709_v41 = vpop.xlane.xlu0 %6708 }
 0xd51   :  { %v6711_v24 = vsub.f32 %v6705_v33, %v6709_v41  ;;  %7902 = vpow2.f32 %v6712_v21 }
 0xd53   :  { %v6714_v30 = vmul.f32 1.442695, %v6711_v24 }
 0xd55   :  { %7904 = vpow2.f32 %v6714_v30 }
 0xd5b   :  { %v7903_v51 = vpop.eup %7902 }
 0xd5c   :  { %6716 = vadd.xlane.f32.xlu1 %v7903_v51 }
 0xd5f   :  { %v7905_v48 = vpop.eup %7904 }
 0xd60   :  { %6718 = vadd.xlane.f32.xlu1 %v7905_v48 }
 0xde9   :  { %v6717_v3 = vpop.xlane.xlu1 %6716 }
 0xdea   :  { %7906 = vlog2.f32 %v6717_v3 }
 0xded   :  { %v6719_v47 = vpop.xlane.xlu1 %6718 }
 0xdee   :  { %7908 = vlog2.f32 %v6719_v47 }
 0xdf4   :  { %v7907_v1 = vpop.eup %7906 }
 0xdf5   :  { %v6721_v26 = vmul.f32 0.6931472, %v7907_v1 }
 0xdf7   :  { %v6724_v59 = vsub.f32 %v6710_v34, %v6721_v26 }
 0xdf8   :  { %v7909_v55 = vpop.eup %7908 }
 0xdf9   :  { %6726 = vst [vmem:[%s12314_s9] sm:$0xff] %v6724_v59  ;;  %v6723_v15 = vmul.f32 0.6931472, %v7909_v55 }
 0xdfb   :  { %v6725_v4 = vsub.f32 %v6711_v24, %v6723_v15 }
 0xdfd   :  { %6727 = vst [vmem:[%s12314_s9 + $0x8] sm:$0xff] %v6725_v4 }
 0xdfe   :  { %6732 = vsyncpa [#allocation5], 1 }
 0xdff   :  { %6733 = vsyncpa [#allocation7], 1 }

</bundles_post_ra>
